<compile_context>
chip_gen: v6e
topology: v6e:2x2x1
jax: 0.10.0
libtpu: 0.0.40
codegen_flags: <defaults>
</compile_context>

<pallas_src>
import jax
import jax.numpy as jnp
from jax.experimental import pallas as pl
from jax.experimental.pallas import tpu as pltpu


# ---------------------------------------------------------------------------
# In-kernel helpers (operate on VMEM values; only lane-preserving reshapes)
# ---------------------------------------------------------------------------
def _pad_hw(x, p):
    """Zero-pad the first two (spatial) dims of a (H, W, C) value by p."""
    H, W, C = x.shape
    zr = jnp.zeros((p, W, C), x.dtype)
    x = jnp.concatenate([zr, x, zr], axis=0)
    zc = jnp.zeros((H + 2 * p, p, C), x.dtype)
    return jnp.concatenate([zc, x, zc], axis=1)


def _im2col(xp, kh, kw, H, W):
    """(H+kh-1, W+kw-1, C) padded input -> (H*W, kh*kw*C) patch matrix.

    Column order is (ky, kx, c), matching an HWIO weight reshaped to
    (kh*kw*C, Cout).  Built once per tile (no per-tap matmuls).
    """
    C = xp.shape[-1]
    # horizontal taps first: (Hp, W, kw*C)
    xw = jnp.concatenate([xp[:, kx:kx + W, :] for kx in range(kw)], axis=-1)
    # then vertical taps: (H*W, kh*kw*C) -- reshapes keep the lane dim intact
    return jnp.concatenate(
        [xw[ky:ky + H, :, :].reshape(H * W, kw * C) for ky in range(kh)],
        axis=-1)


# ---------------------------------------------------------------------------
# Fused kernel: 3x3 conv + BN + SiLU + channel attention + spatial attention
# ---------------------------------------------------------------------------
def _cbam_block_kernel(x_ref, w_ref, scale_ref, bias_ref,
                       w1_ref, w2_ref, w7_ref, o_ref):
    # x_ref     : (H, W, Cin)     one batch element (NHWC tile)
    # w_ref     : (9*Cin, Cout)   3x3 conv weight in im2col layout
    # scale/bias: (1, Cout)       folded inference-mode BN
    # w1_ref    : (hidden, Cout)  channel-attn fc1 (as Conv2d(C, C/r, 1) weight)
    # w2_ref    : (hidden, Cout)  channel-attn fc2 transposed
    # w7_ref    : (98, 1)         7x7x2 spatial conv weight in im2col layout
    # o_ref     : (H*W, Cout)     final output
    H, W, _ = x_ref.shape

    # ---- conv 3x3 (single MXU matmul) + folded BN + SiLU -------------------
    xp = _pad_hw(x_ref[...], 1)                          # halo handled in-kernel
    patches = _im2col(xp, 3, 3, H, W)                    # (H*W, 9*Cin)
    y = jnp.dot(patches, w_ref[...], preferred_element_type=jnp.float32)
    y = y * scale_ref[...] + bias_ref[...]               # folded BN
    y = y * jax.nn.sigmoid(y)                            # SiLU

    # ---- channel attention (tiny MLP done with VPU/XLU reduces) ------------
    avg = jnp.mean(y, axis=0, keepdims=True)             # (1, C)  AdaptiveAvgPool2d(1)
    mx = jnp.max(y, axis=0, keepdims=True)               # (1, C)  AdaptiveMaxPool2d(1)

    def mlp(v):                                          # v: (1, C)
        h = jnp.sum(v * w1_ref[...], axis=-1, keepdims=True)   # (hidden, 1) lane reduce
        h = jnp.maximum(h, 0.0)                                 # ReLU
        return jnp.sum(h * w2_ref[...], axis=0, keepdims=True)  # (1, C) sublane reduce

    att = jax.nn.sigmoid(mlp(avg) + mlp(mx))             # (1, C)
    y_ca = y * att                                       # channel rescale

    # ---- spatial attention (7x7 conv as one im2col matmul) -----------------
    s_avg = jnp.mean(y_ca, axis=-1, keepdims=True)       # (H*W, 1)
    s_max = jnp.max(y_ca, axis=-1, keepdims=True)        # (H*W, 1)
    maps = jnp.concatenate([s_avg, s_max], axis=-1).reshape(H, W, 2)
    mp = _pad_hw(maps, 3)                                # (H+6, W+6, 2)
    patches7 = _im2col(mp, 7, 7, H, W)                   # (H*W, 98)
    sa = jnp.dot(patches7, w7_ref[...], preferred_element_type=jnp.float32)
    sa = jax.nn.sigmoid(sa)                              # (H*W, 1)

    o_ref[...] = y_ca * sa                               # spatial rescale


# ---------------------------------------------------------------------------
# Wrapper
# ---------------------------------------------------------------------------
def cbam_block_forward(x_nchw, params):
    # NCHW -> NHWC so channels sit on the lane dim.
    x = jnp.transpose(x_nchw, (0, 2, 3, 1)).astype(jnp.float32)
    N, H, W, Cin = x.shape
    w_conv = params["conv_w"]                            # (3, 3, Cin, Cout) HWIO
    Cout = w_conv.shape[-1]
    hidden = params["ca_w1"].shape[0]
    w_col = w_conv.reshape(9 * Cin, Cout)                # im2col weight layout

    scale = (params["bn_gamma"] / jnp.sqrt(params["bn_var"] + 1e-5)).reshape(1, Cout)
    bias = params["bn_beta"].reshape(1, Cout) - params["bn_mean"].reshape(1, Cout) * scale

    out = pl.pallas_call(
        _cbam_block_kernel,
        grid=(N,),
        in_specs=[
            pl.BlockSpec((None, H, W, Cin), lambda n: (n, 0, 0, 0)),
            pl.BlockSpec((9 * Cin, Cout), lambda n: (0, 0)),
            pl.BlockSpec((1, Cout), lambda n: (0, 0)),
            pl.BlockSpec((1, Cout), lambda n: (0, 0)),
            pl.BlockSpec((hidden, Cout), lambda n: (0, 0)),
            pl.BlockSpec((hidden, Cout), lambda n: (0, 0)),
            pl.BlockSpec(params["sa_w"].shape, lambda n: (0, 0)),
        ],
        out_specs=pl.BlockSpec((None, H * W, Cout), lambda n: (n, 0, 0)),
        out_shape=jax.ShapeDtypeStruct((N, H * W, Cout), jnp.float32),
        compiler_params=pltpu.CompilerParams(
            dimension_semantics=("parallel",),            # megacore over batch (v7x)
            vmem_limit_bytes=32 * 1024 * 1024),
    )(x, w_col, scale, bias, params["ca_w1"], params["ca_w2"], params["sa_w"])

    out = out.reshape(N, H, W, Cout)                      # metadata-only reshape
    return jnp.transpose(out, (0, 3, 1, 2))               # back to NCHW


# ---------------------------------------------------------------------------
# Deterministic parameter init (shapes follow the PyTorch module __init__;
# all convs in the spec have bias=False)
# ---------------------------------------------------------------------------
def init_params(key, in_c=4, out_c=32, ratio=16):
    ks = jax.random.split(key, 8)
    hidden = max(out_c // ratio, 1)
    conv_w_oihw = 0.1 * jax.random.normal(ks[0], (out_c, in_c, 3, 3), jnp.float32)
    ca_w1_oi = 0.1 * jax.random.normal(ks[1], (hidden, out_c), jnp.float32)  # Conv2d(C, C/r, 1)
    ca_w2_oi = 0.1 * jax.random.normal(ks[2], (out_c, hidden), jnp.float32)  # Conv2d(C/r, C, 1)
    sa_w_oihw = 0.1 * jax.random.normal(ks[3], (1, 2, 7, 7), jnp.float32)    # Conv2d(2, 1, 7)
    bn_gamma = 1.0 + 0.1 * jax.random.normal(ks[4], (out_c,), jnp.float32)
    bn_beta = 0.1 * jax.random.normal(ks[5], (out_c,), jnp.float32)
    bn_mean = 0.1 * jax.random.normal(ks[6], (out_c,), jnp.float32)
    bn_var = 0.5 + jnp.abs(jax.random.normal(ks[7], (out_c,), jnp.float32))
    return dict(
        conv_w=jnp.transpose(conv_w_oihw, (2, 3, 1, 0)),                     # HWIO
        ca_w1=ca_w1_oi,                                                      # (hidden, C)
        ca_w2=ca_w2_oi.T,                                                    # (hidden, C)
        sa_w=jnp.transpose(sa_w_oihw[0], (1, 2, 0)).reshape(7 * 7 * 2, 1),   # (98, 1)
        bn_gamma=bn_gamma, bn_beta=bn_beta, bn_mean=bn_mean, bn_var=bn_var,
    )


# ---------------------------------------------------------------------------
# Pure-JAX reference (same math) for a self-consistency check
# ---------------------------------------------------------------------------
def reference(x_nchw, params):
    x = jnp.transpose(x_nchw, (0, 2, 3, 1)).astype(jnp.float32)
    y = jax.lax.conv_general_dilated(
        x, params["conv_w"], (1, 1), ((1, 1), (1, 1)),
        dimension_numbers=("NHWC", "HWIO", "NHWC"))
    scale = params["bn_gamma"] / jnp.sqrt(params["bn_var"] + 1e-5)
    bias = params["bn_beta"] - params["bn_mean"] * scale
    y = y * scale + bias
    y = y * jax.nn.sigmoid(y)
    avg = jnp.mean(y, axis=(1, 2))                       # (N, C)
    mx = jnp.max(y, axis=(1, 2))                         # (N, C)

    def mlp(v):
        h = jnp.maximum(v @ params["ca_w1"].T, 0.0)      # (N, hidden)
        return h @ params["ca_w2"]                       # (N, C)

    att = jax.nn.sigmoid(mlp(avg) + mlp(mx))
    y = y * att[:, None, None, :]
    maps = jnp.concatenate(
        [jnp.mean(y, -1, keepdims=True), jnp.max(y, -1, keepdims=True)], -1)
    w7 = params["sa_w"].reshape(7, 7, 2, 1)
    sa = jax.lax.conv_general_dilated(
        maps, w7, (1, 1), ((3, 3), (3, 3)),
        dimension_numbers=("NHWC", "HWIO", "NHWC"))
    y = y * jax.nn.sigmoid(sa)
    return jnp.transpose(y, (0, 3, 1, 2))


if __name__ == "__main__":
    key = jax.random.PRNGKey(0)
    k_x, k_p = jax.random.split(key)
    x = jax.random.normal(k_x, (2, 4, 16, 16), jnp.float32)   # NCHW, like PyTorch
    params = init_params(k_p, in_c=4, out_c=32, ratio=16)

    out = jax.jit(cbam_block_forward)(x, params)
    out = jax.block_until_ready(out)

    ref = reference(x, params)
    assert out.shape == (2, 32, 16, 16)
    assert bool(jnp.all(jnp.isfinite(out)))
    err = float(jnp.max(jnp.abs(out - ref)))
    assert jnp.allclose(out, ref, rtol=2e-3, atol=2e-3), err
    print("KERNEL_OK")
</pallas_src>

<mosaic_0001>
module attributes {stable_mosaic.version = 11 : i64} {
  func.func @_cbam_block_kernel(%arg0: i32, %arg1: memref<1x16x16x4xf32, #tpu.memory_space<vmem>>, %arg2: memref<36x32xf32, #tpu.memory_space<vmem>>, %arg3: memref<1x32xf32, #tpu.memory_space<vmem>>, %arg4: memref<1x32xf32, #tpu.memory_space<vmem>>, %arg5: memref<2x32xf32, #tpu.memory_space<vmem>>, %arg6: memref<2x32xf32, #tpu.memory_space<vmem>>, %arg7: memref<98x1xf32, #tpu.memory_space<vmem>>, %arg8: memref<1x256x32xf32, #tpu.memory_space<vmem>>) attributes {dimension_semantics = [#tpu.dimension_semantics<parallel>], iteration_bounds = array<i64: 2>, scalar_prefetch = 0 : i64, scratch_operands = 0 : i64, tpu.core_type = #tpu.core_type<tc>, window_params = [{transform_indices = @transform_0, window_bounds = array<i64: 1, 16, 16, 4>}, {pipeline_mode = #tpu.pipeline_mode<synchronous>, transform_indices = @transform_1, window_bounds = array<i64: 36, 32>}, {pipeline_mode = #tpu.pipeline_mode<synchronous>, transform_indices = @transform_2, window_bounds = array<i64: 1, 32>}, {pipeline_mode = #tpu.pipeline_mode<synchronous>, transform_indices = @transform_3, window_bounds = array<i64: 1, 32>}, {pipeline_mode = #tpu.pipeline_mode<synchronous>, transform_indices = @transform_4, window_bounds = array<i64: 2, 32>}, {pipeline_mode = #tpu.pipeline_mode<synchronous>, transform_indices = @transform_5, window_bounds = array<i64: 2, 32>}, {pipeline_mode = #tpu.pipeline_mode<synchronous>, transform_indices = @transform_6, window_bounds = array<i64: 98, 1>}, {transform_indices = @transform_7, window_bounds = array<i64: 1, 256, 32>}]} {
    %c0 = arith.constant 0 : index
    %c0_0 = arith.constant 0 : index
    %c0_1 = arith.constant 0 : index
    %c0_2 = arith.constant 0 : index
    %0 = vector.load %arg1[%c0, %c0_0, %c0_1, %c0_2] : memref<1x16x16x4xf32, #tpu.memory_space<vmem>>, vector<1x16x16x4xf32>
    %1 = vector.shape_cast %0 : vector<1x16x16x4xf32> to vector<16x16x4xf32>
    %cst = arith.constant 0.000000e+00 : f32
    %2 = vector.broadcast %cst : f32 to vector<1x16x4xf32>
    %3 = tpu.concatenate %2, %1, %2 in 0 : vector<1x16x4xf32>, vector<16x16x4xf32>, vector<1x16x4xf32> -> vector<18x16x4xf32>
    %cst_3 = arith.constant 0.000000e+00 : f32
    %4 = vector.broadcast %cst_3 : f32 to vector<18x1x4xf32>
    %5 = tpu.concatenate %4, %3, %4 in 1 : vector<18x1x4xf32>, vector<18x16x4xf32>, vector<18x1x4xf32> -> vector<18x18x4xf32>
    %6 = vector.extract_strided_slice %5 {offsets = [0, 0, 0], sizes = [18, 16, 4], strides = [1, 1, 1]} : vector<18x18x4xf32> to vector<18x16x4xf32>
    %7 = vector.extract_strided_slice %5 {offsets = [0, 1, 0], sizes = [18, 16, 4], strides = [1, 1, 1]} : vector<18x18x4xf32> to vector<18x16x4xf32>
    %8 = vector.extract_strided_slice %5 {offsets = [0, 2, 0], sizes = [18, 16, 4], strides = [1, 1, 1]} : vector<18x18x4xf32> to vector<18x16x4xf32>
    %9 = tpu.concatenate %6, %7, %8 in 2 : vector<18x16x4xf32>, vector<18x16x4xf32>, vector<18x16x4xf32> -> vector<18x16x12xf32>
    %10 = vector.extract_strided_slice %9 {offsets = [0, 0, 0], sizes = [16, 16, 12], strides = [1, 1, 1]} : vector<18x16x12xf32> to vector<16x16x12xf32>
    %11 = vector.shape_cast %10 : vector<16x16x12xf32> to vector<256x12xf32>
    %12 = vector.extract_strided_slice %9 {offsets = [1, 0, 0], sizes = [16, 16, 12], strides = [1, 1, 1]} : vector<18x16x12xf32> to vector<16x16x12xf32>
    %13 = vector.shape_cast %12 : vector<16x16x12xf32> to vector<256x12xf32>
    %14 = vector.extract_strided_slice %9 {offsets = [2, 0, 0], sizes = [16, 16, 12], strides = [1, 1, 1]} : vector<18x16x12xf32> to vector<16x16x12xf32>
    %15 = vector.shape_cast %14 : vector<16x16x12xf32> to vector<256x12xf32>
    %16 = tpu.concatenate %11, %13, %15 in 1 : vector<256x12xf32>, vector<256x12xf32>, vector<256x12xf32> -> vector<256x36xf32>
    %c0_4 = arith.constant 0 : index
    %c0_5 = arith.constant 0 : index
    %17 = vector.load %arg2[%c0_4, %c0_5] : memref<36x32xf32, #tpu.memory_space<vmem>>, vector<36x32xf32>
    %cst_6 = arith.constant dense<0.000000e+00> : vector<256x32xf32>
    %18 = tpu.matmul %16, %17, %cst_6 {dimension_numbers = #tpu.dot_dimension_numbers<[1], [0], [0], [1], [0, 0, 1, 1], [], []>} : vector<256x36xf32>, vector<36x32xf32>, vector<256x32xf32> -> vector<256x32xf32>
    %c0_7 = arith.constant 0 : index
    %c0_8 = arith.constant 0 : index
    %19 = vector.load %arg3[%c0_7, %c0_8] : memref<1x32xf32, #tpu.memory_space<vmem>>, vector<1x32xf32>
    %20 = vector.broadcast %19 : vector<1x32xf32> to vector<256x32xf32>
    %21 = arith.mulf %18, %20 : vector<256x32xf32>
    %c0_9 = arith.constant 0 : index
    %c0_10 = arith.constant 0 : index
    %22 = vector.load %arg4[%c0_9, %c0_10] : memref<1x32xf32, #tpu.memory_space<vmem>>, vector<1x32xf32>
    %23 = vector.broadcast %22 : vector<1x32xf32> to vector<256x32xf32>
    %24 = arith.addf %21, %23 : vector<256x32xf32>
    %25 = arith.negf %24 : vector<256x32xf32>
    %26 = math.exp %25 : vector<256x32xf32>
    %cst_11 = arith.constant 1.000000e+00 : f32
    %27 = vector.broadcast %cst_11 : f32 to vector<256x32xf32>
    %28 = arith.addf %27, %26 : vector<256x32xf32>
    %29 = arith.divf %27, %28 : vector<256x32xf32>
    %30 = arith.mulf %24, %29 : vector<256x32xf32>
    %cst_12 = arith.constant dense<0.000000e+00> : vector<32xf32>
    %31 = vector.multi_reduction <add>, %30, %cst_12 [0] : vector<256x32xf32> to vector<32xf32>
    %32 = vector.shape_cast %31 : vector<32xf32> to vector<1x32xf32>
    %cst_13 = arith.constant 2.560000e+02 : f32
    %33 = vector.broadcast %cst_13 : f32 to vector<1x32xf32>
    %34 = arith.divf %32, %33 : vector<1x32xf32>
    %cst_14 = arith.constant dense<0xFF800000> : vector<32xf32>
    %35 = vector.multi_reduction <maximumf>, %30, %cst_14 [0] : vector<256x32xf32> to vector<32xf32>
    %36 = vector.shape_cast %35 : vector<32xf32> to vector<1x32xf32>
    %c0_15 = arith.constant 0 : index
    %c0_16 = arith.constant 0 : index
    %37 = vector.load %arg5[%c0_15, %c0_16] : memref<2x32xf32, #tpu.memory_space<vmem>>, vector<2x32xf32>
    %38 = vector.broadcast %34 : vector<1x32xf32> to vector<2x32xf32>
    %39 = arith.mulf %38, %37 : vector<2x32xf32>
    %cst_17 = arith.constant dense<0.000000e+00> : vector<2xf32>
    %40 = vector.multi_reduction <add>, %39, %cst_17 [1] : vector<2x32xf32> to vector<2xf32>
    %41 = vector.shape_cast %40 : vector<2xf32> to vector<2x1xf32>
    %cst_18 = arith.constant 0.000000e+00 : f32
    %42 = vector.broadcast %cst_18 : f32 to vector<2x1xf32>
    %43 = arith.maximumf %41, %42 : vector<2x1xf32>
    %c0_19 = arith.constant 0 : index
    %c0_20 = arith.constant 0 : index
    %44 = vector.load %arg6[%c0_19, %c0_20] : memref<2x32xf32, #tpu.memory_space<vmem>>, vector<2x32xf32>
    %45 = vector.broadcast %43 : vector<2x1xf32> to vector<2x32xf32>
    %46 = arith.mulf %45, %44 : vector<2x32xf32>
    %cst_21 = arith.constant dense<0.000000e+00> : vector<32xf32>
    %47 = vector.multi_reduction <add>, %46, %cst_21 [0] : vector<2x32xf32> to vector<32xf32>
    %48 = vector.shape_cast %47 : vector<32xf32> to vector<1x32xf32>
    %c0_22 = arith.constant 0 : index
    %c0_23 = arith.constant 0 : index
    %49 = vector.load %arg5[%c0_22, %c0_23] : memref<2x32xf32, #tpu.memory_space<vmem>>, vector<2x32xf32>
    %50 = vector.broadcast %36 : vector<1x32xf32> to vector<2x32xf32>
    %51 = arith.mulf %50, %49 : vector<2x32xf32>
    %cst_24 = arith.constant dense<0.000000e+00> : vector<2xf32>
    %52 = vector.multi_reduction <add>, %51, %cst_24 [1] : vector<2x32xf32> to vector<2xf32>
    %53 = vector.shape_cast %52 : vector<2xf32> to vector<2x1xf32>
    %cst_25 = arith.constant 0.000000e+00 : f32
    %54 = vector.broadcast %cst_25 : f32 to vector<2x1xf32>
    %55 = arith.maximumf %53, %54 : vector<2x1xf32>
    %c0_26 = arith.constant 0 : index
    %c0_27 = arith.constant 0 : index
    %56 = vector.load %arg6[%c0_26, %c0_27] : memref<2x32xf32, #tpu.memory_space<vmem>>, vector<2x32xf32>
    %57 = vector.broadcast %55 : vector<2x1xf32> to vector<2x32xf32>
    %58 = arith.mulf %57, %56 : vector<2x32xf32>
    %cst_28 = arith.constant dense<0.000000e+00> : vector<32xf32>
    %59 = vector.multi_reduction <add>, %58, %cst_28 [0] : vector<2x32xf32> to vector<32xf32>
    %60 = vector.shape_cast %59 : vector<32xf32> to vector<1x32xf32>
    %61 = arith.addf %48, %60 : vector<1x32xf32>
    %62 = arith.negf %61 : vector<1x32xf32>
    %63 = math.exp %62 : vector<1x32xf32>
    %cst_29 = arith.constant 1.000000e+00 : f32
    %64 = vector.broadcast %cst_29 : f32 to vector<1x32xf32>
    %65 = arith.addf %64, %63 : vector<1x32xf32>
    %66 = arith.divf %64, %65 : vector<1x32xf32>
    %67 = vector.broadcast %66 : vector<1x32xf32> to vector<256x32xf32>
    %68 = arith.mulf %30, %67 : vector<256x32xf32>
    %cst_30 = arith.constant dense<0.000000e+00> : vector<256xf32>
    %69 = vector.multi_reduction <add>, %68, %cst_30 [1] : vector<256x32xf32> to vector<256xf32>
    %70 = vector.shape_cast %69 : vector<256xf32> to vector<256x1xf32>
    %cst_31 = arith.constant 3.200000e+01 : f32
    %71 = vector.broadcast %cst_31 : f32 to vector<256x1xf32>
    %72 = arith.divf %70, %71 : vector<256x1xf32>
    %cst_32 = arith.constant dense<0xFF800000> : vector<256xf32>
    %73 = vector.multi_reduction <maximumf>, %68, %cst_32 [1] : vector<256x32xf32> to vector<256xf32>
    %74 = vector.shape_cast %73 : vector<256xf32> to vector<256x1xf32>
    %75 = tpu.concatenate %72, %74 in 1 : vector<256x1xf32>, vector<256x1xf32> -> vector<256x2xf32>
    %76 = vector.shape_cast %75 : vector<256x2xf32> to vector<16x16x2xf32>
    %cst_33 = arith.constant 0.000000e+00 : f32
    %77 = vector.broadcast %cst_33 : f32 to vector<3x16x2xf32>
    %78 = tpu.concatenate %77, %76, %77 in 0 : vector<3x16x2xf32>, vector<16x16x2xf32>, vector<3x16x2xf32> -> vector<22x16x2xf32>
    %cst_34 = arith.constant 0.000000e+00 : f32
    %79 = vector.broadcast %cst_34 : f32 to vector<22x3x2xf32>
    %80 = tpu.concatenate %79, %78, %79 in 1 : vector<22x3x2xf32>, vector<22x16x2xf32>, vector<22x3x2xf32> -> vector<22x22x2xf32>
    %81 = vector.extract_strided_slice %80 {offsets = [0, 0, 0], sizes = [22, 16, 2], strides = [1, 1, 1]} : vector<22x22x2xf32> to vector<22x16x2xf32>
    %82 = vector.extract_strided_slice %80 {offsets = [0, 1, 0], sizes = [22, 16, 2], strides = [1, 1, 1]} : vector<22x22x2xf32> to vector<22x16x2xf32>
    %83 = vector.extract_strided_slice %80 {offsets = [0, 2, 0], sizes = [22, 16, 2], strides = [1, 1, 1]} : vector<22x22x2xf32> to vector<22x16x2xf32>
    %84 = vector.extract_strided_slice %80 {offsets = [0, 3, 0], sizes = [22, 16, 2], strides = [1, 1, 1]} : vector<22x22x2xf32> to vector<22x16x2xf32>
    %85 = vector.extract_strided_slice %80 {offsets = [0, 4, 0], sizes = [22, 16, 2], strides = [1, 1, 1]} : vector<22x22x2xf32> to vector<22x16x2xf32>
    %86 = vector.extract_strided_slice %80 {offsets = [0, 5, 0], sizes = [22, 16, 2], strides = [1, 1, 1]} : vector<22x22x2xf32> to vector<22x16x2xf32>
    %87 = vector.extract_strided_slice %80 {offsets = [0, 6, 0], sizes = [22, 16, 2], strides = [1, 1, 1]} : vector<22x22x2xf32> to vector<22x16x2xf32>
    %88 = tpu.concatenate %81, %82, %83, %84, %85, %86, %87 in 2 : vector<22x16x2xf32>, vector<22x16x2xf32>, vector<22x16x2xf32>, vector<22x16x2xf32>, vector<22x16x2xf32>, vector<22x16x2xf32>, vector<22x16x2xf32> -> vector<22x16x14xf32>
    %89 = vector.extract_strided_slice %88 {offsets = [0, 0, 0], sizes = [16, 16, 14], strides = [1, 1, 1]} : vector<22x16x14xf32> to vector<16x16x14xf32>
    %90 = vector.shape_cast %89 : vector<16x16x14xf32> to vector<256x14xf32>
    %91 = vector.extract_strided_slice %88 {offsets = [1, 0, 0], sizes = [16, 16, 14], strides = [1, 1, 1]} : vector<22x16x14xf32> to vector<16x16x14xf32>
    %92 = vector.shape_cast %91 : vector<16x16x14xf32> to vector<256x14xf32>
    %93 = vector.extract_strided_slice %88 {offsets = [2, 0, 0], sizes = [16, 16, 14], strides = [1, 1, 1]} : vector<22x16x14xf32> to vector<16x16x14xf32>
    %94 = vector.shape_cast %93 : vector<16x16x14xf32> to vector<256x14xf32>
    %95 = vector.extract_strided_slice %88 {offsets = [3, 0, 0], sizes = [16, 16, 14], strides = [1, 1, 1]} : vector<22x16x14xf32> to vector<16x16x14xf32>
    %96 = vector.shape_cast %95 : vector<16x16x14xf32> to vector<256x14xf32>
    %97 = vector.extract_strided_slice %88 {offsets = [4, 0, 0], sizes = [16, 16, 14], strides = [1, 1, 1]} : vector<22x16x14xf32> to vector<16x16x14xf32>
    %98 = vector.shape_cast %97 : vector<16x16x14xf32> to vector<256x14xf32>
    %99 = vector.extract_strided_slice %88 {offsets = [5, 0, 0], sizes = [16, 16, 14], strides = [1, 1, 1]} : vector<22x16x14xf32> to vector<16x16x14xf32>
    %100 = vector.shape_cast %99 : vector<16x16x14xf32> to vector<256x14xf32>
    %101 = vector.extract_strided_slice %88 {offsets = [6, 0, 0], sizes = [16, 16, 14], strides = [1, 1, 1]} : vector<22x16x14xf32> to vector<16x16x14xf32>
    %102 = vector.shape_cast %101 : vector<16x16x14xf32> to vector<256x14xf32>
    %103 = tpu.concatenate %90, %92, %94, %96, %98, %100, %102 in 1 : vector<256x14xf32>, vector<256x14xf32>, vector<256x14xf32>, vector<256x14xf32>, vector<256x14xf32>, vector<256x14xf32>, vector<256x14xf32> -> vector<256x98xf32>
    %c0_35 = arith.constant 0 : index
    %c0_36 = arith.constant 0 : index
    %104 = vector.load %arg7[%c0_35, %c0_36] : memref<98x1xf32, #tpu.memory_space<vmem>>, vector<98x1xf32>
    %cst_37 = arith.constant dense<0.000000e+00> : vector<256x1xf32>
    %105 = tpu.matmul %103, %104, %cst_37 {dimension_numbers = #tpu.dot_dimension_numbers<[1], [0], [0], [1], [0, 0, 1, 1], [], []>} : vector<256x98xf32>, vector<98x1xf32>, vector<256x1xf32> -> vector<256x1xf32>
    %106 = arith.negf %105 : vector<256x1xf32>
    %107 = math.exp %106 : vector<256x1xf32>
    %cst_38 = arith.constant 1.000000e+00 : f32
    %108 = vector.broadcast %cst_38 : f32 to vector<256x1xf32>
    %109 = arith.addf %108, %107 : vector<256x1xf32>
    %110 = arith.divf %108, %109 : vector<256x1xf32>
    %111 = vector.broadcast %110 : vector<256x1xf32> to vector<256x32xf32>
    %112 = arith.mulf %68, %111 : vector<256x32xf32>
    %c0_39 = arith.constant 0 : index
    %c0_40 = arith.constant 0 : index
    %c0_41 = arith.constant 0 : index
    %113 = vector.load %arg8[%c0_39, %c0_40, %c0_41] : memref<1x256x32xf32, #tpu.memory_space<vmem>>, vector<1x256x32xf32>
    %114 = vector.shape_cast %113 : vector<1x256x32xf32> to vector<256x32xf32>
    %115 = vector.shape_cast %112 : vector<256x32xf32> to vector<1x256x32xf32>
    tpu.vector_store %arg8[%c0_39, %c0_40, %c0_41], %115 {strides = array<i32>} : memref<1x256x32xf32, #tpu.memory_space<vmem>>, vector<1x256x32xf32>,
    return
  }
  func.func @transform_0(%arg0: i32) -> (i32, i32, i32, i32) {
    %c0_i32 = arith.constant 0 : i32
    %c0_i32_0 = arith.constant 0 : i32
    %c0_i32_1 = arith.constant 0 : i32
    %c0_i32_2 = arith.constant 0 : i32
    return %arg0, %c0_i32, %c0_i32_0, %c0_i32_1 : i32, i32, i32, i32
  }
  func.func @transform_1(%arg0: i32) -> (i32, i32) {
    %c0_i32 = arith.constant 0 : i32
    %c0_i32_0 = arith.constant 0 : i32
    %c0_i32_1 = arith.constant 0 : i32
    return %c0_i32, %c0_i32_0 : i32, i32
  }
  func.func @transform_2(%arg0: i32) -> (i32, i32) {
    %c0_i32 = arith.constant 0 : i32
    %c0_i32_0 = arith.constant 0 : i32
    %c0_i32_1 = arith.constant 0 : i32
    return %c0_i32, %c0_i32_0 : i32, i32
  }
  func.func @transform_3(%arg0: i32) -> (i32, i32) {
    %c0_i32 = arith.constant 0 : i32
    %c0_i32_0 = arith.constant 0 : i32
    %c0_i32_1 = arith.constant 0 : i32
    return %c0_i32, %c0_i32_0 : i32, i32
  }
  func.func @transform_4(%arg0: i32) -> (i32, i32) {
    %c0_i32 = arith.constant 0 : i32
    %c0_i32_0 = arith.constant 0 : i32
    %c0_i32_1 = arith.constant 0 : i32
    return %c0_i32, %c0_i32_0 : i32, i32
  }
  func.func @transform_5(%arg0: i32) -> (i32, i32) {
    %c0_i32 = arith.constant 0 : i32
    %c0_i32_0 = arith.constant 0 : i32
    %c0_i32_1 = arith.constant 0 : i32
    return %c0_i32, %c0_i32_0 : i32, i32
  }
  func.func @transform_6(%arg0: i32) -> (i32, i32) {
    %c0_i32 = arith.constant 0 : i32
    %c0_i32_0 = arith.constant 0 : i32
    %c0_i32_1 = arith.constant 0 : i32
    return %c0_i32, %c0_i32_0 : i32, i32
  }
  func.func @transform_7(%arg0: i32) -> (i32, i32, i32) {
    %c0_i32 = arith.constant 0 : i32
    %c0_i32_0 = arith.constant 0 : i32
    %c0_i32_1 = arith.constant 0 : i32
    return %arg0, %c0_i32, %c0_i32_0 : i32, i32, i32
  }
}

</mosaic_0001>

<bundles_post_ra>
// kernel: cbam_block_forward.1
= control target key start
LH: loop header
LB: loop body
LE: loop exit
PB: predicated region body
PF: predicated region fallthrough
CT: control target
= control target key end

     0   :  { %12 = vsyncpa [#allocation3], 0  ;;  %s10844_s0 = inlined_call_operand.vmem [shape: f32[2,16,16,4], index: 0, kind: input, shape index: {}]   ;;  %s10845_s1 = inlined_call_operand.vmem [shape: f32[36,32], index: 1, kind: input, shape index: {}]   ;;  %s10846_s2 = inlined_call_operand.vmem [shape: f32[1,32], index: 2, kind: input, shape index: {}]   ;;  %s10847_s3 = inlined_call_operand.vmem [shape: f32[1,32], index: 3, kind: input, shape index: {}]   ;;  %s10848_s4 = inlined_call_operand.vmem [shape: f32[2,32], index: 4, kind: input, shape index: {}]   ;;  %s10849_s5 = inlined_call_operand.vmem [shape: f32[2,32], index: 5, kind: input, shape index: {}]   ;;  %s10850_s6 = inlined_call_operand.vmem [shape: f32[98,1], index: 6, kind: input, shape index: {}]   ;;  %s10851_s7 = inlined_call_operand.hbm [shape: f32[2,256,32], index: 7, kind: output, shape index: {}]  }
   0x1   :  { %14 = vsyncpa [#allocation3 + $0x1], 0  ;;  %s6386_s24 = smov 0   ;;  %s6388_s25 = smov 0  }
   0x2   :  { %s6390_s26 = smov 0   ;;  %s6392_s27 = smov 0  }
   0x3 LB: > { %s6407_s28 = sadd.s32 4294967295, %s6327_s27   ;;  %s5493_s29 = sadd.s32 4294967294, %s6327_s27   ;;  %s6327_s27 = sphi %s6392_s27, %s11361_s27   ;;  %s6323_s26 = sphi %s6390_s26, %s11360_s26   ;;  %s6319_s25 = sphi %s6388_s25, %s11359_s25   ;;  %s6315_s24 = sphi %s6386_s24, %s11358_s24  }
   0x4   : > { %s6411_s30 = sadd.s32 1, %s6327_s27   ;;  %s179_s8 = sadd.s32 1, %s6323_s26 }
   0x5   : > { %s176_s9 = ssub.s32 %s6327_s27, %s6411_s30  ;;  %p189_p0 = scmp.ne.s32.totalorder %s6323_s26, %s6319_s25 }
   0x6   : > { %p177_p1 = scmp.eq.s32.totalorder %s176_s9, 0  ;;  %p190_p2 = scmp.eq.s32.totalorder %s6407_s28, 1 }
   0x7   : > { %p195_p3 = scmp.ne.s32.totalorder %s6319_s25, %s6315_s24  ;;  %p196_p4 = scmp.eq.s32.totalorder %s5493_s29, 1 }
   0x8   : > { %s6422_s10 = scalar_select %p177_p1, %s6323_s26, %s179_s8  }
   0x9   : > { %p6424_p5 = por %p190_p2, %p189_p0  ;;  %p6428_p6 = por %p196_p4, %p195_p3 }
   0xa   : > { %p5496_p7 = scmp.ge.s32.totalorder %s6327_s27, 1  ;;  %p240_p8 = scmp.lt.s32.totalorder %s6327_s27, 3 }
   0xc   : > { %p241_p9 = pnand %p5496_p7, %p240_p8 }
   0xe   : > { %244 = sbr.rel (%p241_p9) target bundleno = 2455 (0x997), region = 48 }
  0x13   : > { %vm342_vm0 = vcmask 1040384   ;;  %p272_p10 = scmp.lt.s32.totalorder %s6407_s28, 1  ;;  %v10852_v0 = vmov 0.0   ;;  %vm511_vm1 = vcmask 1046528   ;;  %s6330_s18 = smov 4   ;;  %vm699_vm2 = vcmask 1045504  }
  0x14   : > { %v6436_v1 = vrot.slane %v10852_v0, 7  ;;  %s6331_s19 = smov 8   ;;  %vm922_vm3 = vcmask 64512   ;;  %vm887_vm4 = vcmask 31744   ;;  %s6332_s20 = smov 12   ;;  %vm1351_vm5 = vcmask 1043456  }
  0x15   : > { %s273_s13 = scalar_select %p272_p10, %s6407_s28, 1  ;;  %vm2381_vm6 = vcmask 1042432   ;;  %vm2924_vm7 = vcmask 1044480   ;;  %vm3486_vm8 = vcmask 1041408   ;;  %vm1183_vm9 = vcmask 97280  }
  0x16   : > { %10924 = vst [vmem:[#allocation5_spill] sm:$0xff] %v6436_v1  ;;  %v6441_v2 = vsel %vm342_vm0, 0.0, %v6436_v1  ;;  %v6445_v3 = vsel %vm342_vm0, %v6436_v1, 0.0  ;;  %v513_v4 = vrot.slane %v6436_v1, 1  ;;  %s6334_s21 = smov 2   ;;  %s6335_s22 = smov 6  }
  0x17   : > { %10925 = vst [vmem:[#allocation6_spill] sm:$0xff] %v6441_v2  ;;  %v512_v5 = vrot.slane %v6441_v2, 1  ;;  %v515_v6 = vrot.slane %v6445_v3, 1  ;;  %s5638_s14 = sshll.u32 %s273_s13, 8  ;;  %s6336_s23 = smov 10   ;;  %vm1216_vm10 = vcmask 195584  }
  0x18   : > { %s6453_s17 = scalar_lea.vmem %s10844_s0, %s5638_s14  ;;  %vm1254_vm11 = vcmask 293888   ;;  %vm3674_vm12 = vcmask 15360   ;;  %vm3743_vm13 = vcmask 48128   ;;  %vm3812_vm14 = vcmask 80896   ;;  %s6337_s29 = smov 14  }
  0x19   : > { %v514_v7 = vsel %vm511_vm1, %v512_v5, %v513_v4  ;;  %v516_v8 = vsel %vm511_vm1, %v513_v4, %v515_v6  ;;  %v277_v9 = vld [vmem:[%s6453_s17] sm:$0xff]  ;;  %v278_v10 = vld [vmem:[%s6453_s17 + $0x8] sm:$0xff]  ;;  %v279_v11 = vld [vmem:[%s6453_s17 + $0x10] sm:$0xff]  ;;  %s6338_s8 = smov 28   ;;  %vm1882_vm15 = vcmask 261120   ;;  %s6339_s16 = smov 42  }
  0x1a   : > { %v5935_v12 = vpack.i.bf16 %v516_v8, %v514_v7  ;;  %v345_v13 = vrot.slane %v277_v9, 7  ;;  %v346_v14 = vrot.slane %v278_v10, 7  ;;  %v280_v15 = vld [vmem:[%s6453_s17 + $0x18] sm:$0xff]  ;;  %v348_v16 = vrot.slane %v279_v11, 7  ;;  %v281_v17 = vld [vmem:[%s6453_s17 + $0x20] sm:$0xff]  ;;  %v282_v18 = vld [vmem:[%s6453_s17 + $0x28] sm:$0xff] }
  0x1b   : > { %v349_v19 = vrot.slane %v280_v15, 7  ;;  %v351_v20 = vrot.slane %v281_v17, 7  ;;  %v352_v21 = vrot.slane %v282_v18, 7  ;;  %v283_v34 = vld [vmem:[%s6453_s17 + $0x30] sm:$0xff]  ;;  %v284_v35 = vld [vmem:[%s6453_s17 + $0x38] sm:$0xff]  ;;  %v285_v40 = vld [vmem:[%s6453_s17 + $0x40] sm:$0xff] }
  0x1c   : > { %5936 = vrot.lane.b32.xlu0 %v5935_v12, %s6330_s18  ;;  %v6465_v22 = vsel %vm342_vm0, %v345_v13, %v346_v14  ;;  %v6468_v23 = vsel %vm342_vm0, %v346_v14, 0.0  ;;  %v6471_v24 = vsel %vm342_vm0, 0.0, %v345_v13  ;;  %v6474_v25 = vsel %vm342_vm0, 0.0, %v348_v16  ;;  %v286_v41 = vld [vmem:[%s6453_s17 + $0x48] sm:$0xff]  ;;  %v287_v50 = vld [vmem:[%s6453_s17 + $0x50] sm:$0xff]  ;;  %v288_v53 = vld [vmem:[%s6453_s17 + $0x58] sm:$0xff] }
  0x1d   : > { %v518_v26 = vrot.slane %v6465_v22, 1  ;;  %v520_v27 = vrot.slane %v6468_v23, 1  ;;  %v517_v28 = vrot.slane %v6471_v24, 1  ;;  %v6480_v29 = vsel %vm342_vm0, %v348_v16, %v349_v19  ;;  %v289_v7 = vld [vmem:[%s6453_s17 + $0x60] sm:$0xff]  ;;  %v290_v8 = vld [vmem:[%s6453_s17 + $0x68] sm:$0xff]  ;;  %v291_v17 = vld [vmem:[%s6453_s17 + $0x70] sm:$0xff] }
  0x1e   : > { %v522_v30 = vrot.slane %v6474_v25, 1  ;;  %v523_v31 = vrot.slane %v6480_v29, 1  ;;  %v6485_v32 = vsel %vm342_vm0, %v349_v19, 0.0  ;;  %v6488_v33 = vsel %vm342_vm0, %v351_v20, %v352_v21  ;;  %v292_v18 = vld [vmem:[%s6453_s17 + $0x78] sm:$0xff]  ;;  %s6340_s13 = smov 56  }
  0x1f   : > { %v521_v36 = vsel %vm511_vm1, %v518_v26, %v520_v27  ;;  %v519_v37 = vsel %vm511_vm1, %v517_v28, %v518_v26  ;;  %v525_v38 = vrot.slane %v6485_v32, 1  ;;  %v6496_v39 = vsel %vm342_vm0, 0.0, %v351_v20 }
  0x20   : > { %603 = vrot.lane.b32.xlu1 %v521_v36, %s6330_s18  ;;  %601 = vrot.lane.b32.xlu0 %v519_v37, %s6330_s18  ;;  %v524_v42 = vsel %vm511_vm1, %v522_v30, %v523_v31  ;;  %v527_v43 = vrot.slane %v6496_v39, 1  ;;  %v528_v44 = vrot.slane %v6488_v33, 1  ;;  %v6506_v45 = vsel %vm342_vm0, %v352_v21, 0.0  ;;  %v293_v36 = vld [vmem:[%s6453_s17 + $0x80] sm:$0xff] }
  0x21   : > { %v526_v46 = vsel %vm511_vm1, %v523_v31, %v525_v38  ;;  %v530_v47 = vrot.slane %v6506_v45, 1  ;;  %v354_v48 = vrot.slane %v283_v34, 7  ;;  %v355_v49 = vrot.slane %v284_v35, 7 }
  0x22   : > { %v357_v51 = vrot.slane %v285_v40, 7  ;;  %v358_v52 = vrot.slane %v286_v41, 7  ;;  %v529_v57 = vsel %vm511_vm1, %v527_v43, %v528_v44  ;;  %v360_v60 = vrot.slane %v287_v50, 7  ;;  %v294_v41 = vld [vmem:[%s6453_s17 + $0x88] sm:$0xff] }
  0x23   : > { %v6513_v54 = vsel %vm342_vm0, %v354_v48, %v355_v49  ;;  %v6516_v55 = vsel %vm342_vm0, 0.0, %v354_v48  ;;  %v6519_v56 = vsel %vm342_vm0, %v355_v49, 0.0  ;;  %v531_v61 = vsel %vm511_vm1, %v528_v44, %v530_v47 }
  0x24   : > { %605 = vrot.lane.b32.xlu1 %v524_v42, %s6330_s18  ;;  %607 = vrot.lane.b32.xlu0 %v526_v46, %s6330_s18  ;;  %v532_v58 = vrot.slane %v6516_v55, 1  ;;  %v533_v59 = vrot.slane %v6513_v54, 1  ;;  %v535_v62 = vrot.slane %v6519_v56, 1  ;;  %v6529_v63 = vsel %vm342_vm0, %v357_v51, %v358_v52 }
  0x25   : > { %v361_v4 = vrot.slane %v288_v53, 7  ;;  %v6532_v5 = vsel %vm342_vm0, 0.0, %v357_v51  ;;  %v6535_v6 = vsel %vm342_vm0, %v358_v52, 0.0  ;;  %v538_v10 = vrot.slane %v6529_v63, 1  ;;  %v295_v51 = vld [vmem:[%s6453_s17 + $0x90] sm:$0xff]  ;;  %v296_v53 = vld [vmem:[%s6453_s17 + $0x98] sm:$0xff] }
  0x26   : > { %v534_v9 = vsel %vm511_vm1, %v532_v58, %v533_v59  ;;  %v6547_v12 = vsel %vm342_vm0, 0.0, %v360_v60  ;;  %v536_v13 = vsel %vm511_vm1, %v533_v59, %v535_v62  ;;  %v537_v14 = vrot.slane %v6532_v5, 1 }
  0x27   : > { %v6544_v11 = vsel %vm342_vm0, %v360_v60, %v361_v4  ;;  %v540_v15 = vrot.slane %v6535_v6, 1  ;;  %v363_v16 = vrot.slane %v289_v7, 7  ;;  %v6555_v19 = vsel %vm342_vm0, %v361_v4, 0.0 }
  0x28   : > { %609 = vrot.lane.b32.xlu1 %v529_v57, %s6330_s18  ;;  %611 = vrot.lane.b32.xlu0 %v531_v61, %s6330_s18  ;;  %v364_v20 = vrot.slane %v290_v8, 7  ;;  %v542_v21 = vrot.slane %v6547_v12, 1  ;;  %v543_v26 = vrot.slane %v6544_v11, 1  ;;  %v366_v27 = vrot.slane %v291_v17, 7  ;;  %v297_v8 = vld [vmem:[%s6453_s17 + $0xa0] sm:$0xff] }
  0x29   : > { %v367_v28 = vrot.slane %v292_v18, 7  ;;  %v539_v30 = vsel %vm511_vm1, %v537_v14, %v538_v10  ;;  %v541_v31 = vsel %vm511_vm1, %v538_v10, %v540_v15  ;;  %v545_v34 = vrot.slane %v6555_v19, 1 }
  0x2a   : > { %v6565_v35 = vsel %vm342_vm0, 0.0, %v363_v16  ;;  %v6569_v37 = vsel %vm342_vm0, %v363_v16, %v364_v20  ;;  %v6572_v38 = vsel %vm342_vm0, %v364_v20, 0.0  ;;  %v544_v40 = vsel %vm511_vm1, %v542_v21, %v543_v26  ;;  %v299_v21 = vld [vmem:[%s6453_s17 + $0xb0] sm:$0xff] }
  0x2b   : > { %v547_v42 = vrot.slane %v6565_v35, 1  ;;  %v6580_v43 = vsel %vm342_vm0, %v366_v27, %v367_v28  ;;  %v6583_v44 = vsel %vm342_vm0, 0.0, %v366_v27  ;;  %v369_v46 = vrot.slane %v293_v36, 7 }
  0x2c   : > { %613 = vrot.lane.b32.xlu1 %v534_v9, %s6330_s18  ;;  %615 = vrot.lane.b32.xlu0 %v536_v13, %s6330_s18  ;;  %v546_v47 = vsel %vm511_vm1, %v543_v26, %v545_v34  ;;  %v548_v48 = vrot.slane %v6569_v37, 1  ;;  %v550_v49 = vrot.slane %v6572_v38, 1  ;;  %v6589_v50 = vsel %vm342_vm0, %v367_v28, 0.0  ;;  %v298_v9 = vld [vmem:[%s6453_s17 + $0xa8] sm:$0xff] }
  0x2d   : > { %v370_v52 = vrot.slane %v294_v41, 7  ;;  %v552_v57 = vrot.slane %v6583_v44, 1  ;;  %v553_v58 = vrot.slane %v6580_v43, 1  ;;  %v555_v59 = vrot.slane %v6589_v50, 1 }
  0x2e   : > { %v6599_v60 = vsel %vm342_vm0, 0.0, %v369_v46  ;;  %v372_v61 = vrot.slane %v295_v51, 7  ;;  %v549_v62 = vsel %vm511_vm1, %v547_v42, %v548_v48  ;;  %v551_v4 = vsel %vm511_vm1, %v548_v48, %v550_v49 }
  0x2f   : > { %v373_v7 = vrot.slane %v296_v53, 7  ;;  %v6606_v10 = vsel %vm342_vm0, %v369_v46, %v370_v52  ;;  %v6609_v13 = vsel %vm342_vm0, %v370_v52, 0.0  ;;  %v554_v14 = vsel %vm511_vm1, %v552_v57, %v553_v58  ;;  %v301_v52 = vld [vmem:[%s6453_s17 + $0xc0] sm:$0xff]  ;;  %v302_v53 = vld [vmem:[%s6453_s17 + $0xc8] sm:$0xff] }
  0x30   : > { %617 = vrot.lane.b32.xlu1 %v539_v30, %s6330_s18  ;;  %619 = vrot.lane.b32.xlu0 %v541_v31, %s6330_s18  ;;  %v557_v15 = vrot.slane %v6599_v60, 1  ;;  %v556_v16 = vsel %vm511_vm1, %v553_v58, %v555_v59  ;;  %v6617_v17 = vsel %vm342_vm0, 0.0, %v372_v61  ;;  %v375_v18 = vrot.slane %v297_v8, 7  ;;  %v300_v31 = vld [vmem:[%s6453_s17 + $0xb8] sm:$0xff] }
  0x31   : > { %v376_v20 = vrot.slane %v298_v9, 7  ;;  %v558_v26 = vrot.slane %v6606_v10, 1  ;;  %v560_v27 = vrot.slane %v6609_v13, 1  ;;  %v6623_v28 = vsel %vm342_vm0, %v372_v61, %v373_v7 }
  0x32   : > { %v6626_v30 = vsel %vm342_vm0, %v373_v7, 0.0  ;;  %v562_v34 = vrot.slane %v6617_v17, 1  ;;  %v378_v36 = vrot.slane %v299_v21, 7  ;;  %v6638_v46 = vsel %vm342_vm0, 0.0, %v375_v18 }
  0x33   : > { %v565_v41 = vrot.slane %v6626_v30, 1  ;;  %v6635_v42 = vsel %vm342_vm0, %v375_v18, %v376_v20  ;;  %v561_v48 = vsel %vm511_vm1, %v558_v26, %v560_v27  ;;  %v6643_v49 = vsel %vm342_vm0, %v376_v20, 0.0 }
  0x34   : > { %621 = vrot.lane.b32.xlu1 %v544_v40, %s6330_s18  ;;  %623 = vrot.lane.b32.xlu0 %v546_v47, %s6330_s18  ;;  %v563_v40 = vrot.slane %v6623_v28, 1  ;;  %v559_v47 = vsel %vm511_vm1, %v557_v15, %v558_v26  ;;  %v379_v51 = vrot.slane %v300_v31, 7  ;;  %v567_v57 = vrot.slane %v6638_v46, 1  ;;  %v303_v15 = vld [vmem:[%s6453_s17 + $0xd0] sm:$0xff] }
  0x35   : > { %v568_v58 = vrot.slane %v6635_v42, 1  ;;  %v381_v9 = vrot.slane %v301_v52, 7 }
  0x36   : > { %v564_v59 = vsel %vm511_vm1, %v562_v34, %v563_v40  ;;  %v566_v61 = vsel %vm511_vm1, %v563_v40, %v565_v41  ;;  %v6658_v7 = vsel %vm342_vm0, %v378_v36, %v379_v51  ;;  %v6661_v8 = vsel %vm342_vm0, %v379_v51, 0.0 }
  0x37   : > { %v569_v18 = vsel %vm511_vm1, %v567_v57, %v568_v58  ;;  %v573_v26 = vrot.slane %v6658_v7, 1  ;;  %v575_v27 = vrot.slane %v6661_v8, 1  ;;  %v6676_v34 = vsel %vm342_vm0, 0.0, %v381_v9 }
  0x38   : > { %625 = vrot.lane.b32.xlu1 %v549_v62, %s6330_s18  ;;  %627 = vrot.lane.b32.xlu0 %v551_v4, %s6330_s18  ;;  %v570_v62 = vrot.slane %v6643_v49, 1  ;;  %v6655_v4 = vsel %vm342_vm0, 0.0, %v378_v36  ;;  %v384_v36 = vrot.slane %v303_v15, 7  ;;  %v307_v15 = vld [vmem:[%s6453_s17 + $0xf0] sm:$0xff] }
  0x39   : > { %v572_v21 = vrot.slane %v6655_v4, 1  ;;  %v576_v52 = vsel %vm511_vm1, %v573_v26, %v575_v27 }
  0x3a   : > { %v571_v20 = vsel %vm511_vm1, %v568_v58, %v570_v62 }
  0x3b   : > { %v574_v51 = vsel %vm511_vm1, %v572_v21, %v573_v26 }
  0x3c   : > { %629 = vrot.lane.b32.xlu1 %v554_v14, %s6330_s18  ;;  %631 = vrot.lane.b32.xlu0 %v556_v16, %s6330_s18  ;;  %v382_v14 = vrot.slane %v302_v53, 7  ;;  %v304_v16 = vld [vmem:[%s6453_s17 + $0xd8] sm:$0xff]  ;;  %v577_v53 = vrot.slane %v6676_v34, 1 }
  0x3d   : > { %v385_v40 = vrot.slane %v304_v16, 7  ;;  %v308_v16 = vld [vmem:[%s6453_s17 + $0xf8] sm:$0xff] }
  0x3e   : > { %v6673_v31 = vsel %vm342_vm0, %v381_v9, %v382_v14  ;;  %v6679_v41 = vsel %vm342_vm0, %v382_v14, 0.0 }
  0x3f   : > { %v578_v57 = vrot.slane %v6673_v31, 1  ;;  %v580_v58 = vrot.slane %v6679_v41, 1  ;;  %v6697_v9 = vsel %vm342_vm0, %v385_v40, 0.0 }
  0x40   : > { %633 = vrot.lane.b32.xlu1 %v559_v47, %s6330_s18  ;;  %635 = vrot.lane.b32.xlu0 %v561_v48, %s6330_s18  ;;  %v305_v47 = vld [vmem:[%s6453_s17 + $0xe0] sm:$0xff]  ;;  %v306_v48 = vld [vmem:[%s6453_s17 + $0xe8] sm:$0xff]  ;;  %v585_v27 = vrot.slane %v6697_v9, 1  ;;  %s6333_s17 = smov 24  }
  0x41   : > { %v387_v62 = vrot.slane %v305_v47, 7  ;;  %v388_v14 = vrot.slane %v306_v48, 7  ;;  %v581_v26 = vsel %vm511_vm1, %v578_v57, %v580_v58 }
  0x43   : > { %v6712_v47 = vsel %vm342_vm0, %v387_v62, %v388_v14  ;;  %v6715_v48 = vsel %vm342_vm0, %v388_v14, 0.0 }
  0x44   : > { %637 = vrot.lane.b32.xlu1 %v564_v59, %s6330_s18  ;;  %639 = vrot.lane.b32.xlu0 %v566_v61, %s6330_s18  ;;  %v6691_v59 = vsel %vm342_vm0, %v384_v36, %v385_v40  ;;  %v6694_v61 = vsel %vm342_vm0, 0.0, %v384_v36  ;;  %v6709_v36 = vsel %vm342_vm0, 0.0, %v387_v62  ;;  %v390_v40 = vrot.slane %v307_v15, 7  ;;  %10927 = vst [vmem:[#allocation8_spill] sm:$0xff] %v6712_v47 }
  0x45   : > { %v583_v21 = vrot.slane %v6691_v59, 1  ;;  %10926 = vst [vmem:[#allocation7_spill] sm:$0xff] %v6709_v36  ;;  %v588_v58 = vrot.slane %v6712_v47, 1  ;;  %v590_v15 = vrot.slane %v6715_v48, 1 }
  0x46   : > { %v6725_v62 = vsel %vm342_vm0, 0.0, %v390_v40 }
  0x47   : > { %10928 = vst [vmem:[#allocation9_spill] sm:$0xff] %v6725_v62 }
  0x48   : > { %641 = vrot.lane.b32.xlu1 %v569_v18, %s6330_s18  ;;  %643 = vrot.lane.b32.xlu0 %v571_v20, %s6330_s18  ;;  %v579_v18 = vsel %vm511_vm1, %v577_v53, %v578_v57  ;;  %v582_v20 = vrot.slane %v6694_v61, 1  ;;  %v587_v53 = vrot.slane %v6709_v36, 1  ;;  %v586_v57 = vsel %vm511_vm1, %v583_v21, %v585_v27 }
  0x4a   : > { %v589_v27 = vsel %vm511_vm1, %v587_v53, %v588_v58  ;;  %v705_v53 = vrot.slane %v6471_v24, 2 }
  0x4c   : > { %645 = vrot.lane.b32.xlu1 %v574_v51, %s6330_s18  ;;  %647 = vrot.lane.b32.xlu0 %v576_v52, %s6330_s18  ;;  %v391_v51 = vrot.slane %v308_v16, 7  ;;  %v584_v52 = vsel %vm511_vm1, %v582_v20, %v583_v21  ;;  %v592_v20 = vrot.slane %v6725_v62, 1  ;;  %v700_v21 = vrot.slane %v6441_v2, 2 }
  0x4e   : > { %v6728_v14 = vsel %vm342_vm0, %v390_v40, %v391_v51  ;;  %v6731_v16 = vsel %vm342_vm0, %v391_v51, 0.0  ;;  %v591_v40 = vsel %vm511_vm1, %v588_v58, %v590_v15  ;;  %v706_v58 = vrot.slane %v6465_v22, 2 }
  0x4f   : > { %10929 = vst [vmem:[#allocation10_spill] sm:$0xff] %v6728_v14  ;;  %v593_v51 = vrot.slane %v6728_v14, 1  ;;  %v595_v0 = vrot.slane %v6731_v16, 1  ;;  %vm2025_vm0 = vcmask 254976  }
  0x50   : > { %649 = vrot.lane.b32.xlu1 %v579_v18, %s6330_s18  ;;  %651 = vrot.lane.b32.xlu0 %v581_v26, %s6330_s18  ;;  %v703_v18 = vrot.slane %v6445_v3, 2  ;;  %v701_v26 = vrot.slane %v6436_v1, 2 }
  0x51   : > { %v596_v1 = vsel %vm511_vm1, %v593_v51, %v595_v0 }
  0x52   : > { %v702_v3 = vsel %vm699_vm2, %v700_v21, %v701_v26  ;;  %v710_v21 = vrot.slane %v6474_v25, 2 }
  0x54   : > { %653 = vrot.lane.b32.xlu1 %v584_v52, %s6330_s18  ;;  %655 = vrot.lane.b32.xlu0 %v586_v57, %s6330_s18  ;;  %v704_v52 = vsel %vm699_vm2, %v701_v26, %v703_v18  ;;  %v594_v57 = vsel %vm511_vm1, %v592_v20, %v593_v51  ;;  %v711_v18 = vrot.slane %v6480_v29, 2  ;;  %v715_v26 = vrot.slane %v6496_v39, 2 }
  0x55   : > { %v5940_v15 = vpack.i.bf16 %v704_v52, %v702_v3  ;;  %v718_v51 = vrot.slane %v6506_v45, 2  ;;  %v725_v45 = vrot.slane %v6532_v5, 2 }
  0x56   : > { %v712_v20 = vsel %vm699_vm2, %v710_v21, %v711_v18 }
  0x58   : > { %657 = vrot.lane.b32.xlu1 %v589_v27, %s6330_s18  ;;  %659 = vrot.lane.b32.xlu0 %v591_v40, %s6330_s18  ;;  %v708_v27 = vrot.slane %v6468_v23, 2  ;;  %v707_v40 = vsel %vm699_vm2, %v705_v53, %v706_v58  ;;  %v716_v23 = vrot.slane %v6488_v33, 2  ;;  %v721_v53 = vrot.slane %v6513_v54, 2 }
  0x5a   : > { %v709_v0 = vsel %vm699_vm2, %v706_v58, %v708_v27  ;;  %v717_v52 = vsel %vm699_vm2, %v715_v26, %v716_v23  ;;  %v719_v58 = vsel %vm699_vm2, %v716_v23, %v718_v51  ;;  %v726_v27 = vrot.slane %v6529_v63, 2 }
  0x5b   : > { %v736_v23 = vrot.slane %v6569_v37, 2 }
  0x5c   : > { %661 = vrot.lane.b32.xlu1 %v594_v57, %s6330_s18  ;;  %663 = vrot.lane.b32.xlu0 %v596_v1, %s6330_s18  ;;  %v713_v1 = vrot.slane %v6485_v32, 2  ;;  %v720_v57 = vrot.slane %v6516_v55, 2  ;;  %v723_v32 = vrot.slane %v6519_v56, 2  ;;  %v730_v56 = vrot.slane %v6547_v12, 2 }
  0x5e   : > { %v714_v3 = vsel %vm699_vm2, %v711_v18, %v713_v1  ;;  %v724_v21 = vsel %vm699_vm2, %v721_v53, %v723_v32  ;;  %v727_v18 = vsel %vm699_vm2, %v725_v45, %v726_v27  ;;  %v746_v45 = vrot.slane %v6606_v10, 2 }
  0x60   : > { %5941 = vrot.lane.b32.xlu1 %v5940_v15, %s6331_s19  ;;  %789 = vrot.lane.b32.xlu0 %v707_v40, %s6331_s19  ;;  %v722_v15 = vsel %vm699_vm2, %v720_v57, %v721_v53  ;;  %v728_v40 = vrot.slane %v6535_v6, 2  ;;  %v735_v6 = vrot.slane %v6565_v35, 2  ;;  %v741_v57 = vrot.slane %v6580_v43, 2 }
  0x61   : > { %v743_v53 = vrot.slane %v6589_v50, 2  ;;  %v750_v50 = vrot.slane %v6617_v17, 2 }
  0x62   : > { %v729_v1 = vsel %vm699_vm2, %v726_v27, %v728_v40 }
  0x63   : > { %v744_v27 = vsel %vm699_vm2, %v741_v57, %v743_v53 }
  0x64   : > { %791 = vrot.lane.b32.xlu1 %v709_v0, %s6331_s19  ;;  %793 = vrot.lane.b32.xlu0 %v712_v20, %s6331_s19  ;;  %v731_v0 = vrot.slane %v6544_v11, 2  ;;  %v733_v20 = vrot.slane %v6555_v19, 2  ;;  %v740_v19 = vrot.slane %v6583_v44, 2 }
  0x66   : > { %v732_v26 = vsel %vm699_vm2, %v730_v56, %v731_v0  ;;  %v734_v51 = vsel %vm699_vm2, %v731_v0, %v733_v20  ;;  %v756_v20 = vrot.slane %v6635_v42, 2 }
  0x68   : > { %795 = vrot.lane.b32.xlu1 %v714_v3, %s6331_s19  ;;  %797 = vrot.lane.b32.xlu0 %v717_v52, %s6331_s19  ;;  %v737_v3 = vsel %vm699_vm2, %v735_v6, %v736_v23  ;;  %v738_v52 = vrot.slane %v6572_v38, 2  ;;  %v748_v38 = vrot.slane %v6609_v13, 2  ;;  %v755_v13 = vrot.slane %v6638_v46, 2 }
  0x69   : > { %v758_v6 = vrot.slane %v6643_v49, 2  ;;  %v768_v49 = vrot.slane %v6679_v41, 2 }
  0x6a   : > { %v739_v32 = vsel %vm699_vm2, %v736_v23, %v738_v52  ;;  %v749_v56 = vsel %vm699_vm2, %v746_v45, %v748_v38  ;;  %v761_v23 = vrot.slane %v6658_v7, 2 }
  0x6c   : > { %799 = vrot.lane.b32.xlu1 %v719_v58, %s6331_s19  ;;  %801 = vrot.lane.b32.xlu0 %v722_v15, %s6331_s19  ;;  %v742_v58 = vsel %vm699_vm2, %v740_v19, %v741_v57  ;;  %v745_v15 = vrot.slane %v6599_v60, 2  ;;  %v765_v19 = vrot.slane %v6676_v34, 2  ;;  %v766_v57 = vrot.slane %v6673_v31, 2 }
  0x6e   : > { %v747_v40 = vsel %vm699_vm2, %v745_v15, %v746_v45  ;;  %v773_v45 = vrot.slane %v6697_v9, 2  ;;  %v769_v38 = vsel %vm699_vm2, %v766_v57, %v768_v49  ;;  %v778_v9 = vrot.slane %v6715_v48, 2 }
  0x70   : > { %803 = vrot.lane.b32.xlu1 %v724_v21, %s6331_s19  ;;  %805 = vrot.lane.b32.xlu0 %v727_v18, %s6331_s19  ;;  %v751_v21 = vrot.slane %v6623_v28, 2  ;;  %v753_v18 = vrot.slane %v6626_v30, 2  ;;  %v760_v30 = vrot.slane %v6655_v4, 2 }
  0x72   : > { %v752_v0 = vsel %vm699_vm2, %v750_v50, %v751_v21  ;;  %v762_v52 = vsel %vm699_vm2, %v760_v30, %v761_v23  ;;  %v783_v30 = vrot.slane %v6731_v16, 2 }
  0x74   : > { %807 = vrot.lane.b32.xlu1 %v729_v1, %s6331_s19  ;;  %809 = vrot.lane.b32.xlu0 %v732_v26, %s6331_s19  ;;  %v754_v1 = vsel %vm699_vm2, %v751_v21, %v753_v18  ;;  %v757_v26 = vsel %vm699_vm2, %v755_v13, %v756_v20  ;;  %v781_v13 = vrot.slane %v6728_v14, 2 }
  0x76   : > { %v784_v48 = vsel %vm699_vm2, %v781_v13, %v783_v30 }
  0x78   : > { %811 = vrot.lane.b32.xlu1 %v734_v51, %s6331_s19  ;;  %813 = vrot.lane.b32.xlu0 %v737_v3, %s6331_s19  ;;  %v763_v51 = vrot.slane %v6661_v8, 2  ;;  %v759_v3 = vsel %vm699_vm2, %v756_v20, %v758_v6  ;;  %v770_v8 = vrot.slane %v6694_v61, 2 }
  0x7a   : > { %v764_v53 = vsel %vm699_vm2, %v761_v23, %v763_v51 }
  0x7c   : > { %815 = vrot.lane.b32.xlu1 %v739_v32, %s6331_s19  ;;  %817 = vrot.lane.b32.xlu0 %v742_v58, %s6331_s19  ;;  %v767_v32 = vsel %vm699_vm2, %v765_v19, %v766_v57  ;;  %v771_v58 = vrot.slane %v6691_v59, 2 }
  0x7e   : > { %v772_v41 = vsel %vm699_vm2, %v770_v8, %v771_v58  ;;  %v774_v18 = vsel %vm699_vm2, %v771_v58, %v773_v45 }
  0x80   : > { %819 = vrot.lane.b32.xlu1 %v744_v27, %s6331_s19  ;;  %821 = vrot.lane.b32.xlu0 %v747_v40, %s6331_s19  ;;  %v775_v27 = vrot.slane %v6709_v36, 2  ;;  %v776_v40 = vrot.slane %v6712_v47, 2 }
  0x84   : > { %823 = vrot.lane.b32.xlu1 %v749_v56, %s6331_s19  ;;  %825 = vrot.lane.b32.xlu0 %v752_v0, %s6331_s19  ;;  %v777_v56 = vsel %vm699_vm2, %v775_v27, %v776_v40  ;;  %v780_v0 = vrot.slane %v6725_v62, 2 }
  0x86   : > { %v782_v6 = vsel %vm699_vm2, %v780_v0, %v781_v13 }
  0x88   : > { %827 = vrot.lane.b32.xlu1 %v754_v1, %s6331_s19  ;;  %829 = vrot.lane.b32.xlu0 %v757_v26, %s6331_s19  ;;  %v779_v26 = vsel %vm699_vm2, %v776_v40, %v778_v9 }
  0x8c   : > { %831 = vrot.lane.b32.xlu1 %v759_v3, %s6331_s19  ;;  %833 = vrot.lane.b32.xlu0 %v762_v52, %s6331_s19 }
  0x8e   : > { %v6841_v15 = vpop.permute.xlu0 %5936 }
  0x8f   : > { %10930 = vst [vmem:[#allocation11_spill] sm:$0xff] %v6841_v15 }
  0x90   : > { %835 = vrot.lane.b32.xlu1 %v764_v53, %s6331_s19  ;;  %837 = vrot.lane.b32.xlu0 %v767_v32, %s6331_s19 }
  0x92   : > { %v604_v50 = vpop.permute.xlu1 %603  ;;  %v602_v21 = vpop.permute.xlu0 %601 }
  0x93   : > { %v890_v14 = vsel %vm887_vm4, %v6471_v24, %v602_v21 }
  0x94   : > { %839 = vrot.lane.b32.xlu1 %v769_v38, %s6331_s19  ;;  %841 = vrot.lane.b32.xlu0 %v772_v41, %s6331_s19 }
  0x96   : > { %v606_v20 = vpop.permute.xlu1 %605  ;;  %v608_v1 = vpop.permute.xlu0 %607 }
  0x98   : > { %843 = vrot.lane.b32.xlu1 %v774_v18, %s6331_s19  ;;  %845 = vrot.lane.b32.xlu0 %v777_v56, %s6331_s19 }
  0x9a   : > { %v610_v23 = vpop.permute.xlu1 %609  ;;  %v612_v51 = vpop.permute.xlu0 %611 }
  0x9c   : > { %847 = vrot.lane.b32.xlu1 %v779_v26, %s6331_s19  ;;  %849 = vrot.lane.b32.xlu0 %v782_v6, %s6331_s19 }
  0x9e   : > { %v614_v3 = vpop.permute.xlu1 %613  ;;  %v616_v52 = vpop.permute.xlu0 %615 }
  0xa0   : > { %851 = vrot.lane.b32.xlu1 %v784_v48, %s6331_s19 }
  0xa2   : > { %v618_v19 = vpop.permute.xlu1 %617  ;;  %v6866_v57 = vpop.permute.xlu0 %619 }
  0xa6   : > { %v6868_v49 = vpop.permute.xlu1 %621  ;;  %v6870_v53 = vpop.permute.xlu0 %623 }
  0xaa   : > { %v6872_v16 = vpop.permute.xlu1 %625  ;;  %v6874_v32 = vpop.permute.xlu0 %627 }
  0xae   : > { %v6876_v8 = vpop.permute.xlu1 %629  ;;  %v6878_v58 = vpop.permute.xlu0 %631 }
  0xb2   : > { %v6880_v45 = vpop.permute.xlu1 %633  ;;  %v6882_v38 = vpop.permute.xlu0 %635 }
  0xb6   : > { %v6884_v41 = vpop.permute.xlu1 %637  ;;  %v6886_v27 = vpop.permute.xlu0 %639 }
  0xba   : > { %v6888_v40 = vpop.permute.xlu1 %641  ;;  %v6890_v18 = vpop.permute.xlu0 %643 }
  0xbe   : > { %v6892_v56 = vpop.permute.xlu1 %645  ;;  %v6894_v9 = vpop.permute.xlu0 %647 }
  0xc2   : > { %v6896_v0 = vpop.permute.xlu1 %649  ;;  %v6898_v13 = vpop.permute.xlu0 %651 }
  0xc6   : > { %v6900_v26 = vpop.permute.xlu1 %653  ;;  %v6902_v6 = vpop.permute.xlu0 %655 }
  0xca   : > { %v6904_v30 = vpop.permute.xlu1 %657  ;;  %v6906_v48 = vpop.permute.xlu0 %659 }
  0xcb   : > { %10931 = vst [vmem:[#allocation12_spill] sm:$0xff] %v6904_v30  ;;  %10932 = vst [vmem:[#allocation13_spill] sm:$0xff] %v6906_v48 }
  0xce   : > { %v6908_v2 = vpop.permute.xlu1 %661  ;;  %v6910_v15 = vpop.permute.xlu0 %663 }
  0xcf   : > { %10933 = vst [vmem:[#allocation14_spill] sm:$0xff] %v6908_v2  ;;  %10934 = vst [vmem:[#allocation15_spill] sm:$0xff] %v6910_v15  ;;  %v891_v2 = vsel %vm887_vm4, %v6465_v22, %v604_v50  ;;  %v892_v15 = vsel %vm887_vm4, %v6474_v25, %v606_v20  ;;  %v893_v22 = vsel %vm887_vm4, %v6480_v29, %v608_v1 }
  0xd0   : > { %v894_v25 = vsel %vm887_vm4, %v6496_v39, %v610_v23  ;;  %v895_v29 = vsel %vm887_vm4, %v6488_v33, %v612_v51  ;;  %v896_v39 = vsel %vm887_vm4, %v6516_v55, %v614_v3  ;;  %v897_v33 = vsel %vm887_vm4, %v6513_v54, %v616_v52 }
  0xd1   : > { %v898_v55 = vsel %vm887_vm4, %v6532_v5, %v618_v19  ;;  %v899_v54 = vsel %vm887_vm4, %v6529_v63, %v6866_v57  ;;  %v900_v5 = vsel %vm887_vm4, %v6547_v12, %v6868_v49  ;;  %v901_v63 = vsel %vm887_vm4, %v6544_v11, %v6870_v53 }
  0xd2   : > { %v6914_v62 = vpop.permute.xlu1 %5941  ;;  %v790_v47 = vpop.permute.xlu0 %789  ;;  %v902_v12 = vsel %vm887_vm4, %v6565_v35, %v6872_v16  ;;  %v903_v11 = vsel %vm887_vm4, %v6569_v37, %v6874_v32  ;;  %v904_v35 = vsel %vm887_vm4, %v6583_v44, %v6876_v8  ;;  %v905_v37 = vsel %vm887_vm4, %v6580_v43, %v6878_v58 }
  0xd3   : > { %v6917_v36 = vsel %vm922_vm3, %v890_v14, %v790_v47  ;;  %v906_v44 = vsel %vm887_vm4, %v6599_v60, %v6880_v45  ;;  %v907_v43 = vsel %vm887_vm4, %v6606_v10, %v6882_v38  ;;  %v908_v60 = vsel %vm887_vm4, %v6617_v17, %v6884_v41 }
  0xd4   : > { %989 = vrot.lane.b32.xlu0 %v6917_v36, %s6332_s20  ;;  %v909_v10 = vsel %vm887_vm4, %v6623_v28, %v6886_v27  ;;  %v910_v17 = vsel %vm887_vm4, %v6638_v46, %v6888_v40  ;;  %v911_v28 = vsel %vm887_vm4, %v6635_v42, %v6890_v18  ;;  %v912_v46 = vsel %vm887_vm4, %v6655_v4, %v6892_v56 }
  0xd5   : > { %v913_v42 = vsel %vm887_vm4, %v6658_v7, %v6894_v9  ;;  %v914_v4 = vsel %vm887_vm4, %v6676_v34, %v6896_v0  ;;  %v1251_v7 = vld [vmem:[%s10845_s1 + $0x10] sm:$0xff]  ;;  %v915_v34 = vsel %vm887_vm4, %v6673_v31, %v6898_v13  ;;  %v916_v9 = vsel %vm887_vm4, %v6694_v61, %v6900_v26  ;;  %v10937_v61 = vld [vmem:[#allocation12_spill] sm:$0xff] }
  0xd6   : > { %v792_v48 = vpop.permute.xlu1 %791  ;;  %v794_v30 = vpop.permute.xlu0 %793  ;;  %v917_v31 = vsel %vm887_vm4, %v6691_v59, %v6902_v6  ;;  %v10938_v13 = vld [vmem:[#allocation7_spill] sm:$0xff]  ;;  %v10941_v59 = vld [vmem:[#allocation13_spill] sm:$0xff]  ;;  %v10942_v6 = vld [vmem:[#allocation8_spill] sm:$0xff] }
  0xd7   : > { %v6926_v24 = vsel %vm922_vm3, %v891_v2, %v792_v48  ;;  %v6929_v21 = vsel %vm922_vm3, %v892_v15, %v794_v30  ;;  %v918_v26 = vsel %vm887_vm4, %v10938_v13, %v10937_v61 }
  0xd8   : > { %991 = vrot.lane.b32.xlu1 %v6926_v24, %s6332_s20  ;;  %993 = vrot.lane.b32.xlu0 %v6929_v21, %s6332_s20 }
  0xda   : > { %v796_v47 = vpop.permute.xlu1 %795  ;;  %v798_v14 = vpop.permute.xlu0 %797 }
  0xdb   : > { %v6940_v2 = vsel %vm922_vm3, %v893_v22, %v796_v47  ;;  %v6943_v15 = vsel %vm922_vm3, %v894_v25, %v798_v14 }
  0xdc   : > { %995 = vrot.lane.b32.xlu1 %v6940_v2, %s6332_s20  ;;  %997 = vrot.lane.b32.xlu0 %v6943_v15, %s6332_s20 }
  0xde   : > { %v800_v50 = vpop.permute.xlu1 %799  ;;  %v802_v20 = vpop.permute.xlu0 %801 }
  0xdf   : > { %v6954_v1 = vsel %vm922_vm3, %v895_v29, %v800_v50  ;;  %v6957_v23 = vsel %vm922_vm3, %v896_v39, %v802_v20 }
  0xe0   : > { %999 = vrot.lane.b32.xlu1 %v6954_v1, %s6332_s20  ;;  %1001 = vrot.lane.b32.xlu0 %v6957_v23, %s6332_s20 }
  0xe2   : > { %v804_v51 = vpop.permute.xlu1 %803  ;;  %v806_v3 = vpop.permute.xlu0 %805 }
  0xe3   : > { %v6968_v30 = vsel %vm922_vm3, %v897_v33, %v804_v51  ;;  %v6971_v48 = vsel %vm922_vm3, %v898_v55, %v806_v3 }
  0xe4   : > { %1003 = vrot.lane.b32.xlu1 %v6968_v30, %s6332_s20  ;;  %1005 = vrot.lane.b32.xlu0 %v6971_v48, %s6332_s20 }
  0xe6   : > { %v808_v52 = vpop.permute.xlu1 %807  ;;  %v810_v19 = vpop.permute.xlu0 %809 }
  0xe7   : > { %v6984_v22 = vsel %vm922_vm3, %v899_v54, %v808_v52  ;;  %v6987_v25 = vsel %vm922_vm3, %v900_v5, %v810_v19  ;;  %v1253_v52 = vld [vmem:[%s10845_s1 + $0x20] sm:$0xf] }
  0xe8   : > { %1007 = vrot.lane.b32.xlu1 %v6984_v22, %s6332_s20  ;;  %1009 = vrot.lane.b32.xlu0 %v6987_v25, %s6332_s20 }
  0xe9   : > { %5722 = vmatprep.subr.msk.mxu0 %vm1351_vm5, %v1253_v52 }
  0xea   : > { %v812_v57 = vpop.permute.xlu1 %811  ;;  %v814_v49 = vpop.permute.xlu0 %813  ;;  %5723 = vmatpush3.msk.msra.mxu0 %vm1351_vm5, %v1253_v52  ;;  %v10948_v52 = vmov 0.0  }
  0xeb   : > { %v7000_v47 = vsel %vm922_vm3, %v901_v63, %v812_v57  ;;  %v7003_v14 = vsel %vm922_vm3, %v902_v12, %v814_v49  ;;  %v1252_v12 = vld [vmem:[%s10845_s1 + $0x18] sm:$0xff] }
  0xec   : > { %1011 = vrot.lane.b32.xlu1 %v7000_v47, %s6332_s20  ;;  %1013 = vrot.lane.b32.xlu0 %v7003_v14, %s6332_s20 }
  0xed   : > { %5724 = vmatprep.subr.mxu0 %v1252_v12 }
  0xee   : > { %v816_v53 = vpop.permute.xlu1 %815  ;;  %v818_v16 = vpop.permute.xlu0 %817  ;;  %5725 = vmatpush3.msra.mxu0 %v1252_v12 }
  0xef   : > { %v7016_v29 = vsel %vm922_vm3, %v903_v11, %v816_v53  ;;  %v7019_v39 = vsel %vm922_vm3, %v904_v35, %v818_v16  ;;  %5726 = vmatprep.subr.mxu0 %v1251_v7  ;;  %v1250_v35 = vld [vmem:[%s10845_s1 + $0x8] sm:$0xff] }
  0xf0   : > { %1015 = vrot.lane.b32.xlu1 %v7016_v29, %s6332_s20  ;;  %1017 = vrot.lane.b32.xlu0 %v7019_v39, %s6332_s20 }
  0xf1   : > { %5727 = vmatpush3.msra.mxu0 %v1251_v7 }
  0xf2   : > { %v820_v32 = vpop.permute.xlu1 %819  ;;  %v822_v8 = vpop.permute.xlu0 %821  ;;  %5728 = vmatprep.subr.mxu0 %v1250_v35 }
  0xf3   : > { %v7032_v50 = vsel %vm922_vm3, %v905_v37, %v820_v32  ;;  %v7035_v20 = vsel %vm922_vm3, %v906_v44, %v822_v8  ;;  %v1249_v37 = vld [vmem:[%s10845_s1] sm:$0xff]  ;;  %5729 = vmatpush3.msra.mxu0 %v1250_v35  ;;  %v919_v8 = vsel %vm887_vm4, %v10942_v6, %v10941_v59 }
  0xf4   : > { %1019 = vrot.lane.b32.xlu1 %v7032_v50, %s6332_s20  ;;  %1021 = vrot.lane.b32.xlu0 %v7035_v20, %s6332_s20 }
  0xf5   : > { %5730 = vmatprep.subr.mxu0 %v1249_v37 }
  0xf6   : > { %v824_v58 = vpop.permute.xlu1 %823  ;;  %v826_v45 = vpop.permute.xlu0 %825  ;;  %5731 = vmatpush3.msra.mxu0 %v1249_v37 }
  0xf7   : > { %v7048_v33 = vsel %vm922_vm3, %v907_v43, %v824_v58  ;;  %v7051_v55 = vsel %vm922_vm3, %v908_v60, %v826_v45  ;;  %v10943_v43 = vld [vmem:[#allocation14_spill] sm:$0xff]  ;;  %v10944_v60 = vld [vmem:[#allocation9_spill] sm:$0xff] }
  0xf8   : > { %1023 = vrot.lane.b32.xlu1 %v7048_v33, %s6332_s20  ;;  %1025 = vrot.lane.b32.xlu0 %v7051_v55, %s6332_s20  ;;  %v920_v58 = vsel %vm887_vm4, %v10944_v60, %v10943_v43 }
  0xfa   : > { %v828_v38 = vpop.permute.xlu1 %827  ;;  %v830_v41 = vpop.permute.xlu0 %829 }
  0xfb   : > { %v7064_v51 = vsel %vm922_vm3, %v909_v10, %v828_v38  ;;  %v7067_v3 = vsel %vm922_vm3, %v910_v17, %v830_v41  ;;  %v10946_v41 = vld [vmem:[#allocation15_spill] sm:$0xff] }
  0xfc   : > { %1027 = vrot.lane.b32.xlu1 %v7064_v51, %s6332_s20  ;;  %1029 = vrot.lane.b32.xlu0 %v7067_v3, %s6332_s20 }
  0xfe   : > { %v832_v27 = vpop.permute.xlu1 %831  ;;  %v834_v40 = vpop.permute.xlu0 %833 }
  0xff   : > { %v7080_v54 = vsel %vm922_vm3, %v911_v28, %v832_v27  ;;  %v7083_v5 = vsel %vm922_vm3, %v912_v46, %v834_v40  ;;  %v10947_v28 = vld [vmem:[#allocation10_spill] sm:$0xff] }
 0x100   : > { %1031 = vrot.lane.b32.xlu1 %v7080_v54, %s6332_s20  ;;  %1033 = vrot.lane.b32.xlu0 %v7083_v5, %s6332_s20  ;;  %v921_v46 = vsel %vm887_vm4, %v10947_v28, %v10946_v41 }
 0x102   : > { %v836_v18 = vpop.permute.xlu1 %835  ;;  %v838_v56 = vpop.permute.xlu0 %837 }
 0x103   : > { %v7101_v19 = vsel %vm922_vm3, %v913_v42, %v836_v18  ;;  %v7104_v63 = vsel %vm922_vm3, %v914_v4, %v838_v56  ;;  %v7218_v42 = vrot.slane %v10948_v52, 5  ;;  %v10951_v56 = vld [vmem:[#allocation11_spill] sm:$0xff] }
 0x104   : > { %1035 = vrot.lane.b32.xlu1 %v7101_v19, %s6332_s20  ;;  %1037 = vrot.lane.b32.xlu0 %v7104_v63, %s6332_s20  ;;  %v5939_v12 = vunpack.i.h.bf16 %v10951_v56  ;;  %v5938_v7 = vunpack.i.l.bf16 %v10951_v56 }
 0x105   : > { %10949 = vst [vmem:[#allocation8_spill] sm:$0xff] %v7218_v42  ;;  %v7230_v4 = vsel %vm2381_vm6, 0.0, %v7218_v42  ;;  %v7234_v18 = vsel %vm2381_vm6, %v7218_v42, 0.0  ;;  %v2551_v35 = vrot.slane %v7218_v42, 1  ;;  %v2926_v13 = vrot.slane %v7218_v42, 3 }
 0x106   : > { %v840_v0 = vpop.permute.xlu1 %839  ;;  %v842_v57 = vpop.permute.xlu0 %841  ;;  %10950 = vst [vmem:[#allocation14_spill] sm:$0xff] %v7230_v4  ;;  %v2925_v61 = vrot.slane %v7230_v4, 3  ;;  %v2740_v41 = vrot.slane %v7234_v18, 2  ;;  %v3300_v52 = vrot.slane %v7218_v42, 5  ;;  %v3302_v56 = vrot.slane %v7234_v18, 5 }
 0x107   : > { %v7123_v49 = vsel %vm922_vm3, %v915_v34, %v840_v0  ;;  %v7126_v11 = vsel %vm922_vm3, %v916_v9, %v842_v57  ;;  %v5944_v34 = vunpack.i.h.bf16 %v6914_v62  ;;  %v5943_v0 = vunpack.i.l.bf16 %v6914_v62  ;;  %v10952_v62 = vld [vmem:[#allocation6_spill] sm:$0xff] }
 0x108   : > { %10935 = vst [vmem:[#allocation16_spill] sm:$0xff] %v7123_v49  ;;  %10936 = vst [vmem:[#allocation17_spill] sm:$0xff] %v7126_v11  ;;  %1039 = vrot.lane.b32.xlu1 %v7123_v49, %s6332_s20  ;;  %1041 = vrot.lane.b32.xlu0 %v7126_v11, %s6332_s20  ;;  %v2550_v57 = vrot.slane %v7230_v4, 1  ;;  %v2927_v28 = vsel %vm2924_vm7, %v2925_v61, %v2926_v13 }
 0x10a   : > { %v844_v53 = vpop.permute.xlu1 %843  ;;  %v846_v16 = vpop.permute.xlu0 %845  ;;  %v2552_v60 = vsel %vm511_vm1, %v2550_v57, %v2551_v35 }
 0x10b   : > { %v7145_v44 = vsel %vm922_vm3, %v917_v31, %v844_v53  ;;  %v7148_v32 = vsel %vm922_vm3, %v918_v26, %v846_v16  ;;  %v2553_v31 = vrot.slane %v7234_v18, 1  ;;  %v2928_v26 = vrot.slane %v7234_v18, 3  ;;  %v10953_v16 = vld [vmem:[#allocation5_spill] sm:$0xff] }
 0x10c   : > { %10939 = vst [vmem:[#allocation12_spill] sm:$0xff] %v7145_v44  ;;  %10940 = vst [vmem:[#allocation7_spill] sm:$0xff] %v7148_v32  ;;  %1043 = vrot.lane.b32.xlu1 %v7145_v44, %s6332_s20  ;;  %1045 = vrot.lane.b32.xlu0 %v7148_v32, %s6332_s20  ;;  %v888_v53 = vsel %vm887_vm4, %v10952_v62, %v5938_v7  ;;  %v889_v37 = vsel %vm887_vm4, %v10953_v16, %v5939_v12 }
 0x10d   : > { %v7264_v43 = vsel %vm922_vm3, %v889_v37, %v5944_v34  ;;  %v3303_v62 = vsel %vm2381_vm6, %v3300_v52, %v3302_v56 }
 0x10e   : > { %v848_v45 = vpop.permute.xlu1 %847  ;;  %v850_v10 = vpop.permute.xlu0 %849 }
 0x10f   : > { %v7161_v17 = vsel %vm922_vm3, %v919_v8, %v848_v45  ;;  %v955_v38 = vsel %vm922_vm3, %v920_v58, %v850_v10  ;;  %v7261_v8 = vsel %vm922_vm3, %v888_v53, %v5943_v0  ;;  %v2554_v58 = vsel %vm511_vm1, %v2551_v35, %v2553_v31 }
 0x110   : > { %10945 = vst [vmem:[#allocation13_spill] sm:$0xff] %v7161_v17  ;;  %1047 = vrot.lane.b32.xlu1 %v7161_v17, %s6332_s20  ;;  %1049 = vrot.lane.b32.xlu0 %v955_v38, %s6332_s20  ;;  %v2737_v45 = vrot.slane %v7230_v4, 2  ;;  %v2738_v10 = vrot.slane %v7218_v42, 2  ;;  %v5945_v12 = vpack.i.bf16 %v7264_v43, %v7261_v8  ;;  %v5950_v34 = vpack.i.bf16 %v2554_v58, %v2552_v60 }
 0x111   : > { %v3112_v35 = vrot.slane %v7230_v4, 4  ;;  %v3113_v31 = vrot.slane %v7218_v42, 4 }
 0x112   : > { %v852_v27 = vpop.permute.xlu1 %851  ;;  %v2739_v0 = vsel %vm699_vm2, %v2737_v45, %v2738_v10  ;;  %v2741_v61 = vsel %vm699_vm2, %v2738_v10, %v2740_v41  ;;  %v3487_v45 = vrot.slane %v7230_v4, 6  ;;  %v3488_v10 = vrot.slane %v7218_v42, 6 }
 0x113   : > { %v7171_v40 = vsel %vm922_vm3, %v921_v46, %v852_v27  ;;  %v2929_v46 = vsel %vm2924_vm7, %v2926_v13, %v2928_v26  ;;  %v3299_v27 = vrot.slane %v7230_v4, 5  ;;  %v3115_v13 = vrot.slane %v7234_v18, 4 }
 0x114   : > { %1051 = vrot.lane.b32.xlu1 %v7171_v40, %s6332_s20  ;;  %1087 = vrot.lane.b32.xlu0 %v6929_v21, %s6333_s17  ;;  %v5960_v57 = vpack.i.bf16 %v2929_v46, %v2927_v28  ;;  %v5955_v16 = vpack.i.bf16 %v2741_v61, %v2739_v0  ;;  %v3114_v37 = vsel %vm1351_vm5, %v3112_v35, %v3113_v31  ;;  %v3490_v41 = vrot.slane %v7234_v18, 6 }
 0x115   : > { %v3301_v26 = vsel %vm2381_vm6, %v3299_v27, %v3300_v52  ;;  %v3116_v58 = vsel %vm1351_vm5, %v3113_v31, %v3115_v13  ;;  %v3489_v52 = vsel %vm3486_vm8, %v3487_v45, %v3488_v10 }
 0x116   : > { %v5970_v60 = vpack.i.bf16 %v3303_v62, %v3301_v26  ;;  %v5965_v27 = vpack.i.bf16 %v3116_v58, %v3114_v37  ;;  %v3491_v56 = vsel %vm3486_vm8, %v3488_v10, %v3490_v41 }
 0x117   : > { %v5975_v18 = vpack.i.bf16 %v3491_v56, %v3489_v52 }
 0x118   : > { %1089 = vrot.lane.b32.xlu1 %v6940_v2, %s6333_s17  ;;  %1091 = vrot.lane.b32.xlu0 %v6943_v15, %s6333_s17 }
 0x11c   : > { %1093 = vrot.lane.b32.xlu1 %v6954_v1, %s6333_s17  ;;  %1095 = vrot.lane.b32.xlu0 %v6957_v23, %s6333_s17 }
 0x120   : > { %1097 = vrot.lane.b32.xlu1 %v6968_v30, %s6333_s17  ;;  %1099 = vrot.lane.b32.xlu0 %v6971_v48, %s6333_s17 }
 0x124   : > { %1101 = vrot.lane.b32.xlu1 %v6984_v22, %s6333_s17  ;;  %1103 = vrot.lane.b32.xlu0 %v6987_v25, %s6333_s17 }
 0x128   : > { %1105 = vrot.lane.b32.xlu1 %v7000_v47, %s6333_s17  ;;  %1107 = vrot.lane.b32.xlu0 %v7003_v14, %s6333_s17 }
 0x12c   : > { %1109 = vrot.lane.b32.xlu1 %v7016_v29, %s6333_s17  ;;  %1111 = vrot.lane.b32.xlu0 %v7019_v39, %s6333_s17 }
 0x130   : > { %1113 = vrot.lane.b32.xlu1 %v7032_v50, %s6333_s17  ;;  %1115 = vrot.lane.b32.xlu0 %v7035_v20, %s6333_s17 }
 0x134   : > { %1117 = vrot.lane.b32.xlu1 %v7048_v33, %s6333_s17  ;;  %1119 = vrot.lane.b32.xlu0 %v7051_v55, %s6333_s17 }
 0x138   : > { %1121 = vrot.lane.b32.xlu1 %v7064_v51, %s6333_s17  ;;  %1123 = vrot.lane.b32.xlu0 %v7067_v3, %s6333_s17 }
 0x13c   : > { %1125 = vrot.lane.b32.xlu1 %v7080_v54, %s6333_s17  ;;  %1127 = vrot.lane.b32.xlu0 %v7083_v5, %s6333_s17 }
 0x140   : > { %1129 = vrot.lane.b32.xlu1 %v7101_v19, %s6333_s17  ;;  %1131 = vrot.lane.b32.xlu0 %v7104_v63, %s6333_s17 }
 0x144   : > { %1133 = vrot.lane.b32.xlu1 %v7123_v49, %s6333_s17  ;;  %1135 = vrot.lane.b32.xlu0 %v7126_v11, %s6333_s17 }
 0x146   : > { %v7239_v9 = vpop.permute.xlu0 %989 }
 0x147   : > { %v1184_v42 = vsel %vm1183_vm9, %v7261_v8, %v7239_v9 }
 0x148   : > { %1137 = vrot.lane.b32.xlu1 %v7145_v44, %s6333_s17  ;;  %1139 = vrot.lane.b32.xlu0 %v7148_v32, %s6333_s17 }
 0x14a   : > { %v7256_v59 = vpop.permute.xlu1 %991  ;;  %v7258_v6 = vpop.permute.xlu0 %993 }
 0x14c   : > { %1141 = vrot.lane.b32.xlu1 %v7161_v17, %s6333_s17  ;;  %1143 = vrot.lane.b32.xlu0 %v955_v38, %s6333_s17 }
 0x14e   : > { %v7281_v38 = vpop.permute.xlu1 %995  ;;  %v7283_v7 = vpop.permute.xlu0 %997 }
 0x150   : > { %1145 = vrot.lane.b32.xlu1 %v7171_v40, %s6333_s17  ;;  %5946 = vrot.lane.b32.xlu0 %v5945_v12, %s6333_s17 }
 0x152   : > { %v7295_v53 = vpop.permute.xlu1 %999  ;;  %v7297_v40 = vpop.permute.xlu0 %1001 }
 0x154   : > { %5951 = vrot.lane.b32.xlu0 %v5950_v34, %s6334_s21  ;;  %5961 = vrot.lane.b32.xlu1 %v5960_v57, %s6335_s22 }
 0x156   : > { %v7306_v28 = vpop.permute.xlu1 %1003  ;;  %v7308_v46 = vpop.permute.xlu0 %1005 }
 0x158   : > { %5956 = vrot.lane.b32.xlu0 %v5955_v16, %s6330_s18  ;;  %5971 = vrot.lane.b32.xlu1 %v5970_v60, %s6336_s23 }
 0x15a   : > { %v7314_v12 = vpop.permute.xlu1 %1007  ;;  %v7316_v34 = vpop.permute.xlu0 %1009 }
 0x15c   : > { %5966 = vrot.lane.b32.xlu0 %v5965_v27, %s6331_s19 }
 0x15e   : > { %v7319_v0 = vpop.permute.xlu1 %1011  ;;  %v7321_v57 = vpop.permute.xlu0 %1013 }
 0x160   : > { %5976 = vrot.lane.b32.xlu0 %v5975_v18, %s6332_s20 }
 0x162   : > { %v7324_v35 = vpop.permute.xlu1 %1015  ;;  %v7326_v31 = vpop.permute.xlu0 %1017 }
 0x166   : > { %v7328_v61 = vpop.permute.xlu1 %1019  ;;  %v7330_v13 = vpop.permute.xlu0 %1021 }
 0x16a   : > { %v7332_v26 = vpop.permute.xlu1 %1023  ;;  %v7334_v62 = vpop.permute.xlu0 %1025 }
 0x16e   : > { %v7336_v16 = vpop.permute.xlu1 %1027  ;;  %v7338_v37 = vpop.permute.xlu0 %1029 }
 0x172   : > { %v7340_v60 = vpop.permute.xlu1 %1031  ;;  %v7342_v58 = vpop.permute.xlu0 %1033 }
 0x176   : > { %v7344_v45 = vpop.permute.xlu1 %1035  ;;  %v7346_v10 = vpop.permute.xlu0 %1037 }
 0x17a   : > { %v7348_v41 = vpop.permute.xlu1 %1039  ;;  %v7350_v27 = vpop.permute.xlu0 %1041 }
 0x17e   : > { %v7352_v52 = vpop.permute.xlu1 %1043  ;;  %v7354_v56 = vpop.permute.xlu0 %1045 }
 0x17f   : > { %10954 = vst [vmem:[#allocation9_spill] sm:$0xff] %v7354_v56 }
 0x182   : > { %v7356_v18 = vpop.permute.xlu1 %1047  ;;  %v7358_v4 = vpop.permute.xlu0 %1049 }
 0x183   : > { %10955 = vst [vmem:[#allocation15_spill] sm:$0xff] %v7356_v18  ;;  %10956 = vst [vmem:[#allocation10_spill] sm:$0xff] %v7358_v4  ;;  %v1185_v18 = vsel %vm1183_vm9, %v7264_v43, %v7256_v59  ;;  %v1186_v4 = vsel %vm1183_vm9, %v6917_v36, %v7258_v6  ;;  %v1191_v43 = vsel %vm1183_vm9, %v6954_v1, %v7306_v28 }
 0x184   : > { %v1194_v1 = vsel %vm1183_vm9, %v6971_v48, %v7316_v34 }
 0x186   : > { %v7363_v17 = vpop.permute.xlu1 %1051  ;;  %v1088_v32 = vpop.permute.xlu0 %1087 }
 0x187   : > { %v1217_v44 = vsel %vm1216_vm10, %v1184_v42, %v1088_v32  ;;  %v1188_v32 = vsel %vm1183_vm9, %v6929_v21, %v7283_v7 }
 0x188   : > { %5732 = vmatprep.mubr.msk.f32.mxu0 %vm1254_vm11, %v1217_v44  ;;  %v1187_v44 = vsel %vm1183_vm9, %v6926_v24, %v7281_v38  ;;  %v1190_v24 = vsel %vm1183_vm9, %v6943_v15, %v7297_v40  ;;  %v1193_v40 = vsel %vm1183_vm9, %v6968_v30, %v7314_v12  ;;  %v1196_v30 = vsel %vm1183_vm9, %v6987_v25, %v7321_v57 }
 0x18a   : > { %v1090_v11 = vpop.permute.xlu1 %1089  ;;  %v1092_v56 = vpop.permute.xlu0 %1091 }
 0x18b   : > { %v1218_v49 = vsel %vm1216_vm10, %v1185_v18, %v1090_v11  ;;  %v1219_v9 = vsel %vm1216_vm10, %v1186_v4, %v1092_v56  ;;  %v1195_v18 = vsel %vm1183_vm9, %v6984_v22, %v7319_v0  ;;  %v1198_v22 = vsel %vm1183_vm9, %v7003_v14, %v7326_v31 }
 0x18c   : > { %5733 = vmatmul.mubr.msk.f32.vlgmr.msra.gmra.mxu0 %vm1254_vm11, %v1218_v49  ;;  %v1189_v49 = vsel %vm1183_vm9, %v6940_v2, %v7295_v53  ;;  %v1192_v2 = vsel %vm1183_vm9, %v6957_v23, %v7308_v46 }
 0x18d   : > { %5735 = vmatprep.mubr.msk.f32.mxu0 %vm1254_vm11, %v1219_v9 }
 0x18e   : > { %v1094_v42 = vpop.permute.xlu1 %1093  ;;  %v1096_v36 = vpop.permute.xlu0 %1095 }
 0x18f   : > { %v1220_v59 = vsel %vm1216_vm10, %v1187_v44, %v1094_v42  ;;  %v1221_v11 = vsel %vm1216_vm10, %v1188_v32, %v1096_v36  ;;  %v1197_v44 = vsel %vm1183_vm9, %v7000_v47, %v7324_v35  ;;  %v1199_v42 = vsel %vm1183_vm9, %v7016_v29, %v7328_v61 }
 0x190   : > { %5736 = vmatmul.mubr.msk.f32.gmra.mxu0 %vm1254_vm11, %v1220_v59  ;;  %v1200_v47 = vsel %vm1183_vm9, %v7019_v39, %v7330_v13  ;;  %v1201_v59 = vsel %vm1183_vm9, %v7032_v50, %v7332_v26  ;;  %v1202_v29 = vsel %vm1183_vm9, %v7035_v20, %v7334_v62  ;;  %v1204_v50 = vsel %vm1183_vm9, %v7051_v55, %v7338_v37 }
 0x191   : > { %5738 = vmatprep.mubr.msk.f32.mxu0 %vm1254_vm11, %v1221_v11 }
 0x192   : > { %v1098_v4 = vpop.permute.xlu1 %1097  ;;  %v1100_v21 = vpop.permute.xlu0 %1099 }
 0x193   : > { %v1222_v6 = vsel %vm1216_vm10, %v1189_v49, %v1098_v4  ;;  %v1223_v8 = vsel %vm1216_vm10, %v1190_v24, %v1100_v21  ;;  %v1203_v49 = vsel %vm1183_vm9, %v7048_v33, %v7336_v16  ;;  %v1205_v4 = vsel %vm1183_vm9, %v7064_v51, %v7340_v60 }
 0x194   : > { %5739 = vmatmul.mubr.msk.f32.gmra.mxu0 %vm1254_vm11, %v1222_v6  ;;  %v1206_v33 = vsel %vm1183_vm9, %v7067_v3, %v7342_v58  ;;  %v1207_v6 = vsel %vm1183_vm9, %v7080_v54, %v7344_v45  ;;  %v1208_v51 = vsel %vm1183_vm9, %v7083_v5, %v7346_v10  ;;  %v1210_v54 = vsel %vm1183_vm9, %v7104_v63, %v7350_v27 }
 0x195   : > { %5741 = vmatprep.mubr.msk.f32.mxu0 %vm1254_vm11, %v1223_v8 }
 0x196   : > { %v1102_v38 = vpop.permute.xlu1 %1101  ;;  %v1104_v15 = vpop.permute.xlu0 %1103 }
 0x197   : > { %v1224_v7 = vsel %vm1216_vm10, %v1191_v43, %v1102_v38  ;;  %v1225_v53 = vsel %vm1216_vm10, %v1192_v2, %v1104_v15  ;;  %v1209_v43 = vsel %vm1183_vm9, %v7101_v19, %v7348_v41  ;;  %v10957_v38 = vld [vmem:[#allocation16_spill] sm:$0xff]  ;;  %v10959_v19 = vld [vmem:[#allocation17_spill] sm:$0xff] }
 0x198   : > { %5742 = vmatmul.mubr.msk.f32.gmra.mxu0 %vm1254_vm11, %v1224_v7  ;;  %v1211_v15 = vsel %vm1183_vm9, %v10957_v38, %v7352_v52  ;;  %v10958_v7 = vld [vmem:[#allocation9_spill] sm:$0xff] }
 0x199   : > { %5744 = vmatprep.mubr.msk.f32.mxu0 %vm1254_vm11, %v1225_v53  ;;  %v1212_v41 = vsel %vm1183_vm9, %v10959_v19, %v10958_v7 }
 0x19a   : > { %v1106_v28 = vpop.permute.xlu1 %1105  ;;  %v1108_v23 = vpop.permute.xlu0 %1107 }
 0x19b   : > { %v1226_v46 = vsel %vm1216_vm10, %v1193_v40, %v1106_v28  ;;  %v1227_v56 = vsel %vm1216_vm10, %v1194_v1, %v1108_v23  ;;  %v10960_v1 = vld [vmem:[#allocation15_spill] sm:$0xff]  ;;  %v10961_v28 = vld [vmem:[#allocation12_spill] sm:$0xff] }
 0x19c   : > { %5745 = vmatmul.mubr.msk.f32.gmra.mxu0 %vm1254_vm11, %v1226_v46  ;;  %v1213_v23 = vsel %vm1183_vm9, %v10961_v28, %v10960_v1 }
 0x19d   : > { %5747 = vmatprep.mubr.msk.f32.mxu0 %vm1254_vm11, %v1227_v56 }
 0x19e   : > { %v1110_v12 = vpop.permute.xlu1 %1109  ;;  %v1112_v48 = vpop.permute.xlu0 %1111 }
 0x19f   : > { %v1228_v34 = vsel %vm1216_vm10, %v1195_v18, %v1110_v12  ;;  %v1229_v9 = vsel %vm1216_vm10, %v1196_v30, %v1112_v48  ;;  %v10962_v12 = vld [vmem:[#allocation10_spill] sm:$0xff]  ;;  %v10963_v48 = vld [vmem:[#allocation7_spill] sm:$0xff] }
 0x1a0   : > { %5748 = vmatmul.mubr.msk.f32.gmra.mxu0 %vm1254_vm11, %v1228_v34  ;;  %v1214_v34 = vsel %vm1183_vm9, %v10963_v48, %v10962_v12 }
 0x1a1   : > { %5750 = vmatprep.mubr.msk.f32.mxu0 %vm1254_vm11, %v1229_v9 }
 0x1a2   : > { %v1114_v0 = vpop.permute.xlu1 %1113  ;;  %v1116_v25 = vpop.permute.xlu0 %1115 }
 0x1a3   : > { %v1230_v57 = vsel %vm1216_vm10, %v1197_v44, %v1114_v0  ;;  %v1231_v32 = vsel %vm1216_vm10, %v1198_v22, %v1116_v25  ;;  %v10964_v44 = vld [vmem:[#allocation13_spill] sm:$0xff] }
 0x1a4   : > { %5751 = vmatmul.mubr.msk.f32.gmra.mxu0 %vm1254_vm11, %v1230_v57  ;;  %v1215_v22 = vsel %vm1183_vm9, %v10964_v44, %v7363_v17 }
 0x1a5   : > { %5753 = vmatprep.mubr.msk.f32.mxu0 %vm1254_vm11, %v1231_v32 }
 0x1a6   : > { %v1118_v35 = vpop.permute.xlu1 %1117  ;;  %v1120_v14 = vpop.permute.xlu0 %1119 }
 0x1a7   : > { %v1232_v31 = vsel %vm1216_vm10, %v1199_v42, %v1118_v35  ;;  %v1233_v36 = vsel %vm1216_vm10, %v1200_v47, %v1120_v14  ;;  %v10965_v47 = vld [vmem:[#allocation8_spill] sm:$0xff]  ;;  %v10966_v14 = vld [vmem:[#allocation14_spill] sm:$0xff] }
 0x1a8   : > { %5754 = vmatmul.mubr.msk.f32.gmra.mxu0 %vm1254_vm11, %v1232_v31 }
 0x1a9   : > { %5756 = vmatprep.mubr.msk.f32.mxu0 %vm1254_vm11, %v1233_v36 }
 0x1aa   : > { %v1122_v61 = vpop.permute.xlu1 %1121  ;;  %v1124_v39 = vpop.permute.xlu0 %1123 }
 0x1ab   : > { %v1234_v13 = vsel %vm1216_vm10, %v1201_v59, %v1122_v61  ;;  %v1235_v11 = vsel %vm1216_vm10, %v1202_v29, %v1124_v39 }
 0x1ac   : > { %5757 = vmatmul.mubr.msk.f32.gmra.mxu0 %vm1254_vm11, %v1234_v13 }
 0x1ad   : > { %5759 = vmatprep.mubr.msk.f32.mxu0 %vm1254_vm11, %v1235_v11 }
 0x1ae   : > { %v1126_v26 = vpop.permute.xlu1 %1125  ;;  %v1128_v20 = vpop.permute.xlu0 %1127 }
 0x1af   : > { %v1236_v62 = vsel %vm1216_vm10, %v1203_v49, %v1126_v26  ;;  %v1237_v24 = vsel %vm1216_vm10, %v1204_v50, %v1128_v20 }
 0x1b0   : > { %5760 = vmatmul.mubr.msk.f32.gmra.mxu0 %vm1254_vm11, %v1236_v62 }
 0x1b1   : > { %5762 = vmatprep.mubr.msk.f32.mxu0 %vm1254_vm11, %v1237_v24 }
 0x1b2   : > { %v1130_v16 = vpop.permute.xlu1 %1129  ;;  %v1132_v55 = vpop.permute.xlu0 %1131 }
 0x1b3   : > { %v1238_v37 = vsel %vm1216_vm10, %v1205_v4, %v1130_v16  ;;  %v1239_v21 = vsel %vm1216_vm10, %v1206_v33, %v1132_v55 }
 0x1b4   : > { %5763 = vmatmul.mubr.msk.f32.gmra.mxu0 %vm1254_vm11, %v1238_v37 }
 0x1b5   : > { %5765 = vmatprep.mubr.msk.f32.mxu0 %vm1254_vm11, %v1239_v21 }
 0x1b6   : > { %v1134_v60 = vpop.permute.xlu1 %1133  ;;  %v1136_v3 = vpop.permute.xlu0 %1135 }
 0x1b7   : > { %v1240_v58 = vsel %vm1216_vm10, %v1207_v6, %v1134_v60  ;;  %v1241_v8 = vsel %vm1216_vm10, %v1208_v51, %v1136_v3 }
 0x1b8   : > { %5766 = vmatmul.mubr.msk.f32.gmra.mxu0 %vm1254_vm11, %v1240_v58 }
 0x1b9   : > { %5768 = vmatprep.mubr.msk.f32.mxu0 %vm1254_vm11, %v1241_v8  ;;  %v7551_v8 = vld [vmem:[%s10846_s2] ss:$0 sm:$0xff] }
 0x1ba   : > { %v1138_v45 = vpop.permute.xlu1 %1137  ;;  %v1140_v5 = vpop.permute.xlu0 %1139 }
 0x1bb   : > { %v1242_v10 = vsel %vm1216_vm10, %v1209_v43, %v1138_v45  ;;  %v1243_v2 = vsel %vm1216_vm10, %v1210_v54, %v1140_v5  ;;  %v7556_v54 = vld [vmem:[%s10847_s3] ss:$0 sm:$0xff] }
 0x1bc   : > { %5769 = vmatmul.mubr.msk.f32.gmra.mxu0 %vm1254_vm11, %v1242_v10 }
 0x1bd   : > { %5771 = vmatprep.mubr.msk.f32.mxu0 %vm1254_vm11, %v1243_v2 }
 0x1be   : > { %v1142_v53 = vpop.permute.xlu1 %1141  ;;  %v1144_v63 = vpop.permute.xlu0 %1143 }
 0x1bf   : > { %v1244_v27 = vsel %vm1216_vm10, %v1211_v15, %v1142_v53  ;;  %v1245_v40 = vsel %vm1216_vm10, %v1212_v41, %v1144_v63 }
 0x1c0   : > { %5772 = vmatmul.mubr.msk.f32.gmra.mxu0 %vm1254_vm11, %v1244_v27 }
 0x1c1   : > { %5774 = vmatprep.mubr.msk.f32.mxu0 %vm1254_vm11, %v1245_v40 }
 0x1c2   : > { %v1146_v46 = vpop.permute.xlu1 %1145  ;;  %v5947_v52 = vpop.permute.xlu0 %5946 }
 0x1c3   : > { %v1246_v56 = vsel %vm1216_vm10, %v1213_v23, %v1146_v46  ;;  %v5949_v18 = vunpack.i.h.bf16 %v5947_v52  ;;  %v5948_v30 = vunpack.i.l.bf16 %v5947_v52 }
 0x1c4   : > { %5775 = vmatmul.mubr.msk.f32.gmra.mxu0 %vm1254_vm11, %v1246_v56 }
 0x1c5   : > { %v1247_v9 = vsel %vm1216_vm10, %v1214_v34, %v5948_v30  ;;  %v1248_v57 = vsel %vm1216_vm10, %v1215_v22, %v5949_v18  ;;  %vm2316_vm10 = vcmask 7168  }
 0x1c6   : > { %5777 = vmatprep.mubr.msk.f32.mxu0 %vm1254_vm11, %v1247_v9  ;;  %v5952_v0 = vpop.permute.xlu0 %5951  ;;  %v5962_v25 = vpop.permute.xlu1 %5961 }
 0x1c7   : > { %v5954_v32 = vunpack.i.h.bf16 %v5952_v0  ;;  %v5953_v42 = vunpack.i.l.bf16 %v5952_v0  ;;  %v5964_v59 = vunpack.i.h.bf16 %v5962_v25  ;;  %v5963_v17 = vunpack.i.l.bf16 %v5962_v25 }
 0x1c8   : > { %5778 = vmatmul.mubr.msk.f32.gmra.mxu0 %vm1254_vm11, %v1248_v57  ;;  %vm4676_vm11 = vcmask 801792  }
 0x1c9   : > { %v3676_v35 = vsel %vm3674_vm12, %v10965_v47, %v5954_v32  ;;  %v3675_v31 = vsel %vm3674_vm12, %v10966_v14, %v5953_v42 }
 0x1ca   : > { %v5957_v36 = vpop.permute.xlu0 %5956  ;;  %v5972_v39 = vpop.permute.xlu1 %5971 }
 0x1cb   : > { %v5959_v29 = vunpack.i.h.bf16 %v5957_v36  ;;  %v5958_v61 = vunpack.i.l.bf16 %v5957_v36  ;;  %v5974_v20 = vunpack.i.h.bf16 %v5972_v39  ;;  %v5973_v62 = vunpack.i.l.bf16 %v5972_v39 }
 0x1cd   : > { %v3709_v13 = vsel %vm887_vm4, %v3675_v31, %v5958_v61  ;;  %v3710_v11 = vsel %vm887_vm4, %v3676_v35, %v5959_v29 }
 0x1ce   : > { %v3744_v49 = vsel %vm3743_vm13, %v3709_v13, %v5963_v17  ;;  %v3745_v50 = vsel %vm3743_vm13, %v3710_v11, %v5964_v59  ;;  %v5967_v26 = vpop.permute.xlu0 %5966 }
 0x1cf   : > { %v5969_v24 = vunpack.i.h.bf16 %v5967_v26  ;;  %v5968_v4 = vunpack.i.l.bf16 %v5967_v26 }
 0x1d1   : > { %v3778_v33 = vsel %vm922_vm3, %v3744_v49, %v5968_v4  ;;  %v3779_v16 = vsel %vm922_vm3, %v3745_v50, %v5969_v24 }
 0x1d2   : > { %v3813_v55 = vsel %vm3812_vm14, %v3778_v33, %v5973_v62  ;;  %v3814_v37 = vsel %vm3812_vm14, %v3779_v16, %v5974_v20  ;;  %v5977_v21 = vpop.permute.xlu0 %5976 }
 0x1d3   : > { %v5979_v6 = vunpack.i.h.bf16 %v5977_v21  ;;  %v5978_v51 = vunpack.i.l.bf16 %v5977_v21 }
 0x1d5   : > { %v7535_v60 = vsel %vm1183_vm9, %v3813_v55, %v5978_v51  ;;  %v7538_v3 = vsel %vm1183_vm9, %v3814_v37, %v5979_v6 }
 0x1d6   : > { %10967 = vst [vmem:[#allocation11_spill] sm:$0xff] %v7535_v60  ;;  %10968 = vst [vmem:[#allocation6_spill] sm:$0xff] %v7538_v3  ;;  %v7542_v58 = vpack.i.bf16 %v7538_v3, %v7535_v60 }
 0x1d8   : > { %10969 = vst [vmem:[#allocation5_spill] sm:$0xff] %v7542_v58  ;;  %5981 = vrot.lane.b32.xlu1 %v7542_v58, %s6337_s29  ;;  %5986 = vrot.lane.b32.xlu0 %v7542_v58, %s6338_s8 }
 0x24c   : > { %v5734_v43 = vpop.f32.mrf.mxu0 }
 0x24d   : > { %v1588_v45 = vmul.f32 %v5734_v43, %v7551_v8 }
 0x24e   : > { %v1421_v5 = vpop.f32.mrf.mxu0 }
 0x24f   : > { %v7560_v10 = vadd.f32 %v7556_v54, %v1588_v45  ;;  %v1587_v2 = vmul.f32 %v7551_v8, %v1421_v5 }
 0x250   : > { %v5737_v38 = vpop.f32.mrf.mxu0 }
 0x251   : > { %v5536_v15 = vmul.f32 -1.442695, %v7560_v10  ;;  %v7565_v7 = vadd.f32 %v7556_v54, %v1587_v2  ;;  %v1590_v19 = vmul.f32 %v5737_v38, %v7551_v8 }
 0x252   : > { %v1431_v41 = vpop.f32.mrf.mxu0 }
 0x253   : > { %6007 = vpow2.f32 %v5536_v15  ;;  %v5535_v53 = vmul.f32 -1.442695, %v7565_v7  ;;  %v7570_v63 = vadd.f32 %v7556_v54, %v1590_v19  ;;  %v1589_v27 = vmul.f32 %v7551_v8, %v1431_v41 }
 0x254   : > { %v5740_v40 = vpop.f32.mrf.mxu0 }
 0x255   : > { %6009 = vpow2.f32 %v5535_v53  ;;  %v5538_v1 = vmul.f32 -1.442695, %v7570_v63  ;;  %v7575_v28 = vadd.f32 %v7556_v54, %v1589_v27  ;;  %v1592_v23 = vmul.f32 %v5740_v40, %v7551_v8 }
 0x256   : > { %v1441_v46 = vpop.f32.mrf.mxu0 }
 0x257   : > { %6011 = vpow2.f32 %v5538_v1  ;;  %v5537_v52 = vmul.f32 -1.442695, %v7575_v28  ;;  %v7580_v56 = vadd.f32 %v7556_v54, %v1592_v23  ;;  %v1591_v18 = vmul.f32 %v7551_v8, %v1441_v46 }
 0x258   : > { %v5743_v30 = vpop.f32.mrf.mxu0 }
 0x259   : > { %6013 = vpow2.f32 %v5537_v52  ;;  %v5540_v12 = vmul.f32 -1.442695, %v7580_v56  ;;  %v7585_v48 = vadd.f32 %v7556_v54, %v1591_v18  ;;  %v1594_v34 = vmul.f32 %v5743_v30, %v7551_v8 }
 0x25a   : > { %v1451_v9 = vpop.f32.mrf.mxu0 }
 0x25b   : > { %6015 = vpow2.f32 %v5540_v12  ;;  %v5539_v44 = vmul.f32 -1.442695, %v7585_v48  ;;  %v7590_v22 = vadd.f32 %v7556_v54, %v1594_v34  ;;  %v1593_v0 = vmul.f32 %v7551_v8, %v1451_v9 }
 0x25c   : > { %v5746_v25 = vpop.f32.mrf.mxu0 }
 0x25d   : > { %6017 = vpow2.f32 %v5539_v44  ;;  %v5542_v57 = vmul.f32 -1.442695, %v7590_v22  ;;  %v7595_v32 = vadd.f32 %v7556_v54, %v1593_v0  ;;  %v1596_v42 = vmul.f32 %v5746_v25, %v7551_v8 }
 0x25e   : > { %v1461_v47 = vpop.f32.mrf.mxu0 }
 0x25f   : > { %6019 = vpow2.f32 %v5542_v57  ;;  %v5541_v35 = vmul.f32 -1.442695, %v7595_v32  ;;  %v7600_v14 = vadd.f32 %v7556_v54, %v1596_v42  ;;  %v1595_v31 = vmul.f32 %v7551_v8, %v1461_v47 }
 0x260   : > { %v6008_v36 = vpop.eup %6007  ;;  %v5749_v59 = vpop.f32.mrf.mxu0 }
 0x261   : > { %v1755_v17 = vadd.f32 1.0, %v6008_v36  ;;  %6021 = vpow2.f32 %v5541_v35  ;;  %v5544_v29 = vmul.f32 -1.442695, %v7600_v14  ;;  %v7605_v61 = vadd.f32 %v7556_v54, %v1595_v31 }
 0x262   : > { %v6010_v39 = vpop.eup %6009  ;;  %v1598_v13 = vmul.f32 %v5749_v59, %v7551_v8  ;;  %v1471_v11 = vpop.f32.mrf.mxu0 }
 0x263   : > { %6023 = vrcp.f32 %v1755_v17  ;;  %v1754_v49 = vadd.f32 1.0, %v6010_v39  ;;  %v5543_v50 = vmul.f32 -1.442695, %v7605_v61  ;;  %v1597_v26 = vmul.f32 %v7551_v8, %v1471_v11 }
 0x264   : > { %v6012_v20 = vpop.eup %6011  ;;  %6025 = vpow2.f32 %v5544_v29  ;;  %v7611_v62 = vadd.f32 %v7556_v54, %v1598_v13  ;;  %v5752_v24 = vpop.f32.mrf.mxu0 }
 0x265   : > { %6027 = vrcp.f32 %v1754_v49  ;;  %v1757_v4 = vadd.f32 1.0, %v6012_v20  ;;  %v7614_v33 = vadd.f32 %v7556_v54, %v1597_v26  ;;  %v1600_v16 = vmul.f32 %v5752_v24, %v7551_v8 }
 0x266   : > { %v6014_v55 = vpop.eup %6013  ;;  %6029 = vpow2.f32 %v5543_v50  ;;  %v5546_v37 = vmul.f32 -1.442695, %v7611_v62  ;;  %v1481_v21 = vpop.f32.mrf.mxu0 }
 0x267   : > { %6031 = vrcp.f32 %v1757_v4  ;;  %v1756_v6 = vadd.f32 1.0, %v6014_v55  ;;  %v5545_v51 = vmul.f32 -1.442695, %v7614_v33  ;;  %v7620_v43 = vadd.f32 %v7556_v54, %v1600_v16 }
 0x268   : > { %v6016_v45 = vpop.eup %6015  ;;  %6033 = vpow2.f32 %v5546_v37  ;;  %v1599_v5 = vmul.f32 %v7551_v8, %v1481_v21  ;;  %v5755_v2 = vpop.f32.mrf.mxu0 }
 0x269   : > { %6035 = vrcp.f32 %v1756_v6  ;;  %v1759_v38 = vadd.f32 1.0, %v6016_v45  ;;  %v5548_v15 = vmul.f32 -1.442695, %v7620_v43  ;;  %v1602_v19 = vmul.f32 %v5755_v2, %v7551_v8 }
 0x26a   : > { %v6018_v41 = vpop.eup %6017  ;;  %6037 = vpow2.f32 %v5545_v51  ;;  %v7626_v53 = vadd.f32 %v7556_v54, %v1599_v5  ;;  %v1491_v27 = vpop.f32.mrf.mxu0 }
 0x26b   : > { %6039 = vrcp.f32 %v1759_v38  ;;  %v1758_v40 = vadd.f32 1.0, %v6018_v41  ;;  %v7629_v1 = vadd.f32 %v7556_v54, %v1602_v19  ;;  %v1601_v23 = vmul.f32 %v7551_v8, %v1491_v27 }
 0x26c   : > { %v6020_v46 = vpop.eup %6019  ;;  %6041 = vpow2.f32 %v5548_v15  ;;  %v5547_v52 = vmul.f32 -1.442695, %v7626_v53  ;;  %v5758_v18 = vpop.f32.mrf.mxu0 }
 0x26d   : > { %6043 = vrcp.f32 %v1758_v40  ;;  %v1761_v30 = vadd.f32 1.0, %v6020_v46  ;;  %v5550_v12 = vmul.f32 -1.442695, %v7629_v1  ;;  %v7635_v34 = vadd.f32 %v7556_v54, %v1601_v23 }
 0x26e   : > { %v6022_v9 = vpop.eup %6021  ;;  %6045 = vpow2.f32 %v5547_v52  ;;  %v1604_v44 = vmul.f32 %v5758_v18, %v7551_v8  ;;  %v1501_v0 = vpop.f32.mrf.mxu0 }
 0x26f   : > { %6047 = vrcp.f32 %v1761_v30  ;;  %v1760_v25 = vadd.f32 1.0, %v6022_v9  ;;  %v5549_v57 = vmul.f32 -1.442695, %v7635_v34  ;;  %v1603_v42 = vmul.f32 %v7551_v8, %v1501_v0 }
 0x270   : > { %v6024_v47 = vpop.eup %6023  ;;  %6049 = vpow2.f32 %v5550_v12  ;;  %v7641_v35 = vadd.f32 %v7556_v54, %v1604_v44  ;;  %v5761_v31 = vpop.f32.mrf.mxu0 }
 0x271   : > { %v6026_v36 = vpop.eup %6025  ;;  %6051 = vrcp.f32 %v1760_v25  ;;  %v7644_v59 = vadd.f32 %v7556_v54, %v1603_v42  ;;  %v1606_v17 = vmul.f32 %v5761_v31, %v7551_v8  ;;  %v7648_v39 = vmul.f32 %v6024_v47, %v7560_v10 }
 0x272   : > { %v6028_v29 = vpop.eup %6027  ;;  %v1763_v13 = vadd.f32 1.0, %v6026_v36  ;;  %6053 = vpow2.f32 %v5549_v57  ;;  %v5552_v11 = vmul.f32 -1.442695, %v7641_v35  ;;  %v1511_v49 = vpop.f32.mrf.mxu0 }
 0x273   : > { %v6030_v50 = vpop.eup %6029  ;;  %v7652_v26 = vmul.f32 %v6028_v29, %v7565_v7  ;;  %v5551_v20 = vmul.f32 -1.442695, %v7644_v59  ;;  %v7656_v16 = vadd.f32 %v7556_v54, %v1606_v17  ;;  %v1605_v10 = vmul.f32 %v7551_v8, %v1511_v49 }
 0x274   : > { %v6032_v24 = vpop.eup %6031  ;;  %6055 = vrcp.f32 %v1763_v13  ;;  %v1762_v4 = vadd.f32 1.0, %v6030_v50  ;;  %v5764_v55 = vpop.f32.mrf.mxu0  ;;  %v1884_v51 = vsel %vm1882_vm15, %v7648_v39, 0.0 }
 0x275   : > { %v6034_v37 = vpop.eup %6033  ;;  %v1883_v21 = vsel %vm1882_vm15, %v7652_v26, 0.0  ;;  %v7662_v6 = vmul.f32 %v6032_v24, %v7570_v63  ;;  %6057 = vpow2.f32 %v5552_v11  ;;  %v5554_v19 = vmul.f32 -1.442695, %v7656_v16 }
 0x276   : > { %v6036_v7 = vpop.eup %6035  ;;  %6059 = vrcp.f32 %v1762_v4  ;;  %v1765_v45 = vadd.f32 1.0, %v6034_v37  ;;  %v1521_v5 = vpop.f32.mrf.mxu0  ;;  %v1885_v38 = vadd.f32 %v1884_v51, %v1883_v21  ;;  %v7671_v27 = vadd.f32 %v7556_v54, %v1605_v10 }
 0x277   : > { %v6038_v2 = vpop.eup %6037  ;;  %v7667_v15 = vmul.f32 %v6036_v7, %v7575_v28  ;;  %6061 = vpow2.f32 %v5551_v20  ;;  %v1608_v40 = vmul.f32 %v5764_v55, %v7551_v8  ;;  %v1888_v52 = vsel %vm1882_vm15, %v7662_v6, 0.0 }
 0x278   : > { %v6040_v41 = vpop.eup %6039  ;;  %6063 = vrcp.f32 %v1765_v45  ;;  %v1764_v63 = vadd.f32 1.0, %v6038_v2  ;;  %v5767_v23 = vpop.f32.mrf.mxu0  ;;  %v5553_v9 = vmul.f32 -1.442695, %v7671_v27  ;;  %v1607_v7 = vmul.f32 %v7551_v8, %v1521_v5 }
 0x279   : > { %v6042_v46 = vpop.eup %6041  ;;  %v1886_v28 = vsel %vm1882_vm15, %v7667_v15, 0.0  ;;  %v7680_v25 = vmul.f32 %v6040_v41, %v7580_v56  ;;  %v7686_v42 = vadd.f32 %v7556_v54, %v1608_v40  ;;  %v1610_v41 = vmul.f32 %v5767_v23, %v7551_v8 }
 0x27a   : > { %v6044_v18 = vpop.eup %6043  ;;  %v1887_v30 = vadd.f32 %v1886_v28, %v1885_v38  ;;  %6065 = vrcp.f32 %v1764_v63  ;;  %v1767_v12 = vadd.f32 1.0, %v6042_v46  ;;  %v1531_v44 = vpop.f32.mrf.mxu0 }
 0x27b   : > { %v6046_v0 = vpop.eup %6045  ;;  %v7683_v57 = vmul.f32 %v6044_v18, %v7585_v48  ;;  %6067 = vpow2.f32 %v5554_v19  ;;  %v1892_v50 = vsel %vm1882_vm15, %v7680_v25, 0.0  ;;  %v5556_v4 = vmul.f32 -1.442695, %v7686_v42 }
 0x27c   : > { %v6048_v47 = vpop.eup %6047  ;;  %v1889_v31 = vadd.f32 %v1888_v52, %v1887_v30  ;;  %6069 = vrcp.f32 %v1767_v12  ;;  %v1766_v36 = vadd.f32 1.0, %v6046_v0  ;;  %v7690_v13 = vpop.f32.mrf.mxu0  ;;  %v7707_v19 = vadd.f32 %v7556_v54, %v1607_v7 }
 0x27d   : > { %v6050_v17 = vpop.eup %6049  ;;  %v1890_v29 = vsel %vm1882_vm15, %v7683_v57, 0.0  ;;  %6071 = vpow2.f32 %v5553_v9  ;;  %v7695_v20 = vmul.f32 %v6048_v47, %v7590_v22  ;;  %v7720_v9 = vadd.f32 %v7556_v54, %v1610_v41 }
 0x27e   : > { %v6052_v56 = vpop.eup %6051  ;;  %v1891_v11 = vadd.f32 %v1890_v29, %v1889_v31  ;;  %6073 = vrcp.f32 %v1766_v36  ;;  %v1769_v48 = vadd.f32 1.0, %v6050_v17  ;;  %v1541_v51 = vpop.f32.mrf.mxu0  ;;  %v5555_v18 = vmul.f32 -1.442695, %v7707_v19 }
 0x27f   : > { %v6054_v49 = vpop.eup %6053  ;;  %v7698_v24 = vmul.f32 %v6052_v56, %v7595_v32  ;;  %v1896_v32 = vsel %vm1882_vm15, %v7695_v20, 0.0  ;;  %v1609_v23 = vmul.f32 %v7551_v8, %v1531_v44  ;;  %v5558_v56 = vmul.f32 -1.442695, %v7720_v9 }
 0x280   : > { %v1893_v10 = vadd.f32 %v1892_v50, %v1891_v11  ;;  %6075 = vrcp.f32 %v1769_v48  ;;  %v1768_v55 = vadd.f32 1.0, %v6054_v49  ;;  %v5773_v30 = vpop.f32.mrf.mxu0 }
 0x281   : > { %v6056_v37 = vpop.eup %6055  ;;  %v1894_v21 = vsel %vm1882_vm15, %v7698_v24, 0.0  ;;  %6077 = vpow2.f32 %v5556_v4  ;;  %v7735_v49 = vadd.f32 %v7556_v54, %v1609_v23 }
 0x282   : > { %v6058_v45 = vpop.eup %6057  ;;  %v1895_v2 = vadd.f32 %v1894_v21, %v1893_v10  ;;  %6079 = vrcp.f32 %v1768_v55  ;;  %v7711_v40 = vmul.f32 %v6056_v37, %v7600_v14  ;;  %v1551_v11 = vpop.f32.mrf.mxu0 }
 0x283   : > { %v6060_v22 = vpop.eup %6059  ;;  %v1771_v38 = vadd.f32 1.0, %v6058_v45  ;;  %v5557_v21 = vmul.f32 -1.442695, %v7735_v49 }
 0x284   : > { %v6062_v63 = vpop.eup %6061  ;;  %v7714_v5 = vmul.f32 %v6060_v22, %v7605_v61  ;;  %v1897_v46 = vadd.f32 %v1896_v32, %v1895_v2  ;;  %v1900_v47 = vsel %vm1882_vm15, %v7711_v40, 0.0  ;;  %v1612_v2 = vmul.f32 %v7690_v13, %v7551_v8  ;;  %v5776_v22 = vpop.f32.mrf.mxu0 }
 0x285   : > { %v6064_v52 = vpop.eup %6063  ;;  %v1770_v28 = vadd.f32 1.0, %v6062_v63  ;;  %6081 = vrcp.f32 %v1771_v38  ;;  %v1611_v13 = vmul.f32 %v7551_v8, %v1541_v51 }
 0x286   : > { %v1898_v12 = vsel %vm1882_vm15, %v7714_v5, 0.0  ;;  %v7726_v31 = vmul.f32 %v6064_v52, %v7611_v62  ;;  %v1561_v23 = vpop.f32.mrf.mxu0 }
 0x287   : > { %v6066_v14 = vpop.eup %6065  ;;  %v1899_v0 = vadd.f32 %v1898_v12, %v1897_v46  ;;  %6083 = vrcp.f32 %v1770_v28 }
 0x288   : > { %v6068_v61 = vpop.eup %6067  ;;  %v7729_v36 = vmul.f32 %v6066_v14, %v7614_v33  ;;  %6085 = vpow2.f32 %v5555_v18  ;;  %v1904_v33 = vsel %vm1882_vm15, %v7726_v31, 0.0  ;;  %v7766_v14 = vadd.f32 %v7556_v54, %v1611_v13 }
 0x289   : > { %v6070_v17 = vpop.eup %6069  ;;  %v1901_v29 = vadd.f32 %v1900_v47, %v1899_v0  ;;  %v1773_v62 = vadd.f32 1.0, %v6068_v61  ;;  %6087 = vpow2.f32 %v5558_v56  ;;  %v1614_v0 = vmul.f32 %v5773_v30, %v7551_v8 }
 0x28a   : > { %v6072_v44 = vpop.eup %6071  ;;  %v1902_v48 = vsel %vm1882_vm15, %v7729_v36, 0.0  ;;  %v7740_v55 = vmul.f32 %v6070_v17, %v7620_v43  ;;  %v5559_v17 = vmul.f32 -1.442695, %v7766_v14  ;;  %v1613_v56 = vmul.f32 %v7551_v8, %v1551_v11 }
 0x28b   : > { %v6074_v50 = vpop.eup %6073  ;;  %v1903_v4 = vadd.f32 %v1902_v48, %v1901_v29  ;;  %v1772_v10 = vadd.f32 1.0, %v6072_v44  ;;  %v7773_v29 = vadd.f32 %v7556_v54, %v1614_v0  ;;  %v1616_v44 = vmul.f32 %v5776_v22, %v7551_v8 }
 0x28c   : > { %v7743_v37 = vmul.f32 %v6074_v50, %v7626_v53  ;;  %v7754_v53 = vadd.f32 %v7556_v54, %v1612_v2  ;;  %v1908_v46 = vsel %vm1882_vm15, %v7740_v55, 0.0 }
 0x28d   : > { %v6076_v7 = vpop.eup %6075  ;;  %v1905_v45 = vadd.f32 %v1904_v33, %v1903_v4  ;;  %6089 = vrcp.f32 %v1772_v10  ;;  %v5779_v4 = vpop.f32.mrf.mxu0  ;;  %v5562_v10 = vmul.f32 -1.442695, %v7773_v29 }
 0x28e   : > { %v6078_v32 = vpop.eup %6077  ;;  %v1906_v38 = vsel %vm1882_vm15, %v7743_v37, 0.0  ;;  %6091 = vpow2.f32 %v5557_v21  ;;  %v7751_v63 = vmul.f32 %v6076_v7, %v7629_v1  ;;  %v5560_v12 = vmul.f32 -1.442695, %v7754_v53 }
 0x28f   : > { %v6080_v41 = vpop.eup %6079  ;;  %v1907_v43 = vadd.f32 %v1906_v38, %v1905_v45  ;;  %6093 = vrcp.f32 %v1773_v62  ;;  %v1775_v18 = vadd.f32 1.0, %v6078_v32  ;;  %v7784_v21 = vadd.f32 %v7556_v54, %v1613_v56  ;;  %v1571_v22 = vpop.f32.mrf.mxu0 }
 0x290   : > { %v7759_v52 = vmul.f32 %v6080_v41, %v7635_v34  ;;  %v1912_v34 = vsel %vm1882_vm15, %v7751_v63, 0.0  ;;  %6095 = vpow2.f32 %v5560_v12  ;;  %v1618_v13 = vmul.f32 %v5779_v4, %v7551_v8 }
 0x291   : > { %v1909_v28 = vadd.f32 %v1908_v46, %v1907_v43  ;;  %6097 = vrcp.f32 %v1775_v18  ;;  %v5561_v38 = vmul.f32 -1.442695, %v7784_v21  ;;  %v1617_v12 = vmul.f32 %v7551_v8, %v1571_v22 }
 0x292   : > { %v1910_v1 = vsel %vm1882_vm15, %v7759_v52, 0.0  ;;  %v6082_v61 = vpop.eup %6081  ;;  %6099 = vpow2.f32 %v5559_v17 }
 0x293   : > { %v1911_v47 = vadd.f32 %v1910_v1, %v1909_v28  ;;  %v7787_v7 = vmul.f32 %v6082_v61, %v7641_v35  ;;  %v1615_v35 = vmul.f32 %v7551_v8, %v1561_v23  ;;  %v7808_v23 = vadd.f32 %v7556_v54, %v1618_v13 }
 0x294   : > { %v6084_v51 = vpop.eup %6083 }
 0x295   : > { %v6086_v48 = vpop.eup %6085  ;;  %v7778_v50 = vmul.f32 %v6084_v51, %v7644_v59  ;;  %v1913_v30 = vadd.f32 %v1912_v34, %v1911_v47  ;;  %v7790_v59 = vadd.f32 %v7556_v54, %v1616_v44  ;;  %v1916_v28 = vsel %vm1882_vm15, %v7787_v7, 0.0 }
 0x296   : > { %v1774_v62 = vadd.f32 1.0, %v6086_v48  ;;  %v6088_v11 = vpop.eup %6087  ;;  %v7803_v61 = vadd.f32 %v7556_v54, %v1615_v35  ;;  %v7812_v47 = vadd.f32 %v7556_v54, %v1617_v12  ;;  %v5566_v17 = vmul.f32 -1.442695, %v7808_v23 }
 0x297   : > { %v1914_v33 = vsel %vm1882_vm15, %v7778_v50, 0.0  ;;  %v1777_v2 = vadd.f32 1.0, %v6088_v11  ;;  %v5564_v41 = vmul.f32 -1.442695, %v7790_v59 }
 0x298   : > { %6101 = vrcp.f32 %v1774_v62  ;;  %v1915_v45 = vadd.f32 %v1914_v33, %v1913_v30  ;;  %v5563_v34 = vmul.f32 -1.442695, %v7803_v61  ;;  %v5565_v30 = vmul.f32 -1.442695, %v7812_v47 }
 0x299   : > { %6103 = vpow2.f32 %v5562_v10 }
 0x29a   : > { %v6090_v32 = vpop.eup %6089  ;;  %6105 = vrcp.f32 %v1777_v2  ;;  %v1917_v0 = vadd.f32 %v1916_v28, %v1915_v45 }
 0x29b   : > { %v6092_v43 = vpop.eup %6091  ;;  %v7795_v46 = vmul.f32 %v6090_v32, %v7671_v27  ;;  %6107 = vpow2.f32 %v5561_v38 }
 0x29c   : > { %v1776_v18 = vadd.f32 1.0, %v6092_v43  ;;  %v6094_v1 = vpop.eup %6093  ;;  %6109 = vpow2.f32 %v5564_v41 }
 0x29d   : > { %v1918_v27 = vsel %vm1882_vm15, %v7795_v46, 0.0  ;;  %v6096_v51 = vpop.eup %6095  ;;  %v7815_v8 = vmul.f32 %v6094_v1, %v7656_v16  ;;  %v1960_v1 = vsel %vm1882_vm15, %v7680_v25, -inf }
 0x29e   : > { %6111 = vrcp.f32 %v1776_v18  ;;  %v1919_v56 = vadd.f32 %v1918_v27, %v1917_v0  ;;  %v1779_v44 = vadd.f32 1.0, %v6096_v51  ;;  %v6098_v48 = vpop.eup %6097  ;;  %v1958_v0 = vsel %vm1882_vm15, %v7683_v57, -inf }
 0x29f   : > { %6113 = vpow2.f32 %v5563_v34  ;;  %v6100_v4 = vpop.eup %6099  ;;  %v1920_v62 = vsel %vm1882_vm15, %v7815_v8, 0.0  ;;  %v7822_v11 = vmul.f32 %v6098_v48, %v7686_v42  ;;  %v1954_v48 = vsel %vm1882_vm15, %v7652_v26, -inf }
 0x2a0   : > { %6115 = vpow2.f32 %v5566_v17  ;;  %v1778_v54 = vadd.f32 1.0, %v6100_v4  ;;  %v1921_v33 = vadd.f32 %v1920_v62, %v1919_v56 }
 0x2a1   : > { %6117 = vrcp.f32 %v1779_v44  ;;  %v1924_v35 = vsel %vm1882_vm15, %v7822_v11, 0.0  ;;  %v1955_v44 = vsel %vm1882_vm15, %v7648_v39, -inf }
 0x2a2   : > { %6119 = vpow2.f32 %v5565_v30  ;;  %v1961_v62 = vmax.f32 %v1955_v44, %v1960_v1 }
 0x2a3   : > { %6121 = vrcp.f32 %v1778_v54  ;;  %v1959_v54 = vmax.f32 %v1954_v48, %v1958_v0 }
 0x2a5   : > { %v6102_v10 = vpop.eup %6101 }
 0x2a6   : > { %v6104_v16 = vpop.eup %6103  ;;  %v7825_v45 = vmul.f32 %v6102_v10, %v7707_v19  ;;  %v1964_v10 = vsel %vm1882_vm15, %v7695_v20, -inf }
 0x2a7   : > { %v1781_v2 = vadd.f32 1.0, %v6104_v16  ;;  %v6106_v22 = vpop.eup %6105 }
 0x2a8   : > { %v1922_v32 = vsel %vm1882_vm15, %v7825_v45, 0.0  ;;  %v6108_v38 = vpop.eup %6107  ;;  %v7839_v27 = vmul.f32 %v6106_v22, %v7720_v9  ;;  %v1957_v9 = vsel %vm1882_vm15, %v7662_v6, -inf  ;;  %v1962_v22 = vsel %vm1882_vm15, %v7698_v24, -inf }
 0x2a9   : > { %v1923_v41 = vadd.f32 %v1922_v32, %v1921_v33  ;;  %v6110_v43 = vpop.eup %6109  ;;  %6123 = vrcp.f32 %v1781_v2  ;;  %v1780_v13 = vadd.f32 1.0, %v6108_v38  ;;  %v1968_v32 = vsel %vm1882_vm15, %v7711_v40, -inf }
 0x2aa   : > { %v1783_v18 = vadd.f32 1.0, %v6110_v43  ;;  %v1928_v33 = vsel %vm1882_vm15, %v7839_v27, 0.0  ;;  %v1966_v38 = vsel %vm1882_vm15, %v7714_v5, -inf  ;;  %v1972_v43 = vsel %vm1882_vm15, %v7726_v31, -inf }
 0x2ab   : > { %v6112_v28 = vpop.eup %6111  ;;  %v1925_v42 = vadd.f32 %v1924_v35, %v1923_v41  ;;  %6125 = vrcp.f32 %v1780_v13  ;;  %v1969_v0 = vmax.f32 %v1961_v62, %v1968_v32  ;;  %v1984_v62 = vsel %vm1882_vm15, %v7787_v7, -inf }
 0x2ac   : > { %v7832_v19 = vmul.f32 %v6112_v28, %v7735_v49  ;;  %v6114_v12 = vpop.eup %6113  ;;  %6127 = vrcp.f32 %v1783_v18  ;;  %v1956_v28 = vsel %vm1882_vm15, %v7667_v15, -inf  ;;  %v1970_v18 = vsel %vm1882_vm15, %v7729_v36, -inf }
 0x2ad   : > { %v6116_v51 = vpop.eup %6115  ;;  %v1782_v56 = vadd.f32 1.0, %v6114_v12  ;;  %v1976_v12 = vsel %vm1882_vm15, %v7740_v55, -inf  ;;  %v1963_v1 = vmax.f32 %v1956_v28, %v1962_v22 }
 0x2ae   : > { %v1926_v34 = vsel %vm1882_vm15, %v7832_v19, 0.0  ;;  %v6118_v49 = vpop.eup %6117  ;;  %v1785_v30 = vadd.f32 1.0, %v6116_v51  ;;  %v1977_v48 = vmax.f32 %v1969_v0, %v1976_v12 }
 0x2af   : > { %v1927_v17 = vadd.f32 %v1926_v34, %v1925_v42  ;;  %v6120_v4 = vpop.eup %6119  ;;  %6129 = vrcp.f32 %v1782_v56  ;;  %v7862_v35 = vmul.f32 %v6118_v49, %v7754_v53  ;;  %v1965_v42 = vmax.f32 %v1957_v9, %v1964_v10 }
 0x2b0   : > { %6131 = vrcp.f32 %v1785_v30  ;;  %v1784_v16 = vadd.f32 1.0, %v6120_v4  ;;  %v6122_v2 = vpop.eup %6121  ;;  %v1967_v34 = vmax.f32 %v1959_v54, %v1966_v38  ;;  %v1980_v56 = vsel %vm1882_vm15, %v7751_v63, -inf }
 0x2b1   : > { %v1929_v41 = vadd.f32 %v1928_v33, %v1927_v17  ;;  %v7865_v13 = vmul.f32 %v6122_v2, %v7766_v14  ;;  %v1973_v14 = vmax.f32 %v1965_v42, %v1972_v43  ;;  %v1974_v17 = vsel %vm1882_vm15, %v7743_v37, -inf }
 0x2b2   : > { %6133 = vrcp.f32 %v1784_v16  ;;  %v1971_v44 = vmax.f32 %v1963_v1, %v1970_v18  ;;  %v1978_v30 = vsel %vm1882_vm15, %v7759_v52, -inf  ;;  %v1932_v4 = vsel %vm1882_vm15, %v7862_v35, 0.0 }
 0x2b3   : > { %v1930_v53 = vsel %vm1882_vm15, %v7865_v13, 0.0  ;;  %v1982_v54 = vsel %vm1882_vm15, %v7778_v50, -inf  ;;  %v1988_v10 = vsel %vm1882_vm15, %v7815_v8, -inf  ;;  %v1975_v16 = vmax.f32 %v1967_v34, %v1974_v17 }
 0x2b4   : > { %v1931_v49 = vadd.f32 %v1930_v53, %v1929_v41  ;;  %v1981_v2 = vmax.f32 %v1973_v14, %v1980_v56  ;;  %v1979_v38 = vmax.f32 %v1971_v44, %v1978_v30  ;;  %v1986_v41 = vsel %vm1882_vm15, %v7795_v46, -inf }
 0x2b5   : > { %v1985_v28 = vmax.f32 %v1977_v48, %v1984_v62  ;;  %v1983_v42 = vmax.f32 %v1975_v16, %v1982_v54  ;;  %v1992_v1 = vsel %vm1882_vm15, %v7822_v11, -inf  ;;  %v2000_v14 = vsel %vm1882_vm15, %v7862_v35, -inf }
 0x2b6   : > { %v6124_v51 = vpop.eup %6123  ;;  %v1933_v33 = vadd.f32 %v1932_v4, %v1931_v49  ;;  %v1989_v18 = vmax.f32 %v1981_v2, %v1988_v10  ;;  %v1987_v53 = vmax.f32 %v1979_v38, %v1986_v41  ;;  %v1998_v49 = vsel %vm1882_vm15, %v7865_v13, -inf }
 0x2b7   : > { %v7890_v22 = vmul.f32 %v6124_v51, %v7773_v29  ;;  %v1990_v29 = vsel %vm1882_vm15, %v7825_v45, -inf  ;;  %v1994_v51 = vsel %vm1882_vm15, %v7832_v19, -inf  ;;  %v1993_v4 = vmax.f32 %v1985_v28, %v1992_v1 }
 0x2b8   : > { %v6126_v9 = vpop.eup %6125  ;;  %v1995_v2 = vmax.f32 %v1987_v53, %v1994_v51 }
 0x2b9   : > { %v7893_v32 = vmul.f32 %v6126_v9, %v7784_v21  ;;  %v6128_v43 = vpop.eup %6127  ;;  %v1996_v21 = vsel %vm1882_vm15, %v7839_v27, -inf  ;;  %v1936_v17 = vsel %vm1882_vm15, %v7890_v22, 0.0  ;;  %v1991_v9 = vmax.f32 %v1983_v42, %v1990_v29 }
 0x2ba   : > { %v7914_v44 = vmul.f32 %v6128_v43, %v7790_v59  ;;  %v1997_v62 = vmax.f32 %v1989_v18, %v1996_v21  ;;  %v2001_v38 = vmax.f32 %v1993_v4, %v2000_v14 }
 0x2bb   : > { %v1934_v12 = vsel %vm1882_vm15, %v7893_v32, 0.0  ;;  %v2002_v16 = vsel %vm1882_vm15, %v7893_v32, -inf  ;;  %v1999_v41 = vmax.f32 %v1991_v9, %v1998_v49 }
 0x2bc   : > { %v1935_v0 = vadd.f32 %v1934_v12, %v1933_v33  ;;  %v6130_v34 = vpop.eup %6129  ;;  %v2004_v33 = vsel %vm1882_vm15, %v7890_v22, -inf  ;;  %v2008_v28 = vsel %vm1882_vm15, %v7914_v44, -inf  ;;  %v2003_v1 = vmax.f32 %v1995_v2, %v2002_v16 }
 0x2bd   : > { %v6132_v56 = vpop.eup %6131  ;;  %v7917_v48 = vmul.f32 %v6130_v34, %v7803_v61  ;;  %v2005_v12 = vmax.f32 %v1997_v62, %v2004_v33  ;;  %v2009_v53 = vmax.f32 %v2001_v38, %v2008_v28 }
 0x2be   : > { %v1937_v30 = vadd.f32 %v1936_v17, %v1935_v0  ;;  %v7920_v54 = vmul.f32 %v6132_v56, %v7808_v23  ;;  %v1940_v23 = vsel %vm1882_vm15, %v7914_v44, 0.0 }
 0x2bf   : > { %v6134_v10 = vpop.eup %6133  ;;  %v1938_v59 = vsel %vm1882_vm15, %v7917_v48, 0.0  ;;  %v2006_v61 = vsel %vm1882_vm15, %v7917_v48, -inf }
 0x2c0   : > { %v1939_v43 = vadd.f32 %v1938_v59, %v1937_v30  ;;  %v2012_v42 = vsel %vm1882_vm15, %v7920_v54, -inf  ;;  %v7937_v18 = vmul.f32 %v6134_v10, %v7812_v47  ;;  %v2007_v29 = vmax.f32 %v1999_v41, %v2006_v61 }
 0x2c1   : > { %v2013_v51 = vmax.f32 %v2005_v12, %v2012_v42  ;;  %v1944_v56 = vsel %vm1882_vm15, %v7920_v54, 0.0 }
 0x2c2   : > { %v1941_v21 = vadd.f32 %v1940_v23, %v1939_v43  ;;  %v1942_v0 = vsel %vm1882_vm15, %v7937_v18, 0.0  ;;  %v2010_v34 = vsel %vm1882_vm15, %v7937_v18, -inf  ;;  %v2014_v49 = vmax.f32 %v2007_v29, %v2009_v53  ;;  %v2023_v23 = vld [vmem:[%s10848_s4] sm:$0x3] }
 0x2c3   : > { %v2011_v17 = vmax.f32 %v2003_v1, %v2010_v34  ;;  %v7952_v34 = vpop.permute.xlu0 %5986  ;;  %v2030_v53 = vld [vmem:[%s10849_s5] sm:$0x3] }
 0x2c4   : > { %v1943_v14 = vadd.f32 %v1942_v0, %v1941_v21  ;;  %v7950_v0 = vpop.permute.xlu1 %5981  ;;  %10971 = vst [vmem:[#allocation9_spill] sm:$0xff] %v7952_v34 }
 0x2c5   : > { %v2015_v30 = vmax.f32 %v2011_v17, %v2013_v51  ;;  %10970 = vst [vmem:[#allocation16_spill] sm:$0xff] %v7950_v0 }
 0x2c6   : > { %v1945_v47 = vadd.f32 %v1944_v56, %v1943_v14 }
 0x2c7   : > { %v2016_v4 = vmax.f32 %v2014_v49, %v2015_v30 }
 0x2c8   : > { %v1946_v9 = vrot.slane %v1945_v47, 4 }
 0x2c9   : > { %v2017_v62 = vrot.slane %v2016_v4, 4 }
 0x2ca   : > { %v1947_v10 = vadd.f32 %v1946_v9, %v1945_v47 }
 0x2cb   : > { %v2018_v33 = vmax.f32 %v2016_v4, %v2017_v62 }
 0x2cc   : > { %v1948_v16 = vrot.slane %v1947_v10, 2 }
 0x2cd   : > { %v2019_v59 = vrot.slane %v2018_v33, 2 }
 0x2ce   : > { %v1949_v61 = vadd.f32 %v1948_v16, %v1947_v10 }
 0x2cf   : > { %v2020_v2 = vmax.f32 %v2018_v33, %v2019_v59 }
 0x2d0   : > { %v1950_v41 = vrot.slane %v1949_v61, 1 }
 0x2d1   : > { %v2021_v38 = vrot.slane %v2020_v2, 1 }
 0x2d2   : > { %v1951_v43 = vadd.f32 %v1950_v41, %v1949_v61 }
 0x2d3   : > { %v2022_v28 = vmax.f32 %v2020_v2, %v2021_v38 }
 0x2d4   : > { %v1953_v42 = vmul.f32 0.00390625, %v1951_v43 }
 0x2d5   : > { %v2039_v12 = vmul.f32 %v2023_v23, %v2022_v28 }
 0x2d6   : > { %v2024_v1 = vmul.f32 %v2023_v23, %v1953_v42 }
 0x2d7   : > { %v2040_v29 = vsel %vm2025_vm0, %v2039_v12, 0.0 }
 0x2d8   : > { %v2026_v21 = vsel %vm2025_vm0, %v2024_v1, 0.0  ;;  %2041 = vadd.xlane.f32.xlu0 %v2040_v29 }
 0x2d9   : > { %2027 = vadd.xlane.f32.xlu1 %v2026_v21 }
 0x361   : > { %v2042_v51 = vpop.xlane.xlu0 %2041 }
 0x362   : > { %v2028_v14 = vpop.xlane.xlu1 %2027  ;;  %v2043_v17 = vmax.f32 %v2042_v51, 0.0 }
 0x363   : > { %v2029_v56 = vmax.f32 %v2028_v14, 0.0 }
 0x364   : > { %v2044_v49 = vmul.f32 %v2043_v17, %v2030_v53 }
 0x365   : > { %v2031_v47 = vmul.f32 %v2030_v53, %v2029_v56 }
 0x366   : > { %v2045_v30 = vsel %vm2025_vm0, %v2044_v49, 0.0 }
 0x367   : > { %v2032_v4 = vsel %vm2025_vm0, %v2031_v47, 0.0  ;;  %v2046_v9 = vrot.slane %v2045_v30, 4 }
 0x368   : > { %v2033_v62 = vrot.slane %v2032_v4, 4 }
 0x369   : > { %v2047_v10 = vadd.f32 %v2046_v9, %v2045_v30 }
 0x36a   : > { %v2034_v33 = vadd.f32 %v2033_v62, %v2032_v4 }
 0x36b   : > { %v2048_v16 = vrot.slane %v2047_v10, 2 }
 0x36c   : > { %v2035_v59 = vrot.slane %v2034_v33, 2 }
 0x36d   : > { %v2049_v61 = vadd.f32 %v2048_v16, %v2047_v10 }
 0x36e   : > { %v2036_v2 = vadd.f32 %v2035_v59, %v2034_v33 }
 0x36f   : > { %v2050_v41 = vrot.slane %v2049_v61, 1 }
 0x370   : > { %v2037_v38 = vrot.slane %v2036_v2, 1 }
 0x371   : > { %v2051_v43 = vadd.f32 %v2050_v41, %v2049_v61 }
 0x372   : > { %v2038_v23 = vadd.f32 %v2037_v38, %v2036_v2 }
 0x374   : > { %v2052_v28 = vadd.f32 %v2051_v43, %v2038_v23 }
 0x376   : > { %v5567_v42 = vmul.f32 -1.442695, %v2052_v28 }
 0x378   : > { %6135 = vpow2.f32 %v5567_v42 }
 0x385   : > { %v6136_v12 = vpop.eup %6135 }
 0x386   : > { %v2056_v1 = vadd.f32 1.0, %v6136_v12 }
 0x388   : > { %6137 = vrcp.f32 %v2056_v1 }
 0x395   : > { %v7959_v29 = vpop.eup %6137 }
 0x396   : > { %v7963_v21 = vmul.f32 %v7959_v29, %v7648_v39  ;;  %v7967_v53 = vmul.f32 %v7959_v29, %v7652_v26  ;;  %v7975_v17 = vmul.f32 %v7959_v29, %v7662_v6  ;;  %v7979_v56 = vmul.f32 %v7959_v29, %v7667_v15 }
 0x397   : > { %v7987_v49 = vmul.f32 %v7959_v29, %v7680_v25  ;;  %v7991_v6 = vmul.f32 %v7959_v29, %v7683_v57  ;;  %v7999_v30 = vmul.f32 %v7959_v29, %v7695_v20  ;;  %v8003_v25 = vmul.f32 %v7959_v29, %v7698_v24 }
 0x398   : > { %10972 = vst [vmem:[#allocation17_spill] sm:$0xff] %v7963_v21  ;;  %10973 = vst [vmem:[#allocation15_spill] sm:$0xff] %v7967_v53  ;;  %v2094_v51 = vsel %vm1882_vm15, %v7963_v21, 0.0  ;;  %v2091_v14 = vsel %vm1882_vm15, %v7967_v53, 0.0  ;;  %v2100_v39 = vsel %vm1882_vm15, %v7975_v17, 0.0  ;;  %v2097_v26 = vsel %vm1882_vm15, %v7979_v56, 0.0 }
 0x399   : > { %10974 = vst [vmem:[#allocation12_spill] sm:$0xff] %v7975_v17  ;;  %10975 = vst [vmem:[#allocation10_spill] sm:$0xff] %v7979_v56  ;;  %2095 = vadd.xlane.f32.xlu1 %v2094_v51  ;;  %2092 = vadd.xlane.f32.xlu0 %v2091_v14  ;;  %v2106_v15 = vsel %vm1882_vm15, %v7987_v49, 0.0  ;;  %v2103_v47 = vsel %vm1882_vm15, %v7991_v6, 0.0  ;;  %v2112_v57 = vsel %vm1882_vm15, %v7999_v30, 0.0  ;;  %v2109_v4 = vsel %vm1882_vm15, %v8003_v25, 0.0 }
 0x39a   : > { %10976 = vst [vmem:[#allocation7_spill] sm:$0xff] %v7987_v49  ;;  %10977 = vst [vmem:[#allocation13_spill] sm:$0xff] %v7991_v6  ;;  %v8011_v9 = vmul.f32 %v7959_v29, %v7711_v40  ;;  %v8015_v20 = vmul.f32 %v7959_v29, %v7714_v5  ;;  %v8023_v10 = vmul.f32 %v7959_v29, %v7726_v31 }
 0x39b   : > { %10978 = vst [vmem:[#allocation8_spill] sm:$0xff] %v7999_v30  ;;  %10979 = vst [vmem:[#allocation14_spill] sm:$0xff] %v8003_v25  ;;  %v8027_v40 = vmul.f32 %v7959_v29, %v7729_v36  ;;  %v8035_v16 = vmul.f32 %v7959_v29, %v7740_v55  ;;  %v8039_v31 = vmul.f32 %v7959_v29, %v7743_v37 }
 0x39c   : > { %10980 = vst [vmem:[#allocation18_spill] sm:$0xff] %v8011_v9  ;;  %10981 = vst [vmem:[#allocation19_spill] sm:$0xff] %v8015_v20  ;;  %v2118_v24 = vsel %vm1882_vm15, %v8011_v9, 0.0  ;;  %v2115_v62 = vsel %vm1882_vm15, %v8015_v20, 0.0  ;;  %v2124_v5 = vsel %vm1882_vm15, %v8023_v10, 0.0  ;;  %v8047_v61 = vmul.f32 %v7959_v29, %v7751_v63 }
 0x39d   : > { %2101 = vadd.xlane.f32.xlu1 %v2100_v39  ;;  %2098 = vadd.xlane.f32.xlu0 %v2097_v26  ;;  %10982 = vst [vmem:[#allocation20_spill] sm:$0xff] %v8023_v10  ;;  %10983 = vst [vmem:[#allocation21_spill] sm:$0xff] %v8027_v40  ;;  %v2121_v33 = vsel %vm1882_vm15, %v8027_v40, 0.0  ;;  %v2130_v36 = vsel %vm1882_vm15, %v8035_v16, 0.0  ;;  %v2127_v59 = vsel %vm1882_vm15, %v8039_v31, 0.0  ;;  %v8051_v55 = vmul.f32 %v7959_v29, %v7759_v52 }
 0x39e   : > { %10984 = vst [vmem:[#allocation22_spill] sm:$0xff] %v8035_v16  ;;  %10985 = vst [vmem:[#allocation23_spill] sm:$0xff] %v8039_v31  ;;  %v2136_v37 = vsel %vm1882_vm15, %v8047_v61, 0.0  ;;  %v8059_v41 = vmul.f32 %v7959_v29, %v7787_v7  ;;  %v8063_v63 = vmul.f32 %v7959_v29, %v7778_v50  ;;  %v8071_v43 = vmul.f32 %v7959_v29, %v7815_v8 }
 0x39f   : > { %10986 = vst [vmem:[#allocation24_spill] sm:$0xff] %v8047_v61  ;;  %10987 = vst [vmem:[#allocation25_spill] sm:$0xff] %v8051_v55  ;;  %v2133_v2 = vsel %vm1882_vm15, %v8051_v55, 0.0  ;;  %v8075_v7 = vmul.f32 %v7959_v29, %v7795_v46  ;;  %v8083_v28 = vmul.f32 %v7959_v29, %v7822_v11  ;;  %v8087_v8 = vmul.f32 %v7959_v29, %v7825_v45 }
 0x3a0   : > { %10988 = vst [vmem:[#allocation26_spill] sm:$0xff] %v8059_v41  ;;  %10989 = vst [vmem:[#allocation27_spill] sm:$0xff] %v8063_v63  ;;  %v2142_v52 = vsel %vm1882_vm15, %v8059_v41, 0.0  ;;  %v2139_v38 = vsel %vm1882_vm15, %v8063_v63, 0.0  ;;  %v2148_v50 = vsel %vm1882_vm15, %v8071_v43, 0.0  ;;  %v8095_v12 = vmul.f32 %v7959_v29, %v7839_v27 }
 0x3a1   : > { %2107 = vadd.xlane.f32.xlu1 %v2106_v15  ;;  %2104 = vadd.xlane.f32.xlu0 %v2103_v47  ;;  %10990 = vst [vmem:[#allocation28_spill] sm:$0xff] %v8071_v43  ;;  %10991 = vst [vmem:[#allocation29_spill] sm:$0xff] %v8075_v7  ;;  %v2145_v23 = vsel %vm1882_vm15, %v8075_v7, 0.0  ;;  %v2154_v46 = vsel %vm1882_vm15, %v8083_v28, 0.0  ;;  %v2151_v42 = vsel %vm1882_vm15, %v8087_v8, 0.0  ;;  %v8099_v11 = vmul.f32 %v7959_v29, %v7832_v19 }
 0x3a2   : > { %10992 = vst [vmem:[#allocation30_spill] sm:$0xff] %v8083_v28  ;;  %10993 = vst [vmem:[#allocation31_spill] sm:$0xff] %v8087_v8  ;;  %v2160_v45 = vsel %vm1882_vm15, %v8095_v12, 0.0  ;;  %v8107_v51 = vmul.f32 %v7959_v29, %v7862_v35  ;;  %v8111_v27 = vmul.f32 %v7959_v29, %v7865_v13  ;;  %v8119_v39 = vmul.f32 %v7959_v29, %v7890_v22 }
 0x3a3   : > { %10994 = vst [vmem:[#allocation32_spill] sm:$0xff] %v8095_v12  ;;  %10995 = vst [vmem:[#allocation33_spill] sm:$0xff] %v8099_v11  ;;  %v2157_v1 = vsel %vm1882_vm15, %v8099_v11, 0.0  ;;  %v8123_v35 = vmul.f32 %v7959_v29, %v7893_v32  ;;  %v8131_v15 = vmul.f32 %v7959_v29, %v7914_v44  ;;  %v8135_v22 = vmul.f32 %v7959_v29, %v7917_v48 }
 0x3a4   : > { %10996 = vst [vmem:[#allocation34_spill] sm:$0xff] %v8107_v51  ;;  %10997 = vst [vmem:[#allocation35_spill] sm:$0xff] %v8111_v27  ;;  %v2166_v19 = vsel %vm1882_vm15, %v8107_v51, 0.0  ;;  %v2163_v14 = vsel %vm1882_vm15, %v8111_v27, 0.0  ;;  %v2172_v13 = vsel %vm1882_vm15, %v8119_v39, 0.0  ;;  %v8147_v44 = vmul.f32 %v7959_v29, %v7937_v18 }
 0x3a5   : > { %2113 = vadd.xlane.f32.xlu1 %v2112_v57  ;;  %2110 = vadd.xlane.f32.xlu0 %v2109_v4  ;;  %10998 = vst [vmem:[#allocation36_spill] sm:$0xff] %v8119_v39  ;;  %10999 = vst [vmem:[#allocation37_spill] sm:$0xff] %v8123_v35  ;;  %v2169_v26 = vsel %vm1882_vm15, %v8123_v35, 0.0  ;;  %v2178_v32 = vsel %vm1882_vm15, %v8131_v15, 0.0  ;;  %v2175_v47 = vsel %vm1882_vm15, %v8135_v22, 0.0  ;;  %v8143_v57 = vmul.f32 %v7959_v29, %v7920_v54 }
 0x3a6   : > { %11000 = vst [vmem:[#allocation38_spill] sm:$0xff] %v8131_v15  ;;  %11001 = vst [vmem:[#allocation39_spill] sm:$0xff] %v8135_v22  ;;  %v2181_v4 = vsel %vm1882_vm15, %v8147_v44, 0.0  ;;  %v2220_v54 = vsel %vm1882_vm15, %v7967_v53, -inf  ;;  %v2229_v18 = vsel %vm1882_vm15, %v7975_v17, -inf  ;;  %v2226_v29 = vsel %vm1882_vm15, %v7979_v56, -inf }
 0x3a7   : > { %11002 = vst [vmem:[#allocation40_spill] sm:$0xff] %v8143_v57  ;;  %11003 = vst [vmem:[#allocation41_spill] sm:$0xff] %v8147_v44  ;;  %v2184_v48 = vsel %vm1882_vm15, %v8143_v57, 0.0 }
 0x3a9   : > { %2119 = vadd.xlane.f32.xlu1 %v2118_v24  ;;  %2116 = vadd.xlane.f32.xlu0 %v2115_v62  ;;  %v2223_v24 = vsel %vm1882_vm15, %v7963_v21, -inf  ;;  %v2235_v62 = vsel %vm1882_vm15, %v7987_v49, -inf }
 0x3ad   : > { %2125 = vadd.xlane.f32.xlu1 %v2124_v5  ;;  %2122 = vadd.xlane.f32.xlu0 %v2121_v33  ;;  %v2232_v5 = vsel %vm1882_vm15, %v7991_v6, -inf  ;;  %v2241_v33 = vsel %vm1882_vm15, %v7999_v30, -inf }
 0x3b1   : > { %2131 = vadd.xlane.f32.xlu1 %v2130_v36  ;;  %2128 = vadd.xlane.f32.xlu0 %v2127_v59  ;;  %v2238_v36 = vsel %vm1882_vm15, %v8003_v25, -inf  ;;  %v2247_v59 = vsel %vm1882_vm15, %v8011_v9, -inf }
 0x3b5   : > { %2137 = vadd.xlane.f32.xlu1 %v2136_v37  ;;  %2134 = vadd.xlane.f32.xlu0 %v2133_v2  ;;  %v2244_v37 = vsel %vm1882_vm15, %v8015_v20, -inf  ;;  %v2253_v2 = vsel %vm1882_vm15, %v8023_v10, -inf }
 0x3b9   : > { %2143 = vadd.xlane.f32.xlu1 %v2142_v52  ;;  %2140 = vadd.xlane.f32.xlu0 %v2139_v38  ;;  %v2250_v52 = vsel %vm1882_vm15, %v8027_v40, -inf  ;;  %v2259_v38 = vsel %vm1882_vm15, %v8035_v16, -inf }
 0x3bd   : > { %2149 = vadd.xlane.f32.xlu1 %v2148_v50  ;;  %2146 = vadd.xlane.f32.xlu0 %v2145_v23  ;;  %v2256_v50 = vsel %vm1882_vm15, %v8039_v31, -inf  ;;  %v2265_v23 = vsel %vm1882_vm15, %v8047_v61, -inf }
 0x3c1   : > { %2155 = vadd.xlane.f32.xlu1 %v2154_v46  ;;  %2152 = vadd.xlane.f32.xlu0 %v2151_v42  ;;  %v2262_v46 = vsel %vm1882_vm15, %v8051_v55, -inf  ;;  %v2271_v42 = vsel %vm1882_vm15, %v8059_v41, -inf }
 0x3c5   : > { %2161 = vadd.xlane.f32.xlu1 %v2160_v45  ;;  %2158 = vadd.xlane.f32.xlu0 %v2157_v1  ;;  %v2268_v45 = vsel %vm1882_vm15, %v8063_v63, -inf  ;;  %v2277_v1 = vsel %vm1882_vm15, %v8071_v43, -inf }
 0x3c9   : > { %2167 = vadd.xlane.f32.xlu1 %v2166_v19  ;;  %2164 = vadd.xlane.f32.xlu0 %v2163_v14  ;;  %v2274_v19 = vsel %vm1882_vm15, %v8075_v7, -inf  ;;  %v2283_v14 = vsel %vm1882_vm15, %v8083_v28, -inf }
 0x3cd   : > { %2173 = vadd.xlane.f32.xlu1 %v2172_v13  ;;  %2170 = vadd.xlane.f32.xlu0 %v2169_v26  ;;  %v2280_v13 = vsel %vm1882_vm15, %v8087_v8, -inf  ;;  %v2289_v26 = vsel %vm1882_vm15, %v8095_v12, -inf }
 0x3d1   : > { %2179 = vadd.xlane.f32.xlu1 %v2178_v32  ;;  %2176 = vadd.xlane.f32.xlu0 %v2175_v47  ;;  %v2286_v32 = vsel %vm1882_vm15, %v8099_v11, -inf  ;;  %v2295_v47 = vsel %vm1882_vm15, %v8107_v51, -inf }
 0x3d5   : > { %2185 = vadd.xlane.f32.xlu1 %v2184_v48  ;;  %2182 = vadd.xlane.f32.xlu0 %v2181_v4  ;;  %v2292_v48 = vsel %vm1882_vm15, %v8111_v27, -inf  ;;  %v2301_v4 = vsel %vm1882_vm15, %v8119_v39, -inf }
 0x3d9   : > { %2224 = vmax.xlane.f32.xlu1 %v2223_v24  ;;  %2221 = vmax.xlane.f32.xlu0 %v2220_v54  ;;  %v2298_v24 = vsel %vm1882_vm15, %v8123_v35, -inf  ;;  %v2307_v54 = vsel %vm1882_vm15, %v8131_v15, -inf }
 0x3dd   : > { %2230 = vmax.xlane.f32.xlu1 %v2229_v18  ;;  %2227 = vmax.xlane.f32.xlu0 %v2226_v29  ;;  %v2304_v18 = vsel %vm1882_vm15, %v8135_v22, -inf  ;;  %v2313_v29 = vsel %vm1882_vm15, %v8143_v57, -inf }
 0x3e1   : > { %2236 = vmax.xlane.f32.xlu1 %v2235_v62  ;;  %2233 = vmax.xlane.f32.xlu0 %v2232_v5  ;;  %v2310_v62 = vsel %vm1882_vm15, %v8147_v44, -inf }
 0x3e5   : > { %2242 = vmax.xlane.f32.xlu1 %v2241_v33  ;;  %2239 = vmax.xlane.f32.xlu0 %v2238_v36 }
 0x3e9   : > { %2248 = vmax.xlane.f32.xlu1 %v2247_v59  ;;  %2245 = vmax.xlane.f32.xlu0 %v2244_v37 }
 0x3ed   : > { %2254 = vmax.xlane.f32.xlu1 %v2253_v2  ;;  %2251 = vmax.xlane.f32.xlu0 %v2250_v52 }
 0x3f1   : > { %2260 = vmax.xlane.f32.xlu1 %v2259_v38  ;;  %2257 = vmax.xlane.f32.xlu0 %v2256_v50 }
 0x3f5   : > { %2266 = vmax.xlane.f32.xlu1 %v2265_v23  ;;  %2263 = vmax.xlane.f32.xlu0 %v2262_v46 }
 0x3f9   : > { %2272 = vmax.xlane.f32.xlu1 %v2271_v42  ;;  %2269 = vmax.xlane.f32.xlu0 %v2268_v45 }
 0x3fd   : > { %2278 = vmax.xlane.f32.xlu1 %v2277_v1  ;;  %2275 = vmax.xlane.f32.xlu0 %v2274_v19 }
 0x401   : > { %2284 = vmax.xlane.f32.xlu1 %v2283_v14  ;;  %2281 = vmax.xlane.f32.xlu0 %v2280_v13 }
 0x405   : > { %2290 = vmax.xlane.f32.xlu1 %v2289_v26  ;;  %2287 = vmax.xlane.f32.xlu0 %v2286_v32 }
 0x409   : > { %2296 = vmax.xlane.f32.xlu1 %v2295_v47  ;;  %2293 = vmax.xlane.f32.xlu0 %v2292_v48 }
 0x40d   : > { %2302 = vmax.xlane.f32.xlu1 %v2301_v4  ;;  %2299 = vmax.xlane.f32.xlu0 %v2298_v24 }
 0x411   : > { %2308 = vmax.xlane.f32.xlu1 %v2307_v54  ;;  %2305 = vmax.xlane.f32.xlu0 %v2304_v18 }
 0x415   : > { %2314 = vmax.xlane.f32.xlu1 %v2313_v29  ;;  %2311 = vmax.xlane.f32.xlu0 %v2310_v62 }
 0x422   : > { %v2096_v5 = vpop.xlane.xlu1 %2095  ;;  %v2093_v33 = vpop.xlane.xlu0 %2092 }
 0x423   : > { %v2189_v39 = vmul.f32 0.03125, %v2096_v5  ;;  %v2188_v27 = vmul.f32 0.03125, %v2093_v33 }
 0x426   : > { %v2102_v36 = vpop.xlane.xlu1 %2101  ;;  %v2099_v59 = vpop.xlane.xlu0 %2098 }
 0x427   : > { %v2191_v43 = vmul.f32 0.03125, %v2102_v36  ;;  %v2190_v63 = vmul.f32 0.03125, %v2099_v59 }
 0x42a   : > { %v2108_v37 = vpop.xlane.xlu1 %2107  ;;  %v2105_v2 = vpop.xlane.xlu0 %2104 }
 0x42b   : > { %v2192_v36 = vmul.f32 0.03125, %v2105_v2 }
 0x42e   : > { %v2114_v52 = vpop.xlane.xlu1 %2113  ;;  %v8217_v38 = vpop.xlane.xlu0 %2110 }
 0x432   : > { %v8219_v50 = vpop.xlane.xlu1 %2119  ;;  %v8221_v23 = vpop.xlane.xlu0 %2116 }
 0x436   : > { %v8223_v46 = vpop.xlane.xlu1 %2125  ;;  %v8225_v42 = vpop.xlane.xlu0 %2122 }
 0x43a   : > { %v8227_v45 = vpop.xlane.xlu1 %2131  ;;  %v8229_v1 = vpop.xlane.xlu0 %2128 }
 0x43e   : > { %v8231_v19 = vpop.xlane.xlu1 %2137  ;;  %v8233_v14 = vpop.xlane.xlu0 %2134 }
 0x442   : > { %v8235_v13 = vpop.xlane.xlu1 %2143  ;;  %v8237_v26 = vpop.xlane.xlu0 %2140 }
 0x446   : > { %v8239_v32 = vpop.xlane.xlu1 %2149  ;;  %v8241_v47 = vpop.xlane.xlu0 %2146 }
 0x44a   : > { %v8243_v48 = vpop.xlane.xlu1 %2155  ;;  %v8245_v4 = vpop.xlane.xlu0 %2152 }
 0x44e   : > { %v8247_v24 = vpop.xlane.xlu1 %2161  ;;  %v8249_v54 = vpop.xlane.xlu0 %2158 }
 0x452   : > { %v8251_v18 = vpop.xlane.xlu1 %2167  ;;  %v8253_v29 = vpop.xlane.xlu0 %2164 }
 0x456   : > { %v8255_v62 = vpop.xlane.xlu1 %2173  ;;  %v8257_v44 = vpop.xlane.xlu0 %2170 }
 0x45a   : > { %v8259_v57 = vpop.xlane.xlu1 %2179  ;;  %v8261_v22 = vpop.xlane.xlu0 %2176 }
 0x45e   : > { %v8263_v15 = vpop.xlane.xlu1 %2185  ;;  %v8265_v35 = vpop.xlane.xlu0 %2182 }
 0x462   : > { %v2225_v51 = vpop.xlane.xlu1 %2224  ;;  %v2222_v11 = vpop.xlane.xlu0 %2221 }
 0x463   : > { %v2318_v12 = vsel %vm2316_vm10, %v2189_v39, %v2225_v51  ;;  %v2317_v8 = vsel %vm2316_vm10, %v2188_v27, %v2222_v11  ;;  %v2193_v39 = vmul.f32 0.03125, %v2108_v37 }
 0x464   : > { %v2385_v28 = vrot.slane %v2318_v12, 5  ;;  %v2384_v7 = vrot.slane %v2317_v8, 5 }
 0x466   : > { %v8270_v41 = vsel %vm2381_vm6, %v2385_v28, 0.0  ;;  %v8273_v55 = vsel %vm2381_vm6, %v2384_v7, %v2385_v28  ;;  %v8276_v61 = vsel %vm2381_vm6, 0.0, %v2384_v7  ;;  %v2231_v5 = vpop.xlane.xlu1 %2230  ;;  %v2228_v33 = vpop.xlane.xlu0 %2227 }
 0x467   : > { %v2320_v31 = vsel %vm2316_vm10, %v2191_v43, %v2231_v5  ;;  %v2319_v51 = vsel %vm2316_vm10, %v2190_v63, %v2228_v33  ;;  %v2555_v12 = vrot.slane %v8276_v61, 1  ;;  %v2556_v8 = vrot.slane %v8273_v55, 1 }
 0x468   : > { %v2388_v11 = vrot.slane %v2320_v31, 5  ;;  %v2387_v27 = vrot.slane %v2319_v51, 5  ;;  %v2558_v59 = vrot.slane %v8270_v41, 1  ;;  %v2195_v51 = vmul.f32 0.03125, %v2114_v52 }
 0x469   : > { %v2557_v28 = vsel %vm511_vm1, %v2555_v12, %v2556_v8  ;;  %v2930_v3 = vrot.slane %v8276_v61, 3  ;;  %v2931_v60 = vrot.slane %v8273_v55, 3 }
 0x46a   : > { %v8285_v7 = vsel %vm2381_vm6, %v2388_v11, 0.0  ;;  %v8288_v16 = vsel %vm2381_vm6, %v2387_v27, %v2388_v11  ;;  %v8291_v63 = vsel %vm2381_vm6, 0.0, %v2387_v27  ;;  %v2237_v43 = vpop.xlane.xlu1 %2236  ;;  %2639 = vrot.lane.b32.xlu1 %v2557_v28, %s6334_s21  ;;  %v2234_v31 = vpop.xlane.xlu0 %2233  ;;  %v2194_v11 = vmul.f32 0.03125, %v8217_v38 }
 0x46b   : > { %v2322_v37 = vsel %vm2316_vm10, %v2193_v39, %v2237_v43  ;;  %v2321_v2 = vsel %vm2316_vm10, %v2192_v36, %v2234_v31  ;;  %v2560_v5 = vrot.slane %v8291_v63, 1  ;;  %v2561_v33 = vrot.slane %v8288_v16, 1 }
 0x46c   : > { %v2391_v12 = vrot.slane %v2322_v37, 5  ;;  %v2390_v40 = vrot.slane %v2321_v2, 5  ;;  %v2559_v27 = vsel %vm511_vm1, %v2556_v8, %v2558_v59  ;;  %v2563_v28 = vrot.slane %v8285_v7, 1 }
 0x46d   : > { %v2562_v10 = vsel %vm511_vm1, %v2560_v5, %v2561_v33  ;;  %v2197_v37 = vmul.f32 0.03125, %v8219_v50 }
 0x46e   : > { %v8303_v20 = vsel %vm2381_vm6, %v2391_v12, 0.0  ;;  %v8306_v39 = vsel %vm2381_vm6, %v2390_v40, %v2391_v12  ;;  %v8309_v36 = vsel %vm2381_vm6, 0.0, %v2390_v40  ;;  %v2243_v52 = vpop.xlane.xlu1 %2242  ;;  %2641 = vrot.lane.b32.xlu1 %v2559_v27, %s6334_s21  ;;  %2643 = vrot.lane.b32.xlu0 %v2562_v10, %s6334_s21  ;;  %v2240_v38 = vpop.xlane.xlu0 %2239  ;;  %v2196_v40 = vmul.f32 0.03125, %v8221_v23 }
 0x46f   : > { %v2324_v8 = vsel %vm2316_vm10, %v2195_v51, %v2243_v52  ;;  %v2323_v59 = vsel %vm2316_vm10, %v2194_v11, %v2240_v38  ;;  %v2565_v43 = vrot.slane %v8309_v36, 1  ;;  %v2566_v31 = vrot.slane %v8306_v39, 1 }
 0x470   : > { %v2394_v2 = vrot.slane %v2324_v8, 5  ;;  %v2393_v5 = vrot.slane %v2323_v59, 5  ;;  %v2564_v12 = vsel %vm511_vm1, %v2561_v33, %v2563_v28  ;;  %v2568_v10 = vrot.slane %v8303_v20, 1 }
 0x471   : > { %v2567_v27 = vsel %vm511_vm1, %v2565_v43, %v2566_v31  ;;  %v2199_v59 = vmul.f32 0.03125, %v8223_v46 }
 0x472   : > { %v8323_v51 = vsel %vm2381_vm6, %v2394_v2, 0.0  ;;  %v8326_v11 = vsel %vm2381_vm6, %v2393_v5, %v2394_v2  ;;  %v8329_v52 = vsel %vm2381_vm6, 0.0, %v2393_v5  ;;  %v2249_v50 = vpop.xlane.xlu1 %2248  ;;  %2645 = vrot.lane.b32.xlu1 %v2564_v12, %s6334_s21  ;;  %2647 = vrot.lane.b32.xlu0 %v2567_v27, %s6334_s21  ;;  %v2246_v23 = vpop.xlane.xlu0 %2245  ;;  %v2198_v5 = vmul.f32 0.03125, %v8225_v42 }
 0x473   : > { %v2326_v33 = vsel %vm2316_vm10, %v2197_v37, %v2249_v50  ;;  %v2325_v28 = vsel %vm2316_vm10, %v2196_v40, %v2246_v23  ;;  %v2570_v38 = vrot.slane %v8329_v52, 1  ;;  %v2571_v8 = vrot.slane %v8326_v11, 1 }
 0x474   : > { %v2397_v43 = vrot.slane %v2326_v33, 5  ;;  %v2396_v2 = vrot.slane %v2325_v28, 5  ;;  %v2569_v9 = vsel %vm511_vm1, %v2566_v31, %v2568_v10  ;;  %v2573_v27 = vrot.slane %v8323_v51, 1 }
 0x475   : > { %v2572_v12 = vsel %vm511_vm1, %v2570_v38, %v2571_v8  ;;  %v2201_v28 = vmul.f32 0.03125, %v8227_v45 }
 0x476   : > { %v8343_v37 = vsel %vm2381_vm6, %v2397_v43, 0.0  ;;  %v8346_v40 = vsel %vm2381_vm6, %v2396_v2, %v2397_v43  ;;  %v8349_v50 = vsel %vm2381_vm6, 0.0, %v2396_v2  ;;  %v2255_v46 = vpop.xlane.xlu1 %2254  ;;  %2649 = vrot.lane.b32.xlu1 %v2569_v9, %s6334_s21  ;;  %2651 = vrot.lane.b32.xlu0 %v2572_v12, %s6334_s21  ;;  %v2252_v42 = vpop.xlane.xlu0 %2251  ;;  %v2200_v2 = vmul.f32 0.03125, %v8229_v1 }
 0x477   : > { %v2328_v31 = vsel %vm2316_vm10, %v2199_v59, %v2255_v46  ;;  %v2327_v10 = vsel %vm2316_vm10, %v2198_v5, %v2252_v42  ;;  %v2575_v23 = vrot.slane %v8349_v50, 1  ;;  %v2576_v33 = vrot.slane %v8346_v40, 1 }
 0x478   : > { %v2400_v38 = vrot.slane %v2328_v31, 5  ;;  %v2399_v43 = vrot.slane %v2327_v10, 5  ;;  %v2574_v25 = vsel %vm511_vm1, %v2571_v8, %v2573_v27  ;;  %v2578_v12 = vrot.slane %v8343_v37, 1 }
 0x479   : > { %v2577_v9 = vsel %vm511_vm1, %v2575_v23, %v2576_v33  ;;  %v2203_v10 = vmul.f32 0.03125, %v8231_v19 }
 0x47a   : > { %v8363_v59 = vsel %vm2381_vm6, %v2400_v38, 0.0  ;;  %v8366_v5 = vsel %vm2381_vm6, %v2399_v43, %v2400_v38  ;;  %v8369_v46 = vsel %vm2381_vm6, 0.0, %v2399_v43  ;;  %v2261_v45 = vpop.xlane.xlu1 %2260  ;;  %2653 = vrot.lane.b32.xlu1 %v2574_v25, %s6334_s21  ;;  %2655 = vrot.lane.b32.xlu0 %v2577_v9, %s6334_s21  ;;  %v2258_v1 = vpop.xlane.xlu0 %2257  ;;  %v2202_v43 = vmul.f32 0.03125, %v8233_v14 }
 0x47b   : > { %v2330_v8 = vsel %vm2316_vm10, %v2201_v28, %v2261_v45  ;;  %v2329_v27 = vsel %vm2316_vm10, %v2200_v2, %v2258_v1  ;;  %v2580_v42 = vrot.slane %v8369_v46, 1  ;;  %v2581_v31 = vrot.slane %v8366_v5, 1 }
 0x47c   : > { %v2403_v23 = vrot.slane %v2330_v8, 5  ;;  %v2402_v38 = vrot.slane %v2329_v27, 5  ;;  %v2579_v30 = vsel %vm511_vm1, %v2576_v33, %v2578_v12  ;;  %v2583_v9 = vrot.slane %v8363_v59, 1 }
 0x47d   : > { %v2582_v25 = vsel %vm511_vm1, %v2580_v42, %v2581_v31  ;;  %v2205_v27 = vmul.f32 0.03125, %v8235_v13 }
 0x47e   : > { %v8383_v28 = vsel %vm2381_vm6, %v2403_v23, 0.0  ;;  %v8386_v2 = vsel %vm2381_vm6, %v2402_v38, %v2403_v23  ;;  %v8389_v45 = vsel %vm2381_vm6, 0.0, %v2402_v38  ;;  %v2267_v19 = vpop.xlane.xlu1 %2266  ;;  %2657 = vrot.lane.b32.xlu1 %v2579_v30, %s6334_s21  ;;  %2659 = vrot.lane.b32.xlu0 %v2582_v25, %s6334_s21  ;;  %v2264_v14 = vpop.xlane.xlu0 %2263  ;;  %v2204_v38 = vmul.f32 0.03125, %v8237_v26 }
 0x47f   : > { %v2332_v33 = vsel %vm2316_vm10, %v2203_v10, %v2267_v19  ;;  %v2331_v12 = vsel %vm2316_vm10, %v2202_v43, %v2264_v14  ;;  %v2585_v1 = vrot.slane %v8389_v45, 1  ;;  %v2586_v8 = vrot.slane %v8386_v2, 1 }
 0x480   : > { %v2406_v42 = vrot.slane %v2332_v33, 5  ;;  %v2405_v23 = vrot.slane %v2331_v12, 5  ;;  %v2584_v56 = vsel %vm511_vm1, %v2581_v31, %v2583_v9  ;;  %v2588_v25 = vrot.slane %v8383_v28, 1 }
 0x481   : > { %v2587_v30 = vsel %vm511_vm1, %v2585_v1, %v2586_v8  ;;  %v2207_v12 = vmul.f32 0.03125, %v8239_v32 }
 0x482   : > { %v8403_v10 = vsel %vm2381_vm6, %v2406_v42, 0.0  ;;  %v8406_v43 = vsel %vm2381_vm6, %v2405_v23, %v2406_v42  ;;  %v8409_v19 = vsel %vm2381_vm6, 0.0, %v2405_v23  ;;  %v2273_v13 = vpop.xlane.xlu1 %2272  ;;  %2661 = vrot.lane.b32.xlu1 %v2584_v56, %s6334_s21  ;;  %2663 = vrot.lane.b32.xlu0 %v2587_v30, %s6334_s21  ;;  %v2270_v26 = vpop.xlane.xlu0 %2269  ;;  %v2206_v23 = vmul.f32 0.03125, %v8241_v47 }
 0x483   : > { %v2334_v31 = vsel %vm2316_vm10, %v2205_v27, %v2273_v13  ;;  %v2333_v9 = vsel %vm2316_vm10, %v2204_v38, %v2270_v26  ;;  %v2590_v14 = vrot.slane %v8409_v19, 1  ;;  %v2591_v33 = vrot.slane %v8406_v43, 1 }
 0x484   : > { %v2409_v1 = vrot.slane %v2334_v31, 5  ;;  %v2408_v42 = vrot.slane %v2333_v9, 5  ;;  %v2589_v17 = vsel %vm511_vm1, %v2586_v8, %v2588_v25  ;;  %v2593_v30 = vrot.slane %v8403_v10, 1 }
 0x485   : > { %v2592_v56 = vsel %vm511_vm1, %v2590_v14, %v2591_v33  ;;  %v2209_v9 = vmul.f32 0.03125, %v8243_v48 }
 0x486   : > { %v8423_v27 = vsel %vm2381_vm6, %v2409_v1, 0.0  ;;  %v8426_v38 = vsel %vm2381_vm6, %v2408_v42, %v2409_v1  ;;  %v8429_v13 = vsel %vm2381_vm6, 0.0, %v2408_v42  ;;  %v2279_v32 = vpop.xlane.xlu1 %2278  ;;  %2665 = vrot.lane.b32.xlu1 %v2589_v17, %s6334_s21  ;;  %2667 = vrot.lane.b32.xlu0 %v2592_v56, %s6334_s21  ;;  %v2276_v47 = vpop.xlane.xlu0 %2275  ;;  %v2208_v42 = vmul.f32 0.03125, %v8245_v4 }
 0x487   : > { %v2336_v8 = vsel %vm2316_vm10, %v2207_v12, %v2279_v32  ;;  %v2335_v25 = vsel %vm2316_vm10, %v2206_v23, %v2276_v47  ;;  %v2595_v26 = vrot.slane %v8429_v13, 1  ;;  %v2596_v31 = vrot.slane %v8426_v38, 1 }
 0x488   : > { %v2412_v14 = vrot.slane %v2336_v8, 5  ;;  %v2411_v1 = vrot.slane %v2335_v25, 5  ;;  %v2594_v49 = vsel %vm511_vm1, %v2591_v33, %v2593_v30  ;;  %v2598_v56 = vrot.slane %v8423_v27, 1 }
 0x489   : > { %v2597_v17 = vsel %vm511_vm1, %v2595_v26, %v2596_v31  ;;  %v2211_v25 = vmul.f32 0.03125, %v8247_v24 }
 0x48a   : > { %v8443_v12 = vsel %vm2381_vm6, %v2412_v14, 0.0  ;;  %v8446_v23 = vsel %vm2381_vm6, %v2411_v1, %v2412_v14  ;;  %v8449_v32 = vsel %vm2381_vm6, 0.0, %v2411_v1  ;;  %v2285_v48 = vpop.xlane.xlu1 %2284  ;;  %2669 = vrot.lane.b32.xlu1 %v2594_v49, %s6334_s21  ;;  %2671 = vrot.lane.b32.xlu0 %v2597_v17, %s6334_s21  ;;  %v2282_v4 = vpop.xlane.xlu0 %2281  ;;  %v2210_v1 = vmul.f32 0.03125, %v8249_v54 }
 0x48b   : > { %v2338_v33 = vsel %vm2316_vm10, %v2209_v9, %v2285_v48  ;;  %v2337_v30 = vsel %vm2316_vm10, %v2208_v42, %v2282_v4  ;;  %v2600_v47 = vrot.slane %v8449_v32, 1  ;;  %v2601_v8 = vrot.slane %v8446_v23, 1 }
 0x48c   : > { %v2415_v26 = vrot.slane %v2338_v33, 5  ;;  %v2414_v14 = vrot.slane %v2337_v30, 5  ;;  %v2599_v6 = vsel %vm511_vm1, %v2596_v31, %v2598_v56  ;;  %v2603_v17 = vrot.slane %v8443_v12, 1 }
 0x48d   : > { %v2602_v49 = vsel %vm511_vm1, %v2600_v47, %v2601_v8  ;;  %v2213_v30 = vmul.f32 0.03125, %v8251_v18 }
 0x48e   : > { %v8463_v9 = vsel %vm2381_vm6, %v2415_v26, 0.0  ;;  %v8466_v42 = vsel %vm2381_vm6, %v2414_v14, %v2415_v26  ;;  %v8469_v48 = vsel %vm2381_vm6, 0.0, %v2414_v14  ;;  %v2291_v24 = vpop.xlane.xlu1 %2290  ;;  %2673 = vrot.lane.b32.xlu1 %v2599_v6, %s6334_s21  ;;  %2675 = vrot.lane.b32.xlu0 %v2602_v49, %s6334_s21  ;;  %v2288_v54 = vpop.xlane.xlu0 %2287  ;;  %v2212_v14 = vmul.f32 0.03125, %v8253_v29 }
 0x48f   : > { %v2340_v31 = vsel %vm2316_vm10, %v2211_v25, %v2291_v24  ;;  %v2339_v56 = vsel %vm2316_vm10, %v2210_v1, %v2288_v54  ;;  %v2605_v4 = vrot.slane %v8469_v48, 1  ;;  %v2606_v33 = vrot.slane %v8466_v42, 1 }
 0x490   : > { %v2418_v47 = vrot.slane %v2340_v31, 5  ;;  %v2417_v26 = vrot.slane %v2339_v56, 5  ;;  %v2604_v53 = vsel %vm511_vm1, %v2601_v8, %v2603_v17  ;;  %v2608_v49 = vrot.slane %v8463_v9, 1 }
 0x491   : > { %v2607_v6 = vsel %vm511_vm1, %v2605_v4, %v2606_v33  ;;  %v2215_v56 = vmul.f32 0.03125, %v8255_v62 }
 0x492   : > { %v8483_v25 = vsel %vm2381_vm6, %v2418_v47, 0.0  ;;  %v8486_v1 = vsel %vm2381_vm6, %v2417_v26, %v2418_v47  ;;  %v8489_v24 = vsel %vm2381_vm6, 0.0, %v2417_v26  ;;  %v2297_v18 = vpop.xlane.xlu1 %2296  ;;  %2677 = vrot.lane.b32.xlu1 %v2604_v53, %s6334_s21  ;;  %2679 = vrot.lane.b32.xlu0 %v2607_v6, %s6334_s21  ;;  %v2294_v29 = vpop.xlane.xlu0 %2293  ;;  %v2214_v26 = vmul.f32 0.03125, %v8257_v44 }
 0x493   : > { %11004 = vst [vmem:[#allocation42_spill] sm:$0xff] %v8489_v24  ;;  %v2342_v8 = vsel %vm2316_vm10, %v2213_v30, %v2297_v18  ;;  %v2341_v17 = vsel %vm2316_vm10, %v2212_v14, %v2294_v29  ;;  %v2610_v54 = vrot.slane %v8489_v24, 1  ;;  %v2611_v31 = vrot.slane %v8486_v1, 1 }
 0x494   : > { %v2421_v4 = vrot.slane %v2342_v8, 5  ;;  %v2420_v47 = vrot.slane %v2341_v17, 5  ;;  %v2609_v21 = vsel %vm511_vm1, %v2606_v33, %v2608_v49  ;;  %v2613_v6 = vrot.slane %v8483_v25, 1 }
 0x495   : > { %v2612_v53 = vsel %vm511_vm1, %v2610_v54, %v2611_v31  ;;  %v2217_v17 = vmul.f32 0.03125, %v8259_v57 }
 0x496   : > { %v8503_v30 = vsel %vm2381_vm6, %v2421_v4, 0.0  ;;  %v8506_v14 = vsel %vm2381_vm6, %v2420_v47, %v2421_v4  ;;  %v8509_v18 = vsel %vm2381_vm6, 0.0, %v2420_v47  ;;  %v2303_v62 = vpop.xlane.xlu1 %2302  ;;  %2681 = vrot.lane.b32.xlu1 %v2609_v21, %s6334_s21  ;;  %2683 = vrot.lane.b32.xlu0 %v2612_v53, %s6334_s21  ;;  %v2300_v44 = vpop.xlane.xlu0 %2299  ;;  %v2216_v47 = vmul.f32 0.03125, %v8261_v22 }
 0x497   : > { %11005 = vst [vmem:[#allocation43_spill] sm:$0xff] %v8506_v14  ;;  %11006 = vst [vmem:[#allocation44_spill] sm:$0xff] %v8509_v18  ;;  %v2344_v33 = vsel %vm2316_vm10, %v2215_v56, %v2303_v62  ;;  %v2343_v49 = vsel %vm2316_vm10, %v2214_v26, %v2300_v44  ;;  %v2615_v29 = vrot.slane %v8509_v18, 1  ;;  %v2616_v8 = vrot.slane %v8506_v14, 1 }
 0x498   : > { %v2424_v54 = vrot.slane %v2344_v33, 5  ;;  %v2423_v4 = vrot.slane %v2343_v49, 5  ;;  %v2614_v34 = vsel %vm511_vm1, %v2611_v31, %v2613_v6  ;;  %v2618_v53 = vrot.slane %v8503_v30, 1 }
 0x499   : > { %v2617_v21 = vsel %vm511_vm1, %v2615_v29, %v2616_v8  ;;  %v2219_v49 = vmul.f32 0.03125, %v8263_v15 }
 0x49a   : > { %v8523_v56 = vsel %vm2381_vm6, %v2424_v54, 0.0  ;;  %v8526_v26 = vsel %vm2381_vm6, %v2423_v4, %v2424_v54  ;;  %v8529_v62 = vsel %vm2381_vm6, 0.0, %v2423_v4  ;;  %v2309_v57 = vpop.xlane.xlu1 %2308  ;;  %2685 = vrot.lane.b32.xlu1 %v2614_v34, %s6334_s21  ;;  %2687 = vrot.lane.b32.xlu0 %v2617_v21, %s6334_s21  ;;  %v2306_v22 = vpop.xlane.xlu0 %2305  ;;  %v2218_v4 = vmul.f32 0.03125, %v8265_v35 }
 0x49b   : > { %11007 = vst [vmem:[#allocation45_spill] sm:$0xff] %v8526_v26  ;;  %11008 = vst [vmem:[#allocation46_spill] sm:$0xff] %v8529_v62  ;;  %v2346_v31 = vsel %vm2316_vm10, %v2217_v17, %v2309_v57  ;;  %v2345_v6 = vsel %vm2316_vm10, %v2216_v47, %v2306_v22  ;;  %v2620_v44 = vrot.slane %v8529_v62, 1  ;;  %v2621_v33 = vrot.slane %v8526_v26, 1 }
 0x49c   : > { %v2427_v29 = vrot.slane %v2346_v31, 5  ;;  %v2426_v54 = vrot.slane %v2345_v6, 5  ;;  %v2619_v0 = vsel %vm511_vm1, %v2616_v8, %v2618_v53  ;;  %v2623_v21 = vrot.slane %v8523_v56, 1 }
 0x49d   : > { %v2622_v34 = vsel %vm511_vm1, %v2620_v44, %v2621_v33 }
 0x49e   : > { %v8543_v17 = vsel %vm2381_vm6, %v2427_v29, 0.0  ;;  %v8546_v47 = vsel %vm2381_vm6, %v2426_v54, %v2427_v29  ;;  %v8549_v57 = vsel %vm2381_vm6, 0.0, %v2426_v54  ;;  %v2315_v15 = vpop.xlane.xlu1 %2314  ;;  %2689 = vrot.lane.b32.xlu1 %v2619_v0, %s6334_s21  ;;  %2691 = vrot.lane.b32.xlu0 %v2622_v34, %s6334_s21  ;;  %v2312_v35 = vpop.xlane.xlu0 %2311  ;;  %v2624_v29 = vsel %vm511_vm1, %v2621_v33, %v2623_v21 }
 0x49f   : > { %11009 = vst [vmem:[#allocation47_spill] sm:$0xff] %v8546_v47  ;;  %11010 = vst [vmem:[#allocation48_spill] sm:$0xff] %v8549_v57  ;;  %v2348_v8 = vsel %vm2316_vm10, %v2219_v49, %v2315_v15  ;;  %v2347_v53 = vsel %vm2316_vm10, %v2218_v4, %v2312_v35  ;;  %v2625_v22 = vrot.slane %v8549_v57, 1  ;;  %v2626_v31 = vrot.slane %v8546_v47, 1 }
 0x4a0   : > { %v2430_v6 = vrot.slane %v2348_v8, 5  ;;  %v2429_v44 = vrot.slane %v2347_v53, 5  ;;  %v2628_v58 = vrot.slane %v8543_v17, 1  ;;  %v2743_v21 = vrot.slane %v8273_v55, 2 }
 0x4a1   : > { %v2627_v54 = vsel %vm511_vm1, %v2625_v22, %v2626_v31  ;;  %v2745_v53 = vrot.slane %v8270_v41, 2  ;;  %v2742_v22 = vrot.slane %v8276_v61, 2 }
 0x4a2   : > { %v8561_v0 = vsel %vm2381_vm6, %v2430_v6, 0.0  ;;  %v8564_v34 = vsel %vm2381_vm6, %v2429_v44, %v2430_v6  ;;  %v8567_v49 = vsel %vm2381_vm6, 0.0, %v2429_v44  ;;  %2693 = vrot.lane.b32.xlu1 %v2624_v29, %s6334_s21  ;;  %2695 = vrot.lane.b32.xlu0 %v2627_v54, %s6334_s21  ;;  %v2629_v15 = vsel %vm511_vm1, %v2626_v31, %v2628_v58 }
 0x4a3   : > { %11011 = vst [vmem:[#allocation49_spill] sm:$0xff] %v8564_v34  ;;  %11012 = vst [vmem:[#allocation50_spill] sm:$0xff] %v8567_v49  ;;  %v2630_v4 = vrot.slane %v8567_v49, 1  ;;  %v2631_v33 = vrot.slane %v8564_v34, 1  ;;  %v2633_v8 = vrot.slane %v8561_v0, 1  ;;  %v2746_v44 = vsel %vm699_vm2, %v2743_v21, %v2745_v53 }
 0x4a4   : > { %v2748_v29 = vrot.slane %v8288_v16, 2  ;;  %v2750_v58 = vrot.slane %v8285_v7, 2  ;;  %v2747_v31 = vrot.slane %v8291_v63, 2  ;;  %v2744_v54 = vsel %vm699_vm2, %v2742_v22, %v2743_v21 }
 0x4a5   : > { %v2632_v35 = vsel %vm511_vm1, %v2630_v4, %v2631_v33  ;;  %v2634_v6 = vsel %vm511_vm1, %v2631_v33, %v2633_v8  ;;  %v2755_v33 = vrot.slane %v8303_v20, 2  ;;  %v2752_v53 = vrot.slane %v8309_v36, 2 }
 0x4a6   : > { %2697 = vrot.lane.b32.xlu1 %v2629_v15, %s6334_s21  ;;  %2699 = vrot.lane.b32.xlu0 %v2632_v35, %s6334_s21  ;;  %v2751_v4 = vsel %vm699_vm2, %v2748_v29, %v2750_v58  ;;  %v2753_v15 = vrot.slane %v8306_v39, 2  ;;  %v2749_v35 = vsel %vm699_vm2, %v2747_v31, %v2748_v29  ;;  %v2760_v21 = vrot.slane %v8323_v51, 2 }
 0x4a7   : > { %v2757_v22 = vrot.slane %v8329_v52, 2  ;;  %v2763_v29 = vrot.slane %v8346_v40, 2  ;;  %v2765_v31 = vrot.slane %v8343_v37, 2  ;;  %vm4467_vm1 = vcmask 113664  }
 0x4a8   : > { %v2756_v8 = vsel %vm699_vm2, %v2753_v15, %v2755_v33  ;;  %v2762_v33 = vrot.slane %v8349_v50, 2 }
 0x4aa   : > { %2701 = vrot.lane.b32.xlu1 %v2634_v6, %s6334_s21  ;;  %2828 = vrot.lane.b32.xlu0 %v2746_v44, %s6330_s18  ;;  %v2758_v6 = vrot.slane %v8326_v11, 2  ;;  %v2754_v44 = vsel %vm699_vm2, %v2752_v53, %v2753_v15  ;;  %v2770_v15 = vrot.slane %v8363_v59, 2  ;;  %v2764_v53 = vsel %vm699_vm2, %v2762_v33, %v2763_v29  ;;  %s6344_s21 = smov [#allocation2]  }
 0x4ac   : > { %v2761_v58 = vsel %vm699_vm2, %v2758_v6, %v2760_v21 }
 0x4ae   : > { %2826 = vrot.lane.b32.xlu1 %v2744_v54, %s6330_s18  ;;  %2832 = vrot.lane.b32.xlu0 %v2751_v4, %s6330_s18  ;;  %v2759_v54 = vsel %vm699_vm2, %v2757_v22, %v2758_v6  ;;  %v2766_v4 = vsel %vm699_vm2, %v2763_v29, %v2765_v31  ;;  %v2773_v6 = vrot.slane %v8386_v2, 2  ;;  %v2775_v22 = vrot.slane %v8383_v28, 2 }
 0x4af   : > { %v2772_v31 = vrot.slane %v8389_v45, 2  ;;  %v2780_v29 = vrot.slane %v8403_v10, 2 }
 0x4b1   : > { %v2774_v33 = vsel %vm699_vm2, %v2772_v31, %v2773_v6 }
 0x4b2   : > { %2830 = vrot.lane.b32.xlu1 %v2749_v35, %s6330_s18  ;;  %2836 = vrot.lane.b32.xlu0 %v2756_v8, %s6330_s18  ;;  %v2768_v35 = vrot.slane %v8366_v5, 2  ;;  %v2767_v8 = vrot.slane %v8369_v46, 2 }
 0x4b4   : > { %v2771_v21 = vsel %vm699_vm2, %v2768_v35, %v2770_v15 }
 0x4b6   : > { %2834 = vrot.lane.b32.xlu1 %v2754_v44, %s6330_s18  ;;  %2840 = vrot.lane.b32.xlu0 %v2761_v58, %s6330_s18  ;;  %v2769_v44 = vsel %vm699_vm2, %v2767_v8, %v2768_v35  ;;  %v2776_v58 = vsel %vm699_vm2, %v2773_v6, %v2775_v22  ;;  %v2783_v35 = vrot.slane %v8426_v38, 2  ;;  %v2785_v8 = vrot.slane %v8423_v27, 2 }
 0x4b7   : > { %v2782_v22 = vrot.slane %v8429_v13, 2  ;;  %v2790_v6 = vrot.slane %v8443_v12, 2 }
 0x4b9   : > { %v2784_v31 = vsel %vm699_vm2, %v2782_v22, %v2783_v35 }
 0x4ba   : > { %2838 = vrot.lane.b32.xlu1 %v2759_v54, %s6330_s18  ;;  %2844 = vrot.lane.b32.xlu0 %v2766_v4, %s6330_s18  ;;  %v2778_v54 = vrot.slane %v8406_v43, 2  ;;  %v2777_v4 = vrot.slane %v8409_v19, 2 }
 0x4bc   : > { %v2781_v15 = vsel %vm699_vm2, %v2778_v54, %v2780_v29 }
 0x4be   : > { %2842 = vrot.lane.b32.xlu1 %v2764_v53, %s6330_s18  ;;  %2848 = vrot.lane.b32.xlu0 %v2771_v21, %s6330_s18  ;;  %v2779_v53 = vsel %vm699_vm2, %v2777_v4, %v2778_v54  ;;  %v2786_v21 = vsel %vm699_vm2, %v2783_v35, %v2785_v8  ;;  %v2793_v54 = vrot.slane %v8466_v42, 2  ;;  %v2795_v4 = vrot.slane %v8463_v9, 2 }
 0x4bf   : > { %v2792_v8 = vrot.slane %v8469_v48, 2  ;;  %v2800_v35 = vrot.slane %v8483_v25, 2 }
 0x4c1   : > { %v2794_v22 = vsel %vm699_vm2, %v2792_v8, %v2793_v54  ;;  %v2807_v8 = vrot.slane %v8529_v62, 2 }
 0x4c2   : > { %2846 = vrot.lane.b32.xlu1 %v2769_v44, %s6330_s18  ;;  %2852 = vrot.lane.b32.xlu0 %v2776_v58, %s6330_s18  ;;  %v2788_v44 = vrot.slane %v8446_v23, 2  ;;  %v2787_v58 = vrot.slane %v8449_v32, 2 }
 0x4c4   : > { %v2791_v29 = vsel %vm699_vm2, %v2788_v44, %v2790_v6 }
 0x4c6   : > { %2850 = vrot.lane.b32.xlu1 %v2774_v33, %s6330_s18  ;;  %2856 = vrot.lane.b32.xlu0 %v2781_v15, %s6330_s18  ;;  %v2789_v33 = vsel %vm699_vm2, %v2787_v58, %v2788_v44  ;;  %v2796_v15 = vsel %vm699_vm2, %v2793_v54, %v2795_v4  ;;  %v2803_v44 = vrot.slane %v8506_v14, 2  ;;  %v2805_v58 = vrot.slane %v8503_v30, 2 }
 0x4c7   : > { %v2802_v4 = vrot.slane %v8509_v18, 2  ;;  %v2810_v54 = vrot.slane %v8523_v56, 2 }
 0x4ca   : > { %2854 = vrot.lane.b32.xlu1 %v2779_v53, %s6330_s18  ;;  %2860 = vrot.lane.b32.xlu0 %v2786_v21, %s6330_s18  ;;  %v2798_v53 = vrot.slane %v8486_v1, 2  ;;  %v2797_v21 = vrot.slane %v8489_v24, 2 }
 0x4cc   : > { %v2801_v6 = vsel %vm699_vm2, %v2798_v53, %v2800_v35  ;;  %v2804_v35 = vsel %vm699_vm2, %v2802_v4, %v2803_v44  ;;  %v2818_v4 = vrot.slane %v8564_v34, 2 }
 0x4ce   : > { %2858 = vrot.lane.b32.xlu1 %v2784_v31, %s6330_s18  ;;  %2864 = vrot.lane.b32.xlu0 %v2791_v29, %s6330_s18  ;;  %v2799_v31 = vsel %vm699_vm2, %v2797_v21, %v2798_v53  ;;  %v2806_v29 = vsel %vm699_vm2, %v2803_v44, %v2805_v58  ;;  %v2813_v21 = vrot.slane %v8546_v47, 2  ;;  %v2812_v44 = vrot.slane %v8549_v57, 2 }
 0x4d2   : > { %2862 = vrot.lane.b32.xlu1 %v2789_v33, %s6330_s18  ;;  %2868 = vrot.lane.b32.xlu0 %v2796_v15, %s6330_s18  ;;  %v2808_v33 = vrot.slane %v8526_v26, 2 }
 0x4d4   : > { %v2811_v53 = vsel %vm699_vm2, %v2808_v33, %v2810_v54  ;;  %v2820_v54 = vrot.slane %v8561_v0, 2 }
 0x4d6   : > { %2866 = vrot.lane.b32.xlu1 %v2794_v22, %s6330_s18  ;;  %2872 = vrot.lane.b32.xlu0 %v2801_v6, %s6330_s18  ;;  %v2815_v22 = vrot.slane %v8543_v17, 2 }
 0x4da   : > { %2870 = vrot.lane.b32.xlu1 %v2799_v31, %s6330_s18  ;;  %2876 = vrot.lane.b32.xlu0 %v2806_v29, %s6330_s18  ;;  %v2809_v31 = vsel %vm699_vm2, %v2807_v8, %v2808_v33  ;;  %v2816_v29 = vsel %vm699_vm2, %v2813_v21, %v2815_v22  ;;  %v2814_v33 = vsel %vm699_vm2, %v2812_v44, %v2813_v21  ;;  %v2817_v22 = vrot.slane %v8567_v49, 2 }
 0x4db   : > { %v2821_v8 = vsel %vm699_vm2, %v2818_v4, %v2820_v54  ;;  %v2932_v21 = vsel %vm2924_vm7, %v2930_v3, %v2931_v60  ;;  %v2935_v44 = vrot.slane %v8291_v63, 3  ;;  %v2936_v54 = vrot.slane %v8288_v16, 3 }
 0x4dc   : > { %v8671_v15 = vpop.permute.xlu1 %2639  ;;  %v2940_v3 = vrot.slane %v8309_v36, 3 }
 0x4dd   : > { %11013 = vst [vmem:[#allocation51_spill] sm:$0xff] %v8671_v15 }
 0x4de   : > { %2874 = vrot.lane.b32.xlu1 %v2804_v35, %s6330_s18  ;;  %2880 = vrot.lane.b32.xlu0 %v2811_v53, %s6330_s18 }
 0x4e0   : > { %v8680_v6 = vpop.permute.xlu1 %2641  ;;  %v8682_v58 = vpop.permute.xlu0 %2643 }
 0x4e1   : > { %11014 = vst [vmem:[#allocation52_spill] sm:$0xff] %v8682_v58  ;;  %v2819_v58 = vsel %vm699_vm2, %v2817_v22, %v2818_v4  ;;  %v2937_v4 = vsel %vm2924_vm7, %v2935_v44, %v2936_v54  ;;  %v2941_v22 = vrot.slane %v8306_v39, 3  ;;  %v2946_v44 = vrot.slane %v8326_v11, 3 }
 0x4e2   : > { %2878 = vrot.lane.b32.xlu1 %v2809_v31, %s6330_s18  ;;  %2884 = vrot.lane.b32.xlu0 %v2816_v29, %s6330_s18  ;;  %vm4531_vm2 = vcmask 343040  }
 0x4e4   : > { %v8691_v35 = vpop.permute.xlu1 %2645  ;;  %v8693_v53 = vpop.permute.xlu0 %2647 }
 0x4e5   : > { %11015 = vst [vmem:[#allocation53_spill] sm:$0xff] %v8691_v35  ;;  %11016 = vst [vmem:[#allocation54_spill] sm:$0xff] %v8693_v53  ;;  %v2933_v53 = vrot.slane %v8270_v41, 3 }
 0x4e6   : > { %2882 = vrot.lane.b32.xlu1 %v2814_v33, %s6330_s18  ;;  %2888 = vrot.lane.b32.xlu0 %v2821_v8, %s6330_s18 }
 0x4e8   : > { %v8702_v31 = vpop.permute.xlu1 %2649  ;;  %v8704_v29 = vpop.permute.xlu0 %2651 }
 0x4e9   : > { %11017 = vst [vmem:[#allocation55_spill] sm:$0xff] %v8702_v31  ;;  %11018 = vst [vmem:[#allocation56_spill] sm:$0xff] %v8704_v29  ;;  %v2938_v29 = vrot.slane %v8285_v7, 3  ;;  %v2934_v31 = vsel %vm2924_vm7, %v2931_v60, %v2933_v53  ;;  %v2943_v60 = vrot.slane %v8303_v20, 3  ;;  %v2945_v53 = vrot.slane %v8329_v52, 3 }
 0x4ea   : > { %2886 = vrot.lane.b32.xlu1 %v2819_v58, %s6330_s18  ;;  %3014 = vrot.lane.b32.xlu0 %v2932_v21, %s6335_s22 }
 0x4ec   : > { %v8713_v33 = vpop.permute.xlu1 %2653  ;;  %v8715_v8 = vpop.permute.xlu0 %2655 }
 0x4ed   : > { %11019 = vst [vmem:[#allocation57_spill] sm:$0xff] %v8713_v33  ;;  %11020 = vst [vmem:[#allocation58_spill] sm:$0xff] %v8715_v8  ;;  %v2939_v8 = vsel %vm2924_vm7, %v2936_v54, %v2938_v29  ;;  %v2942_v33 = vsel %vm2924_vm7, %v2940_v3, %v2941_v22  ;;  %v2944_v29 = vsel %vm2924_vm7, %v2941_v22, %v2943_v60  ;;  %v2950_v3 = vrot.slane %v8349_v50, 3 }
 0x4ee   : > { %3016 = vrot.lane.b32.xlu1 %v2934_v31, %s6335_s22  ;;  %3018 = vrot.lane.b32.xlu0 %v2937_v4, %s6335_s22  ;;  %v2947_v54 = vsel %vm2924_vm7, %v2945_v53, %v2946_v44  ;;  %v2955_v60 = vrot.slane %v8369_v46, 3  ;;  %v2956_v53 = vrot.slane %v8366_v5, 3 }
 0x4f0   : > { %v8724_v58 = vpop.permute.xlu1 %2657  ;;  %v8726_v21 = vpop.permute.xlu0 %2659 }
 0x4f1   : > { %11021 = vst [vmem:[#allocation59_spill] sm:$0xff] %v8724_v58  ;;  %11022 = vst [vmem:[#allocation60_spill] sm:$0xff] %v8726_v21  ;;  %v2948_v21 = vrot.slane %v8323_v51, 3  ;;  %v2951_v58 = vrot.slane %v8346_v40, 3 }
 0x4f2   : > { %3020 = vrot.lane.b32.xlu1 %v2939_v8, %s6335_s22  ;;  %3022 = vrot.lane.b32.xlu0 %v2942_v33, %s6335_s22 }
 0x4f3   : > { %v2952_v22 = vsel %vm2924_vm7, %v2950_v3, %v2951_v58  ;;  %v2961_v3 = vrot.slane %v8386_v2, 3 }
 0x4f4   : > { %v8735_v31 = vpop.permute.xlu1 %2661  ;;  %v8737_v4 = vpop.permute.xlu0 %2663 }
 0x4f5   : > { %11023 = vst [vmem:[#allocation61_spill] sm:$0xff] %v8735_v31  ;;  %11024 = vst [vmem:[#allocation62_spill] sm:$0xff] %v8737_v4  ;;  %v2953_v4 = vrot.slane %v8343_v37, 3  ;;  %v2949_v31 = vsel %vm2924_vm7, %v2946_v44, %v2948_v21  ;;  %v2957_v21 = vsel %vm2924_vm7, %v2955_v60, %v2956_v53  ;;  %v2960_v44 = vrot.slane %v8389_v45, 3 }
 0x4f6   : > { %3024 = vrot.lane.b32.xlu1 %v2944_v29, %s6335_s22  ;;  %3026 = vrot.lane.b32.xlu0 %v2947_v54, %s6335_s22  ;;  %v2966_v60 = vrot.slane %v8406_v43, 3 }
 0x4f8   : > { %v8746_v8 = vpop.permute.xlu1 %2665  ;;  %v8748_v33 = vpop.permute.xlu0 %2667 }
 0x4f9   : > { %11025 = vst [vmem:[#allocation63_spill] sm:$0xff] %v8746_v8  ;;  %11026 = vst [vmem:[#allocation64_spill] sm:$0xff] %v8748_v33  ;;  %v2958_v33 = vrot.slane %v8363_v59, 3  ;;  %v2954_v8 = vsel %vm2924_vm7, %v2951_v58, %v2953_v4  ;;  %v2962_v58 = vsel %vm2924_vm7, %v2960_v44, %v2961_v3  ;;  %v2965_v4 = vrot.slane %v8409_v19, 3 }
 0x4fa   : > { %3028 = vrot.lane.b32.xlu1 %v2949_v31, %s6335_s22  ;;  %3030 = vrot.lane.b32.xlu0 %v2952_v22, %s6335_s22  ;;  %v2971_v44 = vrot.slane %v8426_v38, 3 }
 0x4fc   : > { %v8757_v29 = vpop.permute.xlu1 %2669  ;;  %v8759_v54 = vpop.permute.xlu0 %2671 }
 0x4fd   : > { %11027 = vst [vmem:[#allocation65_spill] sm:$0xff] %v8757_v29  ;;  %11028 = vst [vmem:[#allocation66_spill] sm:$0xff] %v8759_v54  ;;  %v2963_v54 = vrot.slane %v8383_v28, 3  ;;  %v2959_v29 = vsel %vm2924_vm7, %v2956_v53, %v2958_v33  ;;  %v2968_v33 = vrot.slane %v8403_v10, 3  ;;  %v2970_v53 = vrot.slane %v8429_v13, 3 }
 0x4fe   : > { %3032 = vrot.lane.b32.xlu1 %v2954_v8, %s6335_s22  ;;  %3034 = vrot.lane.b32.xlu0 %v2957_v21, %s6335_s22 }
 0x500   : > { %v8768_v31 = vpop.permute.xlu1 %2673  ;;  %v8770_v22 = vpop.permute.xlu0 %2675 }
 0x501   : > { %11029 = vst [vmem:[#allocation67_spill] sm:$0xff] %v8768_v31  ;;  %11030 = vst [vmem:[#allocation68_spill] sm:$0xff] %v8770_v22  ;;  %v2964_v22 = vsel %vm2924_vm7, %v2961_v3, %v2963_v54  ;;  %v2967_v31 = vsel %vm2924_vm7, %v2965_v4, %v2966_v60  ;;  %v2969_v54 = vsel %vm2924_vm7, %v2966_v60, %v2968_v33  ;;  %v2975_v4 = vrot.slane %v8449_v32, 3 }
 0x502   : > { %3036 = vrot.lane.b32.xlu1 %v2959_v29, %s6335_s22  ;;  %3038 = vrot.lane.b32.xlu0 %v2962_v58, %s6335_s22  ;;  %v2972_v3 = vsel %vm2924_vm7, %v2970_v53, %v2971_v44  ;;  %v2980_v33 = vrot.slane %v8469_v48, 3  ;;  %v2981_v53 = vrot.slane %v8466_v42, 3 }
 0x504   : > { %v8779_v8 = vpop.permute.xlu1 %2677  ;;  %v8781_v21 = vpop.permute.xlu0 %2679 }
 0x505   : > { %11031 = vst [vmem:[#allocation69_spill] sm:$0xff] %v8779_v8  ;;  %11032 = vst [vmem:[#allocation70_spill] sm:$0xff] %v8781_v21  ;;  %v2973_v21 = vrot.slane %v8423_v27, 3  ;;  %v2976_v8 = vrot.slane %v8446_v23, 3 }
 0x506   : > { %3040 = vrot.lane.b32.xlu1 %v2964_v22, %s6335_s22  ;;  %3042 = vrot.lane.b32.xlu0 %v2967_v31, %s6335_s22 }
 0x507   : > { %v2977_v60 = vsel %vm2924_vm7, %v2975_v4, %v2976_v8  ;;  %v2986_v4 = vrot.slane %v8486_v1, 3 }
 0x508   : > { %v8790_v29 = vpop.permute.xlu1 %2681  ;;  %v8792_v58 = vpop.permute.xlu0 %2683 }
 0x509   : > { %11033 = vst [vmem:[#allocation71_spill] sm:$0xff] %v8790_v29  ;;  %11034 = vst [vmem:[#allocation72_spill] sm:$0xff] %v8792_v58  ;;  %v2978_v58 = vrot.slane %v8443_v12, 3  ;;  %v2974_v29 = vsel %vm2924_vm7, %v2971_v44, %v2973_v21  ;;  %v2982_v21 = vsel %vm2924_vm7, %v2980_v33, %v2981_v53  ;;  %v2985_v44 = vrot.slane %v8489_v24, 3 }
 0x50a   : > { %3044 = vrot.lane.b32.xlu1 %v2969_v54, %s6335_s22  ;;  %3046 = vrot.lane.b32.xlu0 %v2972_v3, %s6335_s22  ;;  %v2991_v33 = vrot.slane %v8506_v14, 3 }
 0x50c   : > { %v8801_v22 = vpop.permute.xlu1 %2685  ;;  %v8803_v31 = vpop.permute.xlu0 %2687 }
 0x50d   : > { %11035 = vst [vmem:[#allocation73_spill] sm:$0xff] %v8801_v22  ;;  %11036 = vst [vmem:[#allocation74_spill] sm:$0xff] %v8803_v31  ;;  %v2983_v31 = vrot.slane %v8463_v9, 3  ;;  %v2979_v22 = vsel %vm2924_vm7, %v2976_v8, %v2978_v58  ;;  %v2988_v8 = vrot.slane %v8483_v25, 3  ;;  %v2990_v58 = vrot.slane %v8509_v18, 3 }
 0x50e   : > { %3048 = vrot.lane.b32.xlu1 %v2974_v29, %s6335_s22  ;;  %3050 = vrot.lane.b32.xlu0 %v2977_v60, %s6335_s22 }
 0x510   : > { %v8812_v54 = vpop.permute.xlu1 %2689  ;;  %v8814_v3 = vpop.permute.xlu0 %2691 }
 0x511   : > { %11037 = vst [vmem:[#allocation75_spill] sm:$0xff] %v8812_v54  ;;  %11038 = vst [vmem:[#allocation76_spill] sm:$0xff] %v8814_v3  ;;  %v2984_v3 = vsel %vm2924_vm7, %v2981_v53, %v2983_v31  ;;  %v2987_v54 = vsel %vm2924_vm7, %v2985_v44, %v2986_v4  ;;  %v2989_v31 = vsel %vm2924_vm7, %v2986_v4, %v2988_v8  ;;  %v2995_v44 = vrot.slane %v8529_v62, 3 }
 0x512   : > { %3052 = vrot.lane.b32.xlu1 %v2979_v22, %s6335_s22  ;;  %3054 = vrot.lane.b32.xlu0 %v2982_v21, %s6335_s22  ;;  %v2992_v53 = vsel %vm2924_vm7, %v2990_v58, %v2991_v33  ;;  %v3000_v8 = vrot.slane %v8549_v57, 3  ;;  %v3001_v58 = vrot.slane %v8546_v47, 3 }
 0x514   : > { %v8823_v29 = vpop.permute.xlu1 %2693  ;;  %v8825_v60 = vpop.permute.xlu0 %2695 }
 0x515   : > { %11039 = vst [vmem:[#allocation77_spill] sm:$0xff] %v8823_v29  ;;  %11040 = vst [vmem:[#allocation78_spill] sm:$0xff] %v8825_v60  ;;  %v2993_v60 = vrot.slane %v8503_v30, 3  ;;  %v2996_v29 = vrot.slane %v8526_v26, 3 }
 0x516   : > { %3056 = vrot.lane.b32.xlu1 %v2984_v3, %s6335_s22  ;;  %3058 = vrot.lane.b32.xlu0 %v2987_v54, %s6335_s22 }
 0x517   : > { %v2997_v4 = vsel %vm2924_vm7, %v2995_v44, %v2996_v29  ;;  %v3006_v44 = vrot.slane %v8564_v34, 3 }
 0x518   : > { %v8834_v22 = vpop.permute.xlu1 %2697  ;;  %v8836_v21 = vpop.permute.xlu0 %2699 }
 0x519   : > { %11041 = vst [vmem:[#allocation79_spill] sm:$0xff] %v8834_v22  ;;  %11042 = vst [vmem:[#allocation80_spill] sm:$0xff] %v8836_v21  ;;  %v2998_v21 = vrot.slane %v8523_v56, 3  ;;  %v2994_v22 = vsel %vm2924_vm7, %v2991_v33, %v2993_v60  ;;  %v3002_v60 = vsel %vm2924_vm7, %v3000_v8, %v3001_v58  ;;  %v3005_v33 = vrot.slane %v8567_v49, 3 }
 0x51a   : > { %3060 = vrot.lane.b32.xlu1 %v2989_v31, %s6335_s22  ;;  %3062 = vrot.lane.b32.xlu0 %v2992_v53, %s6335_s22  ;;  %v3120_v8 = vrot.slane %v8270_v41, 4 }
 0x51b   : > { %v2999_v35 = vsel %vm2924_vm7, %v2996_v29, %v2998_v21  ;;  %v3008_v29 = vrot.slane %v8561_v0, 3  ;;  %v3118_v21 = vrot.slane %v8273_v55, 4 }
 0x51c   : > { %v8845_v3 = vpop.permute.xlu1 %2701  ;;  %v8847_v54 = vpop.permute.xlu0 %2828 }
 0x51d   : > { %11043 = vst [vmem:[#allocation81_spill] sm:$0xff] %v8845_v3  ;;  %v3003_v3 = vrot.slane %v8543_v17, 3 }
 0x51e   : > { %3064 = vrot.lane.b32.xlu1 %v2994_v22, %s6335_s22  ;;  %3066 = vrot.lane.b32.xlu0 %v2997_v4, %s6335_s22 }
 0x520   : > { %v8856_v31 = vpop.permute.xlu1 %2826  ;;  %v8858_v53 = vpop.permute.xlu0 %2832 }
 0x521   : > { %11044 = vst [vmem:[#allocation82_spill] sm:$0xff] %v8856_v31  ;;  %11045 = vst [vmem:[#allocation83_spill] sm:$0xff] %v8858_v53  ;;  %v3004_v53 = vsel %vm2924_vm7, %v3001_v58, %v3003_v3  ;;  %v3007_v31 = vsel %vm2924_vm7, %v3005_v33, %v3006_v44  ;;  %v3009_v3 = vsel %vm2924_vm7, %v3006_v44, %v3008_v29  ;;  %v3123_v33 = vrot.slane %v8288_v16, 4 }
 0x522   : > { %3068 = vrot.lane.b32.xlu1 %v2999_v35, %s6335_s22  ;;  %3070 = vrot.lane.b32.xlu0 %v3002_v60, %s6335_s22  ;;  %v3121_v58 = vsel %vm1351_vm5, %v3118_v21, %v3120_v8  ;;  %v3128_v29 = vrot.slane %v8306_v39, 4  ;;  %v3130_v8 = vrot.slane %v8303_v20, 4  ;;  %vm4597_vm7 = vcmask 572416  }
 0x524   : > { %v8867_v22 = vpop.permute.xlu1 %2830  ;;  %v8869_v4 = vpop.permute.xlu0 %2836 }
 0x525   : > { %11046 = vst [vmem:[#allocation84_spill] sm:$0xff] %v8867_v22  ;;  %11047 = vst [vmem:[#allocation85_spill] sm:$0xff] %v8869_v4  ;;  %v3117_v4 = vrot.slane %v8276_v61, 4  ;;  %v3125_v22 = vrot.slane %v8285_v7, 4 }
 0x526   : > { %3072 = vrot.lane.b32.xlu1 %v3004_v53, %s6335_s22  ;;  %3074 = vrot.lane.b32.xlu0 %v3007_v31, %s6335_s22 }
 0x527   : > { %v3126_v44 = vsel %vm1351_vm5, %v3123_v33, %v3125_v22  ;;  %v3133_v22 = vrot.slane %v8326_v11, 4 }
 0x528   : > { %v8878_v35 = vpop.permute.xlu1 %2834  ;;  %v8880_v60 = vpop.permute.xlu0 %2840 }
 0x529   : > { %11048 = vst [vmem:[#allocation86_spill] sm:$0xff] %v8878_v35  ;;  %11049 = vst [vmem:[#allocation87_spill] sm:$0xff] %v8880_v60  ;;  %v3122_v60 = vrot.slane %v8291_v63, 4  ;;  %v3119_v35 = vsel %vm1351_vm5, %v3117_v4, %v3118_v21  ;;  %v3131_v4 = vsel %vm1351_vm5, %v3128_v29, %v3130_v8  ;;  %v3135_v21 = vrot.slane %v8323_v51, 4 }
 0x52a   : > { %3076 = vrot.lane.b32.xlu1 %v3009_v3, %s6335_s22  ;;  %3203 = vrot.lane.b32.xlu0 %v3121_v58, %s6331_s19  ;;  %v3140_v8 = vrot.slane %v8343_v37, 4  ;;  %s6271_s22 = sshll.u32 %s6344_s21, 4  ;;  %s6272_s22 = int_to_ptr.vmem [resolvable:$false] %s6271_s22 }
 0x52c   : > { %v8889_v53 = vpop.permute.xlu1 %2838  ;;  %v8891_v31 = vpop.permute.xlu0 %2844 }
 0x52d   : > { %11050 = vst [vmem:[#allocation88_spill] sm:$0xff] %v8889_v53  ;;  %11051 = vst [vmem:[#allocation89_spill] sm:$0xff] %v8891_v31  ;;  %v3127_v31 = vrot.slane %v8309_v36, 4  ;;  %v3124_v53 = vsel %vm1351_vm5, %v3122_v60, %v3123_v33  ;;  %v3132_v60 = vrot.slane %v8329_v52, 4  ;;  %v3138_v33 = vrot.slane %v8346_v40, 4 }
 0x52e   : > { %3201 = vrot.lane.b32.xlu1 %v3119_v35, %s6331_s19  ;;  %3207 = vrot.lane.b32.xlu0 %v3126_v44, %s6331_s19 }
 0x530   : > { %v8900_v3 = vpop.permute.xlu1 %2842  ;;  %v8902_v58 = vpop.permute.xlu0 %2848 }
 0x531   : > { %11052 = vst [vmem:[#allocation90_spill] sm:$0xff] %v8900_v3  ;;  %11053 = vst [vmem:[#allocation91_spill] sm:$0xff] %v8902_v58  ;;  %v3129_v58 = vsel %vm1351_vm5, %v3127_v31, %v3128_v29  ;;  %v3136_v3 = vsel %vm1351_vm5, %v3133_v22, %v3135_v21  ;;  %v3134_v31 = vsel %vm1351_vm5, %v3132_v60, %v3133_v22  ;;  %v3143_v21 = vrot.slane %v8366_v5, 4 }
 0x532   : > { %3205 = vrot.lane.b32.xlu1 %v3124_v53, %s6331_s19  ;;  %3211 = vrot.lane.b32.xlu0 %v3131_v4, %s6331_s19  ;;  %v3141_v29 = vsel %vm1351_vm5, %v3138_v33, %v3140_v8  ;;  %v3148_v60 = vrot.slane %v8386_v2, 4  ;;  %v3150_v8 = vrot.slane %v8383_v28, 4 }
 0x534   : > { %v8911_v35 = vpop.permute.xlu1 %2846  ;;  %v8913_v44 = vpop.permute.xlu0 %2852 }
 0x535   : > { %11054 = vst [vmem:[#allocation92_spill] sm:$0xff] %v8911_v35  ;;  %11055 = vst [vmem:[#allocation93_spill] sm:$0xff] %v8913_v44  ;;  %v3137_v44 = vrot.slane %v8349_v50, 4  ;;  %v3145_v35 = vrot.slane %v8363_v59, 4 }
 0x536   : > { %3209 = vrot.lane.b32.xlu1 %v3129_v58, %s6331_s19  ;;  %3215 = vrot.lane.b32.xlu0 %v3136_v3, %s6331_s19 }
 0x537   : > { %v3146_v22 = vsel %vm1351_vm5, %v3143_v21, %v3145_v35  ;;  %v3153_v35 = vrot.slane %v8406_v43, 4 }
 0x538   : > { %v8922_v53 = vpop.permute.xlu1 %2850  ;;  %v8924_v4 = vpop.permute.xlu0 %2856 }
 0x539   : > { %11056 = vst [vmem:[#allocation94_spill] sm:$0xff] %v8922_v53  ;;  %11057 = vst [vmem:[#allocation95_spill] sm:$0xff] %v8924_v4  ;;  %v3142_v4 = vrot.slane %v8369_v46, 4  ;;  %v3139_v53 = vsel %vm1351_vm5, %v3137_v44, %v3138_v33  ;;  %v3151_v44 = vsel %vm1351_vm5, %v3148_v60, %v3150_v8  ;;  %v3155_v33 = vrot.slane %v8403_v10, 4 }
 0x53a   : > { %3213 = vrot.lane.b32.xlu1 %v3134_v31, %s6331_s19  ;;  %3219 = vrot.lane.b32.xlu0 %v3141_v29, %s6331_s19  ;;  %v3160_v8 = vrot.slane %v8423_v27, 4 }
 0x53c   : > { %v8933_v58 = vpop.permute.xlu1 %2854  ;;  %v8935_v3 = vpop.permute.xlu0 %2860 }
 0x53d   : > { %11058 = vst [vmem:[#allocation96_spill] sm:$0xff] %v8933_v58  ;;  %11059 = vst [vmem:[#allocation97_spill] sm:$0xff] %v8935_v3  ;;  %v3147_v3 = vrot.slane %v8389_v45, 4  ;;  %v3144_v58 = vsel %vm1351_vm5, %v3142_v4, %v3143_v21  ;;  %v3152_v4 = vrot.slane %v8409_v19, 4  ;;  %v3158_v21 = vrot.slane %v8426_v38, 4 }
 0x53e   : > { %3217 = vrot.lane.b32.xlu1 %v3139_v53, %s6331_s19  ;;  %3223 = vrot.lane.b32.xlu0 %v3146_v22, %s6331_s19 }
 0x540   : > { %v8944_v31 = vpop.permute.xlu1 %2858  ;;  %v8946_v29 = vpop.permute.xlu0 %2864 }
 0x541   : > { %11060 = vst [vmem:[#allocation98_spill] sm:$0xff] %v8944_v31  ;;  %11061 = vst [vmem:[#allocation99_spill] sm:$0xff] %v8946_v29  ;;  %v3149_v29 = vsel %vm1351_vm5, %v3147_v3, %v3148_v60  ;;  %v3156_v31 = vsel %vm1351_vm5, %v3153_v35, %v3155_v33  ;;  %v3154_v3 = vsel %vm1351_vm5, %v3152_v4, %v3153_v35  ;;  %v3163_v33 = vrot.slane %v8446_v23, 4 }
 0x542   : > { %3221 = vrot.lane.b32.xlu1 %v3144_v58, %s6331_s19  ;;  %3227 = vrot.lane.b32.xlu0 %v3151_v44, %s6331_s19  ;;  %v3161_v60 = vsel %vm1351_vm5, %v3158_v21, %v3160_v8  ;;  %v3168_v4 = vrot.slane %v8466_v42, 4  ;;  %v3170_v8 = vrot.slane %v8463_v9, 4 }
 0x544   : > { %v8955_v53 = vpop.permute.xlu1 %2862  ;;  %v8957_v22 = vpop.permute.xlu0 %2868 }
 0x545   : > { %11062 = vst [vmem:[#allocation100_spill] sm:$0xff] %v8955_v53  ;;  %11063 = vst [vmem:[#allocation101_spill] sm:$0xff] %v8957_v22  ;;  %v3157_v22 = vrot.slane %v8429_v13, 4  ;;  %v3165_v53 = vrot.slane %v8443_v12, 4 }
 0x546   : > { %3225 = vrot.lane.b32.xlu1 %v3149_v29, %s6331_s19  ;;  %3231 = vrot.lane.b32.xlu0 %v3156_v31, %s6331_s19 }
 0x547   : > { %v3166_v35 = vsel %vm1351_vm5, %v3163_v33, %v3165_v53  ;;  %v3173_v53 = vrot.slane %v8486_v1, 4 }
 0x548   : > { %v8966_v58 = vpop.permute.xlu1 %2866  ;;  %v8968_v44 = vpop.permute.xlu0 %2872 }
 0x549   : > { %11064 = vst [vmem:[#allocation102_spill] sm:$0xff] %v8966_v58  ;;  %11065 = vst [vmem:[#allocation103_spill] sm:$0xff] %v8968_v44  ;;  %v3162_v44 = vrot.slane %v8449_v32, 4  ;;  %v3159_v58 = vsel %vm1351_vm5, %v3157_v22, %v3158_v21  ;;  %v3171_v22 = vsel %vm1351_vm5, %v3168_v4, %v3170_v8  ;;  %v3175_v21 = vrot.slane %v8483_v25, 4 }
 0x54a   : > { %3229 = vrot.lane.b32.xlu1 %v3154_v3, %s6331_s19  ;;  %3235 = vrot.lane.b32.xlu0 %v3161_v60, %s6331_s19  ;;  %v3180_v8 = vrot.slane %v8503_v30, 4 }
 0x54c   : > { %v8977_v29 = vpop.permute.xlu1 %2870  ;;  %v8979_v31 = vpop.permute.xlu0 %2876 }
 0x54d   : > { %11066 = vst [vmem:[#allocation104_spill] sm:$0xff] %v8977_v29  ;;  %11067 = vst [vmem:[#allocation105_spill] sm:$0xff] %v8979_v31  ;;  %v3167_v31 = vrot.slane %v8469_v48, 4  ;;  %v3164_v29 = vsel %vm1351_vm5, %v3162_v44, %v3163_v33  ;;  %v3172_v44 = vrot.slane %v8489_v24, 4  ;;  %v3178_v33 = vrot.slane %v8506_v14, 4 }
 0x54e   : > { %3233 = vrot.lane.b32.xlu1 %v3159_v58, %s6331_s19  ;;  %3239 = vrot.lane.b32.xlu0 %v3166_v35, %s6331_s19 }
 0x550   : > { %v8988_v3 = vpop.permute.xlu1 %2874  ;;  %v8990_v60 = vpop.permute.xlu0 %2880 }
 0x551   : > { %11068 = vst [vmem:[#allocation106_spill] sm:$0xff] %v8988_v3  ;;  %11069 = vst [vmem:[#allocation107_spill] sm:$0xff] %v8990_v60  ;;  %v3169_v60 = vsel %vm1351_vm5, %v3167_v31, %v3168_v4  ;;  %v3176_v3 = vsel %vm1351_vm5, %v3173_v53, %v3175_v21  ;;  %v3174_v31 = vsel %vm1351_vm5, %v3172_v44, %v3173_v53  ;;  %v3183_v21 = vrot.slane %v8526_v26, 4 }
 0x552   : > { %3237 = vrot.lane.b32.xlu1 %v3164_v29, %s6331_s19  ;;  %3243 = vrot.lane.b32.xlu0 %v3171_v22, %s6331_s19  ;;  %v3181_v4 = vsel %vm1351_vm5, %v3178_v33, %v3180_v8  ;;  %v3188_v44 = vrot.slane %v8546_v47, 4  ;;  %v3190_v8 = vrot.slane %v8543_v17, 4 }
 0x554   : > { %v8999_v58 = vpop.permute.xlu1 %2878  ;;  %v9001_v35 = vpop.permute.xlu0 %2884 }
 0x555   : > { %11070 = vst [vmem:[#allocation108_spill] sm:$0xff] %v8999_v58  ;;  %11071 = vst [vmem:[#allocation109_spill] sm:$0xff] %v9001_v35  ;;  %v3177_v35 = vrot.slane %v8509_v18, 4  ;;  %v3185_v58 = vrot.slane %v8523_v56, 4 }
 0x556   : > { %3241 = vrot.lane.b32.xlu1 %v3169_v60, %s6331_s19  ;;  %3247 = vrot.lane.b32.xlu0 %v3176_v3, %s6331_s19 }
 0x557   : > { %v3186_v53 = vsel %vm1351_vm5, %v3183_v21, %v3185_v58  ;;  %v3193_v58 = vrot.slane %v8564_v34, 4 }
 0x558   : > { %v9010_v29 = vpop.permute.xlu1 %2882  ;;  %v9012_v22 = vpop.permute.xlu0 %2888 }
 0x559   : > { %11072 = vst [vmem:[#allocation110_spill] sm:$0xff] %v9010_v29  ;;  %11073 = vst [vmem:[#allocation111_spill] sm:$0xff] %v9012_v22  ;;  %v3182_v22 = vrot.slane %v8529_v62, 4  ;;  %v3179_v29 = vsel %vm1351_vm5, %v3177_v35, %v3178_v33  ;;  %v3191_v35 = vsel %vm1351_vm5, %v3188_v44, %v3190_v8  ;;  %v3195_v33 = vrot.slane %v8561_v0, 4 }
 0x55a   : > { %3245 = vrot.lane.b32.xlu1 %v3174_v31, %s6331_s19  ;;  %3251 = vrot.lane.b32.xlu0 %v3181_v4, %s6331_s19  ;;  %v3305_v8 = vrot.slane %v8273_v55, 5 }
 0x55b   : > { %v3196_v15 = vsel %vm1351_vm5, %v3193_v58, %v3195_v33  ;;  %v3309_v33 = vrot.slane %v8291_v63, 5 }
 0x55c   : > { %v9021_v60 = vpop.permute.xlu1 %2886  ;;  %v9023_v3 = vpop.permute.xlu0 %3014 }
 0x55d   : > { %11074 = vst [vmem:[#allocation112_spill] sm:$0xff] %v9021_v60  ;;  %11075 = vst [vmem:[#allocation113_spill] sm:$0xff] %v9023_v3  ;;  %v3187_v60 = vrot.slane %v8549_v57, 4  ;;  %v3184_v3 = vsel %vm1351_vm5, %v3182_v22, %v3183_v21  ;;  %v3192_v22 = vrot.slane %v8567_v49, 4  ;;  %v3304_v21 = vrot.slane %v8276_v61, 5 }
 0x55e   : > { %3249 = vrot.lane.b32.xlu1 %v3179_v29, %s6331_s19  ;;  %3255 = vrot.lane.b32.xlu0 %v3186_v53, %s6331_s19 }
 0x560   : > { %v9032_v31 = vpop.permute.xlu1 %3016  ;;  %v9034_v4 = vpop.permute.xlu0 %3018 }
 0x561   : > { %11076 = vst [vmem:[#allocation114_spill] sm:$0xff] %v9034_v4  ;;  %v3189_v4 = vsel %vm1351_vm5, %v3187_v60, %v3188_v44  ;;  %v3194_v60 = vsel %vm1351_vm5, %v3192_v22, %v3193_v58  ;;  %v3306_v44 = vsel %vm2381_vm6, %v3304_v21, %v3305_v8  ;;  %v3314_v22 = vrot.slane %v8309_v36, 5 }
 0x562   : > { %3253 = vrot.lane.b32.xlu1 %v3184_v3, %s6331_s19  ;;  %3259 = vrot.lane.b32.xlu0 %v3191_v35, %s6331_s19  ;;  %v3315_v21 = vrot.slane %v8306_v39, 5  ;;  %vm4498_vm5 = vcmask 228352  }
 0x564   : > { %v9043_v29 = vpop.permute.xlu1 %3020  ;;  %v9045_v53 = vpop.permute.xlu0 %3022 }
 0x565   : > { %11077 = vst [vmem:[#allocation115_spill] sm:$0xff] %v9043_v29  ;;  %11078 = vst [vmem:[#allocation116_spill] sm:$0xff] %v9045_v53  ;;  %v3307_v53 = vrot.slane %v8270_v41, 5  ;;  %v3310_v29 = vrot.slane %v8288_v16, 5 }
 0x566   : > { %3257 = vrot.lane.b32.xlu1 %v3189_v4, %s6331_s19  ;;  %3263 = vrot.lane.b32.xlu0 %v3196_v15, %s6331_s19 }
 0x567   : > { %v3311_v58 = vsel %vm2381_vm6, %v3309_v33, %v3310_v29  ;;  %v3320_v33 = vrot.slane %v8326_v11, 5 }
 0x568   : > { %v9054_v3 = vpop.permute.xlu1 %3024  ;;  %v9056_v35 = vpop.permute.xlu0 %3026 }
 0x569   : > { %11079 = vst [vmem:[#allocation117_spill] sm:$0xff] %v9054_v3  ;;  %11080 = vst [vmem:[#allocation118_spill] sm:$0xff] %v9056_v35  ;;  %v3312_v35 = vrot.slane %v8285_v7, 5  ;;  %v3308_v3 = vsel %vm2381_vm6, %v3305_v8, %v3307_v53  ;;  %v3316_v53 = vsel %vm2381_vm6, %v3314_v22, %v3315_v21  ;;  %v3319_v8 = vrot.slane %v8329_v52, 5 }
 0x56a   : > { %3261 = vrot.lane.b32.xlu1 %v3194_v60, %s6331_s19  ;;  %3388 = vrot.lane.b32.xlu0 %v3306_v44, %s6336_s23  ;;  %v3325_v22 = vrot.slane %v8346_v40, 5 }
 0x56c   : > { %v9065_v4 = vpop.permute.xlu1 %3028  ;;  %v9067_v15 = vpop.permute.xlu0 %3030 }
 0x56d   : > { %11081 = vst [vmem:[#allocation119_spill] sm:$0xff] %v9065_v4  ;;  %11082 = vst [vmem:[#allocation120_spill] sm:$0xff] %v9067_v15  ;;  %v3317_v15 = vrot.slane %v8303_v20, 5  ;;  %v3313_v4 = vsel %vm2381_vm6, %v3310_v29, %v3312_v35  ;;  %v3322_v29 = vrot.slane %v8323_v51, 5  ;;  %v3324_v35 = vrot.slane %v8349_v50, 5 }
 0x56e   : > { %3390 = vrot.lane.b32.xlu1 %v3308_v3, %s6336_s23  ;;  %3392 = vrot.lane.b32.xlu0 %v3311_v58, %s6336_s23 }
 0x570   : > { %v9076_v60 = vpop.permute.xlu1 %3032  ;;  %v9078_v44 = vpop.permute.xlu0 %3034 }
 0x571   : > { %11083 = vst [vmem:[#allocation121_spill] sm:$0xff] %v9076_v60  ;;  %11084 = vst [vmem:[#allocation122_spill] sm:$0xff] %v9078_v44  ;;  %v3318_v44 = vsel %vm2381_vm6, %v3315_v21, %v3317_v15  ;;  %v3321_v60 = vsel %vm2381_vm6, %v3319_v8, %v3320_v33  ;;  %v3323_v15 = vsel %vm2381_vm6, %v3320_v33, %v3322_v29  ;;  %v3329_v8 = vrot.slane %v8369_v46, 5 }
 0x572   : > { %3394 = vrot.lane.b32.xlu1 %v3313_v4, %s6336_s23  ;;  %3396 = vrot.lane.b32.xlu0 %v3316_v53, %s6336_s23  ;;  %v3326_v21 = vsel %vm2381_vm6, %v3324_v35, %v3325_v22  ;;  %v3334_v29 = vrot.slane %v8389_v45, 5  ;;  %v3335_v35 = vrot.slane %v8386_v2, 5 }
 0x574   : > { %v9087_v3 = vpop.permute.xlu1 %3036  ;;  %v9089_v58 = vpop.permute.xlu0 %3038 }
 0x575   : > { %11085 = vst [vmem:[#allocation123_spill] sm:$0xff] %v9087_v3  ;;  %11086 = vst [vmem:[#allocation124_spill] sm:$0xff] %v9089_v58  ;;  %v3327_v58 = vrot.slane %v8343_v37, 5  ;;  %v3330_v3 = vrot.slane %v8366_v5, 5 }
 0x576   : > { %3398 = vrot.lane.b32.xlu1 %v3318_v44, %s6336_s23  ;;  %3400 = vrot.lane.b32.xlu0 %v3321_v60, %s6336_s23 }
 0x577   : > { %v3331_v33 = vsel %vm2381_vm6, %v3329_v8, %v3330_v3  ;;  %v3340_v8 = vrot.slane %v8406_v43, 5 }
 0x578   : > { %v9098_v4 = vpop.permute.xlu1 %3040  ;;  %v9100_v53 = vpop.permute.xlu0 %3042 }
 0x579   : > { %11087 = vst [vmem:[#allocation125_spill] sm:$0xff] %v9098_v4  ;;  %11088 = vst [vmem:[#allocation126_spill] sm:$0xff] %v9100_v53  ;;  %v3332_v53 = vrot.slane %v8363_v59, 5  ;;  %v3328_v4 = vsel %vm2381_vm6, %v3325_v22, %v3327_v58  ;;  %v3336_v58 = vsel %vm2381_vm6, %v3334_v29, %v3335_v35  ;;  %v3339_v22 = vrot.slane %v8409_v19, 5 }
 0x57a   : > { %3402 = vrot.lane.b32.xlu1 %v3323_v15, %s6336_s23  ;;  %3404 = vrot.lane.b32.xlu0 %v3326_v21, %s6336_s23  ;;  %v3345_v29 = vrot.slane %v8426_v38, 5 }
 0x57c   : > { %v9109_v44 = vpop.permute.xlu1 %3044  ;;  %v9111_v60 = vpop.permute.xlu0 %3046 }
 0x57d   : > { %11089 = vst [vmem:[#allocation127_spill] sm:$0xff] %v9109_v44  ;;  %11090 = vst [vmem:[#allocation128_spill] sm:$0xff] %v9111_v60  ;;  %v3337_v60 = vrot.slane %v8383_v28, 5  ;;  %v3333_v44 = vsel %vm2381_vm6, %v3330_v3, %v3332_v53  ;;  %v3342_v3 = vrot.slane %v8403_v10, 5  ;;  %v3344_v53 = vrot.slane %v8429_v13, 5 }
 0x57e   : > { %3406 = vrot.lane.b32.xlu1 %v3328_v4, %s6336_s23  ;;  %3408 = vrot.lane.b32.xlu0 %v3331_v33, %s6336_s23 }
 0x580   : > { %v9120_v15 = vpop.permute.xlu1 %3048  ;;  %v9122_v21 = vpop.permute.xlu0 %3050 }
 0x581   : > { %11091 = vst [vmem:[#allocation129_spill] sm:$0xff] %v9120_v15  ;;  %11092 = vst [vmem:[#allocation130_spill] sm:$0xff] %v9122_v21  ;;  %v3338_v21 = vsel %vm2381_vm6, %v3335_v35, %v3337_v60  ;;  %v3341_v15 = vsel %vm2381_vm6, %v3339_v22, %v3340_v8  ;;  %v3343_v60 = vsel %vm2381_vm6, %v3340_v8, %v3342_v3  ;;  %v3349_v22 = vrot.slane %v8449_v32, 5 }
 0x582   : > { %3410 = vrot.lane.b32.xlu1 %v3333_v44, %s6336_s23  ;;  %3412 = vrot.lane.b32.xlu0 %v3336_v58, %s6336_s23  ;;  %v3346_v35 = vsel %vm2381_vm6, %v3344_v53, %v3345_v29  ;;  %v3354_v3 = vrot.slane %v8469_v48, 5  ;;  %v3355_v53 = vrot.slane %v8466_v42, 5 }
 0x584   : > { %v9131_v4 = vpop.permute.xlu1 %3052  ;;  %v9133_v33 = vpop.permute.xlu0 %3054 }
 0x585   : > { %11093 = vst [vmem:[#allocation131_spill] sm:$0xff] %v9131_v4  ;;  %11094 = vst [vmem:[#allocation132_spill] sm:$0xff] %v9133_v33  ;;  %v3347_v33 = vrot.slane %v8423_v27, 5  ;;  %v3350_v4 = vrot.slane %v8446_v23, 5 }
 0x586   : > { %3414 = vrot.lane.b32.xlu1 %v3338_v21, %s6336_s23  ;;  %3416 = vrot.lane.b32.xlu0 %v3341_v15, %s6336_s23 }
 0x587   : > { %v3351_v8 = vsel %vm2381_vm6, %v3349_v22, %v3350_v4  ;;  %v3360_v22 = vrot.slane %v8486_v1, 5 }
 0x588   : > { %v9142_v44 = vpop.permute.xlu1 %3056  ;;  %v9144_v58 = vpop.permute.xlu0 %3058 }
 0x589   : > { %11095 = vst [vmem:[#allocation133_spill] sm:$0xff] %v9142_v44  ;;  %11096 = vst [vmem:[#allocation134_spill] sm:$0xff] %v9144_v58  ;;  %v3352_v58 = vrot.slane %v8443_v12, 5  ;;  %v3348_v44 = vsel %vm2381_vm6, %v3345_v29, %v3347_v33  ;;  %v3357_v33 = vrot.slane %v8463_v9, 5  ;;  %v3359_v29 = vrot.slane %v8489_v24, 5 }
 0x58a   : > { %3418 = vrot.lane.b32.xlu1 %v3343_v60, %s6336_s23  ;;  %3420 = vrot.lane.b32.xlu0 %v3346_v35, %s6336_s23 }
 0x58c   : > { %v9153_v21 = vpop.permute.xlu1 %3060  ;;  %v9155_v15 = vpop.permute.xlu0 %3062 }
 0x58d   : > { %11097 = vst [vmem:[#allocation135_spill] sm:$0xff] %v9153_v21  ;;  %11098 = vst [vmem:[#allocation136_spill] sm:$0xff] %v9155_v15  ;;  %v3353_v15 = vsel %vm2381_vm6, %v3350_v4, %v3352_v58  ;;  %v3356_v21 = vsel %vm2381_vm6, %v3354_v3, %v3355_v53  ;;  %v3358_v4 = vsel %vm2381_vm6, %v3355_v53, %v3357_v33  ;;  %v3364_v3 = vrot.slane %v8509_v18, 5 }
 0x58e   : > { %3422 = vrot.lane.b32.xlu1 %v3348_v44, %s6336_s23  ;;  %3424 = vrot.lane.b32.xlu0 %v3351_v8, %s6336_s23  ;;  %v3361_v58 = vsel %vm2381_vm6, %v3359_v29, %v3360_v22  ;;  %v3369_v33 = vrot.slane %v8529_v62, 5  ;;  %v3370_v29 = vrot.slane %v8526_v26, 5 }
 0x590   : > { %v9164_v60 = vpop.permute.xlu1 %3064  ;;  %v9166_v35 = vpop.permute.xlu0 %3066 }
 0x591   : > { %11099 = vst [vmem:[#allocation137_spill] sm:$0xff] %v9164_v60  ;;  %11100 = vst [vmem:[#allocation138_spill] sm:$0xff] %v9166_v35  ;;  %v3362_v35 = vrot.slane %v8483_v25, 5  ;;  %v3365_v60 = vrot.slane %v8506_v14, 5 }
 0x592   : > { %3426 = vrot.lane.b32.xlu1 %v3353_v15, %s6336_s23  ;;  %3428 = vrot.lane.b32.xlu0 %v3356_v21, %s6336_s23 }
 0x593   : > { %v3366_v53 = vsel %vm2381_vm6, %v3364_v3, %v3365_v60  ;;  %v3375_v3 = vrot.slane %v8546_v47, 5 }
 0x594   : > { %v9175_v44 = vpop.permute.xlu1 %3068  ;;  %v9177_v8 = vpop.permute.xlu0 %3070 }
 0x595   : > { %11101 = vst [vmem:[#allocation139_spill] sm:$0xff] %v9175_v44  ;;  %11102 = vst [vmem:[#allocation140_spill] sm:$0xff] %v9177_v8  ;;  %v3367_v8 = vrot.slane %v8503_v30, 5  ;;  %v3363_v44 = vsel %vm2381_vm6, %v3360_v22, %v3362_v35  ;;  %v3372_v35 = vrot.slane %v8523_v56, 5  ;;  %v3374_v22 = vrot.slane %v8549_v57, 5 }
 0x596   : > { %3430 = vrot.lane.b32.xlu1 %v3358_v4, %s6336_s23  ;;  %3432 = vrot.lane.b32.xlu0 %v3361_v58, %s6336_s23 }
 0x598   : > { %v9186_v15 = vpop.permute.xlu1 %3072  ;;  %v9188_v21 = vpop.permute.xlu0 %3074 }
 0x599   : > { %11103 = vst [vmem:[#allocation141_spill] sm:$0xff] %v9186_v15  ;;  %11104 = vst [vmem:[#allocation142_spill] sm:$0xff] %v9188_v21  ;;  %v3368_v21 = vsel %vm2381_vm6, %v3365_v60, %v3367_v8  ;;  %v3371_v15 = vsel %vm2381_vm6, %v3369_v33, %v3370_v29  ;;  %v3373_v60 = vsel %vm2381_vm6, %v3370_v29, %v3372_v35  ;;  %v3379_v33 = vrot.slane %v8567_v49, 5 }
 0x59a   : > { %3434 = vrot.lane.b32.xlu1 %v3363_v44, %s6336_s23  ;;  %3436 = vrot.lane.b32.xlu0 %v3366_v53, %s6336_s23  ;;  %v3376_v8 = vsel %vm2381_vm6, %v3374_v22, %v3375_v3  ;;  %v3493_v35 = vrot.slane %v8273_v55, 6  ;;  %v3495_v22 = vrot.slane %v8270_v41, 6 }
 0x59c   : > { %v9197_v4 = vpop.permute.xlu1 %3076  ;;  %v9199_v58 = vpop.permute.xlu0 %3203 }
 0x59d   : > { %11105 = vst [vmem:[#allocation143_spill] sm:$0xff] %v9197_v4  ;;  %11106 = vst [vmem:[#allocation144_spill] sm:$0xff] %v9199_v58  ;;  %v3377_v4 = vrot.slane %v8543_v17, 5  ;;  %v3380_v58 = vrot.slane %v8564_v34, 5 }
 0x59e   : > { %3438 = vrot.lane.b32.xlu1 %v3368_v21, %s6336_s23  ;;  %3440 = vrot.lane.b32.xlu0 %v3371_v15, %s6336_s23 }
 0x59f   : > { %v3381_v29 = vsel %vm2381_vm6, %v3379_v33, %v3380_v58  ;;  %v3500_v33 = vrot.slane %v8285_v7, 6 }
 0x5a0   : > { %v9208_v44 = vpop.permute.xlu1 %3201  ;;  %v9210_v53 = vpop.permute.xlu0 %3207 }
 0x5a1   : > { %11107 = vst [vmem:[#allocation145_spill] sm:$0xff] %v9208_v44  ;;  %11108 = vst [vmem:[#allocation146_spill] sm:$0xff] %v9210_v53  ;;  %v3382_v53 = vrot.slane %v8561_v0, 5  ;;  %v3378_v44 = vsel %vm2381_vm6, %v3375_v3, %v3377_v4  ;;  %v3492_v4 = vrot.slane %v8276_v61, 6  ;;  %v3498_v3 = vrot.slane %v8288_v16, 6 }
 0x5a2   : > { %3442 = vrot.lane.b32.xlu1 %v3373_v60, %s6336_s23  ;;  %3444 = vrot.lane.b32.xlu0 %v3376_v8, %s6336_s23 }
 0x5a4   : > { %v9219_v21 = vpop.permute.xlu1 %3205  ;;  %v9221_v15 = vpop.permute.xlu0 %3211 }
 0x5a5   : > { %11109 = vst [vmem:[#allocation147_spill] sm:$0xff] %v9219_v21  ;;  %11110 = vst [vmem:[#allocation148_spill] sm:$0xff] %v9221_v15  ;;  %v3383_v15 = vsel %vm2381_vm6, %v3380_v58, %v3382_v53  ;;  %v3496_v21 = vsel %vm3486_vm8, %v3493_v35, %v3495_v22  ;;  %v3494_v58 = vsel %vm3486_vm8, %v3492_v4, %v3493_v35  ;;  %v3503_v22 = vrot.slane %v8306_v39, 6 }
 0x5a6   : > { %3446 = vrot.lane.b32.xlu1 %v3378_v44, %s6336_s23  ;;  %3448 = vrot.lane.b32.xlu0 %v3381_v29, %s6336_s23  ;;  %v3497_v29 = vrot.slane %v8291_v63, 6  ;;  %v3501_v53 = vsel %vm3486_vm8, %v3498_v3, %v3500_v33  ;;  %v3508_v4 = vrot.slane %v8326_v11, 6  ;;  %v3510_v33 = vrot.slane %v8323_v51, 6 }
 0x5a7   : > { %vm4564_vm6 = vcmask 457728  }
 0x5a8   : > { %v9230_v60 = vpop.permute.xlu1 %3209  ;;  %v9232_v8 = vpop.permute.xlu0 %3215 }
 0x5a9   : > { %11111 = vst [vmem:[#allocation149_spill] sm:$0xff] %v9232_v8  ;;  %v3505_v8 = vrot.slane %v8303_v20, 6 }
 0x5aa   : > { %3450 = vrot.lane.b32.xlu1 %v3383_v15, %s6336_s23  ;;  %3578 = vrot.lane.b32.xlu0 %v3496_v21, %s6332_s20  ;;  %v3502_v15 = vrot.slane %v8309_v36, 6  ;;  %s6341_s23 = smov 70  }
 0x5ab   : > { %v3506_v35 = vsel %vm3486_vm8, %v3503_v22, %v3505_v8  ;;  %v3513_v8 = vrot.slane %v8346_v40, 6 }
 0x5ac   : > { %v9241_v41 = vpop.permute.xlu1 %3213  ;;  %v9243_v44 = vpop.permute.xlu0 %3219 }
 0x5ad   : > { %11112 = vst [vmem:[#allocation150_spill] sm:$0xff] %v9243_v44  ;;  %v3499_v44 = vsel %vm3486_vm8, %v3497_v29, %v3498_v3  ;;  %v3507_v3 = vrot.slane %v8329_v52, 6  ;;  %v3515_v29 = vrot.slane %v8343_v37, 6 }
 0x5ae   : > { %3576 = vrot.lane.b32.xlu1 %v3494_v58, %s6332_s20  ;;  %3582 = vrot.lane.b32.xlu0 %v3501_v53, %s6332_s20  ;;  %v3504_v53 = vsel %vm3486_vm8, %v3502_v15, %v3503_v22 }
 0x5af   : > { %v3509_v22 = vsel %vm3486_vm8, %v3507_v3, %v3508_v4  ;;  %v3516_v15 = vsel %vm3486_vm8, %v3513_v8, %v3515_v29  ;;  %v3523_v3 = vrot.slane %v8386_v2, 6  ;;  %v3525_v29 = vrot.slane %v8383_v28, 6 }
 0x5b0   : > { %v9252_v7 = vpop.permute.xlu1 %3217  ;;  %v9254_v21 = vpop.permute.xlu0 %3223 }
 0x5b1   : > { %11113 = vst [vmem:[#allocation151_spill] sm:$0xff] %v9254_v21  ;;  %v3511_v21 = vsel %vm3486_vm8, %v3508_v4, %v3510_v33  ;;  %v3518_v33 = vrot.slane %v8366_v5, 6 }
 0x5b2   : > { %3580 = vrot.lane.b32.xlu1 %v3499_v44, %s6332_s20  ;;  %3586 = vrot.lane.b32.xlu0 %v3506_v35, %s6332_s20  ;;  %v3512_v35 = vrot.slane %v8349_v50, 6 }
 0x5b4   : > { %v9263_v20 = vpop.permute.xlu1 %3221  ;;  %v9265_v58 = vpop.permute.xlu0 %3227 }
 0x5b5   : > { %11114 = vst [vmem:[#allocation152_spill] sm:$0xff] %v9265_v58  ;;  %v3520_v58 = vrot.slane %v8363_v59, 6 }
 0x5b6   : > { %3584 = vrot.lane.b32.xlu1 %v3504_v53, %s6332_s20  ;;  %3590 = vrot.lane.b32.xlu0 %v3511_v21, %s6332_s20  ;;  %v3517_v53 = vrot.slane %v8369_v46, 6 }
 0x5b7   : > { %v3521_v4 = vsel %vm3486_vm8, %v3518_v33, %v3520_v58  ;;  %v3528_v58 = vrot.slane %v8406_v43, 6 }
 0x5b8   : > { %v9274_v51 = vpop.permute.xlu1 %3225  ;;  %v9276_v44 = vpop.permute.xlu0 %3231 }
 0x5b9   : > { %11115 = vst [vmem:[#allocation153_spill] sm:$0xff] %v9276_v44  ;;  %v3514_v44 = vsel %vm3486_vm8, %v3512_v35, %v3513_v8  ;;  %v3522_v8 = vrot.slane %v8389_v45, 6  ;;  %v3530_v35 = vrot.slane %v8403_v10, 6 }
 0x5ba   : > { %3588 = vrot.lane.b32.xlu1 %v3509_v22, %s6332_s20  ;;  %3594 = vrot.lane.b32.xlu0 %v3516_v15, %s6332_s20  ;;  %v3519_v15 = vsel %vm3486_vm8, %v3517_v53, %v3518_v33 }
 0x5bb   : > { %v3524_v33 = vsel %vm3486_vm8, %v3522_v8, %v3523_v3  ;;  %v3531_v53 = vsel %vm3486_vm8, %v3528_v58, %v3530_v35  ;;  %v3538_v8 = vrot.slane %v8446_v23, 6  ;;  %v3540_v35 = vrot.slane %v8443_v12, 6 }
 0x5bc   : > { %v9285_v37 = vpop.permute.xlu1 %3229  ;;  %v9287_v21 = vpop.permute.xlu0 %3235 }
 0x5bd   : > { %11116 = vst [vmem:[#allocation154_spill] sm:$0xff] %v9287_v21  ;;  %v3526_v21 = vsel %vm3486_vm8, %v3523_v3, %v3525_v29  ;;  %v3533_v29 = vrot.slane %v8426_v38, 6  ;;  %v3532_v3 = vrot.slane %v8429_v13, 6 }
 0x5be   : > { %3592 = vrot.lane.b32.xlu1 %v3514_v44, %s6332_s20  ;;  %3598 = vrot.lane.b32.xlu0 %v3521_v4, %s6332_s20  ;;  %v3527_v4 = vrot.slane %v8409_v19, 6 }
 0x5c0   : > { %v9296_v59 = vpop.permute.xlu1 %3233  ;;  %v9298_v22 = vpop.permute.xlu0 %3239 }
 0x5c1   : > { %11117 = vst [vmem:[#allocation155_spill] sm:$0xff] %v9298_v22  ;;  %v3535_v22 = vrot.slane %v8423_v27, 6 }
 0x5c2   : > { %3596 = vrot.lane.b32.xlu1 %v3519_v15, %s6332_s20  ;;  %3602 = vrot.lane.b32.xlu0 %v3526_v21, %s6332_s20  ;;  %v3529_v15 = vsel %vm3486_vm8, %v3527_v4, %v3528_v58  ;;  %v3534_v58 = vsel %vm3486_vm8, %v3532_v3, %v3533_v29  ;;  %v3543_v4 = vrot.slane %v8466_v42, 6  ;;  %v3548_v3 = vrot.slane %v8486_v1, 6 }
 0x5c4   : > { %v9307_v28 = vpop.permute.xlu1 %3237  ;;  %v9309_v44 = vpop.permute.xlu0 %3243 }
 0x5c5   : > { %11118 = vst [vmem:[#allocation156_spill] sm:$0xff] %v9309_v44  ;;  %v3536_v44 = vsel %vm3486_vm8, %v3533_v29, %v3535_v22  ;;  %v3541_v22 = vsel %vm3486_vm8, %v3538_v8, %v3540_v35  ;;  %v3550_v35 = vrot.slane %v8483_v25, 6 }
 0x5c6   : > { %3600 = vrot.lane.b32.xlu1 %v3524_v33, %s6332_s20  ;;  %3606 = vrot.lane.b32.xlu0 %v3531_v53, %s6332_s20  ;;  %v3537_v53 = vrot.slane %v8449_v32, 6 }
 0x5c8   : > { %v9318_v10 = vpop.permute.xlu1 %3241  ;;  %v9320_v21 = vpop.permute.xlu0 %3247 }
 0x5c9   : > { %11119 = vst [vmem:[#allocation157_spill] sm:$0xff] %v9318_v10  ;;  %11120 = vst [vmem:[#allocation158_spill] sm:$0xff] %v9320_v21  ;;  %v3545_v21 = vrot.slane %v8463_v9, 6 }
 0x5ca   : > { %3604 = vrot.lane.b32.xlu1 %v3529_v15, %s6332_s20  ;;  %3610 = vrot.lane.b32.xlu0 %v3536_v44, %s6332_s20  ;;  %v3542_v15 = vrot.slane %v8469_v48, 6 }
 0x5cb   : > { %v3546_v29 = vsel %vm3486_vm8, %v3543_v4, %v3545_v21  ;;  %v3553_v21 = vrot.slane %v8506_v14, 6 }
 0x5cc   : > { %v9329_v27 = vpop.permute.xlu1 %3245  ;;  %v9331_v33 = vpop.permute.xlu0 %3251 }
 0x5cd   : > { %11121 = vst [vmem:[#allocation159_spill] sm:$0xff] %v9329_v27  ;;  %11122 = vst [vmem:[#allocation160_spill] sm:$0xff] %v9331_v33  ;;  %v3539_v33 = vsel %vm3486_vm8, %v3537_v53, %v3538_v8  ;;  %v3547_v8 = vrot.slane %v8489_v24, 6  ;;  %v3555_v53 = vrot.slane %v8503_v30, 6 }
 0x5ce   : > { %3608 = vrot.lane.b32.xlu1 %v3534_v58, %s6332_s20  ;;  %3614 = vrot.lane.b32.xlu0 %v3541_v22, %s6332_s20  ;;  %v3544_v22 = vsel %vm3486_vm8, %v3542_v15, %v3543_v4 }
 0x5cf   : > { %v3549_v4 = vsel %vm3486_vm8, %v3547_v8, %v3548_v3  ;;  %v3556_v15 = vsel %vm3486_vm8, %v3553_v21, %v3555_v53  ;;  %v3563_v8 = vrot.slane %v8546_v47, 6  ;;  %v3565_v53 = vrot.slane %v8543_v17, 6 }
 0x5d0   : > { %v9340_v12 = vpop.permute.xlu1 %3249  ;;  %v9342_v44 = vpop.permute.xlu0 %3255 }
 0x5d1   : > { %11123 = vst [vmem:[#allocation161_spill] sm:$0xff] %v9340_v12  ;;  %11124 = vst [vmem:[#allocation162_spill] sm:$0xff] %v9342_v44  ;;  %v3551_v44 = vsel %vm3486_vm8, %v3548_v3, %v3550_v35  ;;  %v3558_v35 = vrot.slane %v8526_v26, 6 }
 0x5d2   : > { %3612 = vrot.lane.b32.xlu1 %v3539_v33, %s6332_s20  ;;  %3618 = vrot.lane.b32.xlu0 %v3546_v29, %s6332_s20  ;;  %v3552_v29 = vrot.slane %v8509_v18, 6 }
 0x5d4   : > { %v9351_v9 = vpop.permute.xlu1 %3253  ;;  %v9353_v58 = vpop.permute.xlu0 %3259 }
 0x5d5   : > { %11125 = vst [vmem:[#allocation163_spill] sm:$0xff] %v9351_v9  ;;  %11126 = vst [vmem:[#allocation164_spill] sm:$0xff] %v9353_v58  ;;  %v3560_v58 = vrot.slane %v8523_v56, 6 }
 0x5d6   : > { %3616 = vrot.lane.b32.xlu1 %v3544_v22, %s6332_s20  ;;  %3622 = vrot.lane.b32.xlu0 %v3551_v44, %s6332_s20  ;;  %v3557_v22 = vrot.slane %v8529_v62, 6 }
 0x5d7   : > { %v3561_v3 = vsel %vm3486_vm8, %v3558_v35, %v3560_v58  ;;  %v3570_v58 = vrot.slane %v8561_v0, 6 }
 0x5d8   : > { %v9362_v25 = vpop.permute.xlu1 %3257  ;;  %v9364_v33 = vpop.permute.xlu0 %3263 }
 0x5d9   : > { %11127 = vst [vmem:[#allocation165_spill] sm:$0xff] %v9362_v25  ;;  %11128 = vst [vmem:[#allocation166_spill] sm:$0xff] %v9364_v33  ;;  %v3554_v33 = vsel %vm3486_vm8, %v3552_v29, %v3553_v21  ;;  %v3562_v25 = vrot.slane %v8549_v57, 6  ;;  %v3568_v21 = vrot.slane %v8564_v34, 6 }
 0x5da   : > { %3620 = vrot.lane.b32.xlu1 %v3549_v4, %s6332_s20  ;;  %3626 = vrot.lane.b32.xlu0 %v3556_v15, %s6332_s20  ;;  %v3559_v15 = vsel %vm3486_vm8, %v3557_v22, %v3558_v35  ;;  %v3567_v35 = vrot.slane %v8567_v49, 6 }
 0x5db   : > { %v3564_v29 = vsel %vm3486_vm8, %v3562_v25, %v3563_v8 }
 0x5dc   : > { %v9373_v30 = vpop.permute.xlu1 %3261  ;;  %v9375_v44 = vpop.permute.xlu0 %3388 }
 0x5dd   : > { %11129 = vst [vmem:[#allocation167_spill] sm:$0xff] %v9373_v30  ;;  %v3566_v30 = vsel %vm3486_vm8, %v3563_v8, %v3565_v53  ;;  %v3569_v53 = vsel %vm3486_vm8, %v3567_v35, %v3568_v21 }
 0x5de   : > { %3624 = vrot.lane.b32.xlu1 %v3554_v33, %s6332_s20  ;;  %3630 = vrot.lane.b32.xlu0 %v3561_v3, %s6332_s20  ;;  %v3571_v3 = vsel %vm3486_vm8, %v3568_v21, %v3570_v58 }
 0x5e0   : > { %v3391_v56 = vpop.permute.xlu1 %3390  ;;  %v9384_v4 = vpop.permute.xlu0 %3392 }
 0x5e2   : > { %3628 = vrot.lane.b32.xlu1 %v3559_v15, %s6332_s20  ;;  %3634 = vrot.lane.b32.xlu0 %v3566_v30, %s6332_s20 }
 0x5e4   : > { %v3395_v17 = vpop.permute.xlu1 %3394  ;;  %v9393_v33 = vpop.permute.xlu0 %3396 }
 0x5e6   : > { %3632 = vrot.lane.b32.xlu1 %v3564_v29, %s6332_s20  ;;  %3638 = vrot.lane.b32.xlu0 %v3571_v3, %s6332_s20 }
 0x5e8   : > { %v9400_v22 = vpop.permute.xlu1 %3398  ;;  %v9402_v0 = vpop.permute.xlu0 %3400 }
 0x5ea   : > { %3636 = vrot.lane.b32.xlu1 %v3569_v53, %s6332_s20 }
 0x5ec   : > { %v9406_v30 = vpop.permute.xlu1 %3402  ;;  %v9408_v15 = vpop.permute.xlu0 %3404 }
 0x5f0   : > { %v9410_v25 = vpop.permute.xlu1 %3406  ;;  %v9412_v8 = vpop.permute.xlu0 %3408 }
 0x5f4   : > { %v9414_v58 = vpop.permute.xlu1 %3410  ;;  %v9416_v29 = vpop.permute.xlu0 %3412 }
 0x5f8   : > { %v9418_v3 = vpop.permute.xlu1 %3414  ;;  %v9420_v34 = vpop.permute.xlu0 %3416 }
 0x5fc   : > { %v9422_v49 = vpop.permute.xlu1 %3418  ;;  %v9424_v21 = vpop.permute.xlu0 %3420 }
 0x600   : > { %v9426_v35 = vpop.permute.xlu1 %3422  ;;  %v9428_v53 = vpop.permute.xlu0 %3424 }
 0x604   : > { %v9430_v47 = vpop.permute.xlu1 %3426  ;;  %v9432_v57 = vpop.permute.xlu0 %3428 }
 0x605   : > { %11130 = vst [vmem:[#allocation168_spill] sm:$0xff] %v9432_v57  ;;  %v3678_v57 = vsel %vm3674_vm12, %v8273_v55, %v8680_v6 }
 0x608   : > { %v9434_v9 = vpop.permute.xlu1 %3430  ;;  %v9436_v62 = vpop.permute.xlu0 %3432 }
 0x609   : > { %11131 = vst [vmem:[#allocation169_spill] sm:$0xff] %v9434_v9  ;;  %11132 = vst [vmem:[#allocation170_spill] sm:$0xff] %v9436_v62  ;;  %v3712_v62 = vsel %vm887_vm4, %v3678_v57, %v8847_v54  ;;  %v11144_v57 = vld [vmem:[#allocation82_spill] sm:$0xff] }
 0x60c   : > { %v9438_v12 = vpop.permute.xlu1 %3434  ;;  %v9440_v26 = vpop.permute.xlu0 %3436 }
 0x60d   : > { %11133 = vst [vmem:[#allocation171_spill] sm:$0xff] %v9438_v12  ;;  %11134 = vst [vmem:[#allocation172_spill] sm:$0xff] %v9440_v26  ;;  %v3747_v26 = vsel %vm3743_vm13, %v3712_v62, %v9032_v31  ;;  %v11143_v12 = vld [vmem:[#allocation53_spill] sm:$0xff]  ;;  %v11145_v62 = vld [vmem:[#allocation83_spill] sm:$0xff] }
 0x60e   : > { %v3680_v55 = vsel %vm3674_vm12, %v8288_v16, %v11143_v12 }
 0x60f   : > { %v3714_v31 = vsel %vm887_vm4, %v3680_v55, %v11145_v62  ;;  %v11151_v55 = vld [vmem:[#allocation55_spill] sm:$0xff] }
 0x610   : > { %v9442_v18 = vpop.permute.xlu1 %3438  ;;  %v9444_v27 = vpop.permute.xlu0 %3440 }
 0x611   : > { %11135 = vst [vmem:[#allocation173_spill] sm:$0xff] %v9442_v18  ;;  %11136 = vst [vmem:[#allocation174_spill] sm:$0xff] %v9444_v27  ;;  %v11141_v18 = vld [vmem:[#allocation144_spill] sm:$0xff] }
 0x612   : > { %v3781_v27 = vsel %vm922_vm3, %v3747_v26, %v11141_v18  ;;  %v11146_v26 = vld [vmem:[#allocation113_spill] sm:$0xff] }
 0x613   : > { %v3816_v6 = vsel %vm3812_vm14, %v3781_v27, %v3391_v56  ;;  %v11148_v27 = vld [vmem:[#allocation145_spill] sm:$0xff]  ;;  %v11149_v56 = vld [vmem:[#allocation146_spill] sm:$0xff] }
 0x614   : > { %v9446_v14 = vpop.permute.xlu1 %3442  ;;  %v9448_v24 = vpop.permute.xlu0 %3444 }
 0x615   : > { %11137 = vst [vmem:[#allocation175_spill] sm:$0xff] %v9446_v14  ;;  %11138 = vst [vmem:[#allocation176_spill] sm:$0xff] %v9448_v24  ;;  %v11142_v14 = vld [vmem:[#allocation51_spill] sm:$0xff] }
 0x616   : > { %v3677_v24 = vsel %vm3674_vm12, %v8276_v61, %v11142_v14  ;;  %v11147_v14 = vld [vmem:[#allocation115_spill] sm:$0xff] }
 0x617   : > { %v3711_v54 = vsel %vm887_vm4, %v3677_v24, %v11144_v57  ;;  %v3749_v16 = vsel %vm3743_vm13, %v3714_v31, %v11147_v14  ;;  %v11150_v57 = vld [vmem:[#allocation52_spill] sm:$0xff] }
 0x618   : > { %v9453_v10 = vpop.permute.xlu1 %3446  ;;  %v9455_v9 = vpop.permute.xlu0 %3448  ;;  %v3746_v61 = vsel %vm3743_vm13, %v3711_v54, %v11146_v26  ;;  %v3783_v24 = vsel %vm922_vm3, %v3749_v16, %v11149_v56  ;;  %v11152_v14 = vld [vmem:[#allocation84_spill] sm:$0xff] }
 0x619   : > { %11139 = vst [vmem:[#allocation177_spill] sm:$0xff] %v9453_v10  ;;  %11140 = vst [vmem:[#allocation178_spill] sm:$0xff] %v9455_v9  ;;  %v3780_v12 = vsel %vm922_vm3, %v3746_v61, %v11148_v27  ;;  %v3818_v62 = vsel %vm3812_vm14, %v3783_v24, %v3395_v17  ;;  %v11153_v27 = vld [vmem:[#allocation85_spill] sm:$0xff] }
 0x61a   : > { %v3815_v54 = vsel %vm3812_vm14, %v3780_v12, %v9375_v44  ;;  %v11155_v44 = vld [vmem:[#allocation117_spill] sm:$0xff]  ;;  %v11156_v12 = vld [vmem:[#allocation147_spill] sm:$0xff] }
 0x61c   : > { %v9470_v9 = vpop.permute.xlu1 %3450  ;;  %v3579_v10 = vpop.permute.xlu0 %3578 }
 0x61d   : > { %v9477_v18 = vsel %vm1183_vm9, %v3816_v6, %v3579_v10  ;;  %v3679_v10 = vsel %vm3674_vm12, %v8291_v63, %v11150_v57  ;;  %v3682_v6 = vsel %vm3674_vm12, %v8306_v39, %v11151_v55  ;;  %v11154_v39 = vld [vmem:[#allocation114_spill] sm:$0xff] }
 0x61e   : > { %3917 = vrot.lane.b32.xlu1 %v9477_v18, %s6337_s29  ;;  %v3713_v61 = vsel %vm887_vm4, %v3679_v10, %v11152_v14  ;;  %v3716_v16 = vsel %vm887_vm4, %v3682_v6, %v11153_v27  ;;  %v11157_v10 = vld [vmem:[#allocation148_spill] sm:$0xff]  ;;  %v11158_v6 = vld [vmem:[#allocation54_spill] sm:$0xff] }
 0x61f   : > { %v3748_v57 = vsel %vm3743_vm13, %v3713_v61, %v11154_v39  ;;  %v3751_v17 = vsel %vm3743_vm13, %v3716_v16, %v11155_v44  ;;  %v11160_v16 = vld [vmem:[#allocation86_spill] sm:$0xff] }
 0x620   : > { %v3577_v31 = vpop.permute.xlu1 %3576  ;;  %v3583_v26 = vpop.permute.xlu0 %3582  ;;  %v3782_v24 = vsel %vm922_vm3, %v3748_v57, %v11156_v12  ;;  %v3785_v55 = vsel %vm922_vm3, %v3751_v17, %v11157_v10  ;;  %v11161_v57 = vld [vmem:[#allocation87_spill] sm:$0xff]  ;;  %v11164_v10 = vld [vmem:[#allocation149_spill] sm:$0xff] }
 0x621   : > { %v9503_v56 = vsel %vm1183_vm9, %v3815_v54, %v3577_v31  ;;  %v9506_v63 = vsel %vm1183_vm9, %v3818_v62, %v3583_v26  ;;  %v3681_v54 = vsel %vm3674_vm12, %v8309_v36, %v11158_v6  ;;  %v11159_v62 = vld [vmem:[#allocation57_spill] sm:$0xff]  ;;  %v3817_v26 = vsel %vm3812_vm14, %v3782_v24, %v9384_v4  ;;  %v11163_v12 = vld [vmem:[#allocation119_spill] sm:$0xff]  ;;  %v11165_v6 = vld [vmem:[#allocation56_spill] sm:$0xff] }
 0x622   : > { %3915 = vrot.lane.b32.xlu0 %v9503_v56, %s6337_s29  ;;  %3921 = vrot.lane.b32.xlu1 %v9506_v63, %s6337_s29  ;;  %v3684_v31 = vsel %vm3674_vm12, %v8326_v11, %v11159_v62  ;;  %v3820_v14 = vsel %vm3812_vm14, %v3785_v55, %v9400_v22  ;;  %v3715_v39 = vsel %vm887_vm4, %v3681_v54, %v11160_v16  ;;  %v11162_v11 = vld [vmem:[#allocation116_spill] sm:$0xff]  ;;  %v11166_v62 = vld [vmem:[#allocation59_spill] sm:$0xff] }
 0x623   : > { %v3718_v44 = vsel %vm887_vm4, %v3684_v31, %v11161_v57  ;;  %v3750_v4 = vsel %vm3743_vm13, %v3715_v39, %v11162_v11  ;;  %v3683_v54 = vsel %vm3674_vm12, %v8329_v52, %v11165_v6  ;;  %v3686_v31 = vsel %vm3674_vm12, %v8346_v40, %v11166_v62  ;;  %v11168_v39 = vld [vmem:[#allocation89_spill] sm:$0xff]  ;;  %v11169_v40 = vld [vmem:[#allocation118_spill] sm:$0xff] }
 0x624   : > { %v3581_v61 = vpop.permute.xlu1 %3580  ;;  %v3587_v27 = vpop.permute.xlu0 %3586  ;;  %v3753_v22 = vsel %vm3743_vm13, %v3718_v44, %v11163_v12  ;;  %v3784_v24 = vsel %vm922_vm3, %v3750_v4, %v9230_v60  ;;  %v11167_v60 = vld [vmem:[#allocation88_spill] sm:$0xff]  ;;  %v3720_v57 = vsel %vm887_vm4, %v3686_v31, %v11168_v39  ;;  %v11170_v11 = vld [vmem:[#allocation121_spill] sm:$0xff]  ;;  %v11171_v12 = vld [vmem:[#allocation150_spill] sm:$0xff] }
 0x625   : > { %v9535_v36 = vsel %vm1183_vm9, %v3817_v26, %v3581_v61  ;;  %v9538_v17 = vsel %vm1183_vm9, %v3820_v14, %v3587_v27  ;;  %v3787_v55 = vsel %vm922_vm3, %v3753_v22, %v11164_v10  ;;  %v3819_v26 = vsel %vm3812_vm14, %v3784_v24, %v9393_v33  ;;  %v11172_v24 = vld [vmem:[#allocation58_spill] sm:$0xff] }
 0x626   : > { %3919 = vrot.lane.b32.xlu0 %v9535_v36, %s6337_s29  ;;  %3925 = vrot.lane.b32.xlu1 %v9538_v17, %s6337_s29  ;;  %v3822_v14 = vsel %vm3812_vm14, %v3787_v55, %v9406_v30  ;;  %v3717_v16 = vsel %vm887_vm4, %v3683_v54, %v11167_v60  ;;  %v3755_v30 = vsel %vm3743_vm13, %v3720_v57, %v11170_v11  ;;  %v11173_v55 = vld [vmem:[#allocation61_spill] sm:$0xff]  ;;  %v11178_v57 = vld [vmem:[#allocation151_spill] sm:$0xff] }
 0x627   : > { %v3752_v33 = vsel %vm3743_vm13, %v3717_v16, %v11169_v40  ;;  %v3789_v22 = vsel %vm922_vm3, %v3755_v30, %v11171_v12  ;;  %v3685_v10 = vsel %vm3674_vm12, %v8349_v50, %v11172_v24  ;;  %v3688_v6 = vsel %vm3674_vm12, %v8366_v5, %v11173_v55  ;;  %v11176_v5 = vld [vmem:[#allocation120_spill] sm:$0xff]  ;;  %v11177_v16 = vld [vmem:[#allocation123_spill] sm:$0xff] }
 0x628   : > { %v3585_v61 = vpop.permute.xlu1 %3584  ;;  %v3591_v27 = vpop.permute.xlu0 %3590  ;;  %v3786_v4 = vsel %vm922_vm3, %v3752_v33, %v9241_v41  ;;  %v3824_v62 = vsel %vm3812_vm14, %v3789_v22, %v9410_v25  ;;  %v11174_v41 = vld [vmem:[#allocation90_spill] sm:$0xff]  ;;  %v11179_v33 = vld [vmem:[#allocation60_spill] sm:$0xff]  ;;  %v11180_v30 = vld [vmem:[#allocation63_spill] sm:$0xff] }
 0x629   : > { %v9567_v52 = vsel %vm1183_vm9, %v3819_v26, %v3585_v61  ;;  %v9570_v44 = vsel %vm1183_vm9, %v3822_v14, %v3591_v27  ;;  %v3821_v54 = vsel %vm3812_vm14, %v3786_v4, %v9402_v0  ;;  %v3719_v14 = vsel %vm887_vm4, %v3685_v10, %v11174_v41  ;;  %v11175_v61 = vld [vmem:[#allocation91_spill] sm:$0xff]  ;;  %v11185_v41 = vld [vmem:[#allocation152_spill] sm:$0xff] }
 0x62a   : > { %3923 = vrot.lane.b32.xlu0 %v9567_v52, %s6337_s29  ;;  %3929 = vrot.lane.b32.xlu1 %v9570_v44, %s6337_s29  ;;  %v3722_v27 = vsel %vm887_vm4, %v3688_v6, %v11175_v61  ;;  %v3754_v0 = vsel %vm3743_vm13, %v3719_v14, %v11176_v5  ;;  %v3687_v11 = vsel %vm3674_vm12, %v8369_v46, %v11179_v33  ;;  %v11182_v6 = vld [vmem:[#allocation93_spill] sm:$0xff]  ;;  %v11186_v61 = vld [vmem:[#allocation62_spill] sm:$0xff]  ;;  %v11189_v33 = vld [vmem:[#allocation95_spill] sm:$0xff] }
 0x62b   : > { %v3757_v25 = vsel %vm3743_vm13, %v3722_v27, %v11177_v16  ;;  %v3788_v39 = vsel %vm922_vm3, %v3754_v0, %v9252_v7  ;;  %v3690_v4 = vsel %vm3674_vm12, %v8386_v2, %v11180_v30  ;;  %v11181_v7 = vld [vmem:[#allocation92_spill] sm:$0xff]  ;;  %v11183_v2 = vld [vmem:[#allocation122_spill] sm:$0xff]  ;;  %v3689_v27 = vsel %vm3674_vm12, %v8389_v45, %v11186_v61  ;;  %v11187_v5 = vld [vmem:[#allocation65_spill] sm:$0xff] }
 0x62c   : > { %v3589_v31 = vpop.permute.xlu1 %3588  ;;  %v3595_v26 = vpop.permute.xlu0 %3594  ;;  %v3791_v40 = vsel %vm922_vm3, %v3757_v25, %v11178_v57  ;;  %v3823_v12 = vsel %vm3812_vm14, %v3788_v39, %v9408_v15  ;;  %v3721_v55 = vsel %vm887_vm4, %v3687_v11, %v11181_v7  ;;  %v3692_v0 = vsel %vm3674_vm12, %v8406_v43, %v11187_v5  ;;  %v11191_v43 = vld [vmem:[#allocation124_spill] sm:$0xff]  ;;  %v11201_v61 = vld [vmem:[#allocation129_spill] sm:$0xff]  ;;  %v11202_v5 = vld [vmem:[#allocation154_spill] sm:$0xff] }
 0x62d   : > { %v9599_v50 = vsel %vm1183_vm9, %v3821_v54, %v3589_v31  ;;  %v9602_v60 = vsel %vm1183_vm9, %v3824_v62, %v3595_v26  ;;  %v3826_v22 = vsel %vm3812_vm14, %v3791_v40, %v9414_v58  ;;  %v3724_v54 = vsel %vm887_vm4, %v3690_v4, %v11182_v6  ;;  %v11184_v31 = vld [vmem:[#allocation125_spill] sm:$0xff]  ;;  %v11192_v4 = vld [vmem:[#allocation127_spill] sm:$0xff] }
 0x62e   : > { %3927 = vrot.lane.b32.xlu0 %v9599_v50, %s6337_s29  ;;  %3933 = vrot.lane.b32.xlu1 %v9602_v60, %s6337_s29  ;;  %v3756_v15 = vsel %vm3743_vm13, %v3721_v55, %v11183_v2  ;;  %v3759_v58 = vsel %vm3743_vm13, %v3724_v54, %v11184_v31  ;;  %v3726_v11 = vsel %vm887_vm4, %v3692_v0, %v11189_v33  ;;  %v11195_v55 = vld [vmem:[#allocation67_spill] sm:$0xff] }
 0x62f   : > { %v3790_v26 = vsel %vm922_vm3, %v3756_v15, %v9263_v20  ;;  %v3793_v14 = vsel %vm922_vm3, %v3759_v58, %v11185_v41  ;;  %v11188_v20 = vld [vmem:[#allocation94_spill] sm:$0xff]  ;;  %v3694_v6 = vsel %vm3674_vm12, %v8426_v38, %v11195_v55 }
 0x630   : > { %v3593_v24 = vpop.permute.xlu1 %3592  ;;  %v3599_v10 = vpop.permute.xlu0 %3598  ;;  %v3825_v16 = vsel %vm3812_vm14, %v3790_v26, %v9412_v8  ;;  %v3828_v25 = vsel %vm3812_vm14, %v3793_v14, %v9418_v3  ;;  %v3723_v40 = vsel %vm887_vm4, %v3689_v27, %v11188_v20  ;;  %v3761_v3 = vsel %vm3743_vm13, %v3726_v11, %v11192_v4  ;;  %v11197_v26 = vld [vmem:[#allocation97_spill] sm:$0xff]  ;;  %v11200_v38 = vld [vmem:[#allocation126_spill] sm:$0xff] }
 0x631   : > { %v9631_v46 = vsel %vm1183_vm9, %v3823_v12, %v3593_v24  ;;  %v9634_v62 = vsel %vm1183_vm9, %v3826_v22, %v3599_v10  ;;  %v3758_v8 = vsel %vm3743_vm13, %v3723_v40, %v11191_v43  ;;  %v11193_v22 = vld [vmem:[#allocation153_spill] sm:$0xff]  ;;  %v11194_v10 = vld [vmem:[#allocation64_spill] sm:$0xff]  ;;  %v3728_v41 = vsel %vm887_vm4, %v3694_v6, %v11197_v26  ;;  %v11213_v6 = vld [vmem:[#allocation71_spill] sm:$0xff] }
 0x632   : > { %3931 = vrot.lane.b32.xlu0 %v9631_v46, %s6337_s29  ;;  %3937 = vrot.lane.b32.xlu1 %v9634_v62, %s6337_s29  ;;  %v3792_v12 = vsel %vm922_vm3, %v3758_v8, %v9274_v51  ;;  %v3795_v24 = vsel %vm922_vm3, %v3761_v3, %v11193_v22  ;;  %v3691_v7 = vsel %vm3674_vm12, %v8409_v19, %v11194_v10  ;;  %v11196_v51 = vld [vmem:[#allocation96_spill] sm:$0xff]  ;;  %v11206_v8 = vld [vmem:[#allocation99_spill] sm:$0xff]  ;;  %v11215_v26 = vld [vmem:[#allocation101_spill] sm:$0xff] }
 0x633   : > { %v3827_v54 = vsel %vm3812_vm14, %v3792_v12, %v9416_v29  ;;  %v3830_v2 = vsel %vm3812_vm14, %v3795_v24, %v9422_v49  ;;  %v3725_v58 = vsel %vm887_vm4, %v3691_v7, %v11196_v51  ;;  %v3763_v49 = vsel %vm3743_vm13, %v3728_v41, %v11201_v61  ;;  %v11210_v12 = vld [vmem:[#allocation131_spill] sm:$0xff]  ;;  %v11212_v7 = vld [vmem:[#allocation68_spill] sm:$0xff] }
 0x634   : > { %v3597_v39 = vpop.permute.xlu1 %3596  ;;  %v3603_v57 = vpop.permute.xlu0 %3602  ;;  %v3760_v29 = vsel %vm3743_vm13, %v3725_v58, %v11200_v38  ;;  %v3797_v0 = vsel %vm922_vm3, %v3763_v49, %v11202_v5  ;;  %v11211_v24 = vld [vmem:[#allocation155_spill] sm:$0xff]  ;;  %v3695_v55 = vsel %vm3674_vm12, %v8449_v32, %v11212_v7  ;;  %v11219_v49 = vld [vmem:[#allocation156_spill] sm:$0xff]  ;;  %v11220_v5 = vld [vmem:[#allocation70_spill] sm:$0xff] }
 0x635   : > { %v9663_v45 = vsel %vm1183_vm9, %v3825_v16, %v3597_v39  ;;  %v9666_v30 = vsel %vm1183_vm9, %v3828_v25, %v3603_v57  ;;  %v3794_v27 = vsel %vm922_vm3, %v3760_v29, %v9285_v37  ;;  %v11203_v16 = vld [vmem:[#allocation66_spill] sm:$0xff]  ;;  %v11204_v39 = vld [vmem:[#allocation69_spill] sm:$0xff]  ;;  %v3832_v40 = vsel %vm3812_vm14, %v3797_v0, %v9426_v35 }
 0x636   : > { %11190 = vst [vmem:[#allocation144_spill] sm:$0xff] %v9666_v30  ;;  %3935 = vrot.lane.b32.xlu0 %v9663_v45, %s6337_s29  ;;  %3941 = vrot.lane.b32.xlu1 %v9666_v30, %s6337_s29  ;;  %v3693_v25 = vsel %vm3674_vm12, %v8429_v13, %v11203_v16  ;;  %v3696_v57 = vsel %vm3674_vm12, %v8446_v23, %v11204_v39  ;;  %v11205_v37 = vld [vmem:[#allocation98_spill] sm:$0xff]  ;;  %v11209_v23 = vld [vmem:[#allocation128_spill] sm:$0xff]  ;;  %v11218_v29 = vld [vmem:[#allocation133_spill] sm:$0xff] }
 0x637   : > { %v3829_v20 = vsel %vm3812_vm14, %v3794_v27, %v9420_v34  ;;  %v3727_v43 = vsel %vm887_vm4, %v3693_v25, %v11205_v37  ;;  %v3730_v4 = vsel %vm887_vm4, %v3696_v57, %v11206_v8  ;;  %v3697_v0 = vsel %vm3674_vm12, %v8469_v48, %v11220_v5  ;;  %v11221_v16 = vld [vmem:[#allocation73_spill] sm:$0xff]  ;;  %v11224_v37 = vld [vmem:[#allocation103_spill] sm:$0xff] }
 0x638   : > { %v3601_v15 = vpop.permute.xlu1 %3600  ;;  %v3607_v31 = vpop.permute.xlu0 %3606  ;;  %v3762_v34 = vsel %vm3743_vm13, %v3727_v43, %v11209_v23  ;;  %v3765_v35 = vsel %vm3743_vm13, %v3730_v4, %v11210_v12  ;;  %v3700_v25 = vsel %vm3674_vm12, %v8486_v1, %v11221_v16  ;;  %v11222_v57 = vld [vmem:[#allocation169_spill] sm:$0xff]  ;;  %v11225_v1 = vld [vmem:[#allocation132_spill] sm:$0xff]  ;;  %v11226_v4 = vld [vmem:[#allocation135_spill] sm:$0xff] }
 0x639   : > { %v9695_v19 = vsel %vm1183_vm9, %v3827_v54, %v3601_v15  ;;  %v9698_v14 = vsel %vm1183_vm9, %v3830_v2, %v3607_v31  ;;  %v3796_v22 = vsel %vm922_vm3, %v3762_v34, %v9296_v59  ;;  %v3799_v10 = vsel %vm922_vm3, %v3765_v35, %v11211_v24  ;;  %v11214_v59 = vld [vmem:[#allocation100_spill] sm:$0xff]  ;;  %v11227_v34 = vld [vmem:[#allocation157_spill] sm:$0xff]  ;;  %v11228_v35 = vld [vmem:[#allocation158_spill] sm:$0xff] }
 0x63a   : > { %11198 = vst [vmem:[#allocation51_spill] sm:$0xff] %v9695_v19  ;;  %11199 = vst [vmem:[#allocation53_spill] sm:$0xff] %v9698_v14  ;;  %3939 = vrot.lane.b32.xlu0 %v9695_v19, %s6337_s29  ;;  %3945 = vrot.lane.b32.xlu1 %v9698_v14, %s6337_s29  ;;  %v3698_v54 = vsel %vm3674_vm12, %v8466_v42, %v11213_v6  ;;  %v3831_v2 = vsel %vm3812_vm14, %v3796_v22, %v9424_v21  ;;  %v11217_v42 = vld [vmem:[#allocation130_spill] sm:$0xff]  ;;  %v11229_v24 = vld [vmem:[#allocation72_spill] sm:$0xff] }
 0x63b   : > { %v3834_v15 = vsel %vm3812_vm14, %v3799_v10, %v9430_v47  ;;  %v3729_v58 = vsel %vm887_vm4, %v3695_v55, %v11214_v59  ;;  %v3732_v41 = vsel %vm887_vm4, %v3698_v54, %v11215_v26  ;;  %v3734_v43 = vsel %vm887_vm4, %v3700_v25, %v11224_v37  ;;  %v11230_v10 = vld [vmem:[#allocation42_spill] sm:$0xff]  ;;  %v11231_v55 = vld [vmem:[#allocation75_spill] sm:$0xff]  ;;  %v11235_v26 = vld [vmem:[#allocation104_spill] sm:$0xff] }
 0x63c   : > { %v3605_v33 = vpop.permute.xlu1 %3604  ;;  %v3611_v11 = vpop.permute.xlu0 %3610  ;;  %v3764_v21 = vsel %vm3743_vm13, %v3729_v58, %v11217_v42  ;;  %v3767_v47 = vsel %vm3743_vm13, %v3732_v41, %v11218_v29  ;;  %v3769_v23 = vsel %vm3743_vm13, %v3734_v43, %v11226_v4  ;;  %v3699_v7 = vsel %vm3674_vm12, %v11230_v10, %v11229_v24  ;;  %v11232_v6 = vld [vmem:[#allocation43_spill] sm:$0xff]  ;;  %v11236_v42 = vld [vmem:[#allocation105_spill] sm:$0xff]  ;;  %v11240_v25 = vld [vmem:[#allocation160_spill] sm:$0xff] }
 0x63d   : > { %v9727_v13 = vsel %vm1183_vm9, %v3829_v20, %v3605_v33  ;;  %v9730_v3 = vsel %vm1183_vm9, %v3832_v40, %v3611_v11  ;;  %v3798_v61 = vsel %vm922_vm3, %v3764_v21, %v9307_v28  ;;  %v3801_v27 = vsel %vm922_vm3, %v3767_v47, %v11219_v49  ;;  %v11223_v28 = vld [vmem:[#allocation102_spill] sm:$0xff] }
 0x63e   : > { %11207 = vst [vmem:[#allocation82_spill] sm:$0xff] %v9727_v13  ;;  %11208 = vst [vmem:[#allocation83_spill] sm:$0xff] %v9730_v3  ;;  %3943 = vrot.lane.b32.xlu0 %v9727_v13, %s6337_s29  ;;  %3949 = vrot.lane.b32.xlu1 %v9730_v3, %s6337_s29  ;;  %v3833_v39 = vsel %vm3812_vm14, %v3798_v61, %v9428_v53  ;;  %v3836_v20 = vsel %vm3812_vm14, %v3801_v27, %v11222_v57  ;;  %v11237_v61 = vld [vmem:[#allocation134_spill] sm:$0xff]  ;;  %v11238_v27 = vld [vmem:[#allocation137_spill] sm:$0xff] }
 0x63f   : > { %v3731_v11 = vsel %vm887_vm4, %v3697_v0, %v11223_v28  ;;  %v3803_v22 = vsel %vm922_vm3, %v3769_v23, %v11228_v35  ;;  %v3702_v54 = vsel %vm3674_vm12, %v11232_v6, %v11231_v55  ;;  %v3733_v41 = vsel %vm887_vm4, %v3699_v7, %v11235_v26  ;;  %v11239_v0 = vld [vmem:[#allocation159_spill] sm:$0xff]  ;;  %v11241_v57 = vld [vmem:[#allocation74_spill] sm:$0xff]  ;;  %v11244_v28 = vld [vmem:[#allocation45_spill] sm:$0xff] }
 0x640   : > { %v3609_v31 = vpop.permute.xlu1 %3608  ;;  %v3615_v51 = vpop.permute.xlu0 %3614  ;;  %v3766_v53 = vsel %vm3743_vm13, %v3731_v11, %v11225_v1  ;;  %v3736_v21 = vsel %vm887_vm4, %v3702_v54, %v11236_v42  ;;  %v3768_v49 = vsel %vm3743_vm13, %v3733_v41, %v11237_v61  ;;  %v11245_v37 = vld [vmem:[#allocation170_spill] sm:$0xff]  ;;  %v11246_v1 = vld [vmem:[#allocation173_spill] sm:$0xff]  ;;  %v11248_v35 = vld [vmem:[#allocation107_spill] sm:$0xff] }
 0x641   : > { %v9759_v32 = vsel %vm1183_vm9, %v3831_v2, %v3609_v31  ;;  %v9762_v38 = vsel %vm1183_vm9, %v3834_v15, %v3615_v51  ;;  %v3800_v12 = vsel %vm922_vm3, %v3766_v53, %v11227_v34  ;;  %v11233_v2 = vld [vmem:[#allocation168_spill] sm:$0xff]  ;;  %v11234_v31 = vld [vmem:[#allocation171_spill] sm:$0xff]  ;;  %v3771_v5 = vsel %vm3743_vm13, %v3736_v21, %v11238_v27  ;;  %v11247_v34 = vld [vmem:[#allocation106_spill] sm:$0xff] }
 0x642   : > { %11216 = vst [vmem:[#allocation113_spill] sm:$0xff] %v9759_v32  ;;  %3947 = vrot.lane.b32.xlu0 %v9759_v32, %s6337_s29  ;;  %3953 = vrot.lane.b32.xlu1 %v9762_v38, %s6337_s29  ;;  %v3835_v15 = vsel %vm3812_vm14, %v3800_v12, %v11233_v2  ;;  %v3838_v51 = vsel %vm3812_vm14, %v3803_v22, %v11234_v31  ;;  %v11249_v7 = vld [vmem:[#allocation136_spill] sm:$0xff]  ;;  %v11250_v6 = vld [vmem:[#allocation139_spill] sm:$0xff]  ;;  %v11251_v2 = vld [vmem:[#allocation161_spill] sm:$0xff] }
 0x643   : > { %v3802_v16 = vsel %vm922_vm3, %v3768_v49, %v11239_v0  ;;  %v11252_v31 = vld [vmem:[#allocation162_spill] sm:$0xff]  ;;  %v11255_v41 = vld [vmem:[#allocation172_spill] sm:$0xff]  ;;  %v11256_v21 = vld [vmem:[#allocation175_spill] sm:$0xff] }
 0x644   : > { %v3613_v40 = vpop.permute.xlu1 %3612  ;;  %v3619_v33 = vpop.permute.xlu0 %3618  ;;  %v3837_v43 = vsel %vm3812_vm14, %v3802_v16, %v11245_v37 }
 0x645   : > { %v9791_v48 = vsel %vm1183_vm9, %v3833_v39, %v3613_v40  ;;  %v9794_v8 = vsel %vm1183_vm9, %v3836_v20, %v3619_v33  ;;  %v3805_v39 = vsel %vm922_vm3, %v3771_v5, %v11240_v25  ;;  %v11242_v20 = vld [vmem:[#allocation44_spill] sm:$0xff]  ;;  %v11243_v33 = vld [vmem:[#allocation77_spill] sm:$0xff] }
 0x646   : > { %3951 = vrot.lane.b32.xlu0 %v9791_v48, %s6337_s29  ;;  %3957 = vrot.lane.b32.xlu1 %v9794_v8, %s6337_s29  ;;  %v3701_v40 = vsel %vm3674_vm12, %v11242_v20, %v11241_v57  ;;  %v3704_v11 = vsel %vm3674_vm12, %v11244_v28, %v11243_v33  ;;  %v3840_v53 = vsel %vm3812_vm14, %v3805_v39, %v11246_v1  ;;  %v11257_v5 = vld [vmem:[#allocation108_spill] sm:$0xff]  ;;  %v11258_v39 = vld [vmem:[#allocation138_spill] sm:$0xff]  ;;  %v11259_v20 = vld [vmem:[#allocation163_spill] sm:$0xff] }
 0x647   : > { %v3735_v12 = vsel %vm887_vm4, %v3701_v40, %v11247_v34  ;;  %v3738_v22 = vsel %vm887_vm4, %v3704_v11, %v11248_v35  ;;  %v11260_v33 = vld [vmem:[#allocation174_spill] sm:$0xff]  ;;  %v4674_v1 = vld [vmem:[%s10850_s6 + $0x58] sm:$0xff] }
 0x648   : > { %v3617_v59 = vpop.permute.xlu1 %3616  ;;  %v3623_v58 = vpop.permute.xlu0 %3622  ;;  %v3770_v55 = vsel %vm3743_vm13, %v3735_v12, %v11249_v7  ;;  %v3773_v54 = vsel %vm3743_vm13, %v3738_v22, %v11250_v6  ;;  %v4670_v34 = vld [vmem:[%s10850_s6 + $0x38] sm:$0xff]  ;;  %v4669_v12 = vld [vmem:[%s10850_s6 + $0x30] sm:$0xff]  ;;  %v4668_v35 = vld [vmem:[%s10850_s6 + $0x28] sm:$0xff] }
 0x649   : > { %v9823_v29 = vsel %vm1183_vm9, %v3835_v15, %v3617_v59  ;;  %v9826_v47 = vsel %vm1183_vm9, %v3838_v51, %v3623_v58  ;;  %v3804_v15 = vsel %vm922_vm3, %v3770_v55, %v11251_v2  ;;  %v3807_v51 = vsel %vm922_vm3, %v3773_v54, %v11252_v31  ;;  %v11253_v59 = vld [vmem:[#allocation76_spill] sm:$0xff]  ;;  %v11254_v58 = vld [vmem:[#allocation46_spill] sm:$0xff]  ;;  %v4667_v22 = vld [vmem:[%s10850_s6 + $0x20] sm:$0xff] }
 0x64a   : > { %3955 = vrot.lane.b32.xlu0 %v9823_v29, %s6337_s29  ;;  %3961 = vrot.lane.b32.xlu1 %v9826_v47, %s6337_s29  ;;  %v3703_v26 = vsel %vm3674_vm12, %v11254_v58, %v11253_v59  ;;  %v3839_v42 = vsel %vm3812_vm14, %v3804_v15, %v11255_v41  ;;  %v3842_v61 = vsel %vm3812_vm14, %v3807_v51, %v11256_v21  ;;  %v4666_v7 = vld [vmem:[%s10850_s6 + $0x18] sm:$0xff]  ;;  %v4665_v55 = vld [vmem:[%s10850_s6 + $0x10] sm:$0xff] }
 0x64b   : > { %v3737_v0 = vsel %vm887_vm4, %v3703_v26, %v11257_v5  ;;  %v4664_v6 = vld [vmem:[%s10850_s6 + $0x8] sm:$0xff]  ;;  %v4663_v54 = vld [vmem:[%s10850_s6] sm:$0xff] }
 0x64c   : > { %v3621_v4 = vpop.permute.xlu1 %3620  ;;  %v3627_v23 = vpop.permute.xlu0 %3626  ;;  %v3772_v57 = vsel %vm3743_vm13, %v3737_v0, %v11258_v39 }
 0x64d   : > { %v9855_v24 = vsel %vm1183_vm9, %v3837_v43, %v3621_v4  ;;  %v9858_v10 = vsel %vm1183_vm9, %v3840_v53, %v3627_v23  ;;  %v3806_v40 = vsel %vm922_vm3, %v3772_v57, %v11259_v20  ;;  %v4675_v43 = vld [vmem:[%s10850_s6 + $0x60] sm:$0x3]  ;;  %v4673_v53 = vld [vmem:[%s10850_s6 + $0x50] sm:$0xff]  ;;  %v4672_v4 = vld [vmem:[%s10850_s6 + $0x48] sm:$0xff] }
 0x64e   : > { %3959 = vrot.lane.b32.xlu0 %v9855_v24, %s6337_s29  ;;  %3965 = vrot.lane.b32.xlu1 %v9858_v10, %s6337_s29  ;;  %v3841_v28 = vsel %vm3812_vm14, %v3806_v40, %v11260_v33  ;;  %v4671_v23 = vld [vmem:[%s10850_s6 + $0x40] sm:$0xff] }
 0x64f   : > { %5854 = vmatprep.subr.msk.mxu1 %vm3486_vm8, %v4675_v43  ;;  %5780 = vmatprep.subr.msk.mxu0 %vm3486_vm8, %v4675_v43 }
 0x650   : > { %v3625_v49 = vpop.permute.xlu1 %3624  ;;  %v3631_v27 = vpop.permute.xlu0 %3630  ;;  %5867 = vmatpush3.msk.msra.mxu1 %vm3486_vm8, %v4675_v43  ;;  %5781 = vmatpush3.msk.msra.mxu0 %vm3486_vm8, %v4675_v43  ;;  %vm4630_vm8 = vcmask 687104  }
 0x651   : > { %v9882_v16 = vsel %vm1183_vm9, %v3839_v42, %v3625_v49  ;;  %v9885_v25 = vsel %vm1183_vm9, %v3842_v61, %v3631_v27  ;;  %5855 = vmatprep.subr.mxu1 %v4674_v1  ;;  %5782 = vmatprep.subr.mxu0 %v4674_v1 }
 0x652   : > { %3963 = vrot.lane.b32.xlu0 %v9882_v16, %s6337_s29  ;;  %3969 = vrot.lane.b32.xlu1 %v9885_v25, %s6337_s29 }
 0x653   : > { %5868 = vmatpush3.msra.mxu1 %v4674_v1  ;;  %5783 = vmatpush3.msra.mxu0 %v4674_v1 }
 0x654   : > { %v3629_v11 = vpop.permute.xlu1 %3628  ;;  %5856 = vmatprep.subr.mxu1 %v4673_v53  ;;  %5784 = vmatprep.subr.mxu0 %v4673_v53  ;;  %v9997_v15 = vpop.permute.xlu0 %3634 }
 0x655   : > { %v9898_v37 = vsel %vm1183_vm9, %v3841_v28, %v3629_v11  ;;  %5869 = vmatpush3.msra.mxu1 %v4673_v53  ;;  %5785 = vmatpush3.msra.mxu0 %v4673_v53 }
 0x656   : > { %3967 = vrot.lane.b32.xlu0 %v9898_v37, %s6337_s29  ;;  %4007 = vrot.lane.b32.xlu1 %v9503_v56, %s6338_s8  ;;  %s6342_s29 = smov 84  }
 0x657   : > { %5857 = vmatprep.subr.mxu1 %v4672_v4  ;;  %5786 = vmatprep.subr.mxu0 %v4672_v4 }
 0x658   : > { %5870 = vmatpush3.msra.mxu1 %v4672_v4  ;;  %5787 = vmatpush3.msra.mxu0 %v4672_v4  ;;  %v9991_v2 = vpop.permute.xlu1 %3632  ;;  %v10009_v51 = vpop.permute.xlu0 %3638 }
 0x659   : > { %5858 = vmatprep.subr.mxu1 %v4671_v23  ;;  %5788 = vmatprep.subr.mxu0 %v4671_v23 }
 0x65a   : > { %4009 = vrot.lane.b32.xlu0 %v9477_v18, %s6338_s8  ;;  %4011 = vrot.lane.b32.xlu1 %v9535_v36, %s6338_s8 }
 0x65b   : > { %5871 = vmatpush3.msra.mxu1 %v4671_v23  ;;  %5789 = vmatpush3.msra.mxu0 %v4671_v23 }
 0x65c   : > { %5859 = vmatprep.subr.mxu1 %v4670_v34  ;;  %5790 = vmatprep.subr.mxu0 %v4670_v34  ;;  %v10003_v31 = vpop.permute.xlu1 %3636 }
 0x65d   : > { %5872 = vmatpush3.msra.mxu1 %v4670_v34  ;;  %5791 = vmatpush3.msra.mxu0 %v4670_v34 }
 0x65e   : > { %4013 = vrot.lane.b32.xlu0 %v9506_v63, %s6338_s8  ;;  %4015 = vrot.lane.b32.xlu1 %v9567_v52, %s6338_s8 }
 0x65f   : > { %5860 = vmatprep.subr.mxu1 %v4669_v12  ;;  %5792 = vmatprep.subr.mxu0 %v4669_v12 }
 0x660   : > { %5873 = vmatpush3.msra.mxu1 %v4669_v12  ;;  %5793 = vmatpush3.msra.mxu0 %v4669_v12 }
 0x661   : > { %5861 = vmatprep.subr.mxu1 %v4668_v35  ;;  %5794 = vmatprep.subr.mxu0 %v4668_v35 }
 0x662   : > { %4017 = vrot.lane.b32.xlu0 %v9538_v17, %s6338_s8  ;;  %4019 = vrot.lane.b32.xlu1 %v9599_v50, %s6338_s8 }
 0x663   : > { %5874 = vmatpush3.msra.mxu1 %v4668_v35  ;;  %5795 = vmatpush3.msra.mxu0 %v4668_v35 }
 0x664   : > { %5862 = vmatprep.subr.mxu1 %v4667_v22  ;;  %5796 = vmatprep.subr.mxu0 %v4667_v22 }
 0x665   : > { %5875 = vmatpush3.msra.mxu1 %v4667_v22  ;;  %5797 = vmatpush3.msra.mxu0 %v4667_v22 }
 0x666   : > { %4021 = vrot.lane.b32.xlu0 %v9570_v44, %s6338_s8  ;;  %4023 = vrot.lane.b32.xlu1 %v9631_v46, %s6338_s8 }
 0x667   : > { %5863 = vmatprep.subr.mxu1 %v4666_v7  ;;  %5798 = vmatprep.subr.mxu0 %v4666_v7 }
 0x668   : > { %5876 = vmatpush3.msra.mxu1 %v4666_v7  ;;  %5799 = vmatpush3.msra.mxu0 %v4666_v7 }
 0x669   : > { %5864 = vmatprep.subr.mxu1 %v4665_v55  ;;  %5800 = vmatprep.subr.mxu0 %v4665_v55 }
 0x66a   : > { %4025 = vrot.lane.b32.xlu0 %v9602_v60, %s6338_s8  ;;  %4027 = vrot.lane.b32.xlu1 %v9663_v45, %s6338_s8 }
 0x66b   : > { %5877 = vmatpush3.msra.mxu1 %v4665_v55  ;;  %5801 = vmatpush3.msra.mxu0 %v4665_v55 }
 0x66c   : > { %5865 = vmatprep.subr.mxu1 %v4664_v6  ;;  %5802 = vmatprep.subr.mxu0 %v4664_v6 }
 0x66d   : > { %5878 = vmatpush3.msra.mxu1 %v4664_v6  ;;  %5803 = vmatpush3.msra.mxu0 %v4664_v6 }
 0x66e   : > { %4029 = vrot.lane.b32.xlu0 %v9634_v62, %s6338_s8  ;;  %4109 = vrot.lane.b32.xlu1 %v9567_v52, %s6339_s16 }
 0x66f   : > { %5866 = vmatprep.subr.mxu1 %v4663_v54  ;;  %5804 = vmatprep.subr.mxu0 %v4663_v54 }
 0x670   : > { %5879 = vmatpush3.msra.mxu1 %v4663_v54  ;;  %5805 = vmatpush3.msra.mxu0 %v4663_v54 }
 0x672   : > { %4111 = vrot.lane.b32.xlu0 %v9538_v17, %s6339_s16  ;;  %4205 = vrot.lane.b32.xlu1 %v9599_v50, %s6340_s13 }
 0x676   : > { %4207 = vrot.lane.b32.xlu0 %v9570_v44, %s6340_s13  ;;  %4301 = vrot.lane.b32.xlu1 %v9631_v46, %s6341_s23 }
 0x67a   : > { %4303 = vrot.lane.b32.xlu0 %v9602_v60, %s6341_s23  ;;  %4391 = vrot.lane.b32.xlu1 %v9663_v45, %s6342_s29 }
 0x67e   : > { %4113 = vrot.lane.b32.xlu0 %v9599_v50, %s6339_s16  ;;  %4393 = vrot.lane.b32.xlu1 %v9634_v62, %s6342_s29 }
 0x682   : > { %4115 = vrot.lane.b32.xlu0 %v9570_v44, %s6339_s16  ;;  %4209 = vrot.lane.b32.xlu1 %v9631_v46, %s6340_s13 }
 0x686   : > { %4211 = vrot.lane.b32.xlu0 %v9602_v60, %s6340_s13  ;;  %4305 = vrot.lane.b32.xlu1 %v9663_v45, %s6341_s23 }
 0x68a   : > { %4307 = vrot.lane.b32.xlu0 %v9634_v62, %s6341_s23  ;;  %4395 = vrot.lane.b32.xlu1 %v9695_v19, %s6342_s29 }
 0x68e   : > { %4117 = vrot.lane.b32.xlu0 %v9631_v46, %s6339_s16  ;;  %4397 = vrot.lane.b32.xlu1 %v9666_v30, %s6342_s29 }
 0x690   : > { %v10011_v59 = vpop.permute.xlu1 %3917 }
 0x692   : > { %4119 = vrot.lane.b32.xlu0 %v9602_v60, %s6339_s16  ;;  %4213 = vrot.lane.b32.xlu1 %v9663_v45, %s6340_s13 }
 0x694   : > { %v10017_v58 = vpop.permute.xlu1 %3921  ;;  %v10019_v26 = vpop.permute.xlu0 %3915 }
 0x696   : > { %4215 = vrot.lane.b32.xlu0 %v9634_v62, %s6340_s13  ;;  %4309 = vrot.lane.b32.xlu1 %v9695_v19, %s6341_s23 }
 0x698   : > { %v10025_v41 = vpop.permute.xlu1 %3925  ;;  %v10027_v42 = vpop.permute.xlu0 %3919 }
 0x69a   : > { %4311 = vrot.lane.b32.xlu0 %v9666_v30, %s6341_s23  ;;  %4399 = vrot.lane.b32.xlu1 %v9727_v13, %s6342_s29 }
 0x69c   : > { %v10033_v21 = vpop.permute.xlu1 %3929  ;;  %v10035_v61 = vpop.permute.xlu0 %3923 }
 0x69e   : > { %4121 = vrot.lane.b32.xlu0 %v9663_v45, %s6339_s16  ;;  %4401 = vrot.lane.b32.xlu1 %v9698_v14, %s6342_s29 }
 0x6a0   : > { %v10041_v49 = vpop.permute.xlu1 %3933  ;;  %v10043_v27 = vpop.permute.xlu0 %3927 }
 0x6a2   : > { %4123 = vrot.lane.b32.xlu0 %v9634_v62, %s6339_s16  ;;  %4217 = vrot.lane.b32.xlu1 %v9695_v19, %s6340_s13 }
 0x6a4   : > { %v10049_v5 = vpop.permute.xlu1 %3937  ;;  %v10051_v0 = vpop.permute.xlu0 %3931 }
 0x6a6   : > { %4219 = vrot.lane.b32.xlu0 %v9666_v30, %s6340_s13  ;;  %4313 = vrot.lane.b32.xlu1 %v9727_v13, %s6341_s23 }
 0x6a8   : > { %v10057_v39 = vpop.permute.xlu1 %3941  ;;  %v10059_v57 = vpop.permute.xlu0 %3935 }
 0x6aa   : > { %4315 = vrot.lane.b32.xlu0 %v9698_v14, %s6341_s23  ;;  %4403 = vrot.lane.b32.xlu1 %v9759_v32, %s6342_s29 }
 0x6ac   : > { %v10065_v20 = vpop.permute.xlu1 %3945  ;;  %v10067_v40 = vpop.permute.xlu0 %3939 }
 0x6ad   : > { %11261 = vst [vmem:[#allocation115_spill] sm:$0xff] %v10065_v20 }
 0x6ae   : > { %4125 = vrot.lane.b32.xlu0 %v9695_v19, %s6339_s16  ;;  %4405 = vrot.lane.b32.xlu1 %v9730_v3, %s6342_s29 }
 0x6b0   : > { %v10073_v33 = vpop.permute.xlu1 %3949  ;;  %v10075_v28 = vpop.permute.xlu0 %3943 }
 0x6b1   : > { %11262 = vst [vmem:[#allocation145_spill] sm:$0xff] %v10073_v33 }
 0x6b2   : > { %4127 = vrot.lane.b32.xlu0 %v9666_v30, %s6339_s16  ;;  %4221 = vrot.lane.b32.xlu1 %v9727_v13, %s6340_s13 }
 0x6b4   : > { %v10081_v11 = vpop.permute.xlu1 %3953  ;;  %v10083_v43 = vpop.permute.xlu0 %3947 }
 0x6b5   : > { %11263 = vst [vmem:[#allocation146_spill] sm:$0xff] %v10081_v11  ;;  %11264 = vst [vmem:[#allocation52_spill] sm:$0xff] %v10083_v43 }
 0x6b6   : > { %4223 = vrot.lane.b32.xlu0 %v9698_v14, %s6340_s13  ;;  %4317 = vrot.lane.b32.xlu1 %v9759_v32, %s6341_s23 }
 0x6b8   : > { %v10089_v1 = vpop.permute.xlu1 %3957  ;;  %v10091_v53 = vpop.permute.xlu0 %3951 }
 0x6b9   : > { %11265 = vst [vmem:[#allocation55_spill] sm:$0xff] %v10089_v1  ;;  %11266 = vst [vmem:[#allocation84_spill] sm:$0xff] %v10091_v53 }
 0x6ba   : > { %4031 = vrot.lane.b32.xlu0 %v9695_v19, %s6338_s8  ;;  %4319 = vrot.lane.b32.xlu1 %v9730_v3, %s6341_s23 }
 0x6bc   : > { %v10097_v4 = vpop.permute.xlu1 %3961  ;;  %v10099_v23 = vpop.permute.xlu0 %3955 }
 0x6bd   : > { %11267 = vst [vmem:[#allocation85_spill] sm:$0xff] %v10097_v4  ;;  %11268 = vst [vmem:[#allocation114_spill] sm:$0xff] %v10099_v23 }
 0x6be   : > { %4407 = vrot.lane.b32.xlu0 %v9791_v48, %s6342_s29  ;;  %4033 = vrot.lane.b32.xlu1 %v9666_v30, %s6338_s8 }
 0x6c0   : > { %v10105_v34 = vpop.permute.xlu1 %3965  ;;  %v10107_v12 = vpop.permute.xlu0 %3959 }
 0x6c1   : > { %11269 = vst [vmem:[#allocation117_spill] sm:$0xff] %v10105_v34  ;;  %11270 = vst [vmem:[#allocation147_spill] sm:$0xff] %v10107_v12 }
 0x6c2   : > { %4129 = vrot.lane.b32.xlu0 %v9727_v13, %s6339_s16  ;;  %4409 = vrot.lane.b32.xlu1 %v9762_v38, %s6342_s29 }
 0x6c4   : > { %v10113_v35 = vpop.permute.xlu1 %3969  ;;  %v10115_v22 = vpop.permute.xlu0 %3963 }
 0x6c5   : > { %11271 = vst [vmem:[#allocation148_spill] sm:$0xff] %v10113_v35  ;;  %11272 = vst [vmem:[#allocation54_spill] sm:$0xff] %v10115_v22 }
 0x6c6   : > { %4131 = vrot.lane.b32.xlu0 %v9698_v14, %s6339_s16  ;;  %4225 = vrot.lane.b32.xlu1 %v9759_v32, %s6340_s13 }
 0x6c8   : > { %v10121_v7 = vpop.permute.xlu1 %4007  ;;  %v10123_v55 = vpop.permute.xlu0 %3967 }
 0x6c9   : > { %11273 = vst [vmem:[#allocation57_spill] sm:$0xff] %v10121_v7  ;;  %11274 = vst [vmem:[#allocation86_spill] sm:$0xff] %v10123_v55 }
 0x6ca   : > { %4227 = vrot.lane.b32.xlu0 %v9730_v3, %s6340_s13  ;;  %4321 = vrot.lane.b32.xlu1 %v9791_v48, %s6341_s23 }
 0x6cc   : > { %v4012_v6 = vpop.permute.xlu1 %4011  ;;  %v10129_v54 = vpop.permute.xlu0 %4009 }
 0x6cd   : > { %11275 = vst [vmem:[#allocation87_spill] sm:$0xff] %v10129_v54 }
 0x6ce   : > { %4035 = vrot.lane.b32.xlu0 %v9727_v13, %s6338_s8  ;;  %4323 = vrot.lane.b32.xlu1 %v9762_v38, %s6341_s23 }
 0x6d0   : > { %v10135_v35 = vpop.permute.xlu1 %4015  ;;  %v4014_v7 = vpop.permute.xlu0 %4013 }
 0x6d2   : > { %4411 = vrot.lane.b32.xlu0 %v9823_v29, %s6342_s29  ;;  %4037 = vrot.lane.b32.xlu1 %v9698_v14, %s6338_s8  ;;  %v11276_v14 = vld [vmem:[#allocation11_spill] sm:$0xff] }
 0x6d3   : > { %v4470_v33 = vsel %vm4467_vm1, %v11276_v14, %v10019_v26  ;;  %v11277_v26 = vld [vmem:[#allocation6_spill] sm:$0xff] }
 0x6d4   : > { %v10141_v55 = vpop.permute.xlu1 %4019  ;;  %v10143_v22 = vpop.permute.xlu0 %4017  ;;  %v4471_v14 = vsel %vm4467_vm1, %v11277_v26, %v10011_v59 }
 0x6d6   : > { %4133 = vrot.lane.b32.xlu0 %v9759_v32, %s6339_s16  ;;  %4413 = vrot.lane.b32.xlu1 %v9794_v8, %s6342_s29 }
 0x6d8   : > { %v10149_v54 = vpop.permute.xlu1 %4023  ;;  %v10151_v34 = vpop.permute.xlu0 %4021 }
 0x6da   : > { %4229 = vrot.lane.b32.xlu1 %v9791_v48, %s6340_s13  ;;  %4135 = vrot.lane.b32.xlu0 %v9730_v3, %s6339_s16 }
 0x6dc   : > { %v10157_v12 = vpop.permute.xlu1 %4027  ;;  %v10159_v4 = vpop.permute.xlu0 %4025 }
 0x6de   : > { %4325 = vrot.lane.b32.xlu1 %v9823_v29, %s6341_s23  ;;  %4231 = vrot.lane.b32.xlu0 %v9762_v38, %s6340_s13 }
 0x6e0   : > { %v4110_v1 = vpop.permute.xlu1 %4109  ;;  %v10165_v23 = vpop.permute.xlu0 %4029 }
 0x6e2   : > { %4327 = vrot.lane.b32.xlu1 %v9794_v8, %s6341_s23  ;;  %4039 = vrot.lane.b32.xlu0 %v9759_v32, %s6338_s8  ;;  %v4503_v32 = vsel %vm4498_vm5, %v4470_v33, %v4012_v6 }
 0x6e3   : > { %v4536_v30 = vsel %vm4531_vm2, %v4503_v32, %v4110_v1  ;;  %v4504_v32 = vsel %vm4498_vm5, %v4471_v14, %v4014_v7 }
 0x6e4   : > { %v4206_v11 = vpop.permute.xlu1 %4205  ;;  %v4112_v53 = vpop.permute.xlu0 %4111 }
 0x6e5   : > { %v4537_v19 = vsel %vm4531_vm2, %v4504_v32, %v4112_v53  ;;  %v4473_v32 = vsel %vm4467_vm1, %v9477_v18, %v10017_v58 }
 0x6e6   : > { %4041 = vrot.lane.b32.xlu1 %v9730_v3, %s6338_s8  ;;  %4415 = vrot.lane.b32.xlu0 %v9855_v24, %s6342_s29  ;;  %v4569_v3 = vsel %vm4564_vm6, %v4536_v30, %v4206_v11 }
 0x6e8   : > { %v4302_v13 = vpop.permute.xlu1 %4301  ;;  %v4208_v43 = vpop.permute.xlu0 %4207 }
 0x6e9   : > { %v4602_v20 = vsel %vm4597_vm7, %v4569_v3, %v4302_v13  ;;  %v4570_v30 = vsel %vm4564_vm6, %v4537_v19, %v4208_v43  ;;  %v4472_v19 = vsel %vm4467_vm1, %v9503_v56, %v10027_v42 }
 0x6ea   : > { %4417 = vrot.lane.b32.xlu1 %v9826_v47, %s6342_s29  ;;  %4137 = vrot.lane.b32.xlu0 %v9791_v48, %s6339_s16  ;;  %v4505_v7 = vsel %vm4498_vm5, %v4472_v19, %v10135_v35  ;;  %v4506_v35 = vsel %vm4498_vm5, %v4473_v32, %v10143_v22 }
 0x6ec   : > { %v4392_v33 = vpop.permute.xlu1 %4391  ;;  %v4304_v6 = vpop.permute.xlu0 %4303 }
 0x6ed   : > { %v4635_v1 = vsel %vm4630_vm8, %v4602_v20, %v4392_v33  ;;  %v4603_v13 = vsel %vm4597_vm7, %v4570_v30, %v4304_v6 }
 0x6ee   : > { %4233 = vrot.lane.b32.xlu1 %v9823_v29, %s6340_s13  ;;  %5812 = vmatprep.mubr.msk.f32.mxu1 %vm4676_vm11, %v4635_v1 }
 0x6ef   : > { %4139 = vrot.lane.b32.xlu0 %v9762_v38, %s6339_s16 }
 0x6f0   : > { %v4394_v3 = vpop.permute.xlu1 %4393  ;;  %v4114_v59 = vpop.permute.xlu0 %4113 }
 0x6f1   : > { %v4636_v14 = vsel %vm4630_vm8, %v4603_v13, %v4394_v3  ;;  %v4538_v33 = vsel %vm4531_vm2, %v4505_v7, %v4114_v59 }
 0x6f2   : > { %4329 = vrot.lane.b32.xlu1 %v9855_v24, %s6341_s23  ;;  %5813 = vmatmul.mubr.msk.f32.vlgmr.msra.gmra.mxu1 %vm4676_vm11, %v4636_v14 }
 0x6f3   : > { %4235 = vrot.lane.b32.xlu0 %v9794_v8, %s6340_s13 }
 0x6f4   : > { %v4210_v20 = vpop.permute.xlu1 %4209  ;;  %v4116_v11 = vpop.permute.xlu0 %4115 }
 0x6f5   : > { %v4571_v6 = vsel %vm4564_vm6, %v4538_v33, %v4210_v20  ;;  %v4539_v3 = vsel %vm4531_vm2, %v4506_v35, %v4116_v11 }
 0x6f6   : > { %4331 = vrot.lane.b32.xlu1 %v9826_v47, %s6341_s23 }
 0x6f7   : > { %4043 = vrot.lane.b32.xlu0 %v9791_v48, %s6338_s8 }
 0x6f8   : > { %v4306_v43 = vpop.permute.xlu1 %4305  ;;  %v4212_v53 = vpop.permute.xlu0 %4211 }
 0x6f9   : > { %v4604_v42 = vsel %vm4597_vm7, %v4571_v6, %v4306_v43  ;;  %v4572_v59 = vsel %vm4564_vm6, %v4539_v3, %v4212_v53  ;;  %v4474_v43 = vsel %vm4467_vm1, %v9535_v36, %v10035_v61 }
 0x6fa   : > { %4045 = vrot.lane.b32.xlu1 %v9762_v38, %s6338_s8  ;;  %v4507_v33 = vsel %vm4498_vm5, %v4474_v43, %v10141_v55 }
 0x6fb   : > { %4419 = vrot.lane.b32.xlu0 %v9882_v16, %s6342_s29 }
 0x6fc   : > { %v4396_v1 = vpop.permute.xlu1 %4395  ;;  %v4308_v30 = vpop.permute.xlu0 %4307 }
 0x6fd   : > { %v4637_v13 = vsel %vm4630_vm8, %v4604_v42, %v4396_v1  ;;  %v4605_v58 = vsel %vm4597_vm7, %v4572_v59, %v4308_v30  ;;  %v4475_v42 = vsel %vm4467_vm1, %v9506_v63, %v10025_v41 }
 0x6fe   : > { %4421 = vrot.lane.b32.xlu1 %v9858_v10, %s6342_s29  ;;  %5815 = vmatprep.mubr.msk.f32.mxu1 %vm4676_vm11, %v4637_v13  ;;  %v4508_v55 = vsel %vm4498_vm5, %v4475_v42, %v10151_v34  ;;  %v11278_v42 = vld [vmem:[#allocation78_spill] sm:$0xff] }
 0x6ff   : > { %4141 = vrot.lane.b32.xlu0 %v9823_v29, %s6339_s16 }
 0x700   : > { %v4398_v14 = vpop.permute.xlu1 %4397  ;;  %v4118_v20 = vpop.permute.xlu0 %4117 }
 0x701   : > { %v4638_v22 = vsel %vm4630_vm8, %v4605_v58, %v4398_v14  ;;  %v4540_v6 = vsel %vm4531_vm2, %v4507_v33, %v4118_v20  ;;  %v4477_v33 = vsel %vm4467_vm1, %v9538_v17, %v10033_v21  ;;  %v11281_v21 = vld [vmem:[#allocation140_spill] sm:$0xff] }
 0x702   : > { %4237 = vrot.lane.b32.xlu1 %v9855_v24, %s6340_s13  ;;  %5816 = vmatmul.mubr.msk.f32.gmra.mxu1 %vm4676_vm11, %v4638_v22  ;;  %v4476_v22 = vsel %vm4467_vm1, %v9567_v52, %v10043_v27 }
 0x703   : > { %4143 = vrot.lane.b32.xlu0 %v9794_v8, %s6339_s16  ;;  %v4509_v43 = vsel %vm4498_vm5, %v4476_v22, %v10149_v54  ;;  %v11279_v54 = vld [vmem:[#allocation48_spill] sm:$0xff] }
 0x704   : > { %v4214_v11 = vpop.permute.xlu1 %4213  ;;  %v4120_v19 = vpop.permute.xlu0 %4119 }
 0x705   : > { %v4573_v32 = vsel %vm4564_vm6, %v4540_v6, %v4214_v11  ;;  %v4541_v13 = vsel %vm4531_vm2, %v4508_v55, %v4120_v19  ;;  %v11280_v55 = vld [vmem:[#allocation110_spill] sm:$0xff] }
 0x706   : > { %4333 = vrot.lane.b32.xlu1 %v9882_v16, %s6341_s23 }
 0x707   : > { %4239 = vrot.lane.b32.xlu0 %v9826_v47, %s6340_s13 }
 0x708   : > { %v4310_v53 = vpop.permute.xlu1 %4309  ;;  %v4216_v7 = vpop.permute.xlu0 %4215 }
 0x709   : > { %v4606_v61 = vsel %vm4597_vm7, %v4573_v32, %v4310_v53  ;;  %v4574_v3 = vsel %vm4564_vm6, %v4541_v13, %v4216_v7 }
 0x70a   : > { %4335 = vrot.lane.b32.xlu1 %v9858_v10, %s6341_s23 }
 0x70b   : > { %4047 = vrot.lane.b32.xlu0 %v9823_v29, %s6338_s8 }
 0x70c   : > { %v4400_v1 = vpop.permute.xlu1 %4399  ;;  %v4312_v30 = vpop.permute.xlu0 %4311 }
 0x70d   : > { %v4639_v35 = vsel %vm4630_vm8, %v4606_v61, %v4400_v1  ;;  %v4607_v41 = vsel %vm4597_vm7, %v4574_v3, %v4312_v30  ;;  %v3705_v61 = vsel %vm3674_vm12, %v11279_v54, %v11278_v42  ;;  %v4510_v1 = vsel %vm4498_vm5, %v4477_v33, %v10159_v4  ;;  %v11282_v4 = vld [vmem:[#allocation79_spill] sm:$0xff] }
 0x70e   : > { %4049 = vrot.lane.b32.xlu1 %v9794_v8, %s6338_s8  ;;  %5818 = vmatprep.mubr.msk.f32.mxu1 %vm4676_vm11, %v4639_v35  ;;  %v3739_v35 = vsel %vm887_vm4, %v3705_v61, %v11280_v55  ;;  %v11289_v61 = vld [vmem:[#allocation177_spill] sm:$0xff] }
 0x70f   : > { %4423 = vrot.lane.b32.xlu0 %v9898_v37, %s6342_s29  ;;  %v3774_v3 = vsel %vm3743_vm13, %v3739_v35, %v11281_v21  ;;  %v4478_v21 = vsel %vm4467_vm1, %v9599_v50, %v10051_v0 }
 0x710   : > { %v4402_v59 = vpop.permute.xlu1 %4401  ;;  %v4122_v58 = vpop.permute.xlu0 %4121 }
 0x711   : > { %v4640_v34 = vsel %vm4630_vm8, %v4607_v41, %v4402_v59  ;;  %v4542_v53 = vsel %vm4531_vm2, %v4509_v43, %v4122_v58  ;;  %v11283_v59 = vld [vmem:[#allocation47_spill] sm:$0xff]  ;;  %v11285_v43 = vld [vmem:[#allocation109_spill] sm:$0xff] }
 0x712   : > { %4425 = vrot.lane.b32.xlu1 %v9885_v25, %s6342_s29  ;;  %5819 = vmatmul.mubr.msk.f32.gmra.mxu1 %vm4676_vm11, %v4640_v34  ;;  %v3706_v58 = vsel %vm3674_vm12, %v11283_v59, %v11282_v4  ;;  %v11284_v34 = vld [vmem:[#allocation165_spill] sm:$0xff] }
 0x713   : > { %4145 = vrot.lane.b32.xlu0 %v9855_v24, %s6339_s16 }
 0x714   : > { %v4218_v14 = vpop.permute.xlu1 %4217  ;;  %v4124_v20 = vpop.permute.xlu0 %4123 }
 0x715   : > { %v4575_v7 = vsel %vm4564_vm6, %v4542_v53, %v4218_v14  ;;  %v4543_v13 = vsel %vm4531_vm2, %v4510_v1, %v4124_v20  ;;  %v3808_v14 = vsel %vm922_vm3, %v3774_v3, %v11284_v34  ;;  %v3740_v53 = vsel %vm887_vm4, %v3706_v58, %v11285_v43 }
 0x716   : > { %4241 = vrot.lane.b32.xlu1 %v9882_v16, %s6340_s13  ;;  %v4479_v58 = vsel %vm4467_vm1, %v9570_v44, %v10041_v49  ;;  %v11293_v49 = vld [vmem:[#allocation142_spill] sm:$0xff] }
 0x717   : > { %4147 = vrot.lane.b32.xlu0 %v9826_v47, %s6339_s16 }
 0x718   : > { %v4314_v11 = vpop.permute.xlu1 %4313  ;;  %v4220_v19 = vpop.permute.xlu0 %4219 }
 0x719   : > { %v4608_v27 = vsel %vm4597_vm7, %v4575_v7, %v4314_v11  ;;  %v4576_v41 = vsel %vm4564_vm6, %v4543_v13, %v4220_v19  ;;  %v11286_v7 = vld [vmem:[#allocation176_spill] sm:$0xff] }
 0x71a   : > { %4337 = vrot.lane.b32.xlu1 %v9898_v37, %s6341_s23  ;;  %v3843_v19 = vsel %vm3812_vm14, %v3808_v14, %v11286_v7 }
 0x71b   : > { %4243 = vrot.lane.b32.xlu0 %v9858_v10, %s6340_s13  ;;  %v10328_v42 = vsel %vm1183_vm9, %v3843_v19, %v9991_v2 }
 0x71c   : > { %v4404_v6 = vpop.permute.xlu1 %4403  ;;  %v4316_v32 = vpop.permute.xlu0 %4315 }
 0x71d   : > { %v4641_v30 = vsel %vm4630_vm8, %v4608_v27, %v4404_v6  ;;  %v4609_v20 = vsel %vm4597_vm7, %v4576_v41, %v4316_v32  ;;  %v11287_v27 = vld [vmem:[#allocation141_spill] sm:$0xff]  ;;  %v11288_v32 = vld [vmem:[#allocation164_spill] sm:$0xff]  ;;  %v4511_v41 = vsel %vm4498_vm5, %v4478_v21, %v10157_v12  ;;  %v11291_v12 = vld [vmem:[#allocation50_spill] sm:$0xff] }
 0x71e   : > { %4339 = vrot.lane.b32.xlu1 %v9885_v25, %s6341_s23  ;;  %5821 = vmatprep.mubr.msk.f32.mxu1 %vm4676_vm11, %v4641_v30  ;;  %v3775_v6 = vsel %vm3743_vm13, %v3740_v53, %v11287_v27  ;;  %v11292_v53 = vld [vmem:[#allocation112_spill] sm:$0xff] }
 0x71f   : > { %4051 = vrot.lane.b32.xlu0 %v9855_v24, %s6338_s8  ;;  %v3809_v54 = vsel %vm922_vm3, %v3775_v6, %v11288_v32  ;;  %v11295_v6 = vld [vmem:[#allocation49_spill] sm:$0xff] }
 0x720   : > { %v4406_v22 = vpop.permute.xlu1 %4405  ;;  %v4126_v11 = vpop.permute.xlu0 %4125  ;;  %v3844_v1 = vsel %vm3812_vm14, %v3809_v54, %v11289_v61  ;;  %v11296_v54 = vld [vmem:[#allocation167_spill] sm:$0xff] }
 0x721   : > { %v4642_v33 = vsel %vm4630_vm8, %v4609_v20, %v4406_v22  ;;  %v10341_v2 = vsel %vm1183_vm9, %v3844_v1, %v9997_v15  ;;  %v4544_v4 = vsel %vm4531_vm2, %v4511_v41, %v4126_v11  ;;  %v11290_v20 = vld [vmem:[#allocation80_spill] sm:$0xff]  ;;  %v4512_v11 = vsel %vm4498_vm5, %v4479_v58, %v10165_v23  ;;  %v11294_v23 = vld [vmem:[#allocation81_spill] sm:$0xff]  ;;  %v11298_v41 = vld [vmem:[#allocation178_spill] sm:$0xff] }
 0x722   : > { %4053 = vrot.lane.b32.xlu1 %v9826_v47, %s6338_s8  ;;  %5822 = vmatmul.mubr.msk.f32.gmra.mxu1 %vm4676_vm11, %v4642_v33  ;;  %v3707_v22 = vsel %vm3674_vm12, %v11291_v12, %v11290_v20  ;;  %v3708_v32 = vsel %vm3674_vm12, %v11295_v6, %v11294_v23 }
 0x723   : > { %4427 = vrot.lane.b32.xlu0 %v10328_v42, %s6342_s29  ;;  %v3741_v7 = vsel %vm887_vm4, %v3707_v22, %v11292_v53 }
 0x724   : > { %v4222_v30 = vpop.permute.xlu1 %4221  ;;  %v4128_v55 = vpop.permute.xlu0 %4127  ;;  %v3776_v33 = vsel %vm3743_vm13, %v3741_v7, %v11293_v49 }
 0x725   : > { %v4577_v59 = vsel %vm4564_vm6, %v4544_v4, %v4222_v30  ;;  %v4545_v19 = vsel %vm4531_vm2, %v4512_v11, %v4128_v55  ;;  %v3810_v61 = vsel %vm922_vm3, %v3776_v33, %v11296_v54  ;;  %v4481_v33 = vsel %vm4467_vm1, %v9602_v60, %v10049_v5 }
 0x726   : > { %4429 = vrot.lane.b32.xlu1 %v10341_v2, %s6342_s29 }
 0x727   : > { %4149 = vrot.lane.b32.xlu0 %v9882_v16, %s6339_s16 }
 0x728   : > { %v4318_v35 = vpop.permute.xlu1 %4317  ;;  %v4224_v13 = vpop.permute.xlu0 %4223 }
 0x729   : > { %v4610_v0 = vsel %vm4597_vm7, %v4577_v59, %v4318_v35  ;;  %v4578_v27 = vsel %vm4564_vm6, %v4545_v19, %v4224_v13  ;;  %v11297_v35 = vld [vmem:[#allocation111_spill] sm:$0xff]  ;;  %v3845_v13 = vsel %vm3812_vm14, %v3810_v61, %v11298_v41 }
 0x72a   : > { %4245 = vrot.lane.b32.xlu1 %v9898_v37, %s6340_s13  ;;  %v3742_v21 = vsel %vm887_vm4, %v3708_v32, %v11297_v35  ;;  %v11299_v59 = vld [vmem:[#allocation143_spill] sm:$0xff] }
 0x72b   : > { %4151 = vrot.lane.b32.xlu0 %v9858_v10, %s6339_s16  ;;  %v3777_v58 = vsel %vm3743_vm13, %v3742_v21, %v11299_v59 }
 0x72c   : > { %v4320_v15 = vpop.permute.xlu1 %4319  ;;  %v4032_v3 = vpop.permute.xlu0 %4031 }
 0x72d   : > { %v4611_v1 = vsel %vm4597_vm7, %v4578_v27, %v4320_v15  ;;  %v11300_v15 = vld [vmem:[#allocation166_spill] sm:$0xff] }
 0x72e   : > { %4341 = vrot.lane.b32.xlu1 %v10328_v42, %s6341_s23 }
 0x72f   : > { %4247 = vrot.lane.b32.xlu0 %v9885_v25, %s6340_s13 }
 0x730   : > { %v4034_v34 = vpop.permute.xlu1 %4033  ;;  %v4408_v14 = vpop.permute.xlu0 %4407 }
 0x731   : > { %v4643_v43 = vsel %vm4630_vm8, %v4610_v0, %v4408_v14  ;;  %v10398_v0 = vsel %vm1183_vm9, %v3845_v13, %v10003_v31  ;;  %v3811_v14 = vsel %vm922_vm3, %v3777_v58, %v11300_v15 }
 0x732   : > { %4343 = vrot.lane.b32.xlu1 %v10341_v2, %s6341_s23  ;;  %5824 = vmatprep.mubr.msk.f32.mxu1 %vm4676_vm11, %v4643_v43  ;;  %v3846_v20 = vsel %vm3812_vm14, %v3811_v14, %v9470_v9  ;;  %v4480_v9 = vsel %vm4467_vm1, %v9631_v46, %v10059_v57 }
 0x733   : > { %4055 = vrot.lane.b32.xlu0 %v9882_v16, %s6338_s8  ;;  %v10411_v31 = vsel %vm1183_vm9, %v3846_v20, %v10009_v51  ;;  %v4513_v7 = vsel %vm4498_vm5, %v4480_v9, %v4032_v3  ;;  %v4514_v3 = vsel %vm4498_vm5, %v4481_v33, %v4034_v34 }
 0x734   : > { %v4410_v30 = vpop.permute.xlu1 %4409  ;;  %v4130_v55 = vpop.permute.xlu0 %4129 }
 0x735   : > { %v4644_v4 = vsel %vm4630_vm8, %v4611_v1, %v4410_v30  ;;  %v4546_v19 = vsel %vm4531_vm2, %v4513_v7, %v4130_v55  ;;  %v11301_v30 = vld [vmem:[#allocation5_spill] sm:$0xff] }
 0x736   : > { %4057 = vrot.lane.b32.xlu1 %v9858_v10, %s6338_s8  ;;  %5825 = vmatmul.mubr.msk.f32.gmra.mxu1 %vm4676_vm11, %v4644_v4 }
 0x737   : > { %4431 = vrot.lane.b32.xlu0 %v10398_v0, %s6342_s29 }
 0x738   : > { %v4226_v12 = vpop.permute.xlu1 %4225  ;;  %v4132_v22 = vpop.permute.xlu0 %4131 }
 0x739   : > { %v4579_v49 = vsel %vm4564_vm6, %v4546_v19, %v4226_v12  ;;  %v4547_v32 = vsel %vm4531_vm2, %v4514_v3, %v4132_v22  ;;  %v11302_v19 = vld [vmem:[#allocation51_spill] sm:$0xff] }
 0x73a   : > { %4433 = vrot.lane.b32.xlu1 %v10411_v31, %s6342_s29 }
 0x73b   : > { %4153 = vrot.lane.b32.xlu0 %v9898_v37, %s6339_s16 }
 0x73c   : > { %v4322_v11 = vpop.permute.xlu1 %4321  ;;  %v4228_v43 = vpop.permute.xlu0 %4227 }
 0x73d   : > { %v4612_v57 = vsel %vm4597_vm7, %v4579_v49, %v4322_v11  ;;  %v4580_v54 = vsel %vm4564_vm6, %v4547_v32, %v4228_v43  ;;  %v4484_v49 = vsel %vm4467_vm1, %v11302_v19, %v10075_v28 }
 0x73e   : > { %4249 = vrot.lane.b32.xlu1 %v10328_v42, %s6340_s13 }
 0x73f   : > { %4155 = vrot.lane.b32.xlu0 %v9885_v25, %s6339_s16 }
 0x740   : > { %v4324_v51 = vpop.permute.xlu1 %4323  ;;  %v4036_v53 = vpop.permute.xlu0 %4035 }
 0x741   : > { %v4613_v5 = vsel %vm4597_vm7, %v4580_v54, %v4324_v51 }
 0x742   : > { %4345 = vrot.lane.b32.xlu1 %v10398_v0, %s6341_s23 }
 0x743   : > { %4251 = vrot.lane.b32.xlu0 %v10341_v2, %s6340_s13 }
 0x744   : > { %v4038_v27 = vpop.permute.xlu1 %4037  ;;  %v4412_v23 = vpop.permute.xlu0 %4411 }
 0x745   : > { %v4645_v6 = vsel %vm4630_vm8, %v4612_v57, %v4412_v23 }
 0x746   : > { %4347 = vrot.lane.b32.xlu1 %v10411_v31, %s6341_s23  ;;  %5827 = vmatprep.mubr.msk.f32.mxu1 %vm4676_vm11, %v4645_v6 }
 0x747   : > { %4059 = vrot.lane.b32.xlu0 %v9898_v37, %s6338_s8 }
 0x748   : > { %v4414_v61 = vpop.permute.xlu1 %4413  ;;  %v4134_v1 = vpop.permute.xlu0 %4133 }
 0x749   : > { %v4646_v34 = vsel %vm4630_vm8, %v4613_v5, %v4414_v61 }
 0x74a   : > { %4061 = vrot.lane.b32.xlu1 %v9885_v25, %s6338_s8  ;;  %5828 = vmatmul.mubr.msk.f32.gmra.mxu1 %vm4676_vm11, %v4646_v34  ;;  %v4482_v25 = vsel %vm4467_vm1, %v9663_v45, %v10067_v40 }
 0x74b   : > { %5991 = vrot.lane.b32.xlu0 %v11301_v30, %s6342_s29  ;;  %v4515_v4 = vsel %vm4498_vm5, %v4482_v25, %v4036_v53  ;;  %v11305_v25 = vld [vmem:[#allocation52_spill] sm:$0xff] }
 0x74c   : > { %v4230_v55 = vpop.permute.xlu1 %4229  ;;  %v4136_v35 = vpop.permute.xlu0 %4135  ;;  %v4548_v59 = vsel %vm4531_vm2, %v4515_v4, %v4134_v1 }
 0x74e   : > { %4157 = vrot.lane.b32.xlu1 %v10328_v42, %s6339_s16 }
 0x74f   : > { %4101 = vrot.lane.b32.xlu0 %v9503_v56, %s6339_s16  ;;  %v4581_v56 = vsel %vm4564_vm6, %v4548_v59, %v4230_v55 }
 0x750   : > { %v4326_v37 = vpop.permute.xlu1 %4325  ;;  %v4232_v21 = vpop.permute.xlu0 %4231 }
 0x751   : > { %v4614_v45 = vsel %vm4597_vm7, %v4581_v56, %v4326_v37 }
 0x752   : > { %4159 = vrot.lane.b32.xlu1 %v10341_v2, %s6339_s16 }
 0x753   : > { %4103 = vrot.lane.b32.xlu0 %v9477_v18, %s6339_s16  ;;  %v4483_v18 = vsel %vm4467_vm1, %v9634_v62, %v10057_v39 }
 0x754   : > { %v4328_v41 = vpop.permute.xlu1 %4327  ;;  %v4040_v13 = vpop.permute.xlu0 %4039  ;;  %v4516_v15 = vsel %vm4498_vm5, %v4483_v18, %v4038_v27  ;;  %v11304_v27 = vld [vmem:[#allocation144_spill] sm:$0xff] }
 0x755   : > { %v4549_v20 = vsel %vm4531_vm2, %v4516_v15, %v4136_v35  ;;  %v4517_v57 = vsel %vm4498_vm5, %v4484_v49, %v4040_v13 }
 0x756   : > { %4253 = vrot.lane.b32.xlu1 %v10398_v0, %s6340_s13  ;;  %v4582_v12 = vsel %vm4564_vm6, %v4549_v20, %v4232_v21 }
 0x757   : > { %4197 = vrot.lane.b32.xlu0 %v9535_v36, %s6340_s13  ;;  %v4615_v62 = vsel %vm4597_vm7, %v4582_v12, %v4328_v41  ;;  %v11306_v41 = vld [vmem:[#allocation82_spill] sm:$0xff] }
 0x758   : > { %v4042_v40 = vpop.permute.xlu1 %4041  ;;  %v4416_v58 = vpop.permute.xlu0 %4415 }
 0x759   : > { %v4647_v14 = vsel %vm4630_vm8, %v4614_v45, %v4416_v58 }
 0x75a   : > { %4255 = vrot.lane.b32.xlu1 %v10411_v31, %s6340_s13  ;;  %5830 = vmatprep.mubr.msk.f32.mxu1 %vm4676_vm11, %v4647_v14 }
 0x75b   : > { %4199 = vrot.lane.b32.xlu0 %v9506_v63, %s6340_s13 }
 0x75c   : > { %v4418_v39 = vpop.permute.xlu1 %4417  ;;  %v4138_v22 = vpop.permute.xlu0 %4137 }
 0x75d   : > { %v4648_v11 = vsel %vm4630_vm8, %v4615_v62, %v4418_v39 }
 0x75e   : > { %5996 = vrot.lane.b32.xlu1 %v11301_v30, %s6341_s23  ;;  %5831 = vmatmul.mubr.msk.f32.gmra.mxu1 %vm4676_vm11, %v4648_v11 }
 0x75f   : > { %4293 = vrot.lane.b32.xlu0 %v9567_v52, %s6341_s23 }
 0x760   : > { %v4234_v43 = vpop.permute.xlu1 %4233 }
 0x761   : > { %v4140_v9 = vpop.permute.xlu0 %4139 }
 0x762   : > { %4295 = vrot.lane.b32.xlu1 %v9538_v17, %s6341_s23 }
 0x763   : > { %4063 = vrot.lane.b32.xlu0 %v10328_v42, %s6338_s8  ;;  %v4550_v42 = vsel %vm4531_vm2, %v4517_v57, %v4138_v22  ;;  %v11312_v57 = vld [vmem:[#allocation83_spill] sm:$0xff] }
 0x764   : > { %v4330_v51 = vpop.permute.xlu1 %4329  ;;  %v4583_v3 = vsel %vm4564_vm6, %v4550_v42, %v4234_v43 }
 0x765   : > { %v4236_v53 = vpop.permute.xlu0 %4235  ;;  %v4616_v32 = vsel %vm4597_vm7, %v4583_v3, %v4330_v51  ;;  %v11310_v51 = vld [vmem:[#allocation113_spill] sm:$0xff] }
 0x766   : > { %4065 = vrot.lane.b32.xlu1 %v10341_v2, %s6338_s8  ;;  %v11303_v2 = vld [vmem:[#allocation115_spill] sm:$0xff]  ;;  %s269_s8 = sand.u32 1, %s6319_s25  }
 0x767   : > { %4383 = vrot.lane.b32.xlu0 %v9599_v50, %s6342_s29  ;;  %v4485_v23 = vsel %vm4467_vm1, %v11304_v27, %v11303_v2  ;;  %s5497_s14 = sshll.u32 %s269_s8, 8 }
 0x768   : > { %v4332_v7 = vpop.permute.xlu1 %4331  ;;  %v4518_v28 = vsel %vm4498_vm5, %v4485_v23, %v4042_v40  ;;  %s10695_s15 = scalar_lea.vmem [#allocation2], %s5497_s14 }
 0x769   : > { %v4044_v33 = vpop.permute.xlu0 %4043  ;;  %v4551_v5 = vsel %vm4531_vm2, %v4518_v28, %v4140_v9  ;;  %v11309_v9 = vld [vmem:[#allocation84_spill] sm:$0xff]  ;;  %s5431_s17 = sshll.u32 %s10695_s15, 4  ;;  %s10797_s17 = int_to_ptr.vmem [resolvable:$true] %s5431_s17 }
 0x76a   : > { %4161 = vrot.lane.b32.xlu1 %v10398_v0, %s6339_s16  ;;  %s6267_s20 = scalar_lea.vmem %s10797_s17, 4096  ;;  %p6274_p0 = scmp.lt.s32.totalorder %s10797_s17, %s6272_s22 }
 0x76b   : > { %4105 = vrot.lane.b32.xlu0 %v9535_v36, %s6339_s16  ;;  %v4584_v36 = vsel %vm4564_vm6, %v4551_v5, %v4236_v53  ;;  %v4488_v53 = vsel %vm4467_vm1, %v11310_v51, %v11309_v9  ;;  %p6268_p11 = scmp.ne.s32.totalorder %s10797_s17, %s6267_s20 }
 0x76c   : > { %v4046_v6 = vpop.permute.xlu1 %4045  ;;  %v4617_v61 = vsel %vm4597_vm7, %v4584_v36, %v4332_v7 }
 0x76d   : > { %v4420_v54 = vpop.permute.xlu0 %4419  ;;  %p6269_p12 = pnand %p6268_p11, %p6424_p5 }
 0x76e   : > { %v4649_v0 = vsel %vm4630_vm8, %v4616_v32, %v4420_v54  ;;  %4107 = vrot.lane.b32.xlu1 %v9506_v63, %s6339_s16 }
 0x76f   : > { %4385 = vrot.lane.b32.xlu0 %v9570_v44, %s6342_s29  ;;  %5833 = vmatprep.mubr.msk.f32.mxu1 %vm4676_vm11, %v4649_v0  ;;  %p6270_p13 = pneg %p6269_p12 }
 0x770   : > { %v4422_v1 = vpop.permute.xlu1 %4421 }
 0x771   : > { %v4650_v34 = vsel %vm4630_vm8, %v4617_v61, %v4422_v1  ;;  %v4142_v55 = vpop.permute.xlu0 %4141 }
 0x772   : > { %4201 = vrot.lane.b32.xlu1 %v9567_v52, %s6340_s13  ;;  %5834 = vmatmul.mubr.msk.f32.gmra.mxu1 %vm4676_vm11, %v4650_v34 }
 0x773   : > { %4163 = vrot.lane.b32.xlu0 %v10411_v31, %s6339_s16  ;;  %v4486_v31 = vsel %vm4467_vm1, %v11306_v41, %v11305_v25  ;;  %s5639_s16 = sshll.u32 %s6407_s28, 12  ;;  %s10803_s28 = scalar_lea.sflag [#allocation3], %s269_s8 }
 0x774   : > { %v4238_v63 = vpop.permute.xlu1 %4237  ;;  %v4519_v4 = vsel %vm4498_vm5, %v4486_v31, %v4044_v33  ;;  %v11311_v33 = vld [vmem:[#allocation146_spill] sm:$0xff]  ;;  %v11314_v31 = vld [vmem:[#allocation55_spill] sm:$0xff]  ;;  %s10792_s18 = scalar_lea.hbm %s10851_s7, %s5639_s16 }
 0x775   : > { %v4144_v35 = vpop.permute.xlu0 %4143  ;;  %v4489_v42 = vsel %vm4467_vm1, %v11312_v57, %v11311_v33 }
 0x776   : > { %4203 = vrot.lane.b32.xlu1 %v9538_v17, %s6340_s13  ;;  %v4552_v17 = vsel %vm4531_vm2, %v4519_v4, %v4142_v55 }
 0x777   : > { %6001 = vrot.lane.b32.xlu0 %v11301_v30, %s6340_s13  ;;  %v11308_v30 = vld [vmem:[#allocation53_spill] sm:$0xff]  ;;  %v4585_v59 = vsel %vm4564_vm6, %v4552_v17, %v4238_v63 }
 0x778   : > { %v4334_v37 = vpop.permute.xlu1 %4333 }
 0x779   : > { %v4240_v21 = vpop.permute.xlu0 %4239  ;;  %v4618_v45 = vsel %vm4597_vm7, %v4585_v59, %v4334_v37  ;;  %v11313_v37 = vld [vmem:[#allocation114_spill] sm:$0xff] }
 0x77a   : > { %4299 = vrot.lane.b32.xlu1 %v9570_v44, %s6341_s23  ;;  %v11307_v44 = vld [vmem:[#allocation145_spill] sm:$0xff] }
 0x77b   : > { %4297 = vrot.lane.b32.xlu0 %v9599_v50, %s6341_s23  ;;  %v4487_v50 = vsel %vm4467_vm1, %v11308_v30, %v11307_v44  ;;  %s6273_s23 = scalar_lea.vmem %s6272_s22, 8192 }
 0x77c   : > { %v4336_v52 = vpop.permute.xlu1 %4335  ;;  %v4520_v18 = vsel %vm4498_vm5, %v4487_v50, %v4046_v6  ;;  %p6275_p1 = scmp.lt.s32.totalorder %s6273_s23, %s6267_s20 }
 0x77d   : > { %v4048_v13 = vpop.permute.xlu0 %4047  ;;  %v4553_v58 = vsel %vm4531_vm2, %v4520_v18, %v4144_v35 }
 0x77e   : > { %4389 = vrot.lane.b32.xlu1 %v9602_v60, %s6342_s29  ;;  %v4586_v15 = vsel %vm4564_vm6, %v4553_v58, %v4240_v21  ;;  %v4521_v19 = vsel %vm4498_vm5, %v4488_v53, %v4048_v13  ;;  %v4490_v21 = vsel %vm4467_vm1, %v9791_v48, %v11313_v37  ;;  %v4491_v13 = vsel %vm4467_vm1, %v9762_v38, %v11314_v31  ;;  %p6276_p2 = por %p6275_p1, %p6274_p0 }
 0x77f   : > { %4387 = vrot.lane.b32.xlu0 %v9631_v46, %s6342_s29  ;;  %v4619_v46 = vsel %vm4597_vm7, %v4586_v15, %v4336_v52 }
 0x780   : > { %v4050_v56 = vpop.permute.xlu1 %4049  ;;  %p6277_p3 = pnand %p6276_p2, %p6270_p13 }
 0x781   : > { %v4424_v40 = vpop.permute.xlu0 %4423  ;;  %v4522_v23 = vsel %vm4498_vm5, %v4489_v42, %v4050_v56 }
 0x782   : > { %v4651_v60 = vsel %vm4630_vm8, %v4618_v45, %v4424_v40 }
 0x783   : > { %5836 = vmatprep.mubr.msk.f32.mxu1 %vm4676_vm11, %v4651_v60 }
 0x784   : > { %v4426_v14 = vpop.permute.xlu1 %4425 }
 0x785   : > { %v4652_v20 = vsel %vm4630_vm8, %v4619_v46, %v4426_v14  ;;  %v4146_v12 = vpop.permute.xlu0 %4145 }
 0x786   : > { %5837 = vmatmul.mubr.msk.f32.gmra.mxu1 %vm4676_vm11, %v4652_v20  ;;  %v4554_v49 = vsel %vm4531_vm2, %v4521_v19, %v4146_v12  ;;  %v11315_v12 = vld [vmem:[#allocation85_spill] sm:$0xff] }
 0x788   : > { %v4242_v62 = vpop.permute.xlu1 %4241 }
 0x789   : > { %v4148_v39 = vpop.permute.xlu0 %4147  ;;  %v4587_v2 = vsel %vm4564_vm6, %v4554_v49, %v4242_v62  ;;  %v4493_v62 = vsel %vm4467_vm1, %v9794_v8, %v11315_v12 }
 0x78a   : > { %v4555_v28 = vsel %vm4531_vm2, %v4522_v23, %v4148_v39  ;;  %v11316_v39 = vld [vmem:[#allocation147_spill] sm:$0xff] }
 0x78c   : > { %v4338_v22 = vpop.permute.xlu1 %4337 }
 0x78d   : > { %v4244_v11 = vpop.permute.xlu0 %4243  ;;  %v4620_v3 = vsel %vm4597_vm7, %v4587_v2, %v4338_v22  ;;  %v4492_v22 = vsel %vm4467_vm1, %v9823_v29, %v11316_v39 }
 0x78e   : > { %v4588_v54 = vsel %vm4564_vm6, %v4555_v28, %v4244_v11 }
 0x790   : > { %v4340_v43 = vpop.permute.xlu1 %4339 }
 0x791   : > { %v4052_v7 = vpop.permute.xlu0 %4051  ;;  %v4621_v5 = vsel %vm4597_vm7, %v4588_v54, %v4340_v43 }
 0x792   : > { %v4523_v25 = vsel %vm4498_vm5, %v4490_v21, %v4052_v7 }
 0x794   : > { %v4054_v27 = vpop.permute.xlu1 %4053 }
 0x795   : > { %v4428_v6 = vpop.permute.xlu0 %4427  ;;  %v4524_v44 = vsel %vm4498_vm5, %v4491_v13, %v4054_v27  ;;  %v11320_v13 = vld [vmem:[#allocation9_spill] sm:$0xff] }
 0x796   : > { %v4653_v32 = vsel %vm4630_vm8, %v4620_v3, %v4428_v6 }
 0x797   : > { %5839 = vmatprep.mubr.msk.f32.mxu1 %vm4676_vm11, %v4653_v32 }
 0x798   : > { %v4430_v0 = vpop.permute.xlu1 %4429 }
 0x799   : > { %v4654_v36 = vsel %vm4630_vm8, %v4621_v5, %v4430_v0  ;;  %v4150_v61 = vpop.permute.xlu0 %4149  ;;  %v11317_v0 = vld [vmem:[#allocation16_spill] sm:$0xff] }
 0x79a   : > { %5840 = vmatmul.mubr.msk.f32.gmra.mxu1 %vm4676_vm11, %v4654_v36  ;;  %v4556_v41 = vsel %vm4531_vm2, %v4523_v25, %v4150_v61  ;;  %v5983_v36 = vunpack.i.l.bf16 %v11317_v0  ;;  %v11318_v61 = vld [vmem:[#allocation117_spill] sm:$0xff] }
 0x79c   : > { %v4246_v1 = vpop.permute.xlu1 %4245 }
 0x79d   : > { %v4152_v34 = vpop.permute.xlu0 %4151  ;;  %v4589_v4 = vsel %vm4564_vm6, %v4556_v41, %v4246_v1  ;;  %v4495_v1 = vsel %vm4467_vm1, %v9826_v47, %v11318_v61 }
 0x79e   : > { %v4557_v59 = vsel %vm4531_vm2, %v4524_v44, %v4152_v34  ;;  %v11319_v34 = vld [vmem:[#allocation54_spill] sm:$0xff]  ;;  %v11321_v44 = vld [vmem:[#allocation11_spill] sm:$0xff] }
 0x7a0   : > { %v4342_v55 = vpop.permute.xlu1 %4341 }
 0x7a1   : > { %v4248_v63 = vpop.permute.xlu0 %4247  ;;  %v4622_v30 = vsel %vm4597_vm7, %v4589_v4, %v4342_v55  ;;  %v4494_v55 = vsel %vm4467_vm1, %v9855_v24, %v11319_v34  ;;  %v5988_v4 = vunpack.i.l.bf16 %v11320_v13  ;;  %v4468_v24 = vsel %vm4467_vm1, %v11321_v44, %v5983_v36  ;;  %v11324_v36 = vld [vmem:[#allocation87_spill] sm:$0xff] }
 0x7a2   : > { %v4590_v56 = vsel %vm4564_vm6, %v4557_v59, %v4248_v63 }
 0x7a4   : > { %v4344_v35 = vpop.permute.xlu1 %4343 }
 0x7a5   : > { %v4056_v52 = vpop.permute.xlu0 %4055  ;;  %v4623_v18 = vsel %vm4597_vm7, %v4590_v56, %v4344_v35 }
 0x7a6   : > { %v4525_v11 = vsel %vm4498_vm5, %v4492_v22, %v4056_v52 }
 0x7a8   : > { %v4058_v17 = vpop.permute.xlu1 %4057 }
 0x7a9   : > { %v4432_v50 = vpop.permute.xlu0 %4431  ;;  %v4526_v43 = vsel %vm4498_vm5, %v4493_v62, %v4058_v17 }
 0x7aa   : > { %v4655_v48 = vsel %vm4630_vm8, %v4622_v30, %v4432_v50 }
 0x7ab   : > { %5842 = vmatprep.mubr.msk.f32.mxu1 %vm4676_vm11, %v4655_v48 }
 0x7ac   : > { %v4434_v45 = vpop.permute.xlu1 %4433 }
 0x7ad   : > { %v4656_v38 = vsel %vm4630_vm8, %v4623_v18, %v4434_v45  ;;  %v4154_v40 = vpop.permute.xlu0 %4153  ;;  %v4499_v45 = vsel %vm4498_vm5, %v4468_v24, %v5988_v4 }
 0x7ae   : > { %5843 = vmatmul.mubr.msk.f32.gmra.mxu1 %vm4676_vm11, %v4656_v38  ;;  %v4558_v51 = vsel %vm4531_vm2, %v4525_v11, %v4154_v40  ;;  %v5984_v38 = vunpack.i.h.bf16 %v11317_v0 }
 0x7b0   : > { %v4250_v58 = vpop.permute.xlu1 %4249  ;;  %v4469_v12 = vsel %vm4467_vm1, %v11277_v26, %v5984_v38 }
 0x7b1   : > { %v4156_v60 = vpop.permute.xlu0 %4155  ;;  %v4591_v19 = vsel %vm4564_vm6, %v4558_v51, %v4250_v58  ;;  %v4502_v61 = vsel %vm4498_vm5, %v4469_v12, %v11324_v36 }
 0x7b2   : > { %v4559_v53 = vsel %vm4531_vm2, %v4526_v43, %v4156_v60  ;;  %v5814_v44 = vpop.f32.mrf.mxu1 }
 0x7b4   : > { %v4346_v15 = vpop.permute.xlu1 %4345 }
 0x7b5   : > { %v4252_v46 = vpop.permute.xlu0 %4251  ;;  %v4624_v29 = vsel %vm4597_vm7, %v4591_v19, %v4346_v15 }
 0x7b6   : > { %v4592_v49 = vsel %vm4564_vm6, %v4559_v53, %v4252_v46 }
 0x7b8   : > { %v4348_v14 = vpop.permute.xlu1 %4347 }
 0x7b9   : > { %v4060_v20 = vpop.permute.xlu0 %4059  ;;  %v4625_v57 = vsel %vm4597_vm7, %v4592_v49, %v4348_v14  ;;  %v5989_v14 = vunpack.i.h.bf16 %v11320_v13 }
 0x7ba   : > { %v4527_v63 = vsel %vm4498_vm5, %v4494_v55, %v4060_v20  ;;  %v11325_v55 = vld [vmem:[#allocation57_spill] sm:$0xff] }
 0x7bb   : > { %v4500_v22 = vsel %vm4498_vm5, %v4469_v12, %v5989_v14 }
 0x7bc   : > { %v4062_v9 = vpop.permute.xlu1 %4061 }
 0x7bd   : > { %v5992_v7 = vpop.permute.xlu0 %5991  ;;  %v4528_v35 = vsel %vm4498_vm5, %v4495_v1, %v4062_v9 }
 0x7be   : > { %v10605_v33 = vunpack.i.h.bf16 %v5992_v7  ;;  %v10607_v8 = vunpack.i.l.bf16 %v5992_v7 }
 0x7c0   : > { %v4158_v42 = vpop.permute.xlu1 %4157  ;;  %v4657_v2 = vsel %vm4630_vm8, %v4624_v29, %v10607_v8  ;;  %v4658_v27 = vsel %vm4630_vm8, %v4625_v57, %v10605_v33  ;;  %v11322_v29 = vld [vmem:[#allocation148_spill] sm:$0xff] }
 0x7c1   : > { %v4102_v23 = vpop.permute.xlu0 %4101  ;;  %5845 = vmatprep.mubr.msk.f32.mxu1 %vm4676_vm11, %v4657_v2  ;;  %v4560_v21 = vsel %vm4531_vm2, %v4527_v63, %v4158_v42  ;;  %v4497_v57 = vsel %vm4467_vm1, %v9858_v10, %v11322_v29  ;;  %v11323_v42 = vld [vmem:[#allocation86_spill] sm:$0xff]  ;;  %v4501_v63 = vsel %vm4498_vm5, %v4468_v24, %v11325_v55  ;;  %v4862_v24 = vpop.f32.mrf.mxu1 }
 0x7c2   : > { %5846 = vmatmul.mubr.msk.f32.gmra.mxu1 %vm4676_vm11, %v4658_v27  ;;  %v4532_v40 = vsel %vm4531_vm2, %v4499_v45, %v4102_v23  ;;  %v4496_v2 = vsel %vm4467_vm1, %v9882_v16, %v11323_v42  ;;  %v5606_v45 = vmul.f32 -1.442695, %v5814_v44 }
 0x7c4   : > { %v4160_v3 = vpop.permute.xlu1 %4159 }
 0x7c5   : > { %v4104_v6 = vpop.permute.xlu0 %4103  ;;  %v4561_v52 = vsel %vm4531_vm2, %v4528_v35, %v4160_v3 }
 0x7c6   : > { %v4533_v11 = vsel %vm4531_vm2, %v4500_v22, %v4104_v6 }
 0x7c8   : > { %v4254_v28 = vpop.permute.xlu1 %4253 }
 0x7c9   : > { %v4198_v32 = vpop.permute.xlu0 %4197  ;;  %v4593_v47 = vsel %vm4564_vm6, %v4560_v21, %v4254_v28 }
 0x7ca   : > { %v4565_v58 = vsel %vm4564_vm6, %v4532_v40, %v4198_v32 }
 0x7cc   : > { %v4256_v54 = vpop.permute.xlu1 %4255 }
 0x7cd   : > { %v4200_v5 = vpop.permute.xlu0 %4199  ;;  %v4594_v17 = vsel %vm4564_vm6, %v4561_v52, %v4256_v54 }
 0x7ce   : > { %v4566_v43 = vsel %vm4564_vm6, %v4533_v11, %v4200_v5 }
 0x7d0   : > { %v5997_v37 = vpop.permute.xlu1 %5996 }
 0x7d1   : > { %v5999_v25 = vunpack.i.h.bf16 %v5997_v37  ;;  %v5998_v41 = vunpack.i.l.bf16 %v5997_v37  ;;  %v4294_v31 = vpop.permute.xlu0 %4293 }
 0x7d2   : > { %v4598_v15 = vsel %vm4597_vm7, %v4565_v58, %v4294_v31 }
 0x7d3   : > { %v4626_v30 = vsel %vm4597_vm7, %v4593_v47, %v5998_v41  ;;  %v4627_v50 = vsel %vm4597_vm7, %v4594_v17, %v5999_v25  ;;  %v6343_v17 = vmov 0  }
 0x7d4   : > { %v4296_v59 = vpop.permute.xlu1 %4295  ;;  %v4659_v48 = vsel %vm4630_vm8, %v4626_v30, %v10607_v8  ;;  %v4660_v56 = vsel %vm4630_vm8, %v4627_v50, %v10605_v33  ;;  %6005 = vset.pattern.permute.xlu1 %v6343_v17  ;;  %6006 = vset.pattern.permute.xlu0 %v6343_v17  ;;  %v5817_v30 = vpop.f32.mrf.mxu1 }
 0x7d5   : > { %v4064_v18 = vpop.permute.xlu0 %4063  ;;  %5848 = vmatprep.mubr.msk.f32.mxu1 %vm4676_vm11, %v4659_v48  ;;  %v4599_v51 = vsel %vm4597_vm7, %v4566_v43, %v4296_v59  ;;  %v5608_v12 = vmul.f32 -1.442695, %v5817_v30 }
 0x7d6   : > { %5849 = vmatmul.mubr.msk.f32.gmra.mxu1 %vm4676_vm11, %v4660_v56  ;;  %v4529_v23 = vsel %vm4498_vm5, %v4496_v2, %v4064_v18  ;;  %v4872_v50 = vpop.f32.mrf.mxu1  ;;  %v5605_v56 = vmul.f32 -1.442695, %v4862_v24 }
 0x7d8   : > { %v4066_v60 = vpop.permute.xlu1 %4065  ;;  %v5820_v59 = vpop.f32.mrf.mxu1  ;;  %6139 = vpow2.f32 %v5605_v56 }
 0x7d9   : > { %v4384_v46 = vpop.permute.xlu0 %4383  ;;  %v4530_v3 = vsel %vm4498_vm5, %v4497_v57, %v4066_v60  ;;  %v5610_v57 = vmul.f32 -1.442695, %v5820_v59 }
 0x7da   : > { %v4631_v20 = vsel %vm4630_vm8, %v4598_v15, %v4384_v46  ;;  %v4882_v48 = vpop.f32.mrf.mxu1 }
 0x7db   : > { %5806 = vmatprep.mubr.msk.f32.mxu0 %vm4676_vm11, %v4631_v20 }
 0x7dc   : > { %v4162_v62 = vpop.permute.xlu1 %4161 }
 0x7dd   : > { %v4106_v39 = vpop.permute.xlu0 %4105  ;;  %v4562_v32 = vsel %vm4531_vm2, %v4529_v23, %v4162_v62  ;;  %v5607_v62 = vmul.f32 -1.442695, %v4872_v50  ;;  %v5609_v23 = vmul.f32 -1.442695, %v4882_v48 }
 0x7de   : > { %v4534_v52 = vsel %vm4531_vm2, %v4501_v63, %v4106_v39 }
 0x7e0   : > { %v4108_v9 = vpop.permute.xlu1 %4107 }
 0x7e1   : > { %v4386_v53 = vpop.permute.xlu0 %4385  ;;  %v4535_v35 = vsel %vm4531_vm2, %v4502_v61, %v4108_v9 }
 0x7e2   : > { %v4632_v7 = vsel %vm4630_vm8, %v4599_v51, %v4386_v53  ;;  %v5823_v18 = vpop.f32.mrf.mxu1 }
 0x7e3   : > { %5807 = vmatmul.mubr.msk.f32.vlgmr.msra.gmra.mxu0 %vm4676_vm11, %v4632_v7 }
 0x7e4   : > { %v4202_v19 = vpop.permute.xlu1 %4201  ;;  %v4892_v60 = vpop.f32.mrf.mxu1 }
 0x7e5   : > { %v4164_v26 = vpop.permute.xlu0 %4163  ;;  %v6140_v39 = vpop.eup %6139 }
 0x7e6   : > { %v4563_v54 = vsel %vm4531_vm2, %v4530_v3, %v4164_v26  ;;  %v5101_v26 = vadd.f32 1.0, %v6140_v39 }
 0x7e8   : > { %v4204_v49 = vpop.permute.xlu1 %4203 }
 0x7e9   : > { %v6002_v27 = vpop.permute.xlu0 %6001  ;;  %v4568_v31 = vsel %vm4564_vm6, %v4535_v35, %v4204_v49 }
 0x7ea   : > { %v6004_v6 = vunpack.i.h.bf16 %v6002_v27  ;;  %v6003_v28 = vunpack.i.l.bf16 %v6002_v27 }
 0x7ec   : > { %v4596_v5 = vsel %vm4564_vm6, %v4563_v54, %v6004_v6  ;;  %v4595_v0 = vsel %vm4564_vm6, %v4562_v32, %v6003_v28  ;;  %v4300_v10 = vpop.permute.xlu1 %4299  ;;  %v5612_v6 = vmul.f32 -1.442695, %v5823_v18  ;;  %v5611_v28 = vmul.f32 -1.442695, %v4892_v60 }
 0x7ed   : > { %v4298_v16 = vpop.permute.xlu0 %4297  ;;  %v4628_v1 = vsel %vm4597_vm7, %v4595_v0, %v5998_v41  ;;  %v4629_v34 = vsel %vm4597_vm7, %v4596_v5, %v5999_v25  ;;  %v4567_v41 = vsel %vm4564_vm6, %v4534_v52, %v4202_v19  ;;  %v4601_v25 = vsel %vm4597_vm7, %v4568_v31, %v4300_v10 }
 0x7ee   : > { %v4661_v37 = vsel %vm4630_vm8, %v4628_v1, %v10607_v8  ;;  %v4662_v21 = vsel %vm4630_vm8, %v4629_v34, %v10605_v33  ;;  %v4600_v4 = vsel %vm4597_vm7, %v4567_v41, %v4298_v16 }
 0x7ef   : > { %5851 = vmatprep.mubr.msk.f32.mxu1 %vm4676_vm11, %v4661_v37 }
 0x7f0   : > { %5852 = vmatmul.mubr.msk.f32.gmra.mxu1 %vm4676_vm11, %v4662_v21  ;;  %v4390_v13 = vpop.permute.xlu1 %4389 }
 0x7f1   : > { %v4634_v8 = vsel %vm4630_vm8, %v4601_v25, %v4390_v13  ;;  %v4388_v47 = vpop.permute.xlu0 %4387 }
 0x7f2   : > { %v4633_v33 = vsel %vm4630_vm8, %v4600_v4, %v4388_v47 }
 0x7f3   : > { %5809 = vmatprep.mubr.msk.f32.mxu0 %vm4676_vm11, %v4633_v33 }
 0x7f4   : > { %5810 = vmatmul.mubr.msk.f32.gmra.mxu0 %vm4676_vm11, %v4634_v8 }
 0x7f6   : > { %v5826_v46 = vpop.f32.mrf.mxu1 }
 0x7f7   : > { %v5614_v32 = vmul.f32 -1.442695, %v5826_v46 }
 0x7f8   : > { %v4902_v14 = vpop.f32.mrf.mxu1 }
 0x7f9   : > { %v5613_v5 = vmul.f32 -1.442695, %v4902_v14 }
 0x80a   : > { %v5829_v20 = vpop.f32.mrf.mxu1 }
 0x80b   : > { %v5616_v61 = vmul.f32 -1.442695, %v5829_v20 }
 0x80c   : > { %v4912_v22 = vpop.f32.mrf.mxu1 }
 0x80d   : > { %v5615_v34 = vmul.f32 -1.442695, %v4912_v22 }
 0x81e   : > { %v5832_v9 = vpop.f32.mrf.mxu1 }
 0x81f   : > { %v5618_v21 = vmul.f32 -1.442695, %v5832_v9 }
 0x820   : > { %v4922_v27 = vpop.f32.mrf.mxu1 }
 0x821   : > { %v5617_v4 = vmul.f32 -1.442695, %v4922_v27 }
 0x832   : > { %v5835_v3 = vpop.f32.mrf.mxu1 }
 0x833   : > { %v5620_v17 = vmul.f32 -1.442695, %v5835_v3 }
 0x834   : > { %v4932_v54 = vpop.f32.mrf.mxu1 }
 0x835   : > { %v5619_v50 = vmul.f32 -1.442695, %v4932_v54 }
 0x846   : > { %v5838_v0 = vpop.f32.mrf.mxu1 }
 0x847   : > { %v5622_v18 = vmul.f32 -1.442695, %v5838_v0 }
 0x848   : > { %v4942_v55 = vpop.f32.mrf.mxu1 }
 0x85a   : > { %v5841_v52 = vpop.f32.mrf.mxu1 }
 0x85c   : > { %v4952_v44 = vpop.f32.mrf.mxu1 }
 0x86e   : > { %v5844_v59 = vpop.f32.mrf.mxu1 }
 0x8a3   : > { %v5808_v38 = vpop.f32.mrf.mxu0 }
 0x8a4   : > { %v5602_v40 = vmul.f32 -1.442695, %v5808_v38 }
 0x8a5   : > { %v4842_v58 = vpop.f32.mrf.mxu0 }
 0x8a6   : > { %6141 = vpow2.f32 %v5602_v40  ;;  %v5601_v15 = vmul.f32 -1.442695, %v4842_v58  ;;  %v5621_v40 = vmul.f32 -1.442695, %v4942_v55  ;;  %v4962_v58 = vpop.f32.mrf.mxu1 }
 0x8a7   : > { %6143 = vpow2.f32 %v5606_v45 }
 0x8a8   : > { %6145 = vpow2.f32 %v5601_v15  ;;  %v5847_v14 = vpop.f32.mrf.mxu1 }
 0x8a9   : > { %6147 = vpow2.f32 %v5608_v12  ;;  %v5624_v12 = vmul.f32 -1.442695, %v5841_v52 }
 0x8aa   : > { %6149 = vpow2.f32 %v5607_v62 }
 0x8b3   : > { %v6142_v11 = vpop.eup %6141 }
 0x8b4   : > { %v6144_v43 = vpop.eup %6143  ;;  %v5098_v51 = vadd.f32 1.0, %v6142_v11  ;;  %v5811_v53 = vpop.f32.mrf.mxu0  ;;  %v5623_v11 = vmul.f32 -1.442695, %v4952_v44 }
 0x8b5   : > { %v6146_v7 = vpop.eup %6145  ;;  %v5604_v19 = vmul.f32 -1.442695, %v5811_v53  ;;  %v5102_v2 = vadd.f32 1.0, %v6144_v43 }
 0x8b6   : > { %6151 = vrcp.f32 %v5098_v51  ;;  %v5097_v49 = vadd.f32 1.0, %v6146_v7  ;;  %v4852_v29 = vpop.f32.mrf.mxu0  ;;  %v6148_v10 = vpop.eup %6147  ;;  %v5626_v7 = vmul.f32 -1.442695, %v5844_v59 }
 0x8b7   : > { %6153 = vpow2.f32 %v5604_v19  ;;  %v5603_v42 = vmul.f32 -1.442695, %v4852_v29  ;;  %v6150_v36 = vpop.eup %6149  ;;  %v5104_v41 = vadd.f32 1.0, %v6148_v10  ;;  %v4972_v51 = vpop.f32.mrf.mxu1 }
 0x8b8   : > { %6155 = vrcp.f32 %v5097_v49  ;;  %v5103_v47 = vadd.f32 1.0, %v6150_v36  ;;  %v5627_v54 = vmul.f32 -1.442695, %v4972_v51 }
 0x8b9   : > { %6157 = vpow2.f32 %v5603_v42  ;;  %v5850_v49 = vpop.f32.mrf.mxu1 }
 0x8ba   : > { %6159 = vrcp.f32 %v5101_v26 }
 0x8bb   : > { %6161 = vpow2.f32 %v5610_v57  ;;  %v5625_v57 = vmul.f32 -1.442695, %v4962_v58 }
 0x8bc   : > { %6163 = vrcp.f32 %v5102_v2 }
 0x8bd   : > { %6165 = vpow2.f32 %v5609_v23  ;;  %v5628_v23 = vmul.f32 -1.442695, %v5847_v14 }
 0x8be   : > { %6167 = vpow2.f32 %v5612_v6 }
 0x8bf   : > { %6169 = vpow2.f32 %v5611_v28  ;;  %v4982_v28 = vpop.f32.mrf.mxu1 }
 0x8c0   : > { %6171 = vpow2.f32 %v5614_v32  ;;  %v5629_v55 = vmul.f32 -1.442695, %v4982_v28 }
 0x8c1   : > { %6173 = vpow2.f32 %v5613_v5  ;;  %v5853_v10 = vpop.f32.mrf.mxu1 }
 0x8c2   : > { %6175 = vpow2.f32 %v5616_v61  ;;  %v5630_v61 = vmul.f32 -1.442695, %v5850_v49  ;;  %v5632_v52 = vmul.f32 -1.442695, %v5853_v10 }
 0x8c3   : > { %v6152_v16 = vpop.eup %6151 }
 0x8c4   : > { %v6154_v1 = vpop.eup %6153  ;;  %5200 = vperm.xlu1 %6005, %v6152_v16  }
 0x8c5   : > { %v6156_v63 = vpop.eup %6155  ;;  %v5100_v35 = vadd.f32 1.0, %v6154_v1 }
 0x8c6   : > { %v6158_v37 = vpop.eup %6157  ;;  %5195 = vperm.xlu0 %6006, %v6156_v63  }
 0x8c7   : > { %v6160_v31 = vpop.eup %6159  ;;  %6177 = vrcp.f32 %v5100_v35  ;;  %v5099_v25 = vadd.f32 1.0, %v6158_v37  ;;  %v4992_v37 = vpop.f32.mrf.mxu1 }
 0x8c8   : > { %v6162_v13 = vpop.eup %6161  ;;  %6179 = vpow2.f32 %v5615_v34  ;;  %5215 = vperm.xlu1 %6005, %v6160_v31  }
 0x8c9   : > { %v6164_v8 = vpop.eup %6163  ;;  %6181 = vrcp.f32 %v5099_v25  ;;  %v5106_v24 = vadd.f32 1.0, %v6162_v13  ;;  %v5631_v13 = vmul.f32 -1.442695, %v4992_v37 }
 0x8ca   : > { %v6166_v33 = vpop.eup %6165  ;;  %6183 = vpow2.f32 %v5618_v21  ;;  %5220 = vperm.xlu0 %6006, %v6164_v8  }
 0x8cb   : > { %6185 = vrcp.f32 %v5104_v41  ;;  %v6168_v30 = vpop.eup %6167  ;;  %v5105_v48 = vadd.f32 1.0, %v6166_v33 }
 0x8cc   : > { %6187 = vpow2.f32 %v5617_v4  ;;  %v6170_v56 = vpop.eup %6169  ;;  %v5108_v38 = vadd.f32 1.0, %v6168_v30 }
 0x8cd   : > { %6189 = vrcp.f32 %v5103_v47  ;;  %v6172_v45 = vpop.eup %6171  ;;  %v5107_v15 = vadd.f32 1.0, %v6170_v56 }
 0x8ce   : > { %6191 = vpow2.f32 %v5620_v17  ;;  %v6174_v60 = vpop.eup %6173  ;;  %v5110_v46 = vadd.f32 1.0, %v6172_v45 }
 0x8cf   : > { %6193 = vrcp.f32 %v5106_v24  ;;  %v6176_v20 = vpop.eup %6175  ;;  %v5109_v39 = vadd.f32 1.0, %v6174_v60 }
 0x8d0   : > { %6195 = vpow2.f32 %v5619_v50  ;;  %v5112_v9 = vadd.f32 1.0, %v6176_v20 }
 0x8d1   : > { %6197 = vrcp.f32 %v5105_v48 }
 0x8d2   : > { %6199 = vpow2.f32 %v5622_v18 }
 0x8d3   : > { %6201 = vrcp.f32 %v5108_v38 }
 0x8d4   : > { %v6178_v62 = vpop.eup %6177  ;;  %6203 = vpow2.f32 %v5621_v40 }
 0x8d5   : > { %v6180_v22 = vpop.eup %6179  ;;  %6205 = vrcp.f32 %v5107_v15  ;;  %5210 = vperm.xlu0 %6006, %v6178_v62  }
 0x8d6   : > { %v6182_v43 = vpop.eup %6181  ;;  %6207 = vrcp.f32 %v5110_v46  ;;  %v5111_v26 = vadd.f32 1.0, %v6180_v22 }
 0x8d7   : > { %v6184_v53 = vpop.eup %6183  ;;  %6209 = vpow2.f32 %v5624_v12  ;;  %5205 = vperm.xlu1 %6005, %v6182_v43  }
 0x8d8   : > { %v6186_v19 = vpop.eup %6185  ;;  %6211 = vrcp.f32 %v5109_v39  ;;  %v5114_v2 = vadd.f32 1.0, %v6184_v53 }
 0x8d9   : > { %v6188_v29 = vpop.eup %6187  ;;  %6213 = vpow2.f32 %v5623_v11  ;;  %5230 = vperm.xlu0 %6006, %v6186_v19  }
 0x8da   : > { %v6190_v42 = vpop.eup %6189  ;;  %6215 = vrcp.f32 %v5112_v9  ;;  %v5113_v6 = vadd.f32 1.0, %v6188_v29 }
 0x8db   : > { %v6192_v27 = vpop.eup %6191  ;;  %6217 = vpow2.f32 %v5626_v7  ;;  %5225 = vperm.xlu1 %6005, %v6190_v42  }
 0x8dc   : > { %v6194_v3 = vpop.eup %6193  ;;  %6219 = vrcp.f32 %v5111_v26  ;;  %v5116_v0 = vadd.f32 1.0, %v6192_v27 }
 0x8dd   : > { %v6196_v32 = vpop.eup %6195  ;;  %6221 = vpow2.f32 %v5625_v57  ;;  %5240 = vperm.xlu0 %6006, %v6194_v3   ;;  %v11327_v3 = vld [vmem:[#allocation15_spill] sm:$0xff] }
 0x8de   : > { %v6198_v5 = vpop.eup %6197  ;;  %6223 = vrcp.f32 %v5114_v2  ;;  %v5115_v1 = vadd.f32 1.0, %v6196_v32  ;;  %v11326_v2 = vld [vmem:[#allocation17_spill] sm:$0xff] }
 0x8df   : > { %v6200_v36 = vpop.eup %6199  ;;  %6225 = vpow2.f32 %v5628_v23  ;;  %5235 = vperm.xlu1 %6005, %v6198_v5   ;;  %v11328_v32 = vld [vmem:[#allocation13_spill] sm:$0xff] }
 0x8e0   : > { %v6202_v16 = vpop.eup %6201  ;;  %6227 = vrcp.f32 %v5113_v6  ;;  %v5118_v35 = vadd.f32 1.0, %v6200_v36 }
 0x8e1   : > { %v6204_v34 = vpop.eup %6203  ;;  %6229 = vpow2.f32 %v5627_v54  ;;  %5250 = vperm.xlu0 %6006, %v6202_v16  }
 0x8e2   : > { %v6206_v63 = vpop.eup %6205  ;;  %6231 = vrcp.f32 %v5116_v0  ;;  %v5117_v41 = vadd.f32 1.0, %v6204_v34  ;;  %v11329_v0 = vld [vmem:[#allocation7_spill] sm:$0xff]  ;;  %v11331_v34 = vld [vmem:[#allocation10_spill] sm:$0xff] }
 0x8e3   : > { %v6208_v21 = vpop.eup %6207  ;;  %6233 = vpow2.f32 %v5630_v61  ;;  %5245 = vperm.xlu1 %6005, %v6206_v63   ;;  %v11330_v61 = vld [vmem:[#allocation12_spill] sm:$0xff] }
 0x8e4   : > { %v6210_v31 = vpop.eup %6209  ;;  %6235 = vrcp.f32 %v5115_v1 }
 0x8e5   : > { %v6212_v25 = vpop.eup %6211  ;;  %6237 = vpow2.f32 %v5629_v55  ;;  %5260 = vperm.xlu0 %6006, %v6208_v21   ;;  %v5120_v47 = vadd.f32 1.0, %v6210_v31 }
 0x8e6   : > { %v6214_v4 = vpop.eup %6213  ;;  %6239 = vrcp.f32 %v5118_v35  ;;  %v11332_v35 = vld [vmem:[#allocation8_spill] sm:$0xff] }
 0x8e7   : > { %v6216_v8 = vpop.eup %6215  ;;  %6241 = vpow2.f32 %v5632_v52  ;;  %5255 = vperm.xlu1 %6005, %v6212_v25   ;;  %v5119_v44 = vadd.f32 1.0, %v6214_v4  ;;  %v11333_v52 = vld [vmem:[#allocation14_spill] sm:$0xff] }
 0x8e8   : > { %v6218_v33 = vpop.eup %6217  ;;  %6243 = vrcp.f32 %v5117_v41  ;;  %v11334_v25 = vld [vmem:[#allocation18_spill] sm:$0xff] }
 0x8e9   : > { %v6220_v17 = vpop.eup %6219  ;;  %6245 = vpow2.f32 %v5631_v13  ;;  %5270 = vperm.xlu0 %6006, %v6216_v8   ;;  %v5122_v50 = vadd.f32 1.0, %v6218_v33  ;;  %v11335_v8 = vld [vmem:[#allocation19_spill] sm:$0xff] }
 0x8ea   : > { %v6222_v24 = vpop.eup %6221  ;;  %6247 = vrcp.f32 %v5120_v47 }
 0x8eb   : > { %v6224_v30 = vpop.eup %6223  ;;  %5265 = vperm.xlu1 %6005, %v6220_v17   ;;  %6249 = vrcp.f32 %v5119_v44  ;;  %v5121_v56 = vadd.f32 1.0, %v6222_v24  ;;  %v11336_v17 = vld [vmem:[#allocation20_spill] sm:$0xff] }
 0x8ec   : > { %v6226_v59 = vpop.eup %6225  ;;  %6251 = vrcp.f32 %v5122_v50 }
 0x8ed   : > { %v6228_v48 = vpop.eup %6227  ;;  %5280 = vperm.xlu0 %6006, %v6224_v30   ;;  %v5124_v38 = vadd.f32 1.0, %v6226_v59  ;;  %6253 = vrcp.f32 %v5121_v56  ;;  %v11337_v30 = vld [vmem:[#allocation21_spill] sm:$0xff] }
 0x8ee   : > { %v6230_v18 = vpop.eup %6229 }
 0x8ef   : > { %v6232_v45 = vpop.eup %6231  ;;  %5275 = vperm.xlu1 %6005, %v6228_v48   ;;  %v5123_v60 = vadd.f32 1.0, %v6230_v18  ;;  %6255 = vrcp.f32 %v5124_v38  ;;  %v11338_v48 = vld [vmem:[#allocation22_spill] sm:$0xff] }
 0x8f0   : > { %v6234_v40 = vpop.eup %6233 }
 0x8f1   : > { %v6236_v58 = vpop.eup %6235  ;;  %5290 = vperm.xlu0 %6006, %v6232_v45   ;;  %v5126_v14 = vadd.f32 1.0, %v6234_v40  ;;  %6257 = vrcp.f32 %v5123_v60  ;;  %v11339_v45 = vld [vmem:[#allocation23_spill] sm:$0xff] }
 0x8f2   : > { %v6238_v15 = vpop.eup %6237 }
 0x8f3   : > { %v6240_v46 = vpop.eup %6239  ;;  %5285 = vperm.xlu1 %6005, %v6236_v58   ;;  %v5125_v62 = vadd.f32 1.0, %v6238_v15  ;;  %6259 = vrcp.f32 %v5126_v14  ;;  %v11340_v58 = vld [vmem:[#allocation24_spill] sm:$0xff] }
 0x8f4   : > { %v6242_v20 = vpop.eup %6241 }
 0x8f5   : > { %v6244_v12 = vpop.eup %6243  ;;  %5300 = vperm.xlu0 %6006, %v6240_v46   ;;  %v5128_v22 = vadd.f32 1.0, %v6242_v20  ;;  %6261 = vrcp.f32 %v5125_v62  ;;  %v11341_v46 = vld [vmem:[#allocation25_spill] sm:$0xff] }
 0x8f6   : > { %v6246_v39 = vpop.eup %6245 }
 0x8f7   : > { %5295 = vperm.xlu1 %6005, %v6244_v12   ;;  %v6248_v11 = vpop.eup %6247  ;;  %v5127_v43 = vadd.f32 1.0, %v6246_v39  ;;  %6263 = vrcp.f32 %v5128_v22  ;;  %v11342_v12 = vld [vmem:[#allocation26_spill] sm:$0xff]  ;;  %v11343_v22 = vld [vmem:[#allocation27_spill] sm:$0xff] }
 0x8f8   : > { %v6250_v9 = vpop.eup %6249 }
 0x8f9   : > { %5310 = vperm.xlu0 %6006, %v6248_v11   ;;  %v6252_v51 = vpop.eup %6251  ;;  %6265 = vrcp.f32 %v5127_v43 }
 0x8fa   : > { %v6254_v53 = vpop.eup %6253 }
 0x8fb   : > { %5305 = vperm.xlu1 %6005, %v6250_v9   ;;  %v11344_v9 = vld [vmem:[#allocation28_spill] sm:$0xff] }
 0x8fc   : > { %v6256_v7 = vpop.eup %6255 }
 0x8fd   : > { %5320 = vperm.xlu0 %6006, %v6252_v51  }
 0x8fe   : > { %v6258_v19 = vpop.eup %6257 }
 0x8ff   : > { %5315 = vperm.xlu1 %6005, %v6254_v53  }
 0x900   : > { %v6260_v26 = vpop.eup %6259 }
 0x901   : > { %5330 = vperm.xlu0 %6006, %v6256_v7   ;;  %v11345_v7 = vld [vmem:[#allocation29_spill] sm:$0xff] }
 0x902   : > { %v6262_v49 = vpop.eup %6261 }
 0x903   : > { %5325 = vperm.xlu1 %6005, %v6258_v19  }
 0x904   : > { %v6264_v29 = vpop.eup %6263 }
 0x905   : > { %5340 = vperm.xlu0 %6006, %v6260_v26  }
 0x906   : > { %v6266_v57 = vpop.eup %6265 }
 0x907   : > { %5335 = vperm.xlu1 %6005, %v6262_v49   ;;  %v11346_v49 = vld [vmem:[#allocation30_spill] sm:$0xff] }
 0x909   : > { %5350 = vperm.xlu0 %6006, %v6264_v29  }
 0x90b   : > { %5345 = vperm.xlu1 %6005, %v6266_v57  }
 0x93f   : > { %v5201_v42 = vpop.permute.xlu1 %5200 }
 0x940   : > { %v5354_v27 = vmul.f32 %v5201_v42, %v11326_v2  ;;  %v11347_v42 = vld [vmem:[#allocation31_spill] sm:$0xff] }
 0x941   : > { %v5196_v23 = vpop.permute.xlu0 %5195 }
 0x942   : > { %5386 = vst.msk [vmem:[%s10695_s15 + $0x8] sm:$0xff] %vm1882_vm15, %v5354_v27  ;;  %v5353_v6 = vmul.f32 %v5196_v23, %v11327_v3  ;;  %v11348_v23 = vld [vmem:[#allocation32_spill] sm:$0xff] }
 0x943   : > { %v5216_v28 = vpop.permute.xlu1 %5215 }
 0x944   : > { %5385 = vst.msk [vmem:[%s10695_s15] sm:$0xff] %vm1882_vm15, %v5353_v6  ;;  %v5357_v54 = vmul.f32 %v5216_v28, %v11328_v32  ;;  %v11349_v28 = vld [vmem:[#allocation33_spill] sm:$0xff] }
 0x945   : > { %v5221_v5 = vpop.permute.xlu0 %5220 }
 0x946   : > { %5389 = vst.msk [vmem:[%s10695_s15 + $0x20] sm:$0xff] %vm1882_vm15, %v5357_v54  ;;  %v5358_v10 = vmul.f32 %v5221_v5, %v11329_v0  ;;  %v11350_v5 = vld [vmem:[#allocation34_spill] sm:$0xff] }
 0x948   : > { %5390 = vst.msk [vmem:[%s10695_s15 + $0x28] sm:$0xff] %vm1882_vm15, %v5358_v10 }
 0x950   : > { %v5211_v36 = vpop.permute.xlu0 %5210 }
 0x951   : > { %v5356_v16 = vmul.f32 %v5211_v36, %v11330_v61  ;;  %v11351_v36 = vld [vmem:[#allocation35_spill] sm:$0xff] }
 0x952   : > { %v5206_v1 = vpop.permute.xlu1 %5205 }
 0x953   : > { %5388 = vst.msk [vmem:[%s10695_s15 + $0x18] sm:$0xff] %vm1882_vm15, %v5356_v16  ;;  %v5355_v55 = vmul.f32 %v5206_v1, %v11331_v34  ;;  %v11352_v1 = vld [vmem:[#allocation36_spill] sm:$0xff] }
 0x954   : > { %v5231_v63 = vpop.permute.xlu0 %5230 }
 0x955   : > { %5387 = vst.msk [vmem:[%s10695_s15 + $0x10] sm:$0xff] %vm1882_vm15, %v5355_v55  ;;  %v5360_v37 = vmul.f32 %v5231_v63, %v11332_v35  ;;  %v11353_v63 = vld [vmem:[#allocation37_spill] sm:$0xff] }
 0x956   : > { %v5226_v21 = vpop.permute.xlu1 %5225 }
 0x957   : > { %5392 = vst.msk [vmem:[%s10695_s15 + $0x38] sm:$0xff] %vm1882_vm15, %v5360_v37  ;;  %v5359_v31 = vmul.f32 %v5226_v21, %v11333_v52  ;;  %v11354_v21 = vld [vmem:[#allocation38_spill] sm:$0xff] }
 0x958   : > { %v5241_v41 = vpop.permute.xlu0 %5240 }
 0x959   : > { %5391 = vst.msk [vmem:[%s10695_s15 + $0x30] sm:$0xff] %vm1882_vm15, %v5359_v31  ;;  %v5362_v13 = vmul.f32 %v5241_v41, %v11334_v25  ;;  %v11355_v41 = vld [vmem:[#allocation39_spill] sm:$0xff] }
 0x95a   : > { %v5236_v4 = vpop.permute.xlu1 %5235 }
 0x95b   : > { %5394 = vst.msk [vmem:[%s10695_s15 + $0x48] sm:$0xff] %vm1882_vm15, %v5362_v13  ;;  %v5361_v47 = vmul.f32 %v5236_v4, %v11335_v8  ;;  %v11356_v4 = vld [vmem:[#allocation40_spill] sm:$0xff] }
 0x95c   : > { %v5251_v33 = vpop.permute.xlu0 %5250 }
 0x95d   : > { %5393 = vst.msk [vmem:[%s10695_s15 + $0x40] sm:$0xff] %vm1882_vm15, %v5361_v47  ;;  %v5364_v44 = vmul.f32 %v5251_v33, %v11336_v17  ;;  %v11357_v33 = vld [vmem:[#allocation41_spill] sm:$0xff] }
 0x95e   : > { %v5246_v24 = vpop.permute.xlu1 %5245 }
 0x95f   : > { %5396 = vst.msk [vmem:[%s10695_s15 + $0x58] sm:$0xff] %vm1882_vm15, %v5364_v44  ;;  %v5363_v50 = vmul.f32 %v5246_v24, %v11337_v30 }
 0x960   : > { %v5261_v59 = vpop.permute.xlu0 %5260 }
 0x961   : > { %5395 = vst.msk [vmem:[%s10695_s15 + $0x50] sm:$0xff] %vm1882_vm15, %v5363_v50  ;;  %v5366_v56 = vmul.f32 %v5261_v59, %v11338_v48 }
 0x962   : > { %v5256_v18 = vpop.permute.xlu1 %5255 }
 0x963   : > { %5398 = vst.msk [vmem:[%s10695_s15 + $0x68] sm:$0xff] %vm1882_vm15, %v5366_v56  ;;  %v5365_v38 = vmul.f32 %v5256_v18, %v11339_v45 }
 0x964   : > { %v5271_v40 = vpop.permute.xlu0 %5270 }
 0x965   : > { %5397 = vst.msk [vmem:[%s10695_s15 + $0x60] sm:$0xff] %vm1882_vm15, %v5365_v38  ;;  %v5368_v60 = vmul.f32 %v5271_v40, %v11340_v58 }
 0x966   : > { %v5266_v15 = vpop.permute.xlu1 %5265 }
 0x967   : > { %5400 = vst.msk [vmem:[%s10695_s15 + $0x78] sm:$0xff] %vm1882_vm15, %v5368_v60  ;;  %v5367_v14 = vmul.f32 %v5266_v15, %v11341_v46 }
 0x968   : > { %v5281_v20 = vpop.permute.xlu0 %5280 }
 0x969   : > { %5399 = vst.msk [vmem:[%s10695_s15 + $0x70] sm:$0xff] %vm1882_vm15, %v5367_v14  ;;  %v5370_v62 = vmul.f32 %v5281_v20, %v11342_v12 }
 0x96a   : > { %v5276_v39 = vpop.permute.xlu1 %5275 }
 0x96b   : > { %5402 = vst.msk [vmem:[%s10695_s15 + $0x88] sm:$0xff] %vm1882_vm15, %v5370_v62  ;;  %v5369_v11 = vmul.f32 %v5276_v39, %v11343_v22 }
 0x96c   : > { %v5291_v43 = vpop.permute.xlu0 %5290 }
 0x96d   : > { %5401 = vst.msk [vmem:[%s10695_s15 + $0x80] sm:$0xff] %vm1882_vm15, %v5369_v11  ;;  %v5372_v51 = vmul.f32 %v5291_v43, %v11344_v9 }
 0x96e   : > { %v5286_v53 = vpop.permute.xlu1 %5285 }
 0x96f   : > { %5404 = vst.msk [vmem:[%s10695_s15 + $0x98] sm:$0xff] %vm1882_vm15, %v5372_v51  ;;  %v5371_v19 = vmul.f32 %v5286_v53, %v11345_v7 }
 0x970   : > { %v5301_v26 = vpop.permute.xlu0 %5300 }
 0x971   : > { %5403 = vst.msk [vmem:[%s10695_s15 + $0x90] sm:$0xff] %vm1882_vm15, %v5371_v19  ;;  %v5374_v29 = vmul.f32 %v5301_v26, %v11346_v49 }
 0x972   : > { %v5296_v57 = vpop.permute.xlu1 %5295 }
 0x973   : > { %5406 = vst.msk [vmem:[%s10695_s15 + $0xa8] sm:$0xff] %vm1882_vm15, %v5374_v29  ;;  %v5373_v2 = vmul.f32 %v5296_v57, %v11347_v42 }
 0x974   : > { %v5311_v27 = vpop.permute.xlu0 %5310 }
 0x975   : > { %5405 = vst.msk [vmem:[%s10695_s15 + $0xa0] sm:$0xff] %vm1882_vm15, %v5373_v2  ;;  %v5376_v3 = vmul.f32 %v5311_v27, %v11348_v23 }
 0x976   : > { %v5306_v6 = vpop.permute.xlu1 %5305 }
 0x977   : > { %5408 = vst.msk [vmem:[%s10695_s15 + $0xb8] sm:$0xff] %vm1882_vm15, %v5376_v3  ;;  %v5375_v32 = vmul.f32 %v5306_v6, %v11349_v28 }
 0x978   : > { %v5321_v54 = vpop.permute.xlu0 %5320 }
 0x979   : > { %5407 = vst.msk [vmem:[%s10695_s15 + $0xb0] sm:$0xff] %vm1882_vm15, %v5375_v32  ;;  %v5378_v0 = vmul.f32 %v5321_v54, %v11350_v5 }
 0x97a   : > { %v5316_v10 = vpop.permute.xlu1 %5315 }
 0x97b   : > { %5410 = vst.msk [vmem:[%s10695_s15 + $0xc8] sm:$0xff] %vm1882_vm15, %v5378_v0  ;;  %v5377_v61 = vmul.f32 %v5316_v10, %v11351_v36 }
 0x97c   : > { %v5331_v16 = vpop.permute.xlu0 %5330 }
 0x97d   : > { %5409 = vst.msk [vmem:[%s10695_s15 + $0xc0] sm:$0xff] %vm1882_vm15, %v5377_v61  ;;  %v5380_v34 = vmul.f32 %v5331_v16, %v11352_v1 }
 0x97e   : > { %v5326_v55 = vpop.permute.xlu1 %5325 }
 0x97f   : > { %5412 = vst.msk [vmem:[%s10695_s15 + $0xd8] sm:$0xff] %vm1882_vm15, %v5380_v34  ;;  %v5379_v35 = vmul.f32 %v5326_v55, %v11353_v63 }
 0x980   : > { %v5341_v37 = vpop.permute.xlu0 %5340 }
 0x981   : > { %5411 = vst.msk [vmem:[%s10695_s15 + $0xd0] sm:$0xff] %vm1882_vm15, %v5379_v35  ;;  %v5382_v52 = vmul.f32 %v5341_v37, %v11354_v21 }
 0x982   : > { %v5336_v31 = vpop.permute.xlu1 %5335 }
 0x983   : > { %5414 = vst.msk [vmem:[%s10695_s15 + $0xe8] sm:$0xff] %vm1882_vm15, %v5382_v52  ;;  %v5381_v25 = vmul.f32 %v5336_v31, %v11355_v41 }
 0x984   : > { %v5351_v13 = vpop.permute.xlu0 %5350 }
 0x985   : > { %5413 = vst.msk [vmem:[%s10695_s15 + $0xe0] sm:$0xff] %vm1882_vm15, %v5381_v25  ;;  %v5384_v8 = vmul.f32 %v5351_v13, %v11356_v4 }
 0x986   : > { %v5346_v47 = vpop.permute.xlu1 %5345 }
 0x987   : > { %5416 = vst.msk [vmem:[%s10695_s15 + $0xf8] sm:$0xff] %vm1882_vm15, %v5384_v8  ;;  %v5383_v17 = vmul.f32 %v5346_v47, %v11357_v33 }
 0x989   : > { %5415 = vst.msk [vmem:[%s10695_s15 + $0xf0] sm:$0xff] %vm1882_vm15, %v5383_v17 }
 0x98a   : > { %6280 = shalt.err (!%p6277_p3)
}
 0x98b   : > { %s6281_s29 = scalar_lea.hbm %s10792_s18, 4096  ;;  %s6285_s15 = scalar_lea.hbm %s10851_s7, 8192 }
 0x98c   : > { %p6282_p4 = scmp.ne.s32.totalorder %s10792_s18, %s6281_s29  ;;  %p6286_p9 = scmp.lt.s32.totalorder %s10792_s18, %s10851_s7 }
 0x98d   : > { %p6287_p10 = scmp.lt.s32.totalorder %s6285_s15, %s6281_s29 }
 0x98e   : > { %p6283_p7 = pnand %p6282_p4, %p6424_p5 }
 0x98f   : > { %p6288_p11 = por %p6287_p10, %p6286_p9 }
 0x990   : > { %p6284_p8 = pneg %p6283_p7 }
 0x992   : > { %p6289_p12 = pnand %p6288_p11, %p6284_p8 }
 0x994   : > { %6292 = shalt.err (!%p6289_p12)
}
 0x995   : > { %s6345_s13 = smov 128  }
 0x996   : > { %5880 = dma.vmem_to_hbm [thread:$0]  (%p6424_p5), %s10797_s17, 4096, %s10792_s18, %s10803_s28, %s6345_s13, %s6345_s13, %s6331_s19  }
 0x997 PF: > { %p5886_p13 = scmp.ge.s32.totalorder %s6327_s27, 2  ;;  %s5446_s20 = sand.u32 1, %s6315_s24  }
 0x998   : > { %s5447_s21 = scalar_lea.sflag [#allocation3], %s5446_s20 }
 0x999   : > { %p5883_p0 = pnand %p5886_p13, %p6428_p6 }
 0x99b   : > { %p5884_p1 = pneg %p5883_p0 }
 0x99d   : > { %6310 = dma.done.wait (%p5884_p1), %s5447_s21, 4096  }
 0x99e   : > { %6312 = vsyncadd (%p5884_p1), %s5447_s21, 4294963200  ;;  %p17_p2 = scmp.ge.s32.totalorder %s6411_s30, 4   ;;  %s11358_s24 = smov %s6319_s25 }
 0x99f   : > { %s11359_s25 = smov %s6323_s26  ;;  %s11360_s26 = smov %s6422_s10 }
 0x9a0   : > { %s11361_s27 = smov %s6411_s30  ;;  %19 = sbr.rel (!%p17_p2) target bundleno = 3 (0x3), region = 83 }
 0x9a5   :  { %5452 = vsyncpa [#allocation3], 1 }
 0x9a6   :  { %5454 = vsyncpa [#allocation3 + $0x1], 1 }

</bundles_post_ra>
